<compile_context>
chip_gen: v5e
topology: v5e:2x2
jax: 0.10.0
libtpu: 0.0.40
codegen_flags: <defaults>
</compile_context>

<pallas_src>
import jax
import jax.numpy as jnp
import numpy as np
from jax.experimental import pallas as pl
from jax.experimental.pallas import tpu as pltpu

K1_PAD = 32         # conv1 contraction padded 9*3=27 -> 32 (not 128)
N_LOGIT_PAD = 128   # fc2 logits padded 10 -> 128 (lane-dense store)


# ---------------------------------------------------------------------------
# Fused conv(3x3, s1, p1) + bias + ReLU + maxpool(2x2, s2).
#   x_ref: (4, IB*P, K) bf16 im2col rows; axis 0 = pool quadrant (dh, dw),
#          axis 1 ordered (image-in-block, out_pixel)
#   w_ref: (K, N) bf16 im2col weights (K = 9*Cin, conv1 K zero-padded 27->32)
#   b_ref: (1, N) f32
#   o_ref: (IB*P, N) f32 pooled rows; channels on the lane axis
# Pool == running max over the 4 quadrant matmuls (ReLU is monotonic, so
# relu(max_q(conv_q + b)) == max_q(relu(conv_q + b))).
# ---------------------------------------------------------------------------
def _conv_relu_pool_kernel(x_ref, w_ref, b_ref, o_ref):
    w = w_ref[...]
    acc = jnp.dot(x_ref[0], w, preferred_element_type=jnp.float32)
    for q in range(1, 4):
        acc = jnp.maximum(
            acc, jnp.dot(x_ref[q], w, preferred_element_type=jnp.float32))
    o_ref[...] = jnp.maximum(acc + b_ref[...], 0.0)


def _pool_quadrant_patches(x_nhwc):
    """im2col (3x3, pad 1), output shape (4, B*Ho*Wo, 9*Cin).

    Axis 0 indexes the pool quadrant (dh, dw); row b*Ho*Wo + ho*Wo + wo of
    quadrant (dh, dw) holds the 3x3 patch (kh-major, kw, cin) of conv output
    pixel (2*ho+dh, 2*wo+dw) of image b.
    """
    B, H, W, Cin = x_nhwc.shape
    Ho, Wo = H // 2, W // 2
    xp = jnp.pad(x_nhwc, ((0, 0), (1, 1), (1, 1), (0, 0)))
    taps = jnp.concatenate(
        [xp[:, kh:kh + H, kw:kw + W, :] for kh in range(3) for kw in range(3)],
        axis=-1)                                           # (B, H, W, 9*Cin)
    t = taps.reshape(B, Ho, 2, Wo, 2, 9 * Cin)
    t = jnp.transpose(t, (2, 4, 0, 1, 3, 5))               # (dh,dw,b,ho,wo,kc)
    return t.reshape(4, B * Ho * Wo, 9 * Cin)


def conv_relu_pool(x_nhwc, w_kn, b_1n, *, images_per_step=8):
    """x_nhwc: (B,H,W,Cin); w_kn: (K,N) bf16; b_1n: (1,N) -> (B*Ho*Wo, N) f32."""
    B, H, W, _ = x_nhwc.shape
    P = (H // 2) * (W // 2)
    K, N = w_kn.shape
    patches = _pool_quadrant_patches(x_nhwc)               # (4, B*P, k0)
    k0 = patches.shape[-1]
    if k0 != K:                                            # e.g. 27 -> 32
        patches = jnp.pad(patches, ((0, 0), (0, 0), (0, K - k0)))
    patches = patches.astype(jnp.bfloat16)                 # halve HBM traffic

    ib = min(images_per_step, B)                           # images per step
    while B % ib:                                          # keep blocks exact
        ib -= 1

    return pl.pallas_call(
        _conv_relu_pool_kernel,
        out_shape=jax.ShapeDtypeStruct((B * P, N), jnp.float32),
        grid=(B // ib,),
        in_specs=[
            pl.BlockSpec((4, ib * P, K), lambda i: (0, i, 0)),
            pl.BlockSpec((K, N), lambda i: (0, 0)),
            pl.BlockSpec((1, N), lambda i: (0, 0)),
        ],
        out_specs=pl.BlockSpec((ib * P, N), lambda i: (i, 0)),
        compiler_params=pltpu.CompilerParams(
            dimension_semantics=("parallel",),
            vmem_limit_bytes=32 << 20),
    )(patches, w_kn, b_1n)


# ---------------------------------------------------------------------------
# Fused fc1 -> ReLU -> (Dropout: eval identity) -> fc2.
# Grid = (batch blocks [parallel], fc1-N tiles [arbitrary]); the fc2
# contribution accumulates directly into the resident output block.
# ---------------------------------------------------------------------------
def _mlp_kernel(x_ref, w1_ref, b1_ref, w2_ref, b2_ref, o_ref):
    j = pl.program_id(1)

    @pl.when(j == 0)
    def _():
        o_ref[...] = jnp.zeros_like(o_ref)

    h = jnp.dot(x_ref[...], w1_ref[...], preferred_element_type=jnp.float32)
    h = jnp.maximum(h + b1_ref[...], 0.0)          # fc1 tile + ReLU (f32 VPU)
    # TODO(synk): Dropout(p=0.1) is the identity in eval mode; training-mode
    # random masking (pltpu.prng_*) is not implemented in the kernel.
    o_ref[...] += jnp.dot(h.astype(w2_ref.dtype), w2_ref[...],
                          preferred_element_type=jnp.float32)

    @pl.when(j == pl.num_programs(1) - 1)
    def _():
        o_ref[...] += b2_ref[...]


def mlp_head(x, w1, b1, w2, b2, *, n_tile=256):
    # n_tile=256 matches the 256-wide MXU on v6e/v7x; pass n_tile=128 on v5e.
    B, K = x.shape
    N1 = w1.shape[1]                    # 512
    N2 = w2.shape[1]                    # 128 (padded logits)
    assert N1 % n_tile == 0
    bm = 256 if B % 256 == 0 else B     # batch rows per block (megacore split)
    return pl.pallas_call(
        _mlp_kernel,
        out_shape=jax.ShapeDtypeStruct((B, N2), jnp.float32),
        grid=(B // bm, N1 // n_tile),
        in_specs=[
            pl.BlockSpec((bm, K), lambda i, j: (i, 0)),
            pl.BlockSpec((K, n_tile), lambda i, j: (0, j)),
            pl.BlockSpec((1, n_tile), lambda i, j: (0, j)),
            pl.BlockSpec((n_tile, N2), lambda i, j: (j, 0)),
            pl.BlockSpec((1, N2), lambda i, j: (0, 0)),
        ],
        out_specs=pl.BlockSpec((bm, N2), lambda i, j: (i, 0)),
        compiler_params=pltpu.CompilerParams(
            dimension_semantics=("parallel", "arbitrary"),
            vmem_limit_bytes=32 << 20),
    )(x, w1, b1, w2, b2)


# ---------------------------------------------------------------------------
# Parameter prep (one-time, plain-JAX) and full forward (mirrors CNN.forward).
# ---------------------------------------------------------------------------
def prepare_params(w1_oihw, b1, w2_oihw, b2, fw1, fb1, fw2, fb2):
    # conv1: OIHW -> (kh,kw,cin,cout) -> (27,32), K zero-padded to 32, bf16.
    w1_kn = jnp.transpose(w1_oihw, (2, 3, 1, 0)).reshape(27, 32)
    w1_kn = jnp.pad(w1_kn, ((0, K1_PAD - 27), (0, 0)))
    b1_p = b1.reshape(1, 32)
    # conv2: OIHW -> (kh,kw,cin,cout) -> (288, 64), bf16, no padding.
    w2_kn = jnp.transpose(w2_oihw, (2, 3, 1, 0)).reshape(9 * 32, 64)
    b2_p = b2.reshape(1, 64)
    # fc1: permute rows from torch's (c,h,w) flatten order to our (h,w,c) order
    # so the activation flatten is a free reshape (no transpose needed).
    fw1_hwc = jnp.transpose(fw1.reshape(64, 8, 8, 512),
                            (1, 2, 0, 3)).reshape(64 * 8 * 8, 512)
    # fc2: pad the 10 logits to 128 lanes (sliced back in the wrapper).
    fw2_p = jnp.pad(fw2, ((0, 0), (0, N_LOGIT_PAD - 10)))
    fb2_p = jnp.pad(fb2, (0, N_LOGIT_PAD - 10)).reshape(1, N_LOGIT_PAD)
    return dict(
        w1=w1_kn.astype(jnp.bfloat16), b1=b1_p,
        w2=w2_kn.astype(jnp.bfloat16), b2=b2_p,
        fw1=fw1_hwc.astype(jnp.bfloat16), fb1=fb1.reshape(1, 512),
        fw2=fw2_p.astype(jnp.bfloat16), fb2=fb2_p,
    )


def cnn_forward(x_nchw, p):
    B = x_nchw.shape[0]
    x = jnp.transpose(x_nchw, (0, 2, 3, 1))                  # NCHW -> NHWC
    y = conv_relu_pool(x, p["w1"], p["b1"])                  # (B*256, 32) f32
    y = y.reshape(B, 16, 16, 32)
    y = conv_relu_pool(y, p["w2"], p["b2"])                  # (B*64, 64) f32
    # Rows are (b, ho, wo); flatten to (h, w, c) feature order which matches
    # the pre-permuted fc1 rows.  bf16 halves the fc1 activation HBM traffic.
    x_mlp = y.reshape(B, 8 * 8 * 64).astype(jnp.bfloat16)
    logits = mlp_head(x_mlp, p["fw1"], p["fb1"], p["fw2"], p["fb2"])  # (B,128)
    return logits[:, :10]


# ---------------------------------------------------------------------------
# Pure-JAX f32 reference (torch-equivalent) for a correctness sanity check.
# ---------------------------------------------------------------------------
def ref_forward(x_nchw, r):
    def conv(x, w, b):
        y = jax.lax.conv_general_dilated(
            x, w, (1, 1), [(1, 1), (1, 1)],
            dimension_numbers=("NCHW", "OIHW", "NCHW"))
        return y + b[None, :, None, None]

    def pool(x):
        return jax.lax.reduce_window(x, -jnp.inf, jax.lax.max,
                                     (1, 1, 2, 2), (1, 1, 2, 2), "VALID")

    x = pool(jnp.maximum(conv(x_nchw, r["w1_oihw"], r["b1"]), 0.0))
    x = pool(jnp.maximum(conv(x, r["w2_oihw"], r["b2"]), 0.0))
    x = x.reshape(x.shape[0], 64 * 8 * 8)
    x = jnp.maximum(x @ r["fw1"] + r["fb1"], 0.0)
    return x @ r["fw2"] + r["fb2"]


if __name__ == "__main__":
    key = jax.random.PRNGKey(0)
    ks = jax.random.split(key, 9)
    B = 2
    # CIFAR-10 style input: 32x32 RGB (fc1 hard-codes 64*8*8 -> spatial 32).
    x = jax.random.normal(ks[0], (B, 3, 32, 32), jnp.float32)

    # Deterministic synthetic parameters, same shapes as the torch module.
    w1_oihw = jax.random.normal(ks[1], (32, 3, 3, 3), jnp.float32) / np.sqrt(3 * 9)
    b1 = jax.random.normal(ks[2], (32,), jnp.float32) * 0.1
    w2_oihw = jax.random.normal(ks[3], (64, 32, 3, 3), jnp.float32) / np.sqrt(32 * 9)
    b2 = jax.random.normal(ks[4], (64,), jnp.float32) * 0.1
    fw1 = jax.random.normal(ks[5], (64 * 8 * 8, 512), jnp.float32) / np.sqrt(64 * 8 * 8)
    fb1 = jax.random.normal(ks[6], (512,), jnp.float32) * 0.1
    fw2 = jax.random.normal(ks[7], (512, 10), jnp.float32) / np.sqrt(512)
    fb2 = jax.random.normal(ks[8], (10,), jnp.float32) * 0.1

    params = prepare_params(w1_oihw, b1, w2_oihw, b2, fw1, fb1, fw2, fb2)
    ref_params = dict(w1_oihw=w1_oihw, b1=b1, w2_oihw=w2_oihw, b2=b2,
                      fw1=fw1, fb1=fb1, fw2=fw2, fb2=fb2)

    out = jax.block_until_ready(jax.jit(cnn_forward)(x, params))
    ref = jax.block_until_ready(jax.jit(ref_forward)(x, ref_params))
    # Tolerance accounts for bf16 conv/fc matmul inputs (f32 accumulation);
    # layout/permutation bugs would show up as O(1) errors and still fail.
    np.testing.assert_allclose(np.asarray(out), np.asarray(ref),
                               rtol=5e-2, atol=7.5e-2)
    assert out.shape == (B, 10) and out.dtype == jnp.float32
    print("KERNEL_OK")
</pallas_src>

<mosaic_0001>
module attributes {stable_mosaic.version = 11 : i64} {
  func.func @_conv_relu_pool_kernel(%arg0: i32, %arg1: memref<4x512x32xbf16, #tpu.memory_space<vmem>>, %arg2: memref<32x32xbf16, #tpu.memory_space<vmem>>, %arg3: memref<1x32xf32, #tpu.memory_space<vmem>>, %arg4: memref<512x32xf32, #tpu.memory_space<vmem>>) attributes {dimension_semantics = [#tpu.dimension_semantics<parallel>], iteration_bounds = array<i64: 1>, scalar_prefetch = 0 : i64, scratch_operands = 0 : i64, tpu.core_type = #tpu.core_type<tc>, window_params = [{transform_indices = @transform_0, window_bounds = array<i64: 4, 512, 32>}, {pipeline_mode = #tpu.pipeline_mode<synchronous>, transform_indices = @transform_1, window_bounds = array<i64: 32, 32>}, {pipeline_mode = #tpu.pipeline_mode<synchronous>, transform_indices = @transform_2, window_bounds = array<i64: 1, 32>}, {transform_indices = @transform_3, window_bounds = array<i64: 512, 32>}]} {
    %c0 = arith.constant 0 : index
    %c0_0 = arith.constant 0 : index
    %0 = vector.load %arg2[%c0, %c0_0] : memref<32x32xbf16, #tpu.memory_space<vmem>>, vector<32x32xbf16>
    %c0_1 = arith.constant 0 : index
    %c0_2 = arith.constant 0 : index
    %c0_3 = arith.constant 0 : index
    %1 = vector.load %arg1[%c0_1, %c0_2, %c0_3] : memref<4x512x32xbf16, #tpu.memory_space<vmem>>, vector<1x512x32xbf16>
    %2 = vector.shape_cast %1 : vector<1x512x32xbf16> to vector<512x32xbf16>
    %cst = arith.constant dense<0.000000e+00> : vector<512x32xf32>
    %3 = tpu.matmul %2, %0, %cst {dimension_numbers = #tpu.dot_dimension_numbers<[1], [0], [0], [1], [0, 0, 1, 1], [], []>} : vector<512x32xbf16>, vector<32x32xbf16>, vector<512x32xf32> -> vector<512x32xf32>
    %c1 = arith.constant 1 : index
    %c0_4 = arith.constant 0 : index
    %c0_5 = arith.constant 0 : index
    %4 = vector.load %arg1[%c1, %c0_4, %c0_5] : memref<4x512x32xbf16, #tpu.memory_space<vmem>>, vector<1x512x32xbf16>
    %5 = vector.shape_cast %4 : vector<1x512x32xbf16> to vector<512x32xbf16>
    %cst_6 = arith.constant dense<0.000000e+00> : vector<512x32xf32>
    %6 = tpu.matmul %5, %0, %cst_6 {dimension_numbers = #tpu.dot_dimension_numbers<[1], [0], [0], [1], [0, 0, 1, 1], [], []>} : vector<512x32xbf16>, vector<32x32xbf16>, vector<512x32xf32> -> vector<512x32xf32>
    %7 = arith.maximumf %3, %6 : vector<512x32xf32>
    %c2 = arith.constant 2 : index
    %c0_7 = arith.constant 0 : index
    %c0_8 = arith.constant 0 : index
    %8 = vector.load %arg1[%c2, %c0_7, %c0_8] : memref<4x512x32xbf16, #tpu.memory_space<vmem>>, vector<1x512x32xbf16>
    %9 = vector.shape_cast %8 : vector<1x512x32xbf16> to vector<512x32xbf16>
    %cst_9 = arith.constant dense<0.000000e+00> : vector<512x32xf32>
    %10 = tpu.matmul %9, %0, %cst_9 {dimension_numbers = #tpu.dot_dimension_numbers<[1], [0], [0], [1], [0, 0, 1, 1], [], []>} : vector<512x32xbf16>, vector<32x32xbf16>, vector<512x32xf32> -> vector<512x32xf32>
    %11 = arith.maximumf %7, %10 : vector<512x32xf32>
    %c3 = arith.constant 3 : index
    %c0_10 = arith.constant 0 : index
    %c0_11 = arith.constant 0 : index
    %12 = vector.load %arg1[%c3, %c0_10, %c0_11] : memref<4x512x32xbf16, #tpu.memory_space<vmem>>, vector<1x512x32xbf16>
    %13 = vector.shape_cast %12 : vector<1x512x32xbf16> to vector<512x32xbf16>
    %cst_12 = arith.constant dense<0.000000e+00> : vector<512x32xf32>
    %14 = tpu.matmul %13, %0, %cst_12 {dimension_numbers = #tpu.dot_dimension_numbers<[1], [0], [0], [1], [0, 0, 1, 1], [], []>} : vector<512x32xbf16>, vector<32x32xbf16>, vector<512x32xf32> -> vector<512x32xf32>
    %15 = arith.maximumf %11, %14 : vector<512x32xf32>
    %c0_13 = arith.constant 0 : index
    %c0_14 = arith.constant 0 : index
    %16 = vector.load %arg3[%c0_13, %c0_14] : memref<1x32xf32, #tpu.memory_space<vmem>>, vector<1x32xf32>
    %17 = vector.broadcast %16 : vector<1x32xf32> to vector<512x32xf32>
    %18 = arith.addf %15, %17 : vector<512x32xf32>
    %cst_15 = arith.constant 0.000000e+00 : f32
    %19 = vector.broadcast %cst_15 : f32 to vector<512x32xf32>
    %20 = arith.maximumf %18, %19 : vector<512x32xf32>
    %c0_16 = arith.constant 0 : index
    %c0_17 = arith.constant 0 : index
    %21 = vector.load %arg4[%c0_16, %c0_17] : memref<512x32xf32, #tpu.memory_space<vmem>>, vector<512x32xf32>
    tpu.vector_store %arg4[%c0_16, %c0_17], %20 {strides = array<i32>} : memref<512x32xf32, #tpu.memory_space<vmem>>, vector<512x32xf32>,
    return
  }
  func.func @transform_0(%arg0: i32) -> (i32, i32, i32) {
    %c0_i32 = arith.constant 0 : i32
    %c0_i32_0 = arith.constant 0 : i32
    %c0_i32_1 = arith.constant 0 : i32
    return %c0_i32, %arg0, %c0_i32_0 : i32, i32, i32
  }
  func.func @transform_1(%arg0: i32) -> (i32, i32) {
    %c0_i32 = arith.constant 0 : i32
    %c0_i32_0 = arith.constant 0 : i32
    %c0_i32_1 = arith.constant 0 : i32
    return %c0_i32, %c0_i32_0 : i32, i32
  }
  func.func @transform_2(%arg0: i32) -> (i32, i32) {
    %c0_i32 = arith.constant 0 : i32
    %c0_i32_0 = arith.constant 0 : i32
    %c0_i32_1 = arith.constant 0 : i32
    return %c0_i32, %c0_i32_0 : i32, i32
  }
  func.func @transform_3(%arg0: i32) -> (i32, i32) {
    %c0_i32 = arith.constant 0 : i32
    %c0_i32_0 = arith.constant 0 : i32
    return %arg0, %c0_i32 : i32, i32
  }
}

module attributes {stable_mosaic.version = 11 : i64} {
  func.func @_conv_relu_pool_kernel(%arg0: i32, %arg1: memref<4x128x288xbf16, #tpu.memory_space<vmem>>, %arg2: memref<288x64xbf16, #tpu.memory_space<vmem>>, %arg3: memref<1x64xf32, #tpu.memory_space<vmem>>, %arg4: memref<128x64xf32, #tpu.memory_space<vmem>>) attributes {dimension_semantics = [#tpu.dimension_semantics<parallel>], iteration_bounds = array<i64: 1>, scalar_prefetch = 0 : i64, scratch_operands = 0 : i64, tpu.core_type = #tpu.core_type<tc>, window_params = [{transform_indices = @transform_0, window_bounds = array<i64: 4, 128, 288>}, {pipeline_mode = #tpu.pipeline_mode<synchronous>, transform_indices = @transform_1, window_bounds = array<i64: 288, 64>}, {pipeline_mode = #tpu.pipeline_mode<synchronous>, transform_indices = @transform_2, window_bounds = array<i64: 1, 64>}, {transform_indices = @transform_3, window_bounds = array<i64: 128, 64>}]} {
    %c0 = arith.constant 0 : index
    %c0_0 = arith.constant 0 : index
    %0 = vector.load %arg2[%c0, %c0_0] : memref<288x64xbf16, #tpu.memory_space<vmem>>, vector<288x64xbf16>
    %c0_1 = arith.constant 0 : index
    %c0_2 = arith.constant 0 : index
    %c0_3 = arith.constant 0 : index
    %1 = vector.load %arg1[%c0_1, %c0_2, %c0_3] : memref<4x128x288xbf16, #tpu.memory_space<vmem>>, vector<1x128x288xbf16>
    %2 = vector.shape_cast %1 : vector<1x128x288xbf16> to vector<128x288xbf16>
    %cst = arith.constant dense<0.000000e+00> : vector<128x64xf32>
    %3 = tpu.matmul %2, %0, %cst {dimension_numbers = #tpu.dot_dimension_numbers<[1], [0], [0], [1], [0, 0, 1, 1], [], []>} : vector<128x288xbf16>, vector<288x64xbf16>, vector<128x64xf32> -> vector<128x64xf32>
    %c1 = arith.constant 1 : index
    %c0_4 = arith.constant 0 : index
    %c0_5 = arith.constant 0 : index
    %4 = vector.load %arg1[%c1, %c0_4, %c0_5] : memref<4x128x288xbf16, #tpu.memory_space<vmem>>, vector<1x128x288xbf16>
    %5 = vector.shape_cast %4 : vector<1x128x288xbf16> to vector<128x288xbf16>
    %cst_6 = arith.constant dense<0.000000e+00> : vector<128x64xf32>
    %6 = tpu.matmul %5, %0, %cst_6 {dimension_numbers = #tpu.dot_dimension_numbers<[1], [0], [0], [1], [0, 0, 1, 1], [], []>} : vector<128x288xbf16>, vector<288x64xbf16>, vector<128x64xf32> -> vector<128x64xf32>
    %7 = arith.maximumf %3, %6 : vector<128x64xf32>
    %c2 = arith.constant 2 : index
    %c0_7 = arith.constant 0 : index
    %c0_8 = arith.constant 0 : index
    %8 = vector.load %arg1[%c2, %c0_7, %c0_8] : memref<4x128x288xbf16, #tpu.memory_space<vmem>>, vector<1x128x288xbf16>
    %9 = vector.shape_cast %8 : vector<1x128x288xbf16> to vector<128x288xbf16>
    %cst_9 = arith.constant dense<0.000000e+00> : vector<128x64xf32>
    %10 = tpu.matmul %9, %0, %cst_9 {dimension_numbers = #tpu.dot_dimension_numbers<[1], [0], [0], [1], [0, 0, 1, 1], [], []>} : vector<128x288xbf16>, vector<288x64xbf16>, vector<128x64xf32> -> vector<128x64xf32>
    %11 = arith.maximumf %7, %10 : vector<128x64xf32>
    %c3 = arith.constant 3 : index
    %c0_10 = arith.constant 0 : index
    %c0_11 = arith.constant 0 : index
    %12 = vector.load %arg1[%c3, %c0_10, %c0_11] : memref<4x128x288xbf16, #tpu.memory_space<vmem>>, vector<1x128x288xbf16>
    %13 = vector.shape_cast %12 : vector<1x128x288xbf16> to vector<128x288xbf16>
    %cst_12 = arith.constant dense<0.000000e+00> : vector<128x64xf32>
    %14 = tpu.matmul %13, %0, %cst_12 {dimension_numbers = #tpu.dot_dimension_numbers<[1], [0], [0], [1], [0, 0, 1, 1], [], []>} : vector<128x288xbf16>, vector<288x64xbf16>, vector<128x64xf32> -> vector<128x64xf32>
    %15 = arith.maximumf %11, %14 : vector<128x64xf32>
    %c0_13 = arith.constant 0 : index
    %c0_14 = arith.constant 0 : index
    %16 = vector.load %arg3[%c0_13, %c0_14] : memref<1x64xf32, #tpu.memory_space<vmem>>, vector<1x64xf32>
    %17 = vector.broadcast %16 : vector<1x64xf32> to vector<128x64xf32>
    %18 = arith.addf %15, %17 : vector<128x64xf32>
    %cst_15 = arith.constant 0.000000e+00 : f32
    %19 = vector.broadcast %cst_15 : f32 to vector<128x64xf32>
    %20 = arith.maximumf %18, %19 : vector<128x64xf32>
    %c0_16 = arith.constant 0 : index
    %c0_17 = arith.constant 0 : index
    %21 = vector.load %arg4[%c0_16, %c0_17] : memref<128x64xf32, #tpu.memory_space<vmem>>, vector<128x64xf32>
    tpu.vector_store %arg4[%c0_16, %c0_17], %20 {strides = array<i32>} : memref<128x64xf32, #tpu.memory_space<vmem>>, vector<128x64xf32>,
    return
  }
  func.func @transform_0(%arg0: i32) -> (i32, i32, i32) {
    %c0_i32 = arith.constant 0 : i32
    %c0_i32_0 = arith.constant 0 : i32
    %c0_i32_1 = arith.constant 0 : i32
    return %c0_i32, %arg0, %c0_i32_0 : i32, i32, i32
  }
  func.func @transform_1(%arg0: i32) -> (i32, i32) {
    %c0_i32 = arith.constant 0 : i32
    %c0_i32_0 = arith.constant 0 : i32
    %c0_i32_1 = arith.constant 0 : i32
    return %c0_i32, %c0_i32_0 : i32, i32
  }
  func.func @transform_2(%arg0: i32) -> (i32, i32) {
    %c0_i32 = arith.constant 0 : i32
    %c0_i32_0 = arith.constant 0 : i32
    %c0_i32_1 = arith.constant 0 : i32
    return %c0_i32, %c0_i32_0 : i32, i32
  }
  func.func @transform_3(%arg0: i32) -> (i32, i32) {
    %c0_i32 = arith.constant 0 : i32
    %c0_i32_0 = arith.constant 0 : i32
    return %arg0, %c0_i32 : i32, i32
  }
}

module attributes {stable_mosaic.version = 11 : i64} {
  func.func @_mlp_kernel(%arg0: i32, %arg1: i32, %arg2: memref<2x4096xbf16, #tpu.memory_space<vmem>>, %arg3: memref<4096x256xbf16, #tpu.memory_space<vmem>>, %arg4: memref<1x256xf32, #tpu.memory_space<vmem>>, %arg5: memref<256x128xbf16, #tpu.memory_space<vmem>>, %arg6: memref<1x128xf32, #tpu.memory_space<vmem>>, %arg7: memref<2x128xf32, #tpu.memory_space<vmem>>) attributes {dimension_semantics = [#tpu.dimension_semantics<parallel>, #tpu.dimension_semantics<arbitrary>], iteration_bounds = array<i64: 1, 2>, scalar_prefetch = 0 : i64, scratch_operands = 0 : i64, tpu.core_type = #tpu.core_type<tc>, window_params = [{transform_indices = @transform_0, window_bounds = array<i64: 2, 4096>}, {transform_indices = @transform_1, window_bounds = array<i64: 4096, 256>}, {transform_indices = @transform_2, window_bounds = array<i64: 1, 256>}, {transform_indices = @transform_3, window_bounds = array<i64: 256, 128>}, {pipeline_mode = #tpu.pipeline_mode<synchronous>, transform_indices = @transform_4, window_bounds = array<i64: 1, 128>}, {transform_indices = @transform_5, window_bounds = array<i64: 2, 128>}]} {
    %c0_i32 = arith.constant 0 : i32
    %0 = arith.cmpi eq, %arg1, %c0_i32 : i32
    %1 = arith.extui %0 : i1 to i32
    %c0_i32_0 = arith.constant 0 : i32
    %2 = arith.cmpi ne, %1, %c0_i32_0 : i32
    scf.if %2 {
      %cst_15 = arith.constant 0.000000e+00 : f32
      %20 = vector.broadcast %cst_15 : f32 to vector<2x128xf32>
      %c0_16 = arith.constant 0 : index
      %c0_17 = arith.constant 0 : index
      %21 = vector.load %arg7[%c0_16, %c0_17] : memref<2x128xf32, #tpu.memory_space<vmem>>, vector<2x128xf32>
      tpu.vector_store %arg7[%c0_16, %c0_17], %20 {strides = array<i32>} : memref<2x128xf32, #tpu.memory_space<vmem>>, vector<2x128xf32>,
    } else {
    }
    %c0 = arith.constant 0 : index
    %c0_1 = arith.constant 0 : index
    %3 = vector.load %arg2[%c0, %c0_1] : memref<2x4096xbf16, #tpu.memory_space<vmem>>, vector<2x4096xbf16>
    %c0_2 = arith.constant 0 : index
    %c0_3 = arith.constant 0 : index
    %4 = vector.load %arg3[%c0_2, %c0_3] : memref<4096x256xbf16, #tpu.memory_space<vmem>>, vector<4096x256xbf16>
    %cst = arith.constant dense<0.000000e+00> : vector<2x256xf32>
    %5 = tpu.matmul %3, %4, %cst {dimension_numbers = #tpu.dot_dimension_numbers<[1], [0], [0], [1], [0, 0, 1, 1], [], []>} : vector<2x4096xbf16>, vector<4096x256xbf16>, vector<2x256xf32> -> vector<2x256xf32>
    %c0_4 = arith.constant 0 : index
    %c0_5 = arith.constant 0 : index
    %6 = vector.load %arg4[%c0_4, %c0_5] : memref<1x256xf32, #tpu.memory_space<vmem>>, vector<1x256xf32>
    %7 = vector.broadcast %6 : vector<1x256xf32> to vector<2x256xf32>
    %8 = arith.addf %5, %7 : vector<2x256xf32>
    %cst_6 = arith.constant 0.000000e+00 : f32
    %9 = vector.broadcast %cst_6 : f32 to vector<2x256xf32>
    %10 = arith.maximumf %8, %9 : vector<2x256xf32>
    %c0_7 = arith.constant 0 : index
    %c0_8 = arith.constant 0 : index
    %11 = vector.load %arg7[%c0_7, %c0_8] : memref<2x128xf32, #tpu.memory_space<vmem>>, vector<2x128xf32>
    %12 = arith.truncf %10 : vector<2x256xf32> to vector<2x256xbf16>
    %c0_9 = arith.constant 0 : index
    %c0_10 = arith.constant 0 : index
    %13 = vector.load %arg5[%c0_9, %c0_10] : memref<256x128xbf16, #tpu.memory_space<vmem>>, vector<256x128xbf16>
    %cst_11 = arith.constant dense<0.000000e+00> : vector<2x128xf32>
    %14 = tpu.matmul %12, %13, %cst_11 {dimension_numbers = #tpu.dot_dimension_numbers<[1], [0], [0], [1], [0, 0, 1, 1], [], []>} : vector<2x256xbf16>, vector<256x128xbf16>, vector<2x128xf32> -> vector<2x128xf32>
    %15 = arith.addf %11, %14 : vector<2x128xf32>
    %c0_12 = arith.constant 0 : index
    %c0_13 = arith.constant 0 : index
    %16 = vector.load %arg7[%c0_12, %c0_13] : memref<2x128xf32, #tpu.memory_space<vmem>>, vector<2x128xf32>
    tpu.vector_store %arg7[%c0_12, %c0_13], %15 {strides = array<i32>} : memref<2x128xf32, #tpu.memory_space<vmem>>, vector<2x128xf32>,
    %c1_i32 = arith.constant 1 : i32
    %17 = arith.cmpi eq, %arg1, %c1_i32 : i32
    %18 = arith.extui %17 : i1 to i32
    %c0_i32_14 = arith.constant 0 : i32
    %19 = arith.cmpi ne, %18, %c0_i32_14 : i32
    scf.if %19 {
      %c0_15 = arith.constant 0 : index
      %c0_16 = arith.constant 0 : index
      %20 = vector.load %arg7[%c0_15, %c0_16] : memref<2x128xf32, #tpu.memory_space<vmem>>, vector<2x128xf32>
      %c0_17 = arith.constant 0 : index
      %c0_18 = arith.constant 0 : index
      %21 = vector.load %arg6[%c0_17, %c0_18] : memref<1x128xf32, #tpu.memory_space<vmem>>, vector<1x128xf32>
      %22 = vector.broadcast %21 : vector<1x128xf32> to vector<2x128xf32>
      %23 = arith.addf %20, %22 : vector<2x128xf32>
      %c0_19 = arith.constant 0 : index
      %c0_20 = arith.constant 0 : index
      %24 = vector.load %arg7[%c0_19, %c0_20] : memref<2x128xf32, #tpu.memory_space<vmem>>, vector<2x128xf32>
      tpu.vector_store %arg7[%c0_19, %c0_20], %23 {strides = array<i32>} : memref<2x128xf32, #tpu.memory_space<vmem>>, vector<2x128xf32>,
    } else {
    }
    return
  }
  func.func @transform_0(%arg0: i32, %arg1: i32) -> (i32, i32) {
    %c0_i32 = arith.constant 0 : i32
    %c0_i32_0 = arith.constant 0 : i32
    return %arg0, %c0_i32 : i32, i32
  }
  func.func @transform_1(%arg0: i32, %arg1: i32) -> (i32, i32) {
    %c0_i32 = arith.constant 0 : i32
    %c0_i32_0 = arith.constant 0 : i32
    return %c0_i32, %arg1 : i32, i32
  }
  func.func @transform_2(%arg0: i32, %arg1: i32) -> (i32, i32) {
    %c0_i32 = arith.constant 0 : i32
    %c0_i32_0 = arith.constant 0 : i32
    return %c0_i32, %arg1 : i32, i32
  }
  func.func @transform_3(%arg0: i32, %arg1: i32) -> (i32, i32) {
    %c0_i32 = arith.constant 0 : i32
    %c0_i32_0 = arith.constant 0 : i32
    return %arg1, %c0_i32 : i32, i32
  }
  func.func @transform_4(%arg0: i32, %arg1: i32) -> (i32, i32) {
    %c0_i32 = arith.constant 0 : i32
    %c0_i32_0 = arith.constant 0 : i32
    %c0_i32_1 = arith.constant 0 : i32
    return %c0_i32, %c0_i32_0 : i32, i32
  }
  func.func @transform_5(%arg0: i32, %arg1: i32) -> (i32, i32) {
    %c0_i32 = arith.constant 0 : i32
    %c0_i32_0 = arith.constant 0 : i32
    return %arg0, %c0_i32 : i32, i32
  }
}

</mosaic_0001>

<bundles_post_ra>
// kernel: cnn_forward.3
= control target key start
LH: loop header
LB: loop body
LE: loop exit
PB: predicated region body
PF: predicated region fallthrough
CT: control target
= control target key end

     0   :  { %vm255_vm0 = vcmask 261120   ;;  %s4223_s1 = inlined_call_operand.vmem [shape: bf16[32,32], index: 1, kind: input, shape index: {}]   ;;  %s4224_s0 = inlined_call_operand.vmem [shape: bf16[4,512,32], index: 0, kind: input, shape index: {}]   ;;  %s4225_s2 = inlined_call_operand.vmem [shape: f32[1,32], index: 2, kind: input, shape index: {}]   ;;  %s4226_s3 = inlined_call_operand.vmem [shape: f32[512,32], index: 3, kind: output, shape index: {}]  }
   0x1   :  { %v3224_v0 = vld [vmem:[%s4223_s1 + $0x8] sm:$0xff]  ;;  %v3223_v1 = vld [vmem:[%s4223_s1] sm:$0xff]  ;;  %v3227_v10 = vld [vmem:[%s4224_s0 + $0x10] sm:$0xff] }
   0x2   :  { %358 = vmatpush.bf16.msra.mxu0 %v3224_v0  ;;  %848 = vmatpush.bf16.msra.mxu1 %v3224_v0  ;;  %v3225_v2 = vld [vmem:[%s4224_s0] sm:$0xff]  ;;  %v3226_v6 = vld [vmem:[%s4224_s0 + $0x8] sm:$0xff]  ;;  %v3259_v11 = vld [vmem:[%s4224_s0 + $0x110] sm:$0xff] }
   0x3   :  { %1402 = vmatpush.bf16.msra.mxu2 %v3224_v0  ;;  %1956 = vmatpush.bf16.msra.mxu3 %v3224_v0  ;;  %v3257_v3 = vld [vmem:[%s4224_s0 + $0x100] sm:$0xff]  ;;  %v3258_v7 = vld [vmem:[%s4224_s0 + $0x108] sm:$0xff]  ;;  %v3291_v12 = vld [vmem:[%s4224_s0 + $0x210] sm:$0xff] }
   0x4   :  { %v3289_v4 = vld [vmem:[%s4224_s0 + $0x200] sm:$0xff]  ;;  %v3290_v8 = vld [vmem:[%s4224_s0 + $0x208] sm:$0xff]  ;;  %v3323_v13 = vld [vmem:[%s4224_s0 + $0x310] sm:$0xff] }
   0x5   :  { %v3321_v5 = vld [vmem:[%s4224_s0 + $0x300] sm:$0xff]  ;;  %v3322_v9 = vld [vmem:[%s4224_s0 + $0x308] sm:$0xff]  ;;  %v3228_v14 = vld [vmem:[%s4224_s0 + $0x18] sm:$0xff] }
   0x6   :  { %359 = vmatpush.bf16.msra.mxu0 %v3223_v1  ;;  %849 = vmatpush.bf16.msra.mxu1 %v3223_v1  ;;  %v3260_v15 = vld [vmem:[%s4224_s0 + $0x118] sm:$0xff]  ;;  %v3229_v18 = vld [vmem:[%s4224_s0 + $0x20] sm:$0xff]  ;;  %v3230_v22 = vld [vmem:[%s4224_s0 + $0x28] sm:$0xff] }
   0x7   :  { %1403 = vmatpush.bf16.msra.mxu2 %v3223_v1  ;;  %1957 = vmatpush.bf16.msra.mxu3 %v3223_v1  ;;  %v3292_v16 = vld [vmem:[%s4224_s0 + $0x218] sm:$0xff]  ;;  %v3261_v19 = vld [vmem:[%s4224_s0 + $0x120] sm:$0xff]  ;;  %v3262_v23 = vld [vmem:[%s4224_s0 + $0x128] sm:$0xff] }
   0x8   :  { %v3324_v17 = vld [vmem:[%s4224_s0 + $0x318] sm:$0xff]  ;;  %v3293_v20 = vld [vmem:[%s4224_s0 + $0x220] sm:$0xff]  ;;  %v3294_v24 = vld [vmem:[%s4224_s0 + $0x228] sm:$0xff] }
   0x9   :  { %2519 = vmatmul.msk.bf16.vlgmr.msra.gmra.mxu0 %vm255_vm0, %v3225_v2  ;;  %2743 = vmatmul.msk.bf16.vlgmr.msra.gmra.mxu1 %vm255_vm0, %v3257_v3  ;;  %v3325_v21 = vld [vmem:[%s4224_s0 + $0x320] sm:$0xff]  ;;  %v3326_v25 = vld [vmem:[%s4224_s0 + $0x328] sm:$0xff]  ;;  %v3231_v26 = vld [vmem:[%s4224_s0 + $0x30] sm:$0xff] }
   0xa   :  { %2967 = vmatmul.msk.bf16.vlgmr.msra.gmra.mxu2 %vm255_vm0, %v3289_v4  ;;  %3191 = vmatmul.msk.bf16.vlgmr.msra.gmra.mxu3 %vm255_vm0, %v3321_v5  ;;  %v3263_v27 = vld [vmem:[%s4224_s0 + $0x130] sm:$0xff]  ;;  %v3232_v30 = vld [vmem:[%s4224_s0 + $0x38] sm:$0xff]  ;;  %v3233_v34 = vld [vmem:[%s4224_s0 + $0x40] sm:$0xff] }
   0xb   :  { %v3295_v28 = vld [vmem:[%s4224_s0 + $0x230] sm:$0xff]  ;;  %v3264_v31 = vld [vmem:[%s4224_s0 + $0x138] sm:$0xff]  ;;  %v3265_v35 = vld [vmem:[%s4224_s0 + $0x140] sm:$0xff] }
   0xc   :  { %v3327_v29 = vld [vmem:[%s4224_s0 + $0x330] sm:$0xff]  ;;  %v3296_v32 = vld [vmem:[%s4224_s0 + $0x238] sm:$0xff]  ;;  %v3297_v38 = vld [vmem:[%s4224_s0 + $0x240] sm:$0xff] }
   0xd   :  { %v3328_v33 = vld [vmem:[%s4224_s0 + $0x338] sm:$0xff]  ;;  %v3329_v39 = vld [vmem:[%s4224_s0 + $0x340] sm:$0xff]  ;;  %v3234_v53 = vld [vmem:[%s4224_s0 + $0x48] sm:$0xff] }
   0xe   :  { %v3528_v44 = vld [vmem:[%s4225_s2] ss:$0 sm:$0xff]  ;;  %v3266_v54 = vld [vmem:[%s4224_s0 + $0x148] sm:$0xff] }
   0xf   :  { %v3298_v58 = vld [vmem:[%s4224_s0 + $0x248] sm:$0xff] }
  0x10   :  { %v3330_v59 = vld [vmem:[%s4224_s0 + $0x348] sm:$0xff] }
  0x19   :  { %2520 = vmatmul.msk.bf16.gmra.mxu0 %vm255_vm0, %v3226_v6  ;;  %2744 = vmatmul.msk.bf16.gmra.mxu1 %vm255_vm0, %v3258_v7 }
  0x1a   :  { %2968 = vmatmul.msk.bf16.gmra.mxu2 %vm255_vm0, %v3290_v8  ;;  %3192 = vmatmul.msk.bf16.gmra.mxu3 %vm255_vm0, %v3322_v9 }
  0x29   :  { %2521 = vmatmul.msk.bf16.gmra.mxu0 %vm255_vm0, %v3227_v10  ;;  %2745 = vmatmul.msk.bf16.gmra.mxu1 %vm255_vm0, %v3259_v11  ;;  %v3235_v11 = vld [vmem:[%s4224_s0 + $0x50] sm:$0xff] }
  0x2a   :  { %2969 = vmatmul.msk.bf16.gmra.mxu2 %vm255_vm0, %v3291_v12  ;;  %3193 = vmatmul.msk.bf16.gmra.mxu3 %vm255_vm0, %v3323_v13  ;;  %v3267_v12 = vld [vmem:[%s4224_s0 + $0x150] sm:$0xff] }
  0x39   :  { %2522 = vmatmul.msk.bf16.gmra.mxu0 %vm255_vm0, %v3228_v14  ;;  %2746 = vmatmul.msk.bf16.gmra.mxu1 %vm255_vm0, %v3260_v15 }
  0x3a   :  { %2970 = vmatmul.msk.bf16.gmra.mxu2 %vm255_vm0, %v3292_v16  ;;  %3194 = vmatmul.msk.bf16.gmra.mxu3 %vm255_vm0, %v3324_v17  ;;  %v3299_v16 = vld [vmem:[%s4224_s0 + $0x250] sm:$0xff] }
  0x3b   :  { %v3331_v17 = vld [vmem:[%s4224_s0 + $0x350] sm:$0xff] }
  0x49   :  { %2523 = vmatmul.msk.bf16.gmra.mxu0 %vm255_vm0, %v3229_v18  ;;  %2747 = vmatmul.msk.bf16.gmra.mxu1 %vm255_vm0, %v3261_v19 }
  0x4a   :  { %2971 = vmatmul.msk.bf16.gmra.mxu2 %vm255_vm0, %v3293_v20  ;;  %3195 = vmatmul.msk.bf16.gmra.mxu3 %vm255_vm0, %v3325_v21 }
  0x59   :  { %2524 = vmatmul.msk.bf16.gmra.mxu0 %vm255_vm0, %v3230_v22  ;;  %2748 = vmatmul.msk.bf16.gmra.mxu1 %vm255_vm0, %v3262_v23 }
  0x5a   :  { %2972 = vmatmul.msk.bf16.gmra.mxu2 %vm255_vm0, %v3294_v24  ;;  %3196 = vmatmul.msk.bf16.gmra.mxu3 %vm255_vm0, %v3326_v25 }
  0x69   :  { %2525 = vmatmul.msk.bf16.gmra.mxu0 %vm255_vm0, %v3231_v26  ;;  %2749 = vmatmul.msk.bf16.gmra.mxu1 %vm255_vm0, %v3263_v27 }
  0x6a   :  { %2973 = vmatmul.msk.bf16.gmra.mxu2 %vm255_vm0, %v3295_v28  ;;  %3197 = vmatmul.msk.bf16.gmra.mxu3 %vm255_vm0, %v3327_v29 }
  0x79   :  { %2526 = vmatmul.msk.bf16.gmra.mxu0 %vm255_vm0, %v3232_v30  ;;  %2750 = vmatmul.msk.bf16.gmra.mxu1 %vm255_vm0, %v3264_v31 }
  0x7a   :  { %2974 = vmatmul.msk.bf16.gmra.mxu2 %vm255_vm0, %v3296_v32  ;;  %3198 = vmatmul.msk.bf16.gmra.mxu3 %vm255_vm0, %v3328_v33  ;;  %v3236_v33 = vld [vmem:[%s4224_s0 + $0x58] sm:$0xff] }
  0x86   :  { %v361_v36 = vpop.f32.mrf.mxu0  ;;  %v851_v37 = vpop.f32.mrf.mxu1 }
  0x87   :  { %v1011_v40 = vmax.f32 %v361_v36, %v851_v37 }
  0x89   :  { %2527 = vmatmul.msk.bf16.gmra.mxu0 %vm255_vm0, %v3233_v34  ;;  %2751 = vmatmul.msk.bf16.gmra.mxu1 %vm255_vm0, %v3265_v35  ;;  %v3268_v34 = vld [vmem:[%s4224_s0 + $0x158] sm:$0xff] }
  0x8a   :  { %2975 = vmatmul.msk.bf16.gmra.mxu2 %vm255_vm0, %v3297_v38  ;;  %3199 = vmatmul.msk.bf16.gmra.mxu3 %vm255_vm0, %v3329_v39  ;;  %v3300_v38 = vld [vmem:[%s4224_s0 + $0x258] sm:$0xff] }
  0x8b   :  { %v3332_v39 = vld [vmem:[%s4224_s0 + $0x358] sm:$0xff] }
  0x8d   :  { %v1405_v41 = vpop.f32.mrf.mxu2  ;;  %v1959_v42 = vpop.f32.mrf.mxu3 }
  0x8e   :  { %v1565_v43 = vmax.f32 %v1011_v40, %v1405_v41  ;;  %v363_v45 = vpop.f32.mrf.mxu0  ;;  %v853_v46 = vpop.f32.mrf.mxu1 }
  0x8f   :  { %v1012_v50 = vmax.f32 %v363_v45, %v853_v46 }
  0x90   :  { %v2119_v47 = vmax.f32 %v1565_v43, %v1959_v42 }
  0x92   :  { %v2187_v48 = vadd.f32 %v3528_v44, %v2119_v47 }
  0x94   :  { %v2251_v49 = vmax.f32 %v2187_v48, 0.0 }
  0x95   :  { %v1407_v51 = vpop.f32.mrf.mxu2  ;;  %v1961_v52 = vpop.f32.mrf.mxu3 }
  0x96   :  { %2315 = vst.msk [vmem:[%s4226_s3] sm:$0xff] %vm255_vm0, %v2251_v49  ;;  %v1566_v55 = vmax.f32 %v1012_v50, %v1407_v51  ;;  %v366_v56 = vpop.f32.mrf.mxu0  ;;  %v856_v57 = vpop.f32.mrf.mxu1 }
  0x97   :  { %v1013_v62 = vmax.f32 %v366_v56, %v856_v57  ;;  %v3237_v56 = vld [vmem:[%s4224_s0 + $0x60] sm:$0xff] }
  0x98   :  { %v2120_v60 = vmax.f32 %v1566_v55, %v1961_v52  ;;  %v3269_v57 = vld [vmem:[%s4224_s0 + $0x160] sm:$0xff] }
  0x99   :  { %2528 = vmatmul.msk.bf16.gmra.mxu0 %vm255_vm0, %v3234_v53  ;;  %2752 = vmatmul.msk.bf16.gmra.mxu1 %vm255_vm0, %v3266_v54 }
  0x9a   :  { %v2188_v61 = vadd.f32 %v3528_v44, %v2120_v60  ;;  %2976 = vmatmul.msk.bf16.gmra.mxu2 %vm255_vm0, %v3298_v58  ;;  %3200 = vmatmul.msk.bf16.gmra.mxu3 %vm255_vm0, %v3330_v59 }
  0x9c   :  { %v2252_v63 = vmax.f32 %v2188_v61, 0.0  ;;  %v3301_v61 = vld [vmem:[%s4224_s0 + $0x260] sm:$0xff] }
  0x9d   :  { %v1410_v0 = vpop.f32.mrf.mxu2  ;;  %v1964_v1 = vpop.f32.mrf.mxu3 }
  0x9e   :  { %2316 = vst.msk [vmem:[%s4226_s3 + $0x8] sm:$0xff] %vm255_vm0, %v2252_v63  ;;  %v1567_v2 = vmax.f32 %v1013_v62, %v1410_v0  ;;  %v368_v3 = vpop.f32.mrf.mxu0  ;;  %v858_v4 = vpop.f32.mrf.mxu1  ;;  %v3333_v62 = vld [vmem:[%s4224_s0 + $0x360] sm:$0xff] }
  0x9f   :  { %v1014_v8 = vmax.f32 %v368_v3, %v858_v4 }
  0xa0   :  { %v2121_v5 = vmax.f32 %v1567_v2, %v1964_v1 }
  0xa2   :  { %v2189_v6 = vadd.f32 %v3528_v44, %v2121_v5 }
  0xa4   :  { %v2253_v7 = vmax.f32 %v2189_v6, 0.0 }
  0xa5   :  { %v1412_v9 = vpop.f32.mrf.mxu2  ;;  %v1966_v10 = vpop.f32.mrf.mxu3 }
  0xa6   :  { %2317 = vst.msk [vmem:[%s4226_s3 + $0x10] sm:$0xff] %vm255_vm0, %v2253_v7  ;;  %v1568_v13 = vmax.f32 %v1014_v8, %v1412_v9  ;;  %v371_v14 = vpop.f32.mrf.mxu0  ;;  %v861_v15 = vpop.f32.mrf.mxu1 }
  0xa7   :  { %v1015_v20 = vmax.f32 %v371_v14, %v861_v15  ;;  %v3238_v14 = vld [vmem:[%s4224_s0 + $0x68] sm:$0xff] }
  0xa8   :  { %v2122_v18 = vmax.f32 %v1568_v13, %v1966_v10  ;;  %v3270_v15 = vld [vmem:[%s4224_s0 + $0x168] sm:$0xff] }
  0xa9   :  { %2529 = vmatmul.msk.bf16.gmra.mxu0 %vm255_vm0, %v3235_v11  ;;  %2753 = vmatmul.msk.bf16.gmra.mxu1 %vm255_vm0, %v3267_v12 }
  0xaa   :  { %v2190_v19 = vadd.f32 %v3528_v44, %v2122_v18  ;;  %2977 = vmatmul.msk.bf16.gmra.mxu2 %vm255_vm0, %v3299_v16  ;;  %3201 = vmatmul.msk.bf16.gmra.mxu3 %vm255_vm0, %v3331_v17 }
  0xac   :  { %v2254_v21 = vmax.f32 %v2190_v19, 0.0  ;;  %v3302_v19 = vld [vmem:[%s4224_s0 + $0x268] sm:$0xff] }
  0xad   :  { %v1415_v22 = vpop.f32.mrf.mxu2  ;;  %v1969_v23 = vpop.f32.mrf.mxu3 }
  0xae   :  { %2318 = vst.msk [vmem:[%s4226_s3 + $0x18] sm:$0xff] %vm255_vm0, %v2254_v21  ;;  %v1569_v24 = vmax.f32 %v1015_v20, %v1415_v22  ;;  %v373_v25 = vpop.f32.mrf.mxu0  ;;  %v863_v26 = vpop.f32.mrf.mxu1  ;;  %v3334_v20 = vld [vmem:[%s4224_s0 + $0x368] sm:$0xff] }
  0xaf   :  { %v1016_v30 = vmax.f32 %v373_v25, %v863_v26 }
  0xb0   :  { %v2123_v27 = vmax.f32 %v1569_v24, %v1969_v23 }
  0xb2   :  { %v2191_v28 = vadd.f32 %v3528_v44, %v2123_v27 }
  0xb4   :  { %v2255_v29 = vmax.f32 %v2191_v28, 0.0 }
  0xb5   :  { %v1417_v31 = vpop.f32.mrf.mxu2  ;;  %v1971_v32 = vpop.f32.mrf.mxu3 }
  0xb6   :  { %2319 = vst.msk [vmem:[%s4226_s3 + $0x20] sm:$0xff] %vm255_vm0, %v2255_v29  ;;  %v1570_v35 = vmax.f32 %v1016_v30, %v1417_v31  ;;  %v376_v36 = vpop.f32.mrf.mxu0  ;;  %v866_v37 = vpop.f32.mrf.mxu1 }
  0xb7   :  { %v1017_v42 = vmax.f32 %v376_v36, %v866_v37  ;;  %v3239_v36 = vld [vmem:[%s4224_s0 + $0x70] sm:$0xff] }
  0xb8   :  { %v2124_v40 = vmax.f32 %v1570_v35, %v1971_v32  ;;  %v3271_v37 = vld [vmem:[%s4224_s0 + $0x170] sm:$0xff] }
  0xb9   :  { %2530 = vmatmul.msk.bf16.gmra.mxu0 %vm255_vm0, %v3236_v33  ;;  %2754 = vmatmul.msk.bf16.gmra.mxu1 %vm255_vm0, %v3268_v34 }
  0xba   :  { %v2192_v41 = vadd.f32 %v3528_v44, %v2124_v40  ;;  %2978 = vmatmul.msk.bf16.gmra.mxu2 %vm255_vm0, %v3300_v38  ;;  %3202 = vmatmul.msk.bf16.gmra.mxu3 %vm255_vm0, %v3332_v39 }
  0xbc   :  { %v2256_v43 = vmax.f32 %v2192_v41, 0.0  ;;  %v3303_v41 = vld [vmem:[%s4224_s0 + $0x270] sm:$0xff] }
  0xbd   :  { %v1420_v45 = vpop.f32.mrf.mxu2  ;;  %v1974_v46 = vpop.f32.mrf.mxu3 }
  0xbe   :  { %2320 = vst.msk [vmem:[%s4226_s3 + $0x28] sm:$0xff] %vm255_vm0, %v2256_v43  ;;  %v1571_v47 = vmax.f32 %v1017_v42, %v1420_v45  ;;  %v378_v48 = vpop.f32.mrf.mxu0  ;;  %v868_v49 = vpop.f32.mrf.mxu1  ;;  %v3335_v42 = vld [vmem:[%s4224_s0 + $0x370] sm:$0xff] }
  0xbf   :  { %v1018_v53 = vmax.f32 %v378_v48, %v868_v49 }
  0xc0   :  { %v2125_v50 = vmax.f32 %v1571_v47, %v1974_v46 }
  0xc2   :  { %v2193_v51 = vadd.f32 %v3528_v44, %v2125_v50 }
  0xc4   :  { %v2257_v52 = vmax.f32 %v2193_v51, 0.0 }
  0xc5   :  { %v1422_v54 = vpop.f32.mrf.mxu2  ;;  %v1976_v55 = vpop.f32.mrf.mxu3 }
  0xc6   :  { %2321 = vst.msk [vmem:[%s4226_s3 + $0x30] sm:$0xff] %vm255_vm0, %v2257_v52  ;;  %v1572_v58 = vmax.f32 %v1018_v53, %v1422_v54  ;;  %v381_v59 = vpop.f32.mrf.mxu0  ;;  %v871_v60 = vpop.f32.mrf.mxu1 }
  0xc7   :  { %v1019_v1 = vmax.f32 %v381_v59, %v871_v60  ;;  %v3240_v59 = vld [vmem:[%s4224_s0 + $0x78] sm:$0xff] }
  0xc8   :  { %v2126_v63 = vmax.f32 %v1572_v58, %v1976_v55  ;;  %v3272_v60 = vld [vmem:[%s4224_s0 + $0x178] sm:$0xff] }
  0xc9   :  { %2531 = vmatmul.msk.bf16.gmra.mxu0 %vm255_vm0, %v3237_v56  ;;  %2755 = vmatmul.msk.bf16.gmra.mxu1 %vm255_vm0, %v3269_v57 }
  0xca   :  { %v2194_v0 = vadd.f32 %v3528_v44, %v2126_v63  ;;  %2979 = vmatmul.msk.bf16.gmra.mxu2 %vm255_vm0, %v3301_v61  ;;  %3203 = vmatmul.msk.bf16.gmra.mxu3 %vm255_vm0, %v3333_v62 }
  0xcc   :  { %v2258_v2 = vmax.f32 %v2194_v0, 0.0  ;;  %v3304_v0 = vld [vmem:[%s4224_s0 + $0x278] sm:$0xff] }
  0xcd   :  { %v1425_v3 = vpop.f32.mrf.mxu2  ;;  %v1979_v4 = vpop.f32.mrf.mxu3 }
  0xce   :  { %2322 = vst.msk [vmem:[%s4226_s3 + $0x38] sm:$0xff] %vm255_vm0, %v2258_v2  ;;  %v1573_v5 = vmax.f32 %v1019_v1, %v1425_v3  ;;  %v383_v6 = vpop.f32.mrf.mxu0  ;;  %v873_v7 = vpop.f32.mrf.mxu1  ;;  %v3336_v1 = vld [vmem:[%s4224_s0 + $0x378] sm:$0xff] }
  0xcf   :  { %v1020_v11 = vmax.f32 %v383_v6, %v873_v7 }
  0xd0   :  { %v2127_v8 = vmax.f32 %v1573_v5, %v1979_v4 }
  0xd2   :  { %v2195_v9 = vadd.f32 %v3528_v44, %v2127_v8 }
  0xd4   :  { %v2259_v10 = vmax.f32 %v2195_v9, 0.0 }
  0xd5   :  { %v1427_v12 = vpop.f32.mrf.mxu2  ;;  %v1981_v13 = vpop.f32.mrf.mxu3 }
  0xd6   :  { %2323 = vst.msk [vmem:[%s4226_s3 + $0x40] sm:$0xff] %vm255_vm0, %v2259_v10  ;;  %v1574_v16 = vmax.f32 %v1020_v11, %v1427_v12  ;;  %v386_v17 = vpop.f32.mrf.mxu0  ;;  %v876_v18 = vpop.f32.mrf.mxu1 }
  0xd7   :  { %v1021_v23 = vmax.f32 %v386_v17, %v876_v18  ;;  %v3241_v17 = vld [vmem:[%s4224_s0 + $0x80] sm:$0xff] }
  0xd8   :  { %v2128_v21 = vmax.f32 %v1574_v16, %v1981_v13  ;;  %v3273_v18 = vld [vmem:[%s4224_s0 + $0x180] sm:$0xff] }
  0xd9   :  { %2532 = vmatmul.msk.bf16.gmra.mxu0 %vm255_vm0, %v3238_v14  ;;  %2756 = vmatmul.msk.bf16.gmra.mxu1 %vm255_vm0, %v3270_v15 }
  0xda   :  { %v2196_v22 = vadd.f32 %v3528_v44, %v2128_v21  ;;  %2980 = vmatmul.msk.bf16.gmra.mxu2 %vm255_vm0, %v3302_v19  ;;  %3204 = vmatmul.msk.bf16.gmra.mxu3 %vm255_vm0, %v3334_v20 }
  0xdc   :  { %v2260_v24 = vmax.f32 %v2196_v22, 0.0  ;;  %v3305_v22 = vld [vmem:[%s4224_s0 + $0x280] sm:$0xff] }
  0xdd   :  { %v1430_v25 = vpop.f32.mrf.mxu2  ;;  %v1984_v26 = vpop.f32.mrf.mxu3 }
  0xde   :  { %2324 = vst.msk [vmem:[%s4226_s3 + $0x48] sm:$0xff] %vm255_vm0, %v2260_v24  ;;  %v1575_v27 = vmax.f32 %v1021_v23, %v1430_v25  ;;  %v388_v28 = vpop.f32.mrf.mxu0  ;;  %v878_v29 = vpop.f32.mrf.mxu1  ;;  %v3337_v23 = vld [vmem:[%s4224_s0 + $0x380] sm:$0xff] }
  0xdf   :  { %v1022_v33 = vmax.f32 %v388_v28, %v878_v29 }
  0xe0   :  { %v2129_v30 = vmax.f32 %v1575_v27, %v1984_v26 }
  0xe2   :  { %v2197_v31 = vadd.f32 %v3528_v44, %v2129_v30 }
  0xe4   :  { %v2261_v32 = vmax.f32 %v2197_v31, 0.0 }
  0xe5   :  { %v1432_v34 = vpop.f32.mrf.mxu2  ;;  %v1986_v35 = vpop.f32.mrf.mxu3 }
  0xe6   :  { %2325 = vst.msk [vmem:[%s4226_s3 + $0x50] sm:$0xff] %vm255_vm0, %v2261_v32  ;;  %v1576_v38 = vmax.f32 %v1022_v33, %v1432_v34  ;;  %v391_v39 = vpop.f32.mrf.mxu0  ;;  %v881_v40 = vpop.f32.mrf.mxu1 }
  0xe7   :  { %v1023_v46 = vmax.f32 %v391_v39, %v881_v40  ;;  %v3242_v39 = vld [vmem:[%s4224_s0 + $0x88] sm:$0xff] }
  0xe8   :  { %v2130_v43 = vmax.f32 %v1576_v38, %v1986_v35  ;;  %v3274_v40 = vld [vmem:[%s4224_s0 + $0x188] sm:$0xff] }
  0xe9   :  { %2533 = vmatmul.msk.bf16.gmra.mxu0 %vm255_vm0, %v3239_v36  ;;  %2757 = vmatmul.msk.bf16.gmra.mxu1 %vm255_vm0, %v3271_v37 }
  0xea   :  { %v2198_v45 = vadd.f32 %v3528_v44, %v2130_v43  ;;  %2981 = vmatmul.msk.bf16.gmra.mxu2 %vm255_vm0, %v3303_v41  ;;  %3205 = vmatmul.msk.bf16.gmra.mxu3 %vm255_vm0, %v3335_v42 }
  0xec   :  { %v2262_v47 = vmax.f32 %v2198_v45, 0.0  ;;  %v3306_v45 = vld [vmem:[%s4224_s0 + $0x288] sm:$0xff] }
  0xed   :  { %v1435_v48 = vpop.f32.mrf.mxu2  ;;  %v1989_v49 = vpop.f32.mrf.mxu3 }
  0xee   :  { %2326 = vst.msk [vmem:[%s4226_s3 + $0x58] sm:$0xff] %vm255_vm0, %v2262_v47  ;;  %v1577_v50 = vmax.f32 %v1023_v46, %v1435_v48  ;;  %v393_v51 = vpop.f32.mrf.mxu0  ;;  %v883_v52 = vpop.f32.mrf.mxu1  ;;  %v3338_v46 = vld [vmem:[%s4224_s0 + $0x388] sm:$0xff] }
  0xef   :  { %v1024_v56 = vmax.f32 %v393_v51, %v883_v52 }
  0xf0   :  { %v2131_v53 = vmax.f32 %v1577_v50, %v1989_v49 }
  0xf2   :  { %v2199_v54 = vadd.f32 %v3528_v44, %v2131_v53 }
  0xf4   :  { %v2263_v55 = vmax.f32 %v2199_v54, 0.0 }
  0xf5   :  { %v1437_v57 = vpop.f32.mrf.mxu2  ;;  %v1991_v58 = vpop.f32.mrf.mxu3 }
  0xf6   :  { %2327 = vst.msk [vmem:[%s4226_s3 + $0x60] sm:$0xff] %vm255_vm0, %v2263_v55  ;;  %v1578_v61 = vmax.f32 %v1024_v56, %v1437_v57  ;;  %v396_v62 = vpop.f32.mrf.mxu0  ;;  %v886_v63 = vpop.f32.mrf.mxu1 }
  0xf7   :  { %v1025_v4 = vmax.f32 %v396_v62, %v886_v63  ;;  %v3243_v62 = vld [vmem:[%s4224_s0 + $0x90] sm:$0xff] }
  0xf8   :  { %v2132_v2 = vmax.f32 %v1578_v61, %v1991_v58  ;;  %v3275_v63 = vld [vmem:[%s4224_s0 + $0x190] sm:$0xff] }
  0xf9   :  { %2534 = vmatmul.msk.bf16.gmra.mxu0 %vm255_vm0, %v3240_v59  ;;  %2758 = vmatmul.msk.bf16.gmra.mxu1 %vm255_vm0, %v3272_v60 }
  0xfa   :  { %v2200_v3 = vadd.f32 %v3528_v44, %v2132_v2  ;;  %2982 = vmatmul.msk.bf16.gmra.mxu2 %vm255_vm0, %v3304_v0  ;;  %3206 = vmatmul.msk.bf16.gmra.mxu3 %vm255_vm0, %v3336_v1 }
  0xfc   :  { %v2264_v5 = vmax.f32 %v2200_v3, 0.0  ;;  %v3307_v3 = vld [vmem:[%s4224_s0 + $0x290] sm:$0xff] }
  0xfd   :  { %v1440_v6 = vpop.f32.mrf.mxu2  ;;  %v1994_v7 = vpop.f32.mrf.mxu3 }
  0xfe   :  { %2328 = vst.msk [vmem:[%s4226_s3 + $0x68] sm:$0xff] %vm255_vm0, %v2264_v5  ;;  %v1579_v8 = vmax.f32 %v1025_v4, %v1440_v6  ;;  %v398_v9 = vpop.f32.mrf.mxu0  ;;  %v888_v10 = vpop.f32.mrf.mxu1  ;;  %v3339_v4 = vld [vmem:[%s4224_s0 + $0x390] sm:$0xff] }
  0xff   :  { %v1026_v14 = vmax.f32 %v398_v9, %v888_v10 }
 0x100   :  { %v2133_v11 = vmax.f32 %v1579_v8, %v1994_v7 }
 0x102   :  { %v2201_v12 = vadd.f32 %v3528_v44, %v2133_v11 }
 0x104   :  { %v2265_v13 = vmax.f32 %v2201_v12, 0.0 }
 0x105   :  { %v1442_v15 = vpop.f32.mrf.mxu2  ;;  %v1996_v16 = vpop.f32.mrf.mxu3 }
 0x106   :  { %2329 = vst.msk [vmem:[%s4226_s3 + $0x70] sm:$0xff] %vm255_vm0, %v2265_v13  ;;  %v1580_v19 = vmax.f32 %v1026_v14, %v1442_v15  ;;  %v401_v20 = vpop.f32.mrf.mxu0  ;;  %v891_v21 = vpop.f32.mrf.mxu1 }
 0x107   :  { %v1027_v26 = vmax.f32 %v401_v20, %v891_v21  ;;  %v3244_v20 = vld [vmem:[%s4224_s0 + $0x98] sm:$0xff] }
 0x108   :  { %v2134_v24 = vmax.f32 %v1580_v19, %v1996_v16  ;;  %v3276_v21 = vld [vmem:[%s4224_s0 + $0x198] sm:$0xff] }
 0x109   :  { %2535 = vmatmul.msk.bf16.gmra.mxu0 %vm255_vm0, %v3241_v17  ;;  %2759 = vmatmul.msk.bf16.gmra.mxu1 %vm255_vm0, %v3273_v18 }
 0x10a   :  { %v2202_v25 = vadd.f32 %v3528_v44, %v2134_v24  ;;  %2983 = vmatmul.msk.bf16.gmra.mxu2 %vm255_vm0, %v3305_v22  ;;  %3207 = vmatmul.msk.bf16.gmra.mxu3 %vm255_vm0, %v3337_v23 }
 0x10c   :  { %v2266_v27 = vmax.f32 %v2202_v25, 0.0  ;;  %v3308_v25 = vld [vmem:[%s4224_s0 + $0x298] sm:$0xff] }
 0x10d   :  { %v1445_v28 = vpop.f32.mrf.mxu2  ;;  %v1999_v29 = vpop.f32.mrf.mxu3 }
 0x10e   :  { %2330 = vst.msk [vmem:[%s4226_s3 + $0x78] sm:$0xff] %vm255_vm0, %v2266_v27  ;;  %v1581_v30 = vmax.f32 %v1027_v26, %v1445_v28  ;;  %v403_v31 = vpop.f32.mrf.mxu0  ;;  %v893_v32 = vpop.f32.mrf.mxu1  ;;  %v3340_v26 = vld [vmem:[%s4224_s0 + $0x398] sm:$0xff] }
 0x10f   :  { %v1028_v36 = vmax.f32 %v403_v31, %v893_v32 }
 0x110   :  { %v2135_v33 = vmax.f32 %v1581_v30, %v1999_v29 }
 0x112   :  { %v2203_v34 = vadd.f32 %v3528_v44, %v2135_v33 }
 0x114   :  { %v2267_v35 = vmax.f32 %v2203_v34, 0.0 }
 0x115   :  { %v1447_v37 = vpop.f32.mrf.mxu2  ;;  %v2001_v38 = vpop.f32.mrf.mxu3 }
 0x116   :  { %2331 = vst.msk [vmem:[%s4226_s3 + $0x80] sm:$0xff] %vm255_vm0, %v2267_v35  ;;  %v1582_v41 = vmax.f32 %v1028_v36, %v1447_v37  ;;  %v406_v42 = vpop.f32.mrf.mxu0  ;;  %v896_v43 = vpop.f32.mrf.mxu1 }
 0x117   :  { %v1029_v49 = vmax.f32 %v406_v42, %v896_v43  ;;  %v3245_v42 = vld [vmem:[%s4224_s0 + $0xa0] sm:$0xff] }
 0x118   :  { %v2136_v47 = vmax.f32 %v1582_v41, %v2001_v38  ;;  %v3277_v43 = vld [vmem:[%s4224_s0 + $0x1a0] sm:$0xff] }
 0x119   :  { %2536 = vmatmul.msk.bf16.gmra.mxu0 %vm255_vm0, %v3242_v39  ;;  %2760 = vmatmul.msk.bf16.gmra.mxu1 %vm255_vm0, %v3274_v40 }
 0x11a   :  { %v2204_v48 = vadd.f32 %v3528_v44, %v2136_v47  ;;  %2984 = vmatmul.msk.bf16.gmra.mxu2 %vm255_vm0, %v3306_v45  ;;  %3208 = vmatmul.msk.bf16.gmra.mxu3 %vm255_vm0, %v3338_v46 }
 0x11c   :  { %v2268_v50 = vmax.f32 %v2204_v48, 0.0  ;;  %v3309_v48 = vld [vmem:[%s4224_s0 + $0x2a0] sm:$0xff] }
 0x11d   :  { %v1450_v51 = vpop.f32.mrf.mxu2  ;;  %v2004_v52 = vpop.f32.mrf.mxu3 }
 0x11e   :  { %2332 = vst.msk [vmem:[%s4226_s3 + $0x88] sm:$0xff] %vm255_vm0, %v2268_v50  ;;  %v1583_v53 = vmax.f32 %v1029_v49, %v1450_v51  ;;  %v408_v54 = vpop.f32.mrf.mxu0  ;;  %v898_v55 = vpop.f32.mrf.mxu1  ;;  %v3341_v49 = vld [vmem:[%s4224_s0 + $0x3a0] sm:$0xff] }
 0x11f   :  { %v1030_v59 = vmax.f32 %v408_v54, %v898_v55 }
 0x120   :  { %v2137_v56 = vmax.f32 %v1583_v53, %v2004_v52 }
 0x122   :  { %v2205_v57 = vadd.f32 %v3528_v44, %v2137_v56 }
 0x124   :  { %v2269_v58 = vmax.f32 %v2205_v57, 0.0 }
 0x125   :  { %v1452_v60 = vpop.f32.mrf.mxu2  ;;  %v2006_v61 = vpop.f32.mrf.mxu3 }
 0x126   :  { %2333 = vst.msk [vmem:[%s4226_s3 + $0x90] sm:$0xff] %vm255_vm0, %v2269_v58  ;;  %v1584_v0 = vmax.f32 %v1030_v59, %v1452_v60  ;;  %v411_v1 = vpop.f32.mrf.mxu0  ;;  %v901_v2 = vpop.f32.mrf.mxu1 }
 0x127   :  { %v1031_v7 = vmax.f32 %v411_v1, %v901_v2  ;;  %v3246_v1 = vld [vmem:[%s4224_s0 + $0xa8] sm:$0xff] }
 0x128   :  { %v2138_v5 = vmax.f32 %v1584_v0, %v2006_v61  ;;  %v3278_v2 = vld [vmem:[%s4224_s0 + $0x1a8] sm:$0xff] }
 0x129   :  { %2537 = vmatmul.msk.bf16.gmra.mxu0 %vm255_vm0, %v3243_v62  ;;  %2761 = vmatmul.msk.bf16.gmra.mxu1 %vm255_vm0, %v3275_v63 }
 0x12a   :  { %v2206_v6 = vadd.f32 %v3528_v44, %v2138_v5  ;;  %2985 = vmatmul.msk.bf16.gmra.mxu2 %vm255_vm0, %v3307_v3  ;;  %3209 = vmatmul.msk.bf16.gmra.mxu3 %vm255_vm0, %v3339_v4 }
 0x12c   :  { %v2270_v8 = vmax.f32 %v2206_v6, 0.0  ;;  %v3310_v6 = vld [vmem:[%s4224_s0 + $0x2a8] sm:$0xff] }
 0x12d   :  { %v1455_v9 = vpop.f32.mrf.mxu2  ;;  %v2009_v10 = vpop.f32.mrf.mxu3 }
 0x12e   :  { %2334 = vst.msk [vmem:[%s4226_s3 + $0x98] sm:$0xff] %vm255_vm0, %v2270_v8  ;;  %v1585_v11 = vmax.f32 %v1031_v7, %v1455_v9  ;;  %v413_v12 = vpop.f32.mrf.mxu0  ;;  %v903_v13 = vpop.f32.mrf.mxu1  ;;  %v3342_v7 = vld [vmem:[%s4224_s0 + $0x3a8] sm:$0xff] }
 0x12f   :  { %v1032_v17 = vmax.f32 %v413_v12, %v903_v13 }
 0x130   :  { %v2139_v14 = vmax.f32 %v1585_v11, %v2009_v10 }
 0x132   :  { %v2207_v15 = vadd.f32 %v3528_v44, %v2139_v14 }
 0x134   :  { %v2271_v16 = vmax.f32 %v2207_v15, 0.0 }
 0x135   :  { %v1457_v18 = vpop.f32.mrf.mxu2  ;;  %v2011_v19 = vpop.f32.mrf.mxu3 }
 0x136   :  { %2335 = vst.msk [vmem:[%s4226_s3 + $0xa0] sm:$0xff] %vm255_vm0, %v2271_v16  ;;  %v1586_v22 = vmax.f32 %v1032_v17, %v1457_v18  ;;  %v416_v23 = vpop.f32.mrf.mxu0  ;;  %v906_v24 = vpop.f32.mrf.mxu1 }
 0x137   :  { %v1033_v29 = vmax.f32 %v416_v23, %v906_v24  ;;  %v3247_v23 = vld [vmem:[%s4224_s0 + $0xb0] sm:$0xff] }
 0x138   :  { %v2140_v27 = vmax.f32 %v1586_v22, %v2011_v19  ;;  %v3279_v24 = vld [vmem:[%s4224_s0 + $0x1b0] sm:$0xff] }
 0x139   :  { %2538 = vmatmul.msk.bf16.gmra.mxu0 %vm255_vm0, %v3244_v20  ;;  %2762 = vmatmul.msk.bf16.gmra.mxu1 %vm255_vm0, %v3276_v21 }
 0x13a   :  { %v2208_v28 = vadd.f32 %v3528_v44, %v2140_v27  ;;  %2986 = vmatmul.msk.bf16.gmra.mxu2 %vm255_vm0, %v3308_v25  ;;  %3210 = vmatmul.msk.bf16.gmra.mxu3 %vm255_vm0, %v3340_v26 }
 0x13c   :  { %v2272_v30 = vmax.f32 %v2208_v28, 0.0  ;;  %v3311_v28 = vld [vmem:[%s4224_s0 + $0x2b0] sm:$0xff] }
 0x13d   :  { %v1460_v31 = vpop.f32.mrf.mxu2  ;;  %v2014_v32 = vpop.f32.mrf.mxu3 }
 0x13e   :  { %2336 = vst.msk [vmem:[%s4226_s3 + $0xa8] sm:$0xff] %vm255_vm0, %v2272_v30  ;;  %v1587_v33 = vmax.f32 %v1033_v29, %v1460_v31  ;;  %v418_v34 = vpop.f32.mrf.mxu0  ;;  %v908_v35 = vpop.f32.mrf.mxu1  ;;  %v3343_v29 = vld [vmem:[%s4224_s0 + $0x3b0] sm:$0xff] }
 0x13f   :  { %v1034_v39 = vmax.f32 %v418_v34, %v908_v35 }
 0x140   :  { %v2141_v36 = vmax.f32 %v1587_v33, %v2014_v32 }
 0x142   :  { %v2209_v37 = vadd.f32 %v3528_v44, %v2141_v36 }
 0x144   :  { %v2273_v38 = vmax.f32 %v2209_v37, 0.0 }
 0x145   :  { %v1462_v40 = vpop.f32.mrf.mxu2  ;;  %v2016_v41 = vpop.f32.mrf.mxu3 }
 0x146   :  { %2337 = vst.msk [vmem:[%s4226_s3 + $0xb0] sm:$0xff] %vm255_vm0, %v2273_v38  ;;  %v1588_v45 = vmax.f32 %v1034_v39, %v1462_v40  ;;  %v421_v46 = vpop.f32.mrf.mxu0  ;;  %v911_v47 = vpop.f32.mrf.mxu1 }
 0x147   :  { %v1035_v52 = vmax.f32 %v421_v46, %v911_v47  ;;  %v3248_v46 = vld [vmem:[%s4224_s0 + $0xb8] sm:$0xff] }
 0x148   :  { %v2142_v50 = vmax.f32 %v1588_v45, %v2016_v41  ;;  %v3280_v47 = vld [vmem:[%s4224_s0 + $0x1b8] sm:$0xff] }
 0x149   :  { %2539 = vmatmul.msk.bf16.gmra.mxu0 %vm255_vm0, %v3245_v42  ;;  %2763 = vmatmul.msk.bf16.gmra.mxu1 %vm255_vm0, %v3277_v43 }
 0x14a   :  { %v2210_v51 = vadd.f32 %v3528_v44, %v2142_v50  ;;  %2987 = vmatmul.msk.bf16.gmra.mxu2 %vm255_vm0, %v3309_v48  ;;  %3211 = vmatmul.msk.bf16.gmra.mxu3 %vm255_vm0, %v3341_v49 }
 0x14c   :  { %v2274_v53 = vmax.f32 %v2210_v51, 0.0  ;;  %v3312_v51 = vld [vmem:[%s4224_s0 + $0x2b8] sm:$0xff] }
 0x14d   :  { %v1465_v54 = vpop.f32.mrf.mxu2  ;;  %v2019_v55 = vpop.f32.mrf.mxu3 }
 0x14e   :  { %2338 = vst.msk [vmem:[%s4226_s3 + $0xb8] sm:$0xff] %vm255_vm0, %v2274_v53  ;;  %v1589_v56 = vmax.f32 %v1035_v52, %v1465_v54  ;;  %v423_v57 = vpop.f32.mrf.mxu0  ;;  %v913_v58 = vpop.f32.mrf.mxu1  ;;  %v3344_v52 = vld [vmem:[%s4224_s0 + $0x3b8] sm:$0xff] }
 0x14f   :  { %v1036_v62 = vmax.f32 %v423_v57, %v913_v58 }
 0x150   :  { %v2143_v59 = vmax.f32 %v1589_v56, %v2019_v55 }
 0x152   :  { %v2211_v60 = vadd.f32 %v3528_v44, %v2143_v59 }
 0x154   :  { %v2275_v61 = vmax.f32 %v2211_v60, 0.0 }
 0x155   :  { %v1467_v63 = vpop.f32.mrf.mxu2  ;;  %v2021_v0 = vpop.f32.mrf.mxu3 }
 0x156   :  { %2339 = vst.msk [vmem:[%s4226_s3 + $0xc0] sm:$0xff] %vm255_vm0, %v2275_v61  ;;  %v1590_v3 = vmax.f32 %v1036_v62, %v1467_v63  ;;  %v426_v4 = vpop.f32.mrf.mxu0  ;;  %v916_v5 = vpop.f32.mrf.mxu1 }
 0x157   :  { %v1037_v10 = vmax.f32 %v426_v4, %v916_v5  ;;  %v3249_v4 = vld [vmem:[%s4224_s0 + $0xc0] sm:$0xff] }
 0x158   :  { %v2144_v8 = vmax.f32 %v1590_v3, %v2021_v0  ;;  %v3281_v5 = vld [vmem:[%s4224_s0 + $0x1c0] sm:$0xff] }
 0x159   :  { %2540 = vmatmul.msk.bf16.gmra.mxu0 %vm255_vm0, %v3246_v1  ;;  %2764 = vmatmul.msk.bf16.gmra.mxu1 %vm255_vm0, %v3278_v2 }
 0x15a   :  { %v2212_v9 = vadd.f32 %v3528_v44, %v2144_v8  ;;  %2988 = vmatmul.msk.bf16.gmra.mxu2 %vm255_vm0, %v3310_v6  ;;  %3212 = vmatmul.msk.bf16.gmra.mxu3 %vm255_vm0, %v3342_v7 }
 0x15c   :  { %v2276_v11 = vmax.f32 %v2212_v9, 0.0  ;;  %v3313_v9 = vld [vmem:[%s4224_s0 + $0x2c0] sm:$0xff] }
 0x15d   :  { %v1470_v12 = vpop.f32.mrf.mxu2  ;;  %v2024_v13 = vpop.f32.mrf.mxu3 }
 0x15e   :  { %2340 = vst.msk [vmem:[%s4226_s3 + $0xc8] sm:$0xff] %vm255_vm0, %v2276_v11  ;;  %v1591_v14 = vmax.f32 %v1037_v10, %v1470_v12  ;;  %v428_v15 = vpop.f32.mrf.mxu0  ;;  %v918_v16 = vpop.f32.mrf.mxu1  ;;  %v3345_v10 = vld [vmem:[%s4224_s0 + $0x3c0] sm:$0xff] }
 0x15f   :  { %v1038_v20 = vmax.f32 %v428_v15, %v918_v16 }
 0x160   :  { %v2145_v17 = vmax.f32 %v1591_v14, %v2024_v13 }
 0x162   :  { %v2213_v18 = vadd.f32 %v3528_v44, %v2145_v17 }
 0x164   :  { %v2277_v19 = vmax.f32 %v2213_v18, 0.0 }
 0x165   :  { %v1472_v21 = vpop.f32.mrf.mxu2  ;;  %v2026_v22 = vpop.f32.mrf.mxu3 }
 0x166   :  { %2341 = vst.msk [vmem:[%s4226_s3 + $0xd0] sm:$0xff] %vm255_vm0, %v2277_v19  ;;  %v1592_v25 = vmax.f32 %v1038_v20, %v1472_v21  ;;  %v431_v26 = vpop.f32.mrf.mxu0  ;;  %v921_v27 = vpop.f32.mrf.mxu1 }
 0x167   :  { %v1039_v32 = vmax.f32 %v431_v26, %v921_v27  ;;  %v3250_v26 = vld [vmem:[%s4224_s0 + $0xc8] sm:$0xff] }
 0x168   :  { %v2146_v30 = vmax.f32 %v1592_v25, %v2026_v22  ;;  %v3282_v27 = vld [vmem:[%s4224_s0 + $0x1c8] sm:$0xff] }
 0x169   :  { %2541 = vmatmul.msk.bf16.gmra.mxu0 %vm255_vm0, %v3247_v23  ;;  %2765 = vmatmul.msk.bf16.gmra.mxu1 %vm255_vm0, %v3279_v24 }
 0x16a   :  { %v2214_v31 = vadd.f32 %v3528_v44, %v2146_v30  ;;  %2989 = vmatmul.msk.bf16.gmra.mxu2 %vm255_vm0, %v3311_v28  ;;  %3213 = vmatmul.msk.bf16.gmra.mxu3 %vm255_vm0, %v3343_v29 }
 0x16c   :  { %v2278_v33 = vmax.f32 %v2214_v31, 0.0  ;;  %v3314_v31 = vld [vmem:[%s4224_s0 + $0x2c8] sm:$0xff] }
 0x16d   :  { %v1475_v34 = vpop.f32.mrf.mxu2  ;;  %v2029_v35 = vpop.f32.mrf.mxu3 }
 0x16e   :  { %2342 = vst.msk [vmem:[%s4226_s3 + $0xd8] sm:$0xff] %vm255_vm0, %v2278_v33  ;;  %v1593_v36 = vmax.f32 %v1039_v32, %v1475_v34  ;;  %v433_v37 = vpop.f32.mrf.mxu0  ;;  %v923_v38 = vpop.f32.mrf.mxu1  ;;  %v3346_v32 = vld [vmem:[%s4224_s0 + $0x3c8] sm:$0xff] }
 0x16f   :  { %v1040_v42 = vmax.f32 %v433_v37, %v923_v38 }
 0x170   :  { %v2147_v39 = vmax.f32 %v1593_v36, %v2029_v35 }
 0x172   :  { %v2215_v40 = vadd.f32 %v3528_v44, %v2147_v39 }
 0x174   :  { %v2279_v41 = vmax.f32 %v2215_v40, 0.0 }
 0x175   :  { %v1477_v43 = vpop.f32.mrf.mxu2  ;;  %v2031_v45 = vpop.f32.mrf.mxu3 }
 0x176   :  { %2343 = vst.msk [vmem:[%s4226_s3 + $0xe0] sm:$0xff] %vm255_vm0, %v2279_v41  ;;  %v1594_v48 = vmax.f32 %v1040_v42, %v1477_v43  ;;  %v436_v49 = vpop.f32.mrf.mxu0  ;;  %v926_v50 = vpop.f32.mrf.mxu1 }
 0x177   :  { %v1041_v55 = vmax.f32 %v436_v49, %v926_v50  ;;  %v3251_v49 = vld [vmem:[%s4224_s0 + $0xd0] sm:$0xff] }
 0x178   :  { %v2148_v53 = vmax.f32 %v1594_v48, %v2031_v45  ;;  %v3283_v50 = vld [vmem:[%s4224_s0 + $0x1d0] sm:$0xff] }
 0x179   :  { %2542 = vmatmul.msk.bf16.gmra.mxu0 %vm255_vm0, %v3248_v46  ;;  %2766 = vmatmul.msk.bf16.gmra.mxu1 %vm255_vm0, %v3280_v47 }
 0x17a   :  { %v2216_v54 = vadd.f32 %v3528_v44, %v2148_v53  ;;  %2990 = vmatmul.msk.bf16.gmra.mxu2 %vm255_vm0, %v3312_v51  ;;  %3214 = vmatmul.msk.bf16.gmra.mxu3 %vm255_vm0, %v3344_v52 }
 0x17c   :  { %v2280_v56 = vmax.f32 %v2216_v54, 0.0  ;;  %v3315_v54 = vld [vmem:[%s4224_s0 + $0x2d0] sm:$0xff] }
 0x17d   :  { %v1480_v57 = vpop.f32.mrf.mxu2  ;;  %v2034_v58 = vpop.f32.mrf.mxu3 }
 0x17e   :  { %2344 = vst.msk [vmem:[%s4226_s3 + $0xe8] sm:$0xff] %vm255_vm0, %v2280_v56  ;;  %v1595_v59 = vmax.f32 %v1041_v55, %v1480_v57  ;;  %v438_v60 = vpop.f32.mrf.mxu0  ;;  %v928_v61 = vpop.f32.mrf.mxu1  ;;  %v3347_v55 = vld [vmem:[%s4224_s0 + $0x3d0] sm:$0xff] }
 0x17f   :  { %v1042_v1 = vmax.f32 %v438_v60, %v928_v61 }
 0x180   :  { %v2149_v62 = vmax.f32 %v1595_v59, %v2034_v58 }
 0x182   :  { %v2217_v63 = vadd.f32 %v3528_v44, %v2149_v62 }
 0x184   :  { %v2281_v0 = vmax.f32 %v2217_v63, 0.0 }
 0x185   :  { %v1482_v2 = vpop.f32.mrf.mxu2  ;;  %v2036_v3 = vpop.f32.mrf.mxu3 }
 0x186   :  { %2345 = vst.msk [vmem:[%s4226_s3 + $0xf0] sm:$0xff] %vm255_vm0, %v2281_v0  ;;  %v1596_v6 = vmax.f32 %v1042_v1, %v1482_v2  ;;  %v441_v7 = vpop.f32.mrf.mxu0  ;;  %v931_v8 = vpop.f32.mrf.mxu1 }
 0x187   :  { %v1043_v13 = vmax.f32 %v441_v7, %v931_v8  ;;  %v3252_v7 = vld [vmem:[%s4224_s0 + $0xd8] sm:$0xff] }
 0x188   :  { %v2150_v11 = vmax.f32 %v1596_v6, %v2036_v3  ;;  %v3284_v8 = vld [vmem:[%s4224_s0 + $0x1d8] sm:$0xff] }
 0x189   :  { %2543 = vmatmul.msk.bf16.gmra.mxu0 %vm255_vm0, %v3249_v4  ;;  %2767 = vmatmul.msk.bf16.gmra.mxu1 %vm255_vm0, %v3281_v5 }
 0x18a   :  { %v2218_v12 = vadd.f32 %v3528_v44, %v2150_v11  ;;  %2991 = vmatmul.msk.bf16.gmra.mxu2 %vm255_vm0, %v3313_v9  ;;  %3215 = vmatmul.msk.bf16.gmra.mxu3 %vm255_vm0, %v3345_v10  ;;  %v3316_v11 = vld [vmem:[%s4224_s0 + $0x2d8] sm:$0xff] }
 0x18c   :  { %v2282_v14 = vmax.f32 %v2218_v12, 0.0  ;;  %v3348_v12 = vld [vmem:[%s4224_s0 + $0x3d8] sm:$0xff] }
 0x18d   :  { %v1485_v15 = vpop.f32.mrf.mxu2  ;;  %v2039_v16 = vpop.f32.mrf.mxu3 }
 0x18e   :  { %2346 = vst.msk [vmem:[%s4226_s3 + $0xf8] sm:$0xff] %vm255_vm0, %v2282_v14  ;;  %v1597_v17 = vmax.f32 %v1043_v13, %v1485_v15  ;;  %v443_v18 = vpop.f32.mrf.mxu0  ;;  %v933_v19 = vpop.f32.mrf.mxu1  ;;  %v4020_v14 = vld [vmem:[%s4225_s2] ss:$0 sm:$0xff] }
 0x18f   :  { %v1044_v23 = vmax.f32 %v443_v18, %v933_v19 }
 0x190   :  { %v2151_v20 = vmax.f32 %v1597_v17, %v2039_v16 }
 0x192   :  { %v2219_v21 = vadd.f32 %v3528_v44, %v2151_v20 }
 0x194   :  { %v2283_v22 = vmax.f32 %v2219_v21, 0.0 }
 0x195   :  { %v1487_v24 = vpop.f32.mrf.mxu2  ;;  %v2041_v25 = vpop.f32.mrf.mxu3 }
 0x196   :  { %2347 = vst.msk [vmem:[%s4226_s3 + $0x100] sm:$0xff] %vm255_vm0, %v2283_v22  ;;  %v1598_v28 = vmax.f32 %v1044_v23, %v1487_v24  ;;  %v446_v29 = vpop.f32.mrf.mxu0  ;;  %v936_v30 = vpop.f32.mrf.mxu1 }
 0x197   :  { %v1045_v35 = vmax.f32 %v446_v29, %v936_v30  ;;  %v3253_v29 = vld [vmem:[%s4224_s0 + $0xe0] sm:$0xff] }
 0x198   :  { %v2152_v33 = vmax.f32 %v1598_v28, %v2041_v25  ;;  %v3285_v30 = vld [vmem:[%s4224_s0 + $0x1e0] sm:$0xff] }
 0x199   :  { %2544 = vmatmul.msk.bf16.gmra.mxu0 %vm255_vm0, %v3250_v26  ;;  %2768 = vmatmul.msk.bf16.gmra.mxu1 %vm255_vm0, %v3282_v27 }
 0x19a   :  { %v2220_v34 = vadd.f32 %v3528_v44, %v2152_v33  ;;  %2992 = vmatmul.msk.bf16.gmra.mxu2 %vm255_vm0, %v3314_v31  ;;  %3216 = vmatmul.msk.bf16.gmra.mxu3 %vm255_vm0, %v3346_v32 }
 0x19c   :  { %v2284_v36 = vmax.f32 %v2220_v34, 0.0  ;;  %v3317_v34 = vld [vmem:[%s4224_s0 + $0x2e0] sm:$0xff] }
 0x19d   :  { %v1490_v37 = vpop.f32.mrf.mxu2  ;;  %v2044_v38 = vpop.f32.mrf.mxu3 }
 0x19e   :  { %2348 = vst.msk [vmem:[%s4226_s3 + $0x108] sm:$0xff] %vm255_vm0, %v2284_v36  ;;  %v1599_v39 = vmax.f32 %v1045_v35, %v1490_v37  ;;  %v448_v40 = vpop.f32.mrf.mxu0  ;;  %v938_v41 = vpop.f32.mrf.mxu1  ;;  %v3349_v35 = vld [vmem:[%s4224_s0 + $0x3e0] sm:$0xff] }
 0x19f   :  { %v1046_v46 = vmax.f32 %v448_v40, %v938_v41 }
 0x1a0   :  { %v2153_v42 = vmax.f32 %v1599_v39, %v2044_v38 }
 0x1a2   :  { %v2221_v43 = vadd.f32 %v3528_v44, %v2153_v42 }
 0x1a4   :  { %v2285_v45 = vmax.f32 %v2221_v43, 0.0 }
 0x1a5   :  { %v1492_v47 = vpop.f32.mrf.mxu2  ;;  %v2046_v48 = vpop.f32.mrf.mxu3 }
 0x1a6   :  { %2349 = vst.msk [vmem:[%s4226_s3 + $0x110] sm:$0xff] %vm255_vm0, %v2285_v45  ;;  %v1600_v51 = vmax.f32 %v1046_v46, %v1492_v47  ;;  %v451_v52 = vpop.f32.mrf.mxu0  ;;  %v941_v53 = vpop.f32.mrf.mxu1 }
 0x1a7   :  { %v1047_v58 = vmax.f32 %v451_v52, %v941_v53  ;;  %v3254_v52 = vld [vmem:[%s4224_s0 + $0xe8] sm:$0xff] }
 0x1a8   :  { %v2154_v56 = vmax.f32 %v1600_v51, %v2046_v48  ;;  %v3286_v53 = vld [vmem:[%s4224_s0 + $0x1e8] sm:$0xff] }
 0x1a9   :  { %2545 = vmatmul.msk.bf16.gmra.mxu0 %vm255_vm0, %v3251_v49  ;;  %2769 = vmatmul.msk.bf16.gmra.mxu1 %vm255_vm0, %v3283_v50 }
 0x1aa   :  { %v2222_v57 = vadd.f32 %v3528_v44, %v2154_v56  ;;  %2993 = vmatmul.msk.bf16.gmra.mxu2 %vm255_vm0, %v3315_v54  ;;  %3217 = vmatmul.msk.bf16.gmra.mxu3 %vm255_vm0, %v3347_v55 }
 0x1ac   :  { %v2286_v59 = vmax.f32 %v2222_v57, 0.0  ;;  %v3318_v57 = vld [vmem:[%s4224_s0 + $0x2e8] sm:$0xff] }
 0x1ad   :  { %v1495_v60 = vpop.f32.mrf.mxu2  ;;  %v2049_v61 = vpop.f32.mrf.mxu3 }
 0x1ae   :  { %2350 = vst.msk [vmem:[%s4226_s3 + $0x118] sm:$0xff] %vm255_vm0, %v2286_v59  ;;  %v1601_v62 = vmax.f32 %v1047_v58, %v1495_v60  ;;  %v453_v63 = vpop.f32.mrf.mxu0  ;;  %v943_v0 = vpop.f32.mrf.mxu1  ;;  %v3350_v58 = vld [vmem:[%s4224_s0 + $0x3e8] sm:$0xff] }
 0x1af   :  { %v1048_v4 = vmax.f32 %v453_v63, %v943_v0 }
 0x1b0   :  { %v2155_v1 = vmax.f32 %v1601_v62, %v2049_v61 }
 0x1b2   :  { %v2223_v2 = vadd.f32 %v3528_v44, %v2155_v1 }
 0x1b4   :  { %v2287_v3 = vmax.f32 %v2223_v2, 0.0 }
 0x1b5   :  { %v1497_v5 = vpop.f32.mrf.mxu2  ;;  %v2051_v6 = vpop.f32.mrf.mxu3 }
 0x1b6   :  { %2351 = vst.msk [vmem:[%s4226_s3 + $0x120] sm:$0xff] %vm255_vm0, %v2287_v3  ;;  %v1602_v9 = vmax.f32 %v1048_v4, %v1497_v5  ;;  %v456_v10 = vpop.f32.mrf.mxu0  ;;  %v946_v44 = vpop.f32.mrf.mxu1 }
 0x1b7   :  { %v1049_v16 = vmax.f32 %v456_v10, %v946_v44  ;;  %v3255_v10 = vld [vmem:[%s4224_s0 + $0xf0] sm:$0xff] }
 0x1b8   :  { %v2156_v13 = vmax.f32 %v1602_v9, %v2051_v6  ;;  %v3287_v44 = vld [vmem:[%s4224_s0 + $0x1f0] sm:$0xff] }
 0x1b9   :  { %2546 = vmatmul.msk.bf16.gmra.mxu0 %vm255_vm0, %v3252_v7  ;;  %2770 = vmatmul.msk.bf16.gmra.mxu1 %vm255_vm0, %v3284_v8 }
 0x1ba   :  { %v2224_v15 = vadd.f32 %v4020_v14, %v2156_v13  ;;  %2994 = vmatmul.msk.bf16.gmra.mxu2 %vm255_vm0, %v3316_v11  ;;  %3218 = vmatmul.msk.bf16.gmra.mxu3 %vm255_vm0, %v3348_v12 }
 0x1bc   :  { %v2288_v17 = vmax.f32 %v2224_v15, 0.0  ;;  %v3319_v15 = vld [vmem:[%s4224_s0 + $0x2f0] sm:$0xff] }
 0x1bd   :  { %v1500_v18 = vpop.f32.mrf.mxu2  ;;  %v2054_v19 = vpop.f32.mrf.mxu3 }
 0x1be   :  { %2352 = vst.msk [vmem:[%s4226_s3 + $0x128] sm:$0xff] %vm255_vm0, %v2288_v17  ;;  %v1603_v20 = vmax.f32 %v1049_v16, %v1500_v18  ;;  %v458_v21 = vpop.f32.mrf.mxu0  ;;  %v948_v22 = vpop.f32.mrf.mxu1  ;;  %v3351_v16 = vld [vmem:[%s4224_s0 + $0x3f0] sm:$0xff] }
 0x1bf   :  { %v1050_v26 = vmax.f32 %v458_v21, %v948_v22 }
 0x1c0   :  { %v2157_v23 = vmax.f32 %v1603_v20, %v2054_v19 }
 0x1c2   :  { %v2225_v24 = vadd.f32 %v4020_v14, %v2157_v23 }
 0x1c4   :  { %v2289_v25 = vmax.f32 %v2225_v24, 0.0 }
 0x1c5   :  { %v1502_v27 = vpop.f32.mrf.mxu2  ;;  %v2056_v28 = vpop.f32.mrf.mxu3 }
 0x1c6   :  { %2353 = vst.msk [vmem:[%s4226_s3 + $0x130] sm:$0xff] %vm255_vm0, %v2289_v25  ;;  %v1604_v31 = vmax.f32 %v1050_v26, %v1502_v27  ;;  %v461_v32 = vpop.f32.mrf.mxu0  ;;  %v951_v33 = vpop.f32.mrf.mxu1 }
 0x1c7   :  { %v1051_v38 = vmax.f32 %v461_v32, %v951_v33  ;;  %v3256_v32 = vld [vmem:[%s4224_s0 + $0xf8] sm:$0xff] }
 0x1c8   :  { %v2158_v36 = vmax.f32 %v1604_v31, %v2056_v28  ;;  %v3288_v33 = vld [vmem:[%s4224_s0 + $0x1f8] sm:$0xff] }
 0x1c9   :  { %2547 = vmatmul.msk.bf16.gmra.mxu0 %vm255_vm0, %v3253_v29  ;;  %2771 = vmatmul.msk.bf16.gmra.mxu1 %vm255_vm0, %v3285_v30 }
 0x1ca   :  { %v2226_v37 = vadd.f32 %v4020_v14, %v2158_v36  ;;  %2995 = vmatmul.msk.bf16.gmra.mxu2 %vm255_vm0, %v3317_v34  ;;  %3219 = vmatmul.msk.bf16.gmra.mxu3 %vm255_vm0, %v3349_v35 }
 0x1cc   :  { %v2290_v39 = vmax.f32 %v2226_v37, 0.0  ;;  %v3320_v37 = vld [vmem:[%s4224_s0 + $0x2f8] sm:$0xff] }
 0x1cd   :  { %v1505_v40 = vpop.f32.mrf.mxu2  ;;  %v2059_v41 = vpop.f32.mrf.mxu3 }
 0x1ce   :  { %2354 = vst.msk [vmem:[%s4226_s3 + $0x138] sm:$0xff] %vm255_vm0, %v2290_v39  ;;  %v1605_v42 = vmax.f32 %v1051_v38, %v1505_v40  ;;  %v463_v43 = vpop.f32.mrf.mxu0  ;;  %v953_v45 = vpop.f32.mrf.mxu1  ;;  %v3352_v38 = vld [vmem:[%s4224_s0 + $0x3f8] sm:$0xff] }
 0x1cf   :  { %v1052_v49 = vmax.f32 %v463_v43, %v953_v45 }
 0x1d0   :  { %v2159_v46 = vmax.f32 %v1605_v42, %v2059_v41 }
 0x1d2   :  { %v2227_v47 = vadd.f32 %v4020_v14, %v2159_v46 }
 0x1d4   :  { %v2291_v48 = vmax.f32 %v2227_v47, 0.0 }
 0x1d5   :  { %v1507_v50 = vpop.f32.mrf.mxu2  ;;  %v2061_v51 = vpop.f32.mrf.mxu3 }
 0x1d6   :  { %2355 = vst.msk [vmem:[%s4226_s3 + $0x140] sm:$0xff] %vm255_vm0, %v2291_v48  ;;  %v1606_v54 = vmax.f32 %v1052_v49, %v1507_v50  ;;  %v466_v55 = vpop.f32.mrf.mxu0  ;;  %v956_v56 = vpop.f32.mrf.mxu1 }
 0x1d7   :  { %v1053_v61 = vmax.f32 %v466_v55, %v956_v56 }
 0x1d8   :  { %v2160_v59 = vmax.f32 %v1606_v54, %v2061_v51 }
 0x1d9   :  { %2548 = vmatmul.msk.bf16.gmra.mxu0 %vm255_vm0, %v3254_v52  ;;  %2772 = vmatmul.msk.bf16.gmra.mxu1 %vm255_vm0, %v3286_v53 }
 0x1da   :  { %v2228_v60 = vadd.f32 %v4020_v14, %v2160_v59  ;;  %2996 = vmatmul.msk.bf16.gmra.mxu2 %vm255_vm0, %v3318_v57  ;;  %3220 = vmatmul.msk.bf16.gmra.mxu3 %vm255_vm0, %v3350_v58 }
 0x1dc   :  { %v2292_v62 = vmax.f32 %v2228_v60, 0.0 }
 0x1dd   :  { %v1510_v63 = vpop.f32.mrf.mxu2  ;;  %v2064_v0 = vpop.f32.mrf.mxu3 }
 0x1de   :  { %2356 = vst.msk [vmem:[%s4226_s3 + $0x148] sm:$0xff] %vm255_vm0, %v2292_v62  ;;  %v1607_v1 = vmax.f32 %v1053_v61, %v1510_v63  ;;  %v468_v2 = vpop.f32.mrf.mxu0  ;;  %v958_v3 = vpop.f32.mrf.mxu1 }
 0x1df   :  { %v1054_v7 = vmax.f32 %v468_v2, %v958_v3 }
 0x1e0   :  { %v2161_v4 = vmax.f32 %v1607_v1, %v2064_v0 }
 0x1e2   :  { %v2229_v5 = vadd.f32 %v4020_v14, %v2161_v4 }
 0x1e4   :  { %v2293_v6 = vmax.f32 %v2229_v5, 0.0 }
 0x1e5   :  { %v1512_v8 = vpop.f32.mrf.mxu2  ;;  %v2066_v9 = vpop.f32.mrf.mxu3 }
 0x1e6   :  { %2357 = vst.msk [vmem:[%s4226_s3 + $0x150] sm:$0xff] %vm255_vm0, %v2293_v6  ;;  %v1608_v11 = vmax.f32 %v1054_v7, %v1512_v8  ;;  %v471_v12 = vpop.f32.mrf.mxu0  ;;  %v961_v13 = vpop.f32.mrf.mxu1 }
 0x1e7   :  { %v1055_v19 = vmax.f32 %v471_v12, %v961_v13 }
 0x1e8   :  { %v2162_v17 = vmax.f32 %v1608_v11, %v2066_v9 }
 0x1e9   :  { %2549 = vmatmul.msk.bf16.gmra.mxu0 %vm255_vm0, %v3255_v10  ;;  %2773 = vmatmul.msk.bf16.gmra.mxu1 %vm255_vm0, %v3287_v44 }
 0x1ea   :  { %v2230_v18 = vadd.f32 %v4020_v14, %v2162_v17  ;;  %2997 = vmatmul.msk.bf16.gmra.mxu2 %vm255_vm0, %v3319_v15  ;;  %3221 = vmatmul.msk.bf16.gmra.mxu3 %vm255_vm0, %v3351_v16 }
 0x1ec   :  { %v2294_v20 = vmax.f32 %v2230_v18, 0.0 }
 0x1ed   :  { %v1515_v21 = vpop.f32.mrf.mxu2  ;;  %v2069_v22 = vpop.f32.mrf.mxu3 }
 0x1ee   :  { %2358 = vst.msk [vmem:[%s4226_s3 + $0x158] sm:$0xff] %vm255_vm0, %v2294_v20  ;;  %v1609_v23 = vmax.f32 %v1055_v19, %v1515_v21  ;;  %v473_v24 = vpop.f32.mrf.mxu0  ;;  %v963_v25 = vpop.f32.mrf.mxu1 }
 0x1ef   :  { %v1056_v29 = vmax.f32 %v473_v24, %v963_v25 }
 0x1f0   :  { %v2163_v26 = vmax.f32 %v1609_v23, %v2069_v22 }
 0x1f2   :  { %v2231_v27 = vadd.f32 %v4020_v14, %v2163_v26 }
 0x1f4   :  { %v2295_v28 = vmax.f32 %v2231_v27, 0.0 }
 0x1f5   :  { %v1517_v30 = vpop.f32.mrf.mxu2  ;;  %v2071_v31 = vpop.f32.mrf.mxu3 }
 0x1f6   :  { %2359 = vst.msk [vmem:[%s4226_s3 + $0x160] sm:$0xff] %vm255_vm0, %v2295_v28  ;;  %v1610_v34 = vmax.f32 %v1056_v29, %v1517_v30  ;;  %v476_v35 = vpop.f32.mrf.mxu0  ;;  %v966_v36 = vpop.f32.mrf.mxu1 }
 0x1f7   :  { %v1057_v41 = vmax.f32 %v476_v35, %v966_v36 }
 0x1f8   :  { %v2164_v39 = vmax.f32 %v1610_v34, %v2071_v31 }
 0x1f9   :  { %2550 = vmatmul.msk.bf16.gmra.mxu0 %vm255_vm0, %v3256_v32  ;;  %2774 = vmatmul.msk.bf16.gmra.mxu1 %vm255_vm0, %v3288_v33 }
 0x1fa   :  { %v2232_v40 = vadd.f32 %v4020_v14, %v2164_v39  ;;  %2998 = vmatmul.msk.bf16.gmra.mxu2 %vm255_vm0, %v3320_v37  ;;  %3222 = vmatmul.msk.bf16.gmra.mxu3 %vm255_vm0, %v3352_v38 }
 0x1fc   :  { %v2296_v42 = vmax.f32 %v2232_v40, 0.0 }
 0x1fd   :  { %v1520_v43 = vpop.f32.mrf.mxu2  ;;  %v2074_v45 = vpop.f32.mrf.mxu3 }
 0x1fe   :  { %2360 = vst.msk [vmem:[%s4226_s3 + $0x168] sm:$0xff] %vm255_vm0, %v2296_v42  ;;  %v1611_v46 = vmax.f32 %v1057_v41, %v1520_v43  ;;  %v478_v47 = vpop.f32.mrf.mxu0  ;;  %v968_v48 = vpop.f32.mrf.mxu1 }
 0x1ff   :  { %v1058_v52 = vmax.f32 %v478_v47, %v968_v48 }
 0x200   :  { %v2165_v49 = vmax.f32 %v1611_v46, %v2074_v45 }
 0x202   :  { %v2233_v50 = vadd.f32 %v4020_v14, %v2165_v49 }
 0x204   :  { %v2297_v51 = vmax.f32 %v2233_v50, 0.0 }
 0x205   :  { %v1522_v53 = vpop.f32.mrf.mxu2  ;;  %v2076_v54 = vpop.f32.mrf.mxu3 }
 0x206   :  { %2361 = vst.msk [vmem:[%s4226_s3 + $0x170] sm:$0xff] %vm255_vm0, %v2297_v51  ;;  %v1612_v55 = vmax.f32 %v1058_v52, %v1522_v53  ;;  %v481_v56 = vpop.f32.mrf.mxu0  ;;  %v971_v57 = vpop.f32.mrf.mxu1 }
 0x207   :  { %v1059_v60 = vmax.f32 %v481_v56, %v971_v57 }
 0x208   :  { %v2166_v58 = vmax.f32 %v1612_v55, %v2076_v54 }
 0x20a   :  { %v2234_v59 = vadd.f32 %v4020_v14, %v2166_v58 }
 0x20c   :  { %v2298_v61 = vmax.f32 %v2234_v59, 0.0 }
 0x20d   :  { %v1525_v62 = vpop.f32.mrf.mxu2  ;;  %v2079_v63 = vpop.f32.mrf.mxu3 }
 0x20e   :  { %2362 = vst.msk [vmem:[%s4226_s3 + $0x178] sm:$0xff] %vm255_vm0, %v2298_v61  ;;  %v1613_v0 = vmax.f32 %v1059_v60, %v1525_v62  ;;  %v483_v1 = vpop.f32.mrf.mxu0  ;;  %v973_v2 = vpop.f32.mrf.mxu1 }
 0x20f   :  { %v1060_v6 = vmax.f32 %v483_v1, %v973_v2 }
 0x210   :  { %v2167_v3 = vmax.f32 %v1613_v0, %v2079_v63 }
 0x212   :  { %v2235_v4 = vadd.f32 %v4020_v14, %v2167_v3 }
 0x214   :  { %v2299_v5 = vmax.f32 %v2235_v4, 0.0 }
 0x215   :  { %v1527_v7 = vpop.f32.mrf.mxu2  ;;  %v2081_v8 = vpop.f32.mrf.mxu3 }
 0x216   :  { %2363 = vst.msk [vmem:[%s4226_s3 + $0x180] sm:$0xff] %vm255_vm0, %v2299_v5  ;;  %v1614_v9 = vmax.f32 %v1060_v6, %v1527_v7  ;;  %v486_v10 = vpop.f32.mrf.mxu0  ;;  %v976_v44 = vpop.f32.mrf.mxu1 }
 0x217   :  { %v1061_v13 = vmax.f32 %v486_v10, %v976_v44 }
 0x218   :  { %v2168_v11 = vmax.f32 %v1614_v9, %v2081_v8 }
 0x21a   :  { %v2236_v12 = vadd.f32 %v4020_v14, %v2168_v11 }
 0x21c   :  { %v2300_v15 = vmax.f32 %v2236_v12, 0.0 }
 0x21d   :  { %v1530_v16 = vpop.f32.mrf.mxu2  ;;  %v2084_v17 = vpop.f32.mrf.mxu3 }
 0x21e   :  { %2364 = vst.msk [vmem:[%s4226_s3 + $0x188] sm:$0xff] %vm255_vm0, %v2300_v15  ;;  %v1615_v18 = vmax.f32 %v1061_v13, %v1530_v16  ;;  %v488_v19 = vpop.f32.mrf.mxu0  ;;  %v978_v20 = vpop.f32.mrf.mxu1 }
 0x21f   :  { %v1062_v24 = vmax.f32 %v488_v19, %v978_v20 }
 0x220   :  { %v2169_v21 = vmax.f32 %v1615_v18, %v2084_v17 }
 0x222   :  { %v2237_v22 = vadd.f32 %v4020_v14, %v2169_v21 }
 0x224   :  { %v2301_v23 = vmax.f32 %v2237_v22, 0.0 }
 0x225   :  { %v1532_v25 = vpop.f32.mrf.mxu2  ;;  %v2086_v26 = vpop.f32.mrf.mxu3 }
 0x226   :  { %2365 = vst.msk [vmem:[%s4226_s3 + $0x190] sm:$0xff] %vm255_vm0, %v2301_v23  ;;  %v1616_v27 = vmax.f32 %v1062_v24, %v1532_v25  ;;  %v491_v28 = vpop.f32.mrf.mxu0  ;;  %v981_v29 = vpop.f32.mrf.mxu1 }
 0x227   :  { %v1063_v32 = vmax.f32 %v491_v28, %v981_v29 }
 0x228   :  { %v2170_v30 = vmax.f32 %v1616_v27, %v2086_v26 }
 0x22a   :  { %v2238_v31 = vadd.f32 %v4020_v14, %v2170_v30 }
 0x22c   :  { %v2302_v33 = vmax.f32 %v2238_v31, 0.0 }
 0x22d   :  { %v1535_v34 = vpop.f32.mrf.mxu2  ;;  %v2089_v35 = vpop.f32.mrf.mxu3 }
 0x22e   :  { %2366 = vst.msk [vmem:[%s4226_s3 + $0x198] sm:$0xff] %vm255_vm0, %v2302_v33  ;;  %v1617_v36 = vmax.f32 %v1063_v32, %v1535_v34  ;;  %v493_v37 = vpop.f32.mrf.mxu0  ;;  %v983_v38 = vpop.f32.mrf.mxu1 }
 0x22f   :  { %v1064_v42 = vmax.f32 %v493_v37, %v983_v38 }
 0x230   :  { %v2171_v39 = vmax.f32 %v1617_v36, %v2089_v35 }
 0x232   :  { %v2239_v40 = vadd.f32 %v4020_v14, %v2171_v39 }
 0x234   :  { %v2303_v41 = vmax.f32 %v2239_v40, 0.0 }
 0x235   :  { %v1537_v43 = vpop.f32.mrf.mxu2  ;;  %v2091_v45 = vpop.f32.mrf.mxu3 }
 0x236   :  { %2367 = vst.msk [vmem:[%s4226_s3 + $0x1a0] sm:$0xff] %vm255_vm0, %v2303_v41  ;;  %v1618_v46 = vmax.f32 %v1064_v42, %v1537_v43  ;;  %v496_v47 = vpop.f32.mrf.mxu0  ;;  %v986_v48 = vpop.f32.mrf.mxu1 }
 0x237   :  { %v1065_v51 = vmax.f32 %v496_v47, %v986_v48 }
 0x238   :  { %v2172_v49 = vmax.f32 %v1618_v46, %v2091_v45 }
 0x23a   :  { %v2240_v50 = vadd.f32 %v4020_v14, %v2172_v49 }
 0x23c   :  { %v2304_v52 = vmax.f32 %v2240_v50, 0.0 }
 0x23d   :  { %v1540_v53 = vpop.f32.mrf.mxu2  ;;  %v2094_v54 = vpop.f32.mrf.mxu3 }
 0x23e   :  { %2368 = vst.msk [vmem:[%s4226_s3 + $0x1a8] sm:$0xff] %vm255_vm0, %v2304_v52  ;;  %v1619_v55 = vmax.f32 %v1065_v51, %v1540_v53  ;;  %v498_v56 = vpop.f32.mrf.mxu0  ;;  %v988_v57 = vpop.f32.mrf.mxu1 }
 0x23f   :  { %v1066_v61 = vmax.f32 %v498_v56, %v988_v57 }
 0x240   :  { %v2173_v58 = vmax.f32 %v1619_v55, %v2094_v54 }
 0x242   :  { %v2241_v59 = vadd.f32 %v4020_v14, %v2173_v58 }
 0x244   :  { %v2305_v60 = vmax.f32 %v2241_v59, 0.0 }
 0x245   :  { %v1542_v62 = vpop.f32.mrf.mxu2  ;;  %v2096_v63 = vpop.f32.mrf.mxu3 }
 0x246   :  { %2369 = vst.msk [vmem:[%s4226_s3 + $0x1b0] sm:$0xff] %vm255_vm0, %v2305_v60  ;;  %v1620_v0 = vmax.f32 %v1066_v61, %v1542_v62  ;;  %v501_v1 = vpop.f32.mrf.mxu0  ;;  %v991_v2 = vpop.f32.mrf.mxu1 }
 0x247   :  { %v1067_v5 = vmax.f32 %v501_v1, %v991_v2 }
 0x248   :  { %v2174_v3 = vmax.f32 %v1620_v0, %v2096_v63 }
 0x24a   :  { %v2242_v4 = vadd.f32 %v4020_v14, %v2174_v3 }
 0x24c   :  { %v2306_v6 = vmax.f32 %v2242_v4, 0.0 }
 0x24d   :  { %v1545_v7 = vpop.f32.mrf.mxu2  ;;  %v2099_v8 = vpop.f32.mrf.mxu3 }
 0x24e   :  { %2370 = vst.msk [vmem:[%s4226_s3 + $0x1b8] sm:$0xff] %vm255_vm0, %v2306_v6  ;;  %v1621_v9 = vmax.f32 %v1067_v5, %v1545_v7  ;;  %v503_v10 = vpop.f32.mrf.mxu0  ;;  %v993_v44 = vpop.f32.mrf.mxu1 }
 0x24f   :  { %v1068_v15 = vmax.f32 %v503_v10, %v993_v44 }
 0x250   :  { %v2175_v11 = vmax.f32 %v1621_v9, %v2099_v8 }
 0x252   :  { %v2243_v12 = vadd.f32 %v4020_v14, %v2175_v11 }
 0x254   :  { %v2307_v13 = vmax.f32 %v2243_v12, 0.0 }
 0x255   :  { %v1547_v16 = vpop.f32.mrf.mxu2  ;;  %v2101_v17 = vpop.f32.mrf.mxu3 }
 0x256   :  { %2371 = vst.msk [vmem:[%s4226_s3 + $0x1c0] sm:$0xff] %vm255_vm0, %v2307_v13  ;;  %v1622_v18 = vmax.f32 %v1068_v15, %v1547_v16  ;;  %v506_v19 = vpop.f32.mrf.mxu0  ;;  %v996_v20 = vpop.f32.mrf.mxu1 }
 0x257   :  { %v1069_v23 = vmax.f32 %v506_v19, %v996_v20 }
 0x258   :  { %v2176_v21 = vmax.f32 %v1622_v18, %v2101_v17 }
 0x25a   :  { %v2244_v22 = vadd.f32 %v4020_v14, %v2176_v21 }
 0x25c   :  { %v2308_v24 = vmax.f32 %v2244_v22, 0.0 }
 0x25d   :  { %v1550_v25 = vpop.f32.mrf.mxu2  ;;  %v2104_v26 = vpop.f32.mrf.mxu3 }
 0x25e   :  { %2372 = vst.msk [vmem:[%s4226_s3 + $0x1c8] sm:$0xff] %vm255_vm0, %v2308_v24  ;;  %v1623_v27 = vmax.f32 %v1069_v23, %v1550_v25  ;;  %v508_v28 = vpop.f32.mrf.mxu0  ;;  %v998_v29 = vpop.f32.mrf.mxu1 }
 0x25f   :  { %v1070_v33 = vmax.f32 %v508_v28, %v998_v29 }
 0x260   :  { %v2177_v30 = vmax.f32 %v1623_v27, %v2104_v26 }
 0x262   :  { %v2245_v31 = vadd.f32 %v4020_v14, %v2177_v30 }
 0x264   :  { %v2309_v32 = vmax.f32 %v2245_v31, 0.0 }
 0x265   :  { %v1552_v34 = vpop.f32.mrf.mxu2  ;;  %v2106_v35 = vpop.f32.mrf.mxu3 }
 0x266   :  { %2373 = vst.msk [vmem:[%s4226_s3 + $0x1d0] sm:$0xff] %vm255_vm0, %v2309_v32  ;;  %v1624_v36 = vmax.f32 %v1070_v33, %v1552_v34  ;;  %v511_v37 = vpop.f32.mrf.mxu0  ;;  %v1001_v38 = vpop.f32.mrf.mxu1 }
 0x267   :  { %v1071_v41 = vmax.f32 %v511_v37, %v1001_v38 }
 0x268   :  { %v2178_v39 = vmax.f32 %v1624_v36, %v2106_v35 }
 0x26a   :  { %v2246_v40 = vadd.f32 %v4020_v14, %v2178_v39 }
 0x26c   :  { %v2310_v42 = vmax.f32 %v2246_v40, 0.0 }
 0x26d   :  { %v1555_v43 = vpop.f32.mrf.mxu2  ;;  %v2109_v45 = vpop.f32.mrf.mxu3 }
 0x26e   :  { %2374 = vst.msk [vmem:[%s4226_s3 + $0x1d8] sm:$0xff] %vm255_vm0, %v2310_v42  ;;  %v1625_v46 = vmax.f32 %v1071_v41, %v1555_v43  ;;  %v513_v47 = vpop.f32.mrf.mxu0  ;;  %v1003_v48 = vpop.f32.mrf.mxu1 }
 0x26f   :  { %v1072_v52 = vmax.f32 %v513_v47, %v1003_v48 }
 0x270   :  { %v2179_v49 = vmax.f32 %v1625_v46, %v2109_v45 }
 0x272   :  { %v2247_v50 = vadd.f32 %v4020_v14, %v2179_v49 }
 0x274   :  { %v2311_v51 = vmax.f32 %v2247_v50, 0.0 }
 0x275   :  { %v1557_v53 = vpop.f32.mrf.mxu2  ;;  %v2111_v54 = vpop.f32.mrf.mxu3 }
 0x276   :  { %2375 = vst.msk [vmem:[%s4226_s3 + $0x1e0] sm:$0xff] %vm255_vm0, %v2311_v51  ;;  %v1626_v55 = vmax.f32 %v1072_v52, %v1557_v53  ;;  %v516_v56 = vpop.f32.mrf.mxu0  ;;  %v1006_v57 = vpop.f32.mrf.mxu1 }
 0x277   :  { %v1073_v60 = vmax.f32 %v516_v56, %v1006_v57 }
 0x278   :  { %v2180_v58 = vmax.f32 %v1626_v55, %v2111_v54 }
 0x27a   :  { %v2248_v59 = vadd.f32 %v4020_v14, %v2180_v58 }
 0x27c   :  { %v2312_v61 = vmax.f32 %v2248_v59, 0.0 }
 0x27d   :  { %v1560_v62 = vpop.f32.mrf.mxu2  ;;  %v2114_v63 = vpop.f32.mrf.mxu3 }
 0x27e   :  { %2376 = vst.msk [vmem:[%s4226_s3 + $0x1e8] sm:$0xff] %vm255_vm0, %v2312_v61  ;;  %v1627_v0 = vmax.f32 %v1073_v60, %v1560_v62  ;;  %v518_v2 = vpop.f32.mrf.mxu0  ;;  %v1008_v3 = vpop.f32.mrf.mxu1 }
 0x27f   :  { %v1074_v6 = vmax.f32 %v518_v2, %v1008_v3 }
 0x280   :  { %v2181_v1 = vmax.f32 %v1627_v0, %v2114_v63 }
 0x282   :  { %v2249_v4 = vadd.f32 %v4020_v14, %v2181_v1 }
 0x284   :  { %v2313_v5 = vmax.f32 %v2249_v4, 0.0 }
 0x285   :  { %v1562_v7 = vpop.f32.mrf.mxu2  ;;  %v2116_v9 = vpop.f32.mrf.mxu3 }
 0x286   :  { %2377 = vst.msk [vmem:[%s4226_s3 + $0x1f0] sm:$0xff] %vm255_vm0, %v2313_v5  ;;  %v1628_v8 = vmax.f32 %v1074_v6, %v1562_v7 }
 0x288   :  { %v2182_v10 = vmax.f32 %v1628_v8, %v2116_v9 }
 0x28a   :  { %v2250_v44 = vadd.f32 %v4020_v14, %v2182_v10 }
 0x28c   :  { %v2314_v11 = vmax.f32 %v2250_v44, 0.0 }
 0x28e   :  { %2378 = vst.msk [vmem:[%s4226_s3 + $0x1f8] sm:$0xff] %vm255_vm0, %v2314_v11 }

// kernel: cnn_forward.4
= control target key start
LH: loop header
LB: loop body
LE: loop exit
PB: predicated region body
PF: predicated region fallthrough
CT: control target
= control target key end

     0   :  { %vm311_vm0 = vcmask 261120   ;;  %vm1539_vm1 = vcmask 523264   ;;  %s3374_s1 = inlined_call_operand.vmem [shape: bf16[288,64], index: 1, kind: input, shape index: {}]   ;;  %s3375_s0 = inlined_call_operand.vmem [shape: bf16[4,128,288], index: 0, kind: input, shape index: {}]   ;;  %s3376_s2 = inlined_call_operand.vmem [shape: f32[1,64], index: 2, kind: input, shape index: {}]   ;;  %s3377_s3 = inlined_call_operand.vmem [shape: f32[128,64], index: 3, kind: output, shape index: {}]  }
   0x1   :  { %v2282_v0 = vld [vmem:[%s3374_s1 + $0x38] sm:$0xff]  ;;  %v2292_v2 = vld [vmem:[%s3374_s1 + $0x88] sm:$0xff]  ;;  %v2299_v3 = vld [vmem:[%s3374_s1 + $0x30] sm:$0xff] }
   0x2   :  { %v2287_v1 = vld [vmem:[%s3374_s1 + $0x78] sm:$0xff]  ;;  %336 = vmatpush.bf16.msra.mxu0 %v2282_v0  ;;  %v2304_v4 = vld [vmem:[%s3374_s1 + $0x70] sm:$0xff]  ;;  %440 = vmatpush.bf16.msra.mxu2 %v2292_v2  ;;  %v2311_v5 = vld [vmem:[%s3374_s1 + $0x80] sm:$0xff] }
   0x3   :  { %385 = vmatpush.bf16.msra.mxu1 %v2287_v1  ;;  %660 = vmatpush.bf16.msra.mxu3 %v2282_v0  ;;  %v1570_v6 = vld [vmem:[%s3375_s0 + $0x8] sm:$0xf]  ;;  %v2164_v7 = vld [vmem:[%s3375_s0 + $0x10] sm:$0xf0]  ;;  %v2339_v11 = vld [vmem:[%s3374_s1 + $0x20] sm:$0xff] }
   0x4   :  { %v1571_v8 = vor.u32 %v2164_v7, %v1570_v6  ;;  %v2324_v9 = vld [vmem:[%s3374_s1 + $0x28] sm:$0xff]  ;;  %v2346_v12 = vld [vmem:[%s3374_s1 + $0x60] sm:$0xff]  ;;  %v2353_v13 = vld [vmem:[%s3374_s1 + $0x18] sm:$0xff] }
   0x5   :  { %v2331_v10 = vld [vmem:[%s3374_s1 + $0x68] sm:$0xff]  ;;  %v2360_v14 = vld [vmem:[%s3374_s1 + $0x58] sm:$0xff]  ;;  %v2367_v15 = vld [vmem:[%s3374_s1 + $0x10] sm:$0xff] }
   0x6   :  { %337 = vmatpush.bf16.msra.mxu0 %v2299_v3  ;;  %441 = vmatpush.bf16.msra.mxu2 %v2311_v5  ;;  %v2374_v16 = vld [vmem:[%s3374_s1 + $0x50] sm:$0xff]  ;;  %v1582_v17 = vld [vmem:[%s3375_s0 + $0x20] sm:$0xf]  ;;  %v2167_v18 = vld [vmem:[%s3375_s0 + $0x28] sm:$0xf0] }
   0x7   :  { %386 = vmatpush.bf16.msra.mxu1 %v2304_v4  ;;  %661 = vmatpush.bf16.msra.mxu3 %v2299_v3  ;;  %v1583_v19 = vor.u32 %v2167_v18, %v1582_v17  ;;  %v2387_v20 = vld [vmem:[%s3374_s1 + $0x8] sm:$0xff]  ;;  %v2400_v22 = vld [vmem:[%s3374_s1] sm:$0xff]  ;;  %v1564_v27 = vld [vmem:[%s3375_s0 + $0xc] sm:$0xf0] }
   0x8   :  { %v2394_v21 = vld [vmem:[%s3374_s1 + $0x48] sm:$0xff]  ;;  %v2405_v23 = vld [vmem:[%s3374_s1 + $0x40] sm:$0xff]  ;;  %v1594_v33 = vld [vmem:[%s3375_s0 + $0x38] sm:$0xf] }
   0x9   :  { %1728 = vmatmul.msk.bf16.vlgmr.msra.gmra.mxu2 %vm311_vm0, %v1571_v8  ;;  %v1562_v24 = vld [vmem:[%s3375_s0] sm:$0xf]  ;;  %v2163_v25 = vld [vmem:[%s3375_s0 + $0x8] sm:$0xf0]  ;;  %v2162_v26 = vld [vmem:[%s3375_s0 + $0x4] sm:$0xf] }
   0xa   :  { %709 = vmatpush.bf16.msrb.mxu2 %v2287_v1  ;;  %338 = vmatpush.bf16.msra.mxu0 %v2324_v9  ;;  %v1770_v28 = vld [vmem:[%s3375_s0 + $0xc0] sm:$0xf]  ;;  %v2187_v29 = vld [vmem:[%s3375_s0 + $0xc8] sm:$0xf0]  ;;  %v1563_v30 = vor.u32 %v2163_v25, %v1562_v24  ;;  %v1567_v31 = vor.u32 %v2162_v26, %v1564_v27  ;;  %v2170_v34 = vld [vmem:[%s3375_s0 + $0x40] sm:$0xf0] }
   0xb   :  { %387 = vmatpush.bf16.msra.mxu1 %v2331_v10  ;;  %662 = vmatpush.bf16.msra.mxu3 %v2324_v9  ;;  %v1771_v32 = vor.u32 %v2187_v29, %v1770_v28  ;;  %v1595_v35 = vor.u32 %v2170_v34, %v1594_v33  ;;  %v1574_v36 = vld [vmem:[%s3375_s0 + $0x18] sm:$0xf]  ;;  %v2166_v37 = vld [vmem:[%s3375_s0 + $0x20] sm:$0xf0]  ;;  %v2165_v38 = vld [vmem:[%s3375_s0 + $0x1c] sm:$0xf] }
   0xc   :  { %v1576_v39 = vld [vmem:[%s3375_s0 + $0x24] sm:$0xf0]  ;;  %v1782_v40 = vld [vmem:[%s3375_s0 + $0xd8] sm:$0xf]  ;;  %v2190_v41 = vld [vmem:[%s3375_s0 + $0xe0] sm:$0xf0]  ;;  %v1575_v42 = vor.u32 %v2166_v37, %v1574_v36 }
   0xd   :  { %v1579_v43 = vor.u32 %v2165_v38, %v1576_v39  ;;  %v1783_v44 = vor.u32 %v2190_v41, %v1782_v40  ;;  %v1606_v45 = vld [vmem:[%s3375_s0 + $0x50] sm:$0xf]  ;;  %v2173_v46 = vld [vmem:[%s3375_s0 + $0x58] sm:$0xf0]  ;;  %v2168_v50 = vld [vmem:[%s3375_s0 + $0x34] sm:$0xf] }
   0xe   :  { %710 = vmatpush.bf16.msrb.mxu2 %v2304_v4  ;;  %339 = vmatpush.bf16.msra.mxu0 %v2339_v11  ;;  %v1607_v47 = vor.u32 %v2173_v46, %v1606_v45  ;;  %v1586_v48 = vld [vmem:[%s3375_s0 + $0x30] sm:$0xf]  ;;  %v2169_v49 = vld [vmem:[%s3375_s0 + $0x38] sm:$0xf0]  ;;  %v1588_v51 = vld [vmem:[%s3375_s0 + $0x3c] sm:$0xf0] }
   0xf   :  { %388 = vmatpush.bf16.msra.mxu1 %v2346_v12  ;;  %663 = vmatpush.bf16.msra.mxu3 %v2339_v11  ;;  %v1794_v52 = vld [vmem:[%s3375_s0 + $0xf0] sm:$0xf]  ;;  %v2193_v53 = vld [vmem:[%s3375_s0 + $0xf8] sm:$0xf0]  ;;  %v1587_v54 = vor.u32 %v2169_v49, %v1586_v48  ;;  %v1591_v55 = vor.u32 %v2168_v50, %v1588_v51  ;;  %v1618_v57 = vld [vmem:[%s3375_s0 + $0x68] sm:$0xf] }
  0x10   :  { %v1795_v56 = vor.u32 %v2193_v53, %v1794_v52  ;;  %v2176_v58 = vld [vmem:[%s3375_s0 + $0x70] sm:$0xf0]  ;;  %v1598_v60 = vld [vmem:[%s3375_s0 + $0x48] sm:$0xf]  ;;  %v2171_v62 = vld [vmem:[%s3375_s0 + $0x4c] sm:$0xf] }
  0x11   :  { %v1619_v59 = vor.u32 %v2176_v58, %v1618_v57  ;;  %v2172_v61 = vld [vmem:[%s3375_s0 + $0x50] sm:$0xf0]  ;;  %v1600_v63 = vld [vmem:[%s3375_s0 + $0x54] sm:$0xf0]  ;;  %v2179_v6 = vld [vmem:[%s3375_s0 + $0x88] sm:$0xf0] }
  0x12   :  { %711 = vmatpush.bf16.msrb.mxu2 %v2331_v10  ;;  %340 = vmatpush.bf16.msra.mxu0 %v2353_v13  ;;  %v1610_v8 = vld [vmem:[%s3375_s0 + $0x60] sm:$0xf]  ;;  %v1642_v17 = vld [vmem:[%s3375_s0 + $0x98] sm:$0xf]  ;;  %v2182_v18 = vld [vmem:[%s3375_s0 + $0xa0] sm:$0xf0] }
  0x13   :  { %389 = vmatpush.bf16.msra.mxu1 %v2360_v14  ;;  %664 = vmatpush.bf16.msra.mxu3 %v2353_v13  ;;  %v1830_v24 = vld [vmem:[%s3375_s0 + $0x138] sm:$0xf]  ;;  %v2202_v25 = vld [vmem:[%s3375_s0 + $0x140] sm:$0xf0]  ;;  %v1654_v29 = vld [vmem:[%s3375_s0 + $0xb0] sm:$0xf] }
  0x14   :  { %v1831_v28 = vor.u32 %v2202_v25, %v1830_v24  ;;  %v2181_v33 = vld [vmem:[%s3375_s0 + $0x98] sm:$0xf0]  ;;  %v2180_v34 = vld [vmem:[%s3375_s0 + $0x94] sm:$0xf]  ;;  %v1842_v36 = vld [vmem:[%s3375_s0 + $0x150] sm:$0xf] }
  0x15   :  { %v2205_v37 = vld [vmem:[%s3375_s0 + $0x158] sm:$0xf0]  ;;  %v2186_v41 = vld [vmem:[%s3375_s0 + $0xc4] sm:$0xf]  ;;  %v2184_v45 = vld [vmem:[%s3375_s0 + $0xb0] sm:$0xf0] }
  0x16   :  { %712 = vmatpush.bf16.msrb.mxu2 %v2346_v12  ;;  %341 = vmatpush.bf16.msra.mxu0 %v2367_v15  ;;  %v1843_v40 = vor.u32 %v2205_v37, %v1842_v36  ;;  %v2183_v46 = vld [vmem:[%s3375_s0 + $0xac] sm:$0xf]  ;;  %v1854_v48 = vld [vmem:[%s3375_s0 + $0x168] sm:$0xf]  ;;  %v2208_v49 = vld [vmem:[%s3375_s0 + $0x170] sm:$0xf0] }
  0x17   :  { %390 = vmatpush.bf16.msra.mxu1 %v2374_v16  ;;  %665 = vmatpush.bf16.msra.mxu3 %v2367_v15  ;;  %v1855_v53 = vor.u32 %v2208_v49, %v1854_v48  ;;  %v1778_v58 = vld [vmem:[%s3375_s0 + $0xc8] sm:$0xf] }
  0x19   :  { %1729 = vmatmul.msk.bf16.gmra.mxu2 %vm311_vm0, %v1583_v19  ;;  %v1643_v19 = vor.u32 %v2182_v18, %v1642_v17  ;;  %v1790_v17 = vld [vmem:[%s3375_s0 + $0xe0] sm:$0xf]  ;;  %v2191_v18 = vld [vmem:[%s3375_s0 + $0xe8] sm:$0xf0] }
  0x1a   :  { %713 = vmatpush.bf16.msrb.mxu2 %v2360_v14  ;;  %342 = vmatpush.bf16.msra.mxu0 %v2387_v20  ;;  %v1791_v25 = vor.u32 %v2191_v18, %v1790_v17 }
  0x1b   :  { %391 = vmatpush.bf16.msra.mxu1 %v2394_v21  ;;  %666 = vmatpush.bf16.msra.mxu3 %v2387_v20 }
  0x1e   :  { %714 = vmatpush.bf16.msrb.mxu2 %v2374_v16  ;;  %343 = vmatpush.bf16.msra.mxu0 %v2400_v22 }
  0x1f   :  { %392 = vmatpush.bf16.msra.mxu1 %v2405_v23  ;;  %667 = vmatpush.bf16.msra.mxu3 %v2400_v22 }
  0x21   :  { %344 = vmatmul.bf16.vlgmr.msra.gmra.mxu0 %v1563_v30  ;;  %v2185_v30 = vld [vmem:[%s3375_s0 + $0xb8] sm:$0xf0] }
  0x22   :  { %764 = vmatpush.bf16.msrb.mxu0 %v2292_v2  ;;  %393 = vmatmul.bf16.vlgmr.msra.gmra.mxu1 %v1567_v31  ;;  %v1655_v31 = vor.u32 %v2185_v30, %v1654_v29 }
  0x23   :  { %1049 = vmatpush.bf16.msrb.mxu3 %v2287_v1  ;;  %1000 = vmatpush.bf16.msrb.mxu1 %v2282_v0 }
  0x24   :  { %668 = vmatmul.bf16.vlgmr.msra.gmra.mxu3 %v1771_v32  ;;  %715 = vmatpush.bf16.msrb.mxu2 %v2394_v21  ;;  %v1634_v32 = vld [vmem:[%s3375_s0 + $0x90] sm:$0xf] }
  0x25   :  { %v1635_v38 = vor.u32 %v2181_v33, %v1634_v32  ;;  %v2195_v32 = vld [vmem:[%s3375_s0 + $0x10c] sm:$0xf]  ;;  %v1808_v33 = vld [vmem:[%s3375_s0 + $0x114] sm:$0xf0] }
  0x26   :  { %765 = vmatpush.bf16.msrb.mxu0 %v2311_v5  ;;  %v1811_v37 = vor.u32 %v2195_v32, %v1808_v33  ;;  %v1954_v32 = vld [vmem:[%s3375_s0 + $0x1e0] sm:$0xf]  ;;  %v2223_v33 = vld [vmem:[%s3375_s0 + $0x1e8] sm:$0xf0] }
  0x27   :  { %1050 = vmatpush.bf16.msrb.mxu3 %v2304_v4  ;;  %1001 = vmatpush.bf16.msrb.mxu1 %v2299_v3 }
  0x28   :  { %716 = vmatpush.bf16.msrb.mxu2 %v2405_v23 }
  0x29   :  { %1730 = vmatmul.msk.bf16.gmra.mxu2 %vm311_vm0, %v1595_v35  ;;  %v1636_v35 = vld [vmem:[%s3375_s0 + $0x9c] sm:$0xf0] }
  0x2a   :  { %1340 = vmatpush.bf16.msra.mxu0 %v2282_v0  ;;  %v1806_v0 = vld [vmem:[%s3375_s0 + $0x108] sm:$0xf]  ;;  %v1639_v39 = vor.u32 %v2180_v34, %v1636_v35 }
  0x2b   :  { %1051 = vmatpush.bf16.msrb.mxu3 %v2331_v10  ;;  %1002 = vmatpush.bf16.msrb.mxu1 %v2324_v9 }
  0x2c   :  { %1104 = vmatpush.bf16.msra.mxu2 %v2292_v2 }
  0x2e   :  { %1341 = vmatpush.bf16.msra.mxu0 %v2299_v3  ;;  %v1603_v3 = vor.u32 %v2171_v62, %v1600_v63  ;;  %v2210_v62 = vld [vmem:[%s3375_s0 + $0x184] sm:$0xf]  ;;  %v1908_v63 = vld [vmem:[%s3375_s0 + $0x18c] sm:$0xf0] }
  0x2f   :  { %1052 = vmatpush.bf16.msrb.mxu3 %v2346_v12  ;;  %1003 = vmatpush.bf16.msrb.mxu1 %v2339_v11 }
  0x30   :  { %1105 = vmatpush.bf16.msra.mxu2 %v2311_v5 }
  0x31   :  { %349 = vmatmul.bf16.gmra.mxu0 %v1575_v42  ;;  %v1772_v42 = vld [vmem:[%s3375_s0 + $0xcc] sm:$0xf0] }
  0x32   :  { %1342 = vmatpush.bf16.msra.mxu0 %v2324_v9  ;;  %398 = vmatmul.bf16.gmra.mxu1 %v1579_v43  ;;  %v2175_v9 = vld [vmem:[%s3375_s0 + $0x68] sm:$0xf0]  ;;  %v1775_v43 = vor.u32 %v2186_v41, %v1772_v42  ;;  %v1802_v41 = vld [vmem:[%s3375_s0 + $0xf8] sm:$0xf]  ;;  %v2194_v42 = vld [vmem:[%s3375_s0 + $0x100] sm:$0xf0] }
  0x33   :  { %1053 = vmatpush.bf16.msrb.mxu3 %v2360_v14  ;;  %1004 = vmatpush.bf16.msrb.mxu1 %v2353_v13  ;;  %v1803_v49 = vor.u32 %v2194_v42, %v1802_v41  ;;  %v1955_v42 = vor.u32 %v2223_v33, %v1954_v32  ;;  %v2229_v32 = vld [vmem:[%s3375_s0 + $0x218] sm:$0xf0]  ;;  %v2228_v33 = vld [vmem:[%s3375_s0 + $0x214] sm:$0xf] }
  0x34   :  { %673 = vmatmul.bf16.gmra.mxu3 %v1783_v44  ;;  %v1646_v44 = vld [vmem:[%s3375_s0 + $0xa8] sm:$0xf] }
  0x35   :  { %v1647_v51 = vor.u32 %v2184_v45, %v1646_v44  ;;  %v2217_v44 = vld [vmem:[%s3375_s0 + $0x1b8] sm:$0xf0]  ;;  %v2216_v45 = vld [vmem:[%s3375_s0 + $0x1b4] sm:$0xf] }
  0x36   :  { %1343 = vmatpush.bf16.msra.mxu0 %v2339_v11  ;;  %v1612_v11 = vld [vmem:[%s3375_s0 + $0x6c] sm:$0xf0] }
  0x37   :  { %1054 = vmatpush.bf16.msrb.mxu3 %v2374_v16  ;;  %1005 = vmatpush.bf16.msrb.mxu1 %v2367_v15 }
  0x39   :  { %1731 = vmatmul.msk.bf16.gmra.mxu2 %vm311_vm0, %v1607_v47  ;;  %v1648_v47 = vld [vmem:[%s3375_s0 + $0xb4] sm:$0xf0] }
  0x3a   :  { %1344 = vmatpush.bf16.msra.mxu0 %v2353_v13  ;;  %v2199_v13 = vld [vmem:[%s3375_s0 + $0x128] sm:$0xf0]  ;;  %v1651_v52 = vor.u32 %v2183_v46, %v1648_v47  ;;  %v1932_v46 = vld [vmem:[%s3375_s0 + $0x1bc] sm:$0xf0] }
  0x3b   :  { %1055 = vmatpush.bf16.msrb.mxu3 %v2394_v21  ;;  %1006 = vmatpush.bf16.msrb.mxu1 %v2387_v20 }
  0x3e   :  { %1345 = vmatpush.bf16.msra.mxu0 %v2367_v15 }
  0x3f   :  { %1056 = vmatpush.bf16.msrb.mxu3 %v2405_v23  ;;  %1007 = vmatpush.bf16.msrb.mxu1 %v2400_v22 }
  0x41   :  { %354 = vmatmul.bf16.gmra.mxu0 %v1587_v54  ;;  %v2189_v54 = vld [vmem:[%s3375_s0 + $0xdc] sm:$0xf] }
  0x42   :  { %1346 = vmatpush.bf16.msra.mxu0 %v2387_v20  ;;  %403 = vmatmul.bf16.gmra.mxu1 %v1591_v55  ;;  %v1622_v20 = vld [vmem:[%s3375_s0 + $0x78] sm:$0xf]  ;;  %v1784_v55 = vld [vmem:[%s3375_s0 + $0xe4] sm:$0xf0] }
  0x43   :  { %1444 = vmatpush.bf16.msra.mxu3 %v2292_v2  ;;  %1389 = vmatpush.bf16.msra.mxu1 %v2287_v1  ;;  %v2196_v1 = vld [vmem:[%s3375_s0 + $0x110] sm:$0xf0]  ;;  %v1599_v2 = vor.u32 %v2172_v61, %v1598_v60  ;;  %v1787_v57 = vor.u32 %v2189_v54, %v1784_v55  ;;  %v1906_v60 = vld [vmem:[%s3375_s0 + $0x180] sm:$0xf]  ;;  %v2211_v61 = vld [vmem:[%s3375_s0 + $0x188] sm:$0xf0] }
  0x44   :  { %678 = vmatmul.bf16.gmra.mxu3 %v1795_v56 }
  0x46   :  { %1347 = vmatpush.bf16.msra.mxu0 %v2400_v22  ;;  %v2177_v22 = vld [vmem:[%s3375_s0 + $0x7c] sm:$0xf] }
  0x47   :  { %1445 = vmatpush.bf16.msra.mxu3 %v2311_v5  ;;  %1390 = vmatpush.bf16.msra.mxu1 %v2304_v4  ;;  %v1807_v4 = vor.u32 %v2196_v1, %v1806_v0  ;;  %v1630_v5 = vld [vmem:[%s3375_s0 + $0x80] sm:$0xf] }
  0x48   :  { %v1631_v7 = vor.u32 %v2179_v6, %v1630_v5 }
  0x49   :  { %1732 = vmatmul.msk.bf16.gmra.mxu2 %vm311_vm0, %v1619_v59  ;;  %v2188_v59 = vld [vmem:[%s3375_s0 + $0xd0] sm:$0xf0] }
  0x4a   :  { %v1779_v1 = vor.u32 %v2188_v59, %v1778_v58 }
  0x4b   :  { %1391 = vmatpush.bf16.msra.mxu1 %v2331_v10  ;;  %v2174_v10 = vld [vmem:[%s3375_s0 + $0x64] sm:$0xf] }
  0x4c   :  { %v1615_v15 = vor.u32 %v2174_v10, %v1612_v11 }
  0x4f   :  { %1392 = vmatpush.bf16.msra.mxu1 %v2346_v12  ;;  %v1818_v12 = vld [vmem:[%s3375_s0 + $0x120] sm:$0xf] }
  0x51   :  { %359 = vmatmul.bf16.gmra.mxu0 %v1599_v2 }
  0x52   :  { %408 = vmatmul.bf16.gmra.mxu1 %v1603_v3  ;;  %v1907_v3 = vor.u32 %v2211_v61, %v1906_v60 }
  0x53   :  { %1393 = vmatpush.bf16.msra.mxu1 %v2360_v14  ;;  %v1611_v14 = vor.u32 %v2175_v9, %v1610_v8  ;;  %v2192_v8 = vld [vmem:[%s3375_s0 + $0xf4] sm:$0xf]  ;;  %v1796_v9 = vld [vmem:[%s3375_s0 + $0xfc] sm:$0xf0] }
  0x54   :  { %683 = vmatmul.bf16.gmra.mxu3 %v1807_v4  ;;  %v1911_v4 = vor.u32 %v2210_v62, %v1908_v63 }
  0x57   :  { %1394 = vmatpush.bf16.msra.mxu1 %v2374_v16  ;;  %v1819_v16 = vor.u32 %v2199_v13, %v1818_v12  ;;  %v1799_v13 = vor.u32 %v2192_v8, %v1796_v9 }
  0x59   :  { %1733 = vmatmul.msk.bf16.gmra.mxu2 %vm311_vm0, %v1631_v7 }
  0x5b   :  { %1395 = vmatpush.bf16.msra.mxu1 %v2394_v21  ;;  %v2178_v21 = vld [vmem:[%s3375_s0 + $0x80] sm:$0xf0] }
  0x5c   :  { %v1623_v26 = vor.u32 %v2178_v21, %v1622_v20  ;;  %v2214_v20 = vld [vmem:[%s3375_s0 + $0x1a0] sm:$0xf0]  ;;  %v2213_v21 = vld [vmem:[%s3375_s0 + $0x19c] sm:$0xf] }
  0x5f   :  { %1396 = vmatpush.bf16.msra.mxu1 %v2405_v23  ;;  %v1624_v23 = vld [vmem:[%s3375_s0 + $0x84] sm:$0xf0] }
  0x60   :  { %v1627_v27 = vor.u32 %v2177_v22, %v1624_v23  ;;  %v1920_v22 = vld [vmem:[%s3375_s0 + $0x1a4] sm:$0xf0] }
  0x61   :  { %364 = vmatmul.bf16.gmra.mxu0 %v1611_v14 }
  0x62   :  { %413 = vmatmul.bf16.gmra.mxu1 %v1615_v15 }
  0x64   :  { %688 = vmatmul.bf16.gmra.mxu3 %v1819_v16 }
  0x69   :  { %1734 = vmatmul.msk.bf16.gmra.mxu2 %vm311_vm0, %v1643_v19  ;;  %v1918_v19 = vld [vmem:[%s3375_s0 + $0x198] sm:$0xf] }
  0x71   :  { %369 = vmatmul.bf16.gmra.mxu0 %v1623_v26 }
  0x72   :  { %418 = vmatmul.bf16.gmra.mxu1 %v1627_v27  ;;  %v1919_v27 = vor.u32 %v2214_v20, %v1918_v19  ;;  %v2201_v19 = vld [vmem:[%s3375_s0 + $0x13c] sm:$0xf]  ;;  %v1832_v20 = vld [vmem:[%s3375_s0 + $0x144] sm:$0xf0] }
  0x74   :  { %693 = vmatmul.bf16.gmra.mxu3 %v1831_v28  ;;  %v1923_v28 = vor.u32 %v2213_v21, %v1920_v22 }
  0x79   :  { %1735 = vmatmul.msk.bf16.gmra.mxu2 %vm311_vm0, %v1655_v31 }
  0x81   :  { %374 = vmatmul.bf16.gmra.mxu0 %v1635_v38 }
  0x82   :  { %423 = vmatmul.bf16.gmra.mxu1 %v1639_v39 }
  0x84   :  { %698 = vmatmul.bf16.gmra.mxu3 %v1843_v40 }
  0x89   :  { %717 = vmatmul.bf16.vlgmr.msrb.gmra.mxu2 %v1775_v43  ;;  %v1930_v43 = vld [vmem:[%s3375_s0 + $0x1b0] sm:$0xf] }
  0x8c   :  { %v443_v50 = vpop.f32.mrf.mxu2 }
  0x91   :  { %379 = vmatmul.bf16.gmra.mxu0 %v1647_v51  ;;  %v1931_v51 = vor.u32 %v2217_v44, %v1930_v43 }
  0x92   :  { %428 = vmatmul.bf16.gmra.mxu1 %v1651_v52  ;;  %v1935_v52 = vor.u32 %v2216_v45, %v1932_v46 }
  0x94   :  { %703 = vmatmul.bf16.gmra.mxu3 %v1855_v53  ;;  %v445_v56 = vpop.f32.mrf.mxu2 }
  0x99   :  { %722 = vmatmul.bf16.gmra.mxu2 %v1787_v57  ;;  %v1820_v57 = vld [vmem:[%s3375_s0 + $0x12c] sm:$0xf0] }
  0x9c   :  { %v448_v0 = vpop.f32.mrf.mxu2 }
  0x9e   :  { %v345_v2 = vpop.f32.mrf.mxu0 }
  0x9f   :  { %v394_v5 = vpop.f32.mrf.mxu1 }
  0xa0   :  { %v395_v6 = vadd.f32 %v394_v5, %v345_v2  ;;  %v2197_v2 = vld [vmem:[%s3375_s0 + $0x118] sm:$0xf0]  ;;  %v2219_v5 = vld [vmem:[%s3375_s0 + $0x1cc] sm:$0xf] }
  0xa1   :  { %1864 = vmatmul.msk.bf16.vlgmr.msrb.gmra.mxu0 %vm311_vm0, %v1779_v1  ;;  %v1814_v1 = vld [vmem:[%s3375_s0 + $0x110] sm:$0xf] }
  0xa2   :  { %v2672_v7 = vadd.f32 %v443_v50, %v395_v6  ;;  %1008 = vmatmul.bf16.vlgmr.msrb.gmra.mxu1 %v1907_v3  ;;  %v1942_v3 = vld [vmem:[%s3375_s0 + $0x1c8] sm:$0xf]  ;;  %v1944_v6 = vld [vmem:[%s3375_s0 + $0x1d4] sm:$0xf0] }
  0xa4   :  { %1057 = vmatmul.bf16.vlgmr.msrb.gmra.mxu3 %v1911_v4  ;;  %v450_v10 = vpop.f32.mrf.mxu2  ;;  %v2220_v4 = vld [vmem:[%s3375_s0 + $0x1d0] sm:$0xf0] }
  0xa6   :  { %v347_v12 = vpop.f32.mrf.mxu0 }
  0xa7   :  { %v2680_v11 = vpop.f32.mrf.mxu3  ;;  %v396_v14 = vpop.f32.mrf.mxu1 }
  0xa8   :  { %v397_v15 = vadd.f32 %v396_v14, %v347_v12  ;;  %v1947_v14 = vor.u32 %v2219_v5, %v1944_v6 }
  0xa9   :  { %727 = vmatmul.bf16.gmra.mxu2 %v1799_v13  ;;  %v1943_v13 = vor.u32 %v2220_v4, %v1942_v3 }
  0xaa   :  { %v2682_v16 = vadd.f32 %v445_v56, %v397_v15  ;;  %v2198_v56 = vld [vmem:[%s3375_s0 + $0x124] sm:$0xf] }
  0xab   :  { %v1823_v61 = vor.u32 %v2198_v56, %v1820_v57 }
  0xac   :  { %v453_v23 = vpop.f32.mrf.mxu2 }
  0xae   :  { %v350_v26 = vpop.f32.mrf.mxu0 }
  0xaf   :  { %v2702_v24 = vpop.f32.mrf.mxu3  ;;  %v399_v29 = vpop.f32.mrf.mxu1 }
  0xb0   :  { %v400_v30 = vadd.f32 %v399_v29, %v350_v26  ;;  %v1826_v29 = vld [vmem:[%s3375_s0 + $0x128] sm:$0xf] }
  0xb1   :  { %1865 = vmatmul.msk.bf16.gmra.mxu0 %vm311_vm0, %v1791_v25  ;;  %v1835_v25 = vor.u32 %v2201_v19, %v1832_v20 }
  0xb2   :  { %v2705_v31 = vadd.f32 %v448_v0, %v400_v30  ;;  %1013 = vmatmul.bf16.gmra.mxu1 %v1919_v27  ;;  %v2200_v30 = vld [vmem:[%s3375_s0 + $0x130] sm:$0xf0] }
  0xb4   :  { %1062 = vmatmul.bf16.gmra.mxu3 %v1923_v28  ;;  %v455_v34 = vpop.f32.mrf.mxu2 }
  0xb6   :  { %v352_v36 = vpop.f32.mrf.mxu0 }
  0xb7   :  { %v2713_v35 = vpop.f32.mrf.mxu3  ;;  %v401_v38 = vpop.f32.mrf.mxu1 }
  0xb8   :  { %v402_v39 = vadd.f32 %v401_v38, %v352_v36  ;;  %v1956_v36 = vld [vmem:[%s3375_s0 + $0x1ec] sm:$0xf0] }
  0xb9   :  { %732 = vmatmul.bf16.gmra.mxu2 %v1811_v37 }
  0xba   :  { %v2715_v40 = vadd.f32 %v450_v10, %v402_v39  ;;  %v1815_v10 = vor.u32 %v2197_v2, %v1814_v1  ;;  %v1827_v39 = vor.u32 %v2200_v30, %v1826_v29  ;;  %v1968_v1 = vld [vmem:[%s3375_s0 + $0x204] sm:$0xf0]  ;;  %v2206_v29 = vld [vmem:[%s3375_s0 + $0x160] sm:$0xf0]  ;;  %v1978_v30 = vld [vmem:[%s3375_s0 + $0x210] sm:$0xf] }
  0xbc   :  { %v458_v47 = vpop.f32.mrf.mxu2 }
  0xbe   :  { %v355_v50 = vpop.f32.mrf.mxu0 }
  0xbf   :  { %v2735_v48 = vpop.f32.mrf.mxu3  ;;  %v404_v53 = vpop.f32.mrf.mxu1 }
  0xc0   :  { %v405_v54 = vadd.f32 %v404_v53, %v355_v50 }
  0xc1   :  { %1866 = vmatmul.msk.bf16.gmra.mxu0 %vm311_vm0, %v1803_v49  ;;  %v1844_v49 = vld [vmem:[%s3375_s0 + $0x15c] sm:$0xf0] }
  0xc2   :  { %v2738_v55 = vadd.f32 %v453_v23, %v405_v54  ;;  %1018 = vmatmul.bf16.gmra.mxu1 %v1931_v51 }
  0xc4   :  { %1067 = vmatmul.bf16.gmra.mxu3 %v1935_v52  ;;  %v460_v58 = vpop.f32.mrf.mxu2 }
  0xc6   :  { %v357_v60 = vpop.f32.mrf.mxu0 }
  0xc7   :  { %v2746_v59 = vpop.f32.mrf.mxu3  ;;  %v406_v62 = vpop.f32.mrf.mxu1 }
  0xc8   :  { %v407_v63 = vadd.f32 %v406_v62, %v357_v60  ;;  %v2203_v60 = vld [vmem:[%s3375_s0 + $0x148] sm:$0xf0]  ;;  %v2226_v62 = vld [vmem:[%s3375_s0 + $0x200] sm:$0xf0] }
  0xc9   :  { %737 = vmatmul.bf16.gmra.mxu2 %v1823_v61  ;;  %v1966_v61 = vld [vmem:[%s3375_s0 + $0x1f8] sm:$0xf] }
  0xca   :  { %v2748_v0 = vadd.f32 %v455_v34, %v407_v63  ;;  %v2222_v34 = vld [vmem:[%s3375_s0 + $0x1e4] sm:$0xf]  ;;  %v2225_v63 = vld [vmem:[%s3375_s0 + $0x1fc] sm:$0xf]  ;;  %v1967_v6 = vor.u32 %v2226_v62, %v1966_v61  ;;  %v1862_v62 = vld [vmem:[%s3375_s0 + $0x170] sm:$0xf] }
  0xcb   :  { %v1959_v43 = vor.u32 %v2222_v34, %v1956_v36  ;;  %v1980_v34 = vld [vmem:[%s3375_s0 + $0x21c] sm:$0xf0] }
  0xcc   :  { %v463_v8 = vpop.f32.mrf.mxu2 }
  0xce   :  { %v360_v12 = vpop.f32.mrf.mxu0 }
  0xcf   :  { %v2768_v9 = vpop.f32.mrf.mxu3  ;;  %v409_v15 = vpop.f32.mrf.mxu1 }
  0xd0   :  { %v410_v17 = vadd.f32 %v409_v15, %v360_v12  ;;  %v1856_v15 = vld [vmem:[%s3375_s0 + $0x174] sm:$0xf0] }
  0xd1   :  { %1867 = vmatmul.msk.bf16.gmra.mxu0 %vm311_vm0, %v1815_v10 }
  0xd2   :  { %v2771_v18 = vadd.f32 %v458_v47, %v410_v17  ;;  %1023 = vmatmul.bf16.gmra.mxu1 %v1943_v13  ;;  %v2204_v47 = vld [vmem:[%s3375_s0 + $0x154] sm:$0xf] }
  0xd3   :  { %v1847_v53 = vor.u32 %v2204_v47, %v1844_v49  ;;  %v1914_v49 = vld [vmem:[%s3375_s0 + $0x188] sm:$0xf] }
  0xd4   :  { %1072 = vmatmul.bf16.gmra.mxu3 %v1947_v14  ;;  %v465_v21 = vpop.f32.mrf.mxu2  ;;  %v2207_v14 = vld [vmem:[%s3375_s0 + $0x16c] sm:$0xf] }
  0xd6   :  { %v362_v23 = vpop.f32.mrf.mxu0 }
  0xd7   :  { %v2779_v22 = vpop.f32.mrf.mxu3  ;;  %v411_v26 = vpop.f32.mrf.mxu1 }
  0xd8   :  { %v412_v27 = vadd.f32 %v411_v26, %v362_v23 }
  0xd9   :  { %742 = vmatmul.bf16.gmra.mxu2 %v1835_v25 }
  0xda   :  { %v2781_v28 = vadd.f32 %v460_v58, %v412_v27  ;;  %v1838_v58 = vld [vmem:[%s3375_s0 + $0x140] sm:$0xf]  ;;  %v1850_v27 = vld [vmem:[%s3375_s0 + $0x158] sm:$0xf] }
  0xdb   :  { %v1839_v4 = vor.u32 %v2203_v60, %v1838_v58 }
  0xdc   :  { %v468_v37 = vpop.f32.mrf.mxu2 }
  0xde   :  { %v365_v41 = vpop.f32.mrf.mxu0 }
  0xdf   :  { %v2801_v38 = vpop.f32.mrf.mxu3  ;;  %v414_v44 = vpop.f32.mrf.mxu1 }
  0xe0   :  { %v415_v45 = vadd.f32 %v414_v44, %v365_v41 }
  0xe1   :  { %1868 = vmatmul.msk.bf16.gmra.mxu0 %vm311_vm0, %v1827_v39  ;;  %v1851_v39 = vor.u32 %v2206_v29, %v1850_v27 }
  0xe2   :  { %v2804_v46 = vadd.f32 %v463_v8, %v415_v45  ;;  %1028 = vmatmul.bf16.gmra.mxu1 %v1955_v42  ;;  %v1971_v8 = vor.u32 %v2225_v63, %v1968_v1  ;;  %v1979_v42 = vor.u32 %v2229_v32, %v1978_v30  ;;  %v2209_v63 = vld [vmem:[%s3375_s0 + $0x178] sm:$0xf0]  ;;  %v1990_v1 = vld [vmem:[%s3375_s0 + $0x228] sm:$0xf] }
  0xe4   :  { %1077 = vmatmul.bf16.gmra.mxu3 %v1959_v43  ;;  %v470_v50 = vpop.f32.mrf.mxu2  ;;  %v1983_v43 = vor.u32 %v2228_v33, %v1980_v34 }
  0xe6   :  { %v367_v52 = vpop.f32.mrf.mxu0 }
  0xe7   :  { %v2812_v51 = vpop.f32.mrf.mxu3  ;;  %v416_v54 = vpop.f32.mrf.mxu1 }
  0xe8   :  { %v417_v56 = vadd.f32 %v416_v54, %v367_v52 }
  0xe9   :  { %747 = vmatmul.bf16.gmra.mxu2 %v1847_v53 }
  0xea   :  { %v2814_v57 = vadd.f32 %v465_v21, %v417_v56  ;;  %v1859_v21 = vor.u32 %v2207_v14, %v1856_v15 }
  0xec   :  { %v473_v2 = vpop.f32.mrf.mxu2 }
  0xee   :  { %v370_v5 = vpop.f32.mrf.mxu0 }
  0xef   :  { %v2834_v3 = vpop.f32.mrf.mxu3  ;;  %v419_v10 = vpop.f32.mrf.mxu1 }
  0xf0   :  { %v420_v12 = vadd.f32 %v419_v10, %v370_v5  ;;  %v1992_v5 = vld [vmem:[%s3375_s0 + $0x234] sm:$0xf0]  ;;  %v1863_v10 = vor.u32 %v2209_v63, %v1862_v62 }
  0xf1   :  { %1869 = vmatmul.msk.bf16.gmra.mxu0 %vm311_vm0, %v1839_v4  ;;  %v2231_v4 = vld [vmem:[%s3375_s0 + $0x22c] sm:$0xf] }
  0xf2   :  { %v2837_v13 = vadd.f32 %v468_v37, %v420_v12  ;;  %1033 = vmatmul.bf16.gmra.mxu1 %v1967_v6  ;;  %v1995_v15 = vor.u32 %v2231_v4, %v1992_v5 }
  0xf4   :  { %1082 = vmatmul.bf16.gmra.mxu3 %v1971_v8  ;;  %v475_v17 = vpop.f32.mrf.mxu2 }
  0xf6   :  { %v372_v20 = vpop.f32.mrf.mxu0 }
  0xf7   :  { %v2845_v19 = vpop.f32.mrf.mxu3  ;;  %v421_v23 = vpop.f32.mrf.mxu1 }
  0xf8   :  { %v422_v25 = vadd.f32 %v421_v23, %v372_v20  ;;  %v1926_v23 = vld [vmem:[%s3375_s0 + $0x1a0] sm:$0xf] }
  0xf9   :  { %752 = vmatmul.bf16.gmra.mxu2 %v1859_v21 }
  0xfa   :  { %v2847_v26 = vadd.f32 %v470_v50, %v422_v25  ;;  %v2212_v50 = vld [vmem:[%s3375_s0 + $0x190] sm:$0xf0]  ;;  %v2215_v25 = vld [vmem:[%s3375_s0 + $0x1a8] sm:$0xf0] }
  0xfb   :  { %v1915_v56 = vor.u32 %v2212_v50, %v1914_v49  ;;  %v1927_v32 = vor.u32 %v2215_v25, %v1926_v23  ;;  %v2054_v23 = vld [vmem:[%s3375_s0 + $0x258] sm:$0xf]  ;;  %v2237_v25 = vld [vmem:[%s3375_s0 + $0x25c] sm:$0xf] }
  0xfc   :  { %v478_v36 = vpop.f32.mrf.mxu2 }
  0xfe   :  { %v375_v41 = vpop.f32.mrf.mxu0 }
  0xff   :  { %v2867_v37 = vpop.f32.mrf.mxu3  ;;  %v424_v44 = vpop.f32.mrf.mxu1 }
 0x100   :  { %v425_v45 = vadd.f32 %v424_v44, %v375_v41  ;;  %v2235_v41 = vld [vmem:[%s3375_s0 + $0x248] sm:$0xf0]  ;;  %v2050_v44 = vld [vmem:[%s3375_s0 + $0x248] sm:$0xf] }
 0x101   :  { %1870 = vmatmul.msk.bf16.gmra.mxu0 %vm311_vm0, %v1851_v39 }
 0x102   :  { %v2870_v47 = vadd.f32 %v473_v2, %v425_v45  ;;  %1038 = vmatmul.bf16.gmra.mxu1 %v1979_v42  ;;  %v2232_v2 = vld [vmem:[%s3375_s0 + $0x230] sm:$0xf0]  ;;  %v2234_v42 = vld [vmem:[%s3375_s0 + $0x244] sm:$0xf] }
 0x103   :  { %v1991_v14 = vor.u32 %v2232_v2, %v1990_v1  ;;  %v2236_v45 = vld [vmem:[%s3375_s0 + $0x250] sm:$0xf0]  ;;  %v2218_v2 = vld [vmem:[%s3375_s0 + $0x1c0] sm:$0xf0] }
 0x104   :  { %1087 = vmatmul.bf16.gmra.mxu3 %v1983_v43  ;;  %v480_v52 = vpop.f32.mrf.mxu2  ;;  %v2044_v43 = vld [vmem:[%s3375_s0 + $0x24c] sm:$0xf0] }
 0x106   :  { %v377_v54 = vpop.f32.mrf.mxu0 }
 0x107   :  { %v2878_v53 = vpop.f32.mrf.mxu3  ;;  %v426_v58 = vpop.f32.mrf.mxu1 }
 0x108   :  { %v427_v60 = vadd.f32 %v426_v58, %v377_v54  ;;  %v2047_v58 = vor.u32 %v2234_v42, %v2044_v43 }
 0x109   :  { %2000 = vmatmul.msk.bf16.vlgmr.msra.gmra.mxu2 %vm311_vm0, %v1915_v56 }
 0x10a   :  { %v2880_v61 = vadd.f32 %v475_v17, %v427_v60  ;;  %v2051_v60 = vor.u32 %v2236_v45, %v2050_v44 }
 0x10c   :  { %3381 = vst [vmem:[#allocation2_spill] sm:$0xff] %v2880_v61  ;;  %v718_v8 = vpop.f32.mrf.mxu2 }
 0x10d   :  { %v719_v49 = vadd.f32 %v718_v8, %v2680_v11  ;;  %v1938_v11 = vld [vmem:[%s3375_s0 + $0x1b8] sm:$0xf] }
 0x10e   :  { %v380_v12 = vpop.f32.mrf.mxu0 }
 0x10f   :  { %v2901_v6 = vpop.f32.mrf.mxu3  ;;  %v429_v17 = vpop.f32.mrf.mxu1 }
 0x110   :  { %v430_v20 = vadd.f32 %v429_v17, %v380_v12 }
 0x111   :  { %1871 = vmatmul.msk.bf16.gmra.mxu0 %vm311_vm0, %v1863_v10 }
 0x112   :  { %v2904_v21 = vadd.f32 %v478_v36, %v430_v20  ;;  %1043 = vmatmul.bf16.gmra.mxu1 %v1991_v14  ;;  %v2042_v36 = vld [vmem:[%s3375_s0 + $0x240] sm:$0xf]  ;;  %v1939_v14 = vor.u32 %v2218_v2, %v1938_v11 }
 0x113   :  { %v2043_v54 = vor.u32 %v2235_v41, %v2042_v36 }
 0x114   :  { %1092 = vmatmul.bf16.gmra.mxu3 %v1995_v15  ;;  %v720_v29 = vpop.f32.mrf.mxu2 }
 0x115   :  { %v721_v4 = vadd.f32 %v720_v29, %v2702_v24  ;;  %v2238_v24 = vld [vmem:[%s3375_s0 + $0x260] sm:$0xf0]  ;;  %v2056_v29 = vld [vmem:[%s3375_s0 + $0x264] sm:$0xf0] }
 0x116   :  { %v382_v30 = vpop.f32.mrf.mxu0  ;;  %v2055_v41 = vor.u32 %v2238_v24, %v2054_v23  ;;  %v2059_v44 = vor.u32 %v2237_v25, %v2056_v29  ;;  %v2068_v23 = vld [vmem:[%s3375_s0 + $0x27c] sm:$0xf0]  ;;  %v2074_v24 = vld [vmem:[%s3375_s0 + $0x278] sm:$0xf]  ;;  %v2242_v25 = vld [vmem:[%s3375_s0 + $0x280] sm:$0xf0] }
 0x117   :  { %v2912_v27 = vpop.f32.mrf.mxu3  ;;  %v431_v33 = vpop.f32.mrf.mxu1 }
 0x118   :  { %v432_v34 = vadd.f32 %v431_v33, %v382_v30  ;;  %v2062_v30 = vld [vmem:[%s3375_s0 + $0x260] sm:$0xf] }
 0x119   :  { %2001 = vmatmul.msk.bf16.gmra.mxu2 %vm311_vm0, %v1927_v32  ;;  %v2239_v32 = vld [vmem:[%s3375_s0 + $0x268] sm:$0xf0] }
 0x11a   :  { %v2914_v39 = vadd.f32 %v480_v52, %v432_v34  ;;  %v2063_v45 = vor.u32 %v2239_v32, %v2062_v30 }
 0x11c   :  { %v723_v52 = vpop.f32.mrf.mxu2 }
 0x11d   :  { %v724_v33 = vadd.f32 %v723_v52, %v2713_v35  ;;  %v1950_v35 = vld [vmem:[%s3375_s0 + $0x1d0] sm:$0xf]  ;;  %v2221_v52 = vld [vmem:[%s3375_s0 + $0x1d8] sm:$0xf0] }
 0x11e   :  { %v767_v56 = vpop.f32.mrf.mxu0 }
 0x11f   :  { %v2936_v50 = vpop.f32.mrf.mxu3  ;;  %v2938_v62 = vadd.f32 %v767_v56, %v719_v49  ;;  %v1009_v63 = vpop.f32.mrf.mxu1 }
 0x121   :  { %1348 = vmatmul.bf16.vlgmr.msra.gmra.mxu0 %v2043_v54  ;;  %v3384_v61 = vmax.f32 %v2672_v7, %v2938_v62 }
 0x122   :  { %1397 = vmatmul.bf16.vlgmr.msra.gmra.mxu1 %v2047_v58 }
 0x124   :  { %2136 = vmatmul.msk.bf16.vlgmr.msra.gmra.mxu3 %vm311_vm0, %v2051_v60  ;;  %v725_v5 = vpop.f32.mrf.mxu2 }
 0x125   :  { %v726_v58 = vadd.f32 %v725_v5, %v2735_v48  ;;  %v2241_v48 = vld [vmem:[%s3375_s0 + $0x278] sm:$0xf0]  ;;  %v2240_v5 = vld [vmem:[%s3375_s0 + $0x274] sm:$0xf] }
 0x126   :  { %v769_v12 = vpop.f32.mrf.mxu0 }
 0x127   :  { %v1058_v8 = vpop.f32.mrf.mxu3  ;;  %v2952_v15 = vadd.f32 %v769_v12, %v721_v4  ;;  %v1011_v17 = vpop.f32.mrf.mxu1  ;;  %v1951_v4 = vor.u32 %v2221_v52, %v1950_v35 }
 0x128   :  { %v2950_v10 = vadd.f32 %v1058_v8, %v1009_v63 }
 0x129   :  { %2002 = vmatmul.msk.bf16.gmra.mxu2 %vm311_vm0, %v1939_v14 }
 0x12c   :  { %v728_v34 = vpop.f32.mrf.mxu2 }
 0x12d   :  { %v729_v29 = vadd.f32 %v728_v34, %v2746_v59  ;;  %v1962_v59 = vld [vmem:[%s3375_s0 + $0x1e8] sm:$0xf]  ;;  %v2224_v34 = vld [vmem:[%s3375_s0 + $0x1f0] sm:$0xf0] }
 0x12e   :  { %v772_v43 = vpop.f32.mrf.mxu0 }
 0x12f   :  { %v1060_v36 = vpop.f32.mrf.mxu3  ;;  %v2978_v49 = vadd.f32 %v772_v43, %v724_v33  ;;  %v1014_v54 = vpop.f32.mrf.mxu1  ;;  %v2071_v43 = vor.u32 %v2240_v5, %v2068_v23  ;;  %v2078_v23 = vld [vmem:[%s3375_s0 + $0x288] sm:$0xf] }
 0x130   :  { %v2976_v42 = vadd.f32 %v1060_v36, %v1011_v17  ;;  %v2066_v17 = vld [vmem:[%s3375_s0 + $0x270] sm:$0xf] }
 0x131   :  { %1353 = vmatmul.bf16.gmra.mxu0 %v2055_v41  ;;  %v2067_v33 = vor.u32 %v2241_v48, %v2066_v17 }
 0x132   :  { %1402 = vmatmul.bf16.gmra.mxu1 %v2059_v44  ;;  %v2075_v44 = vor.u32 %v2242_v25, %v2074_v24  ;;  %v2080_v24 = vld [vmem:[%s3375_s0 + $0x294] sm:$0xf0]  ;;  %v2086_v25 = vld [vmem:[%s3375_s0 + $0x290] sm:$0xf] }
 0x134   :  { %2137 = vmatmul.msk.bf16.gmra.mxu3 %vm311_vm0, %v2063_v45  ;;  %v730_v60 = vpop.f32.mrf.mxu2 }
 0x135   :  { %v731_v52 = vadd.f32 %v730_v60, %v2768_v9  ;;  %v2244_v9 = vld [vmem:[%s3375_s0 + $0x290] sm:$0xf0]  ;;  %v2243_v60 = vld [vmem:[%s3375_s0 + $0x28c] sm:$0xf] }
 0x136   :  { %v774_v2 = vpop.f32.mrf.mxu0 }
 0x137   :  { %v1063_v63 = vpop.f32.mrf.mxu3  ;;  %v2992_v8 = vadd.f32 %v774_v2, %v726_v58  ;;  %v1016_v12 = vpop.f32.mrf.mxu1 }
 0x138   :  { %v2990_v11 = vadd.f32 %v1063_v63, %v1014_v54 }
 0x139   :  { %2003 = vmatmul.msk.bf16.gmra.mxu2 %vm311_vm0, %v1951_v4 }
 0x13c   :  { %v733_v30 = vpop.f32.mrf.mxu2 }
 0x13e   :  { %v777_v41 = vpop.f32.mrf.mxu0 }
 0x13f   :  { %v1065_v32 = vpop.f32.mrf.mxu3  ;;  %v3018_v45 = vadd.f32 %v777_v41, %v729_v29  ;;  %v1019_v54 = vpop.f32.mrf.mxu1  ;;  %v2245_v29 = vld [vmem:[%s3375_s0 + $0x298] sm:$0xf0] }
 0x140   :  { %v3016_v36 = vadd.f32 %v1065_v32, %v1016_v12  ;;  %v1963_v12 = vor.u32 %v2224_v34, %v1962_v59  ;;  %v734_v32 = vadd.f32 %v733_v30, %v2779_v22  ;;  %v2083_v59 = vor.u32 %v2243_v60, %v2080_v24  ;;  %v1974_v22 = vld [vmem:[%s3375_s0 + $0x200] sm:$0xf]  ;;  %v2227_v30 = vld [vmem:[%s3375_s0 + $0x208] sm:$0xf0] }
 0x141   :  { %1358 = vmatmul.bf16.gmra.mxu0 %v2067_v33  ;;  %v2087_v34 = vor.u32 %v2245_v29, %v2086_v25  ;;  %v1975_v24 = vor.u32 %v2227_v30, %v1974_v22 }
 0x142   :  { %1407 = vmatmul.bf16.gmra.mxu1 %v2071_v43  ;;  %v2079_v43 = vor.u32 %v2244_v9, %v2078_v23 }
 0x144   :  { %2138 = vmatmul.msk.bf16.gmra.mxu3 %vm311_vm0, %v2075_v44  ;;  %v735_v58 = vpop.f32.mrf.mxu2 }
 0x146   :  { %v779_v4 = vpop.f32.mrf.mxu0 }
 0x147   :  { %v1068_v63 = vpop.f32.mrf.mxu3  ;;  %v3032_v17 = vadd.f32 %v779_v4, %v731_v52  ;;  %v1021_v48 = vpop.f32.mrf.mxu1 }
 0x148   :  { %v3030_v2 = vadd.f32 %v1068_v63, %v1019_v54 }
 0x149   :  { %2004 = vmatmul.msk.bf16.gmra.mxu2 %vm311_vm0, %v1963_v12  ;;  %v736_v12 = vadd.f32 %v735_v58, %v2801_v38  ;;  %v2247_v38 = vld [vmem:[%s3375_s0 + $0x2a8] sm:$0xf0]  ;;  %v2246_v58 = vld [vmem:[%s3375_s0 + $0x2a4] sm:$0xf] }
 0x14c   :  { %v738_v33 = vpop.f32.mrf.mxu2 }
 0x14e   :  { %v782_v54 = vpop.f32.mrf.mxu0 }
 0x14f   :  { %v1070_v41 = vpop.f32.mrf.mxu3  ;;  %v3058_v52 = vadd.f32 %v782_v54, %v734_v32  ;;  %v1024_v63 = vpop.f32.mrf.mxu1  ;;  %v2098_v54 = vld [vmem:[%s3375_s0 + $0x2a8] sm:$0xf] }
 0x150   :  { %v3056_v44 = vadd.f32 %v1070_v41, %v1021_v48  ;;  %v2090_v41 = vld [vmem:[%s3375_s0 + $0x2a0] sm:$0xf] }
 0x151   :  { %1363 = vmatmul.bf16.gmra.mxu0 %v2079_v43  ;;  %v2092_v43 = vld [vmem:[%s3375_s0 + $0x2ac] sm:$0xf0]  ;;  %v2091_v30 = vor.u32 %v2247_v38, %v2090_v41 }
 0x152   :  { %1412 = vmatmul.bf16.gmra.mxu1 %v2083_v59  ;;  %v2248_v59 = vld [vmem:[%s3375_s0 + $0x2b0] sm:$0xf0] }
 0x154   :  { %2139 = vmatmul.msk.bf16.gmra.mxu3 %vm311_vm0, %v2087_v34  ;;  %v740_v48 = vpop.f32.mrf.mxu2  ;;  %v739_v34 = vadd.f32 %v738_v33, %v2812_v51  ;;  %v1986_v51 = vld [vmem:[%s3375_s0 + $0x218] sm:$0xf]  ;;  %v2230_v33 = vld [vmem:[%s3375_s0 + $0x220] sm:$0xf0] }
 0x156   :  { %v784_v60 = vpop.f32.mrf.mxu0 }
 0x157   :  { %v1073_v23 = vpop.f32.mrf.mxu3  ;;  %v3072_v25 = vadd.f32 %v784_v60, %v736_v12  ;;  %v1026_v29 = vpop.f32.mrf.mxu1  ;;  %v2095_v60 = vor.u32 %v2246_v58, %v2092_v43 }
 0x158   :  { %v3070_v9 = vadd.f32 %v1073_v23, %v1024_v63 }
 0x159   :  { %2005 = vmatmul.msk.bf16.gmra.mxu2 %vm311_vm0, %v1975_v24  ;;  %v2099_v24 = vor.u32 %v2248_v59, %v2098_v54  ;;  %v1987_v54 = vor.u32 %v2230_v33, %v1986_v51 }
 0x15c   :  { %v743_v63 = vpop.f32.mrf.mxu2 }
 0x15e   :  { %v787_v23 = vpop.f32.mrf.mxu0 }
 0x15f   :  { %v1075_v22 = vpop.f32.mrf.mxu3  ;;  %v3098_v32 = vadd.f32 %v787_v23, %v739_v34  ;;  %v1029_v4 = vpop.f32.mrf.mxu1  ;;  %v2110_v23 = vld [vmem:[%s3375_s0 + $0x2c0] sm:$0xf] }
 0x160   :  { %v3096_v12 = vadd.f32 %v1075_v22, %v1026_v29  ;;  %v741_v29 = vadd.f32 %v740_v48, %v2834_v3  ;;  %v2250_v3 = vld [vmem:[%s3375_s0 + $0x2c0] sm:$0xf0]  ;;  %v2104_v48 = vld [vmem:[%s3375_s0 + $0x2c4] sm:$0xf0] }
 0x161   :  { %1368 = vmatmul.bf16.gmra.mxu0 %v2091_v30  ;;  %v2102_v30 = vld [vmem:[%s3375_s0 + $0x2b8] sm:$0xf] }
 0x162   :  { %1417 = vmatmul.bf16.gmra.mxu1 %v2095_v60  ;;  %v2251_v60 = vld [vmem:[%s3375_s0 + $0x2c8] sm:$0xf0] }
 0x163   :  { %v2111_v22 = vor.u32 %v2251_v60, %v2110_v23 }
 0x164   :  { %2140 = vmatmul.msk.bf16.gmra.mxu3 %vm311_vm0, %v2099_v24  ;;  %v745_v41 = vpop.f32.mrf.mxu2  ;;  %v744_v24 = vadd.f32 %v743_v63, %v2845_v19  ;;  %v1998_v19 = vld [vmem:[%s3375_s0 + $0x230] sm:$0xf]  ;;  %v2233_v63 = vld [vmem:[%s3375_s0 + $0x238] sm:$0xf0] }
 0x165   :  { %v1999_v23 = vor.u32 %v2233_v63, %v1998_v19 }
 0x166   :  { %v789_v43 = vpop.f32.mrf.mxu0 }
 0x167   :  { %v1078_v38 = vpop.f32.mrf.mxu3  ;;  %v3112_v59 = vadd.f32 %v789_v43, %v741_v29  ;;  %v1031_v34 = vpop.f32.mrf.mxu1  ;;  %v2103_v29 = vor.u32 %v2250_v3, %v2102_v30 }
 0x168   :  { %v3110_v58 = vadd.f32 %v1078_v38, %v1029_v4  ;;  %v2249_v4 = vld [vmem:[%s3375_s0 + $0x2bc] sm:$0xf] }
 0x169   :  { %2006 = vmatmul.msk.bf16.gmra.mxu2 %vm311_vm0, %v1987_v54  ;;  %v2107_v54 = vor.u32 %v2249_v4, %v2104_v48 }
 0x16c   :  { %v748_v51 = vpop.f32.mrf.mxu2 }
 0x16e   :  { %v792_v43 = vpop.f32.mrf.mxu0 }
 0x16f   :  { %v1080_v33 = vpop.f32.mrf.mxu3  ;;  %v3138_v5 = vadd.f32 %v792_v43, %v744_v24  ;;  %v1034_v35 = vpop.f32.mrf.mxu1  ;;  %v2254_v43 = vld [vmem:[%s3375_s0 + $0x2e0] sm:$0xf0] }
 0x170   :  { %v3136_v38 = vadd.f32 %v1080_v33, %v1031_v34  ;;  %v746_v34 = vadd.f32 %v745_v41, %v2867_v37  ;;  %v2114_v33 = vld [vmem:[%s3375_s0 + $0x2d0] sm:$0xf]  ;;  %v2253_v37 = vld [vmem:[%s3375_s0 + $0x2d8] sm:$0xf0]  ;;  %v2116_v41 = vld [vmem:[%s3375_s0 + $0x2dc] sm:$0xf0] }
 0x171   :  { %1373 = vmatmul.bf16.gmra.mxu0 %v2103_v29  ;;  %v2122_v29 = vld [vmem:[%s3375_s0 + $0x2d8] sm:$0xf] }
 0x172   :  { %1422 = vmatmul.bf16.gmra.mxu1 %v2107_v54  ;;  %v749_v54 = vadd.f32 %v748_v51, %v2878_v53 }
 0x174   :  { %2141 = vmatmul.msk.bf16.gmra.mxu3 %vm311_vm0, %v2111_v22  ;;  %v750_v30 = vpop.f32.mrf.mxu2  ;;  %v2123_v22 = vor.u32 %v2254_v43, %v2122_v29  ;;  %v2126_v29 = vld [vmem:[%s3375_s0 + $0x2e8] sm:$0xf] }
 0x175   :  { %v751_v53 = vadd.f32 %v750_v30, %v2901_v6  ;;  %v2255_v6 = vld [vmem:[%s3375_s0 + $0x2ec] sm:$0xf]  ;;  %v2257_v30 = vld [vmem:[%s3375_s0 + $0x2f8] sm:$0xf0] }
 0x176   :  { %v794_v48 = vpop.f32.mrf.mxu0 }
 0x177   :  { %v1083_v3 = vpop.f32.mrf.mxu3  ;;  %v3152_v60 = vadd.f32 %v794_v48, %v746_v34  ;;  %v1036_v24 = vpop.f32.mrf.mxu1  ;;  %v2115_v34 = vor.u32 %v2253_v37, %v2114_v33 }
 0x178   :  { %v3150_v4 = vadd.f32 %v1083_v3, %v1034_v35  ;;  %v2252_v35 = vld [vmem:[%s3375_s0 + $0x2d4] sm:$0xf] }
 0x179   :  { %2007 = vmatmul.msk.bf16.gmra.mxu2 %vm311_vm0, %v1999_v23  ;;  %v2119_v23 = vor.u32 %v2252_v35, %v2116_v41 }
 0x17c   :  { %v753_v19 = vpop.f32.mrf.mxu2 }
 0x17d   :  { %v754_v43 = vadd.f32 %v753_v19, %v2912_v27 }
 0x17e   :  { %v797_v48 = vpop.f32.mrf.mxu0 }
 0x17f   :  { %v1085_v63 = vpop.f32.mrf.mxu3  ;;  %v3178_v14 = vadd.f32 %v797_v48, %v749_v54  ;;  %v1039_v56 = vpop.f32.mrf.mxu1 }
 0x180   :  { %v3176_v3 = vadd.f32 %v1085_v63, %v1036_v24 }
 0x181   :  { %3382 = vst [vmem:[#allocation3_spill] sm:$0xff] %v3178_v14  ;;  %1378 = vmatmul.bf16.gmra.mxu0 %v2115_v34 }
 0x182   :  { %1427 = vmatmul.bf16.gmra.mxu1 %v2119_v23 }
 0x184   :  { %2142 = vmatmul.msk.bf16.gmra.mxu3 %vm311_vm0, %v2123_v22  ;;  %v755_v51 = vpop.f32.mrf.mxu2  ;;  %v2256_v22 = vld [vmem:[%s3375_s0 + $0x2f0] sm:$0xf0] }
 0x185   :  { %v2127_v34 = vor.u32 %v2256_v22, %v2126_v29  ;;  %v756_v19 = vadd.f32 %v755_v51, %v2936_v50 }
 0x186   :  { %v799_v24 = vpop.f32.mrf.mxu0 }
 0x187   :  { %v1088_v1 = vpop.f32.mrf.mxu3  ;;  %v3186_v37 = vadd.f32 %v799_v24, %v751_v53  ;;  %v1041_v35 = vpop.f32.mrf.mxu1 }
 0x188   :  { %v3184_v33 = vadd.f32 %v1088_v1, %v1039_v56  ;;  %v2128_v1 = vld [vmem:[%s3375_s0 + $0x2f4] sm:$0xf0]  ;;  %v2134_v56 = vld [vmem:[%s3375_s0 + $0x2f0] sm:$0xf] }
 0x189   :  { %3383 = vst [vmem:[#allocation4_spill] sm:$0xff] %v3186_v37  ;;  %v2131_v24 = vor.u32 %v2255_v6, %v2128_v1  ;;  %v2135_v41 = vor.u32 %v2257_v30, %v2134_v56 }
 0x18c   :  { %v1107_v63 = vpop.f32.mrf.mxu2 }
 0x18d   :  { %v1108_v23 = vadd.f32 %v1107_v63, %v2950_v10 }
 0x18e   :  { %v802_v53 = vpop.f32.mrf.mxu0 }
 0x18f   :  { %v1090_v54 = vpop.f32.mrf.mxu3  ;;  %v3212_v20 = vadd.f32 %v802_v53, %v754_v43  ;;  %v1044_v37 = vpop.f32.mrf.mxu1  ;;  %v1147_v14 = vmax.f32 %v3384_v61, %v1108_v23  ;;  %v3385_v61 = vmax.f32 %v2682_v16, %v2952_v15  ;;  %v3241_v53 = vld [vmem:[%s3376_s2] ss:$0 sm:$0xff] }
 0x190   :  { %v3209_v48 = vadd.f32 %v1090_v54, %v1041_v35 }
 0x191   :  { %v821_v27 = vmax.f32 %v2904_v21, %v3212_v20  ;;  %1383 = vmatmul.bf16.gmra.mxu0 %v2127_v34 }
 0x192   :  { %1432 = vmatmul.bf16.gmra.mxu1 %v2131_v24 }
 0x194   :  { %2143 = vmatmul.msk.bf16.gmra.mxu3 %vm311_vm0, %v2135_v41  ;;  %v1109_v35 = vpop.f32.mrf.mxu2 }
 0x195   :  { %v1110_v22 = vadd.f32 %v1109_v35, %v2976_v42  ;;  %v3386_v42 = vmax.f32 %v2705_v31, %v2978_v49 }
 0x196   :  { %v804_v6 = vpop.f32.mrf.mxu0 }
 0x197   :  { %v1093_v10 = vpop.f32.mrf.mxu3  ;;  %v3224_v1 = vadd.f32 %v804_v6, %v756_v19  ;;  %v1046_v7 = vpop.f32.mrf.mxu1  ;;  %v1148_v62 = vmax.f32 %v3385_v61, %v1110_v22 }
 0x198   :  { %v3221_v29 = vadd.f32 %v1093_v10, %v1044_v37 }
 0x199   :  { %v822_v56 = vmax.f32 %v2914_v39, %v3224_v1 }
 0x19c   :  { %v1112_v30 = vpop.f32.mrf.mxu2 }
 0x19d   :  { %v1113_v51 = vadd.f32 %v1112_v30, %v2990_v11  ;;  %v3387_v11 = vmax.f32 %v2715_v40, %v2992_v8  ;;  %v3388_v40 = vmax.f32 %v2738_v55, %v3018_v45  ;;  %v3389_v55 = vmax.f32 %v2748_v0, %v3032_v17 }
 0x19e   :  { %v1349_v37 = vpop.f32.mrf.mxu0  ;;  %v3390_v0 = vmax.f32 %v2771_v18, %v3058_v52  ;;  %v3391_v18 = vmax.f32 %v2781_v28, %v3072_v25  ;;  %v3392_v28 = vmax.f32 %v2804_v46, %v3098_v32  ;;  %v3393_v46 = vmax.f32 %v2814_v57, %v3112_v59 }
 0x19f   :  { %v1095_v41 = vpop.f32.mrf.mxu3  ;;  %v1398_v43 = vpop.f32.mrf.mxu1  ;;  %v1149_v54 = vmax.f32 %v3386_v42, %v1113_v51  ;;  %v3394_v57 = vmax.f32 %v2837_v13, %v3138_v5  ;;  %v3395_v13 = vmax.f32 %v2847_v26, %v3152_v60  ;;  %v3396_v26 = vld [vmem:[#allocation3_spill] sm:$0xff] }
 0x1a0   :  { %v3231_v50 = vadd.f32 %v1095_v41, %v1046_v7  ;;  %v1399_v63 = vadd.f32 %v1398_v43, %v1349_v37  ;;  %v3397_v60 = vmax.f32 %v2870_v47, %v3396_v26  ;;  %v3399_v47 = vld [vmem:[#allocation4_spill] sm:$0xff] }
 0x1a4   :  { %v1114_v34 = vpop.f32.mrf.mxu2 }
 0x1a5   :  { %v1115_v16 = vadd.f32 %v1114_v34, %v3016_v36 }
 0x1a6   :  { %v1351_v24 = vpop.f32.mrf.mxu0 }
 0x1a7   :  { %v1447_v23 = vpop.f32.mrf.mxu3  ;;  %v1400_v19 = vpop.f32.mrf.mxu1  ;;  %v1150_v10 = vmax.f32 %v3387_v11, %v1115_v16 }
 0x1a8   :  { %v1448_v15 = vadd.f32 %v1447_v23, %v1399_v63  ;;  %v1401_v22 = vadd.f32 %v1400_v19, %v1351_v24 }
 0x1aa   :  { %v1487_v35 = vmax.f32 %v1147_v14, %v1448_v15 }
 0x1ac   :  { %v1507_v31 = vadd.f32 %v3241_v53, %v1487_v35  ;;  %v1117_v6 = vpop.f32.mrf.mxu2 }
 0x1ad   :  { %v1118_v7 = vadd.f32 %v1117_v6, %v3030_v2 }
 0x1ae   :  { %v1523_v49 = vmax.f32 %v1507_v31, 0.0  ;;  %v1354_v41 = vpop.f32.mrf.mxu0 }
 0x1af   :  { %v1449_v36 = vpop.f32.mrf.mxu3  ;;  %v1403_v30 = vpop.f32.mrf.mxu1  ;;  %v1151_v8 = vmax.f32 %v3388_v40, %v1118_v7 }
 0x1b0   :  { %1540 = vst.msk [vmem:[%s3377_s3] sm:$0xff] %vm1539_vm1, %v1523_v49  ;;  %v1450_v61 = vadd.f32 %v1449_v36, %v1401_v22  ;;  %v1404_v37 = vadd.f32 %v1403_v30, %v1354_v41 }
 0x1b2   :  { %v1488_v14 = vmax.f32 %v1148_v62, %v1450_v61 }
 0x1b4   :  { %v1508_v51 = vadd.f32 %v3241_v53, %v1488_v14  ;;  %v1119_v42 = vpop.f32.mrf.mxu2 }
 0x1b5   :  { %v1120_v2 = vadd.f32 %v1119_v42, %v3056_v44 }
 0x1b6   :  { %v1524_v43 = vmax.f32 %v1508_v51, 0.0  ;;  %v1356_v23 = vpop.f32.mrf.mxu0 }
 0x1b7   :  { %v1452_v63 = vpop.f32.mrf.mxu3  ;;  %v1405_v16 = vpop.f32.mrf.mxu1  ;;  %v1152_v45 = vmax.f32 %v3389_v55, %v1120_v2 }
 0x1b8   :  { %1541 = vst.msk [vmem:[%s3377_s3 + $0x8] sm:$0xff] %vm1539_vm1, %v1524_v43  ;;  %v1453_v34 = vadd.f32 %v1452_v63, %v1404_v37  ;;  %v1406_v19 = vadd.f32 %v1405_v16, %v1356_v23 }
 0x1ba   :  { %v1489_v62 = vmax.f32 %v1149_v54, %v1453_v34 }
 0x1bc   :  { %v1509_v15 = vadd.f32 %v3241_v53, %v1489_v62  ;;  %v1122_v11 = vpop.f32.mrf.mxu2 }
 0x1bd   :  { %v1123_v44 = vadd.f32 %v1122_v11, %v3070_v9 }
 0x1be   :  { %v1525_v24 = vmax.f32 %v1509_v15, 0.0  ;;  %v1359_v49 = vpop.f32.mrf.mxu0 }
 0x1bf   :  { %v1454_v35 = vpop.f32.mrf.mxu3  ;;  %v1408_v22 = vpop.f32.mrf.mxu1  ;;  %v1153_v17 = vmax.f32 %v3390_v0, %v1123_v44 }
 0x1c0   :  { %1542 = vst.msk [vmem:[%s3377_s3 + $0x10] sm:$0xff] %vm1539_vm1, %v1525_v24  ;;  %v1455_v31 = vadd.f32 %v1454_v35, %v1406_v19  ;;  %v1409_v36 = vadd.f32 %v1408_v22, %v1359_v49 }
 0x1c2   :  { %v1490_v54 = vmax.f32 %v1150_v10, %v1455_v31 }
 0x1c4   :  { %v1510_v6 = vadd.f32 %v3241_v53, %v1490_v54  ;;  %v1124_v61 = vpop.f32.mrf.mxu2 }
 0x1c5   :  { %v1125_v9 = vadd.f32 %v1124_v61, %v3096_v12 }
 0x1c6   :  { %v1526_v7 = vmax.f32 %v1510_v6, 0.0  ;;  %v1361_v40 = vpop.f32.mrf.mxu0 }
 0x1c7   :  { %v1457_v41 = vpop.f32.mrf.mxu3  ;;  %v1410_v14 = vpop.f32.mrf.mxu1  ;;  %v1154_v52 = vmax.f32 %v3391_v18, %v1125_v9 }
 0x1c8   :  { %1543 = vst.msk [vmem:[%s3377_s3 + $0x18] sm:$0xff] %vm1539_vm1, %v1526_v7  ;;  %v1458_v30 = vadd.f32 %v1457_v41, %v1409_v36  ;;  %v1411_v43 = vadd.f32 %v1410_v14, %v1361_v40 }
 0x1ca   :  { %v1491_v10 = vmax.f32 %v1151_v8, %v1458_v30 }
 0x1cc   :  { %v1511_v51 = vadd.f32 %v3241_v53, %v1491_v10  ;;  %v1127_v42 = vpop.f32.mrf.mxu2 }
 0x1cd   :  { %v1128_v12 = vadd.f32 %v1127_v42, %v3110_v58 }
 0x1ce   :  { %v1527_v37 = vmax.f32 %v1511_v51, 0.0  ;;  %v1364_v34 = vpop.f32.mrf.mxu0 }
 0x1cf   :  { %v1459_v63 = vpop.f32.mrf.mxu3  ;;  %v1413_v23 = vpop.f32.mrf.mxu1  ;;  %v1155_v25 = vmax.f32 %v3392_v28, %v1128_v12 }
 0x1d0   :  { %1544 = vst.msk [vmem:[%s3377_s3 + $0x20] sm:$0xff] %vm1539_vm1, %v1527_v37  ;;  %v1460_v2 = vadd.f32 %v1459_v63, %v1411_v43  ;;  %v1414_v55 = vadd.f32 %v1413_v23, %v1364_v34 }
 0x1d2   :  { %v1492_v8 = vmax.f32 %v1152_v45, %v1460_v2 }
 0x1d4   :  { %v1512_v16 = vadd.f32 %v3241_v53, %v1492_v8  ;;  %v1129_v15 = vpop.f32.mrf.mxu2 }
 0x1d5   :  { %v1130_v58 = vadd.f32 %v1129_v15, %v3136_v38 }
 0x1d6   :  { %v1528_v62 = vmax.f32 %v1512_v16, 0.0  ;;  %v1366_v11 = vpop.f32.mrf.mxu0 }
 0x1d7   :  { %v1462_v24 = vpop.f32.mrf.mxu3  ;;  %v1415_v35 = vpop.f32.mrf.mxu1  ;;  %v1156_v32 = vmax.f32 %v3393_v46, %v1130_v58  ;;  %v3398_v58 = vld [vmem:[#allocation2_spill] sm:$0xff] }
 0x1d8   :  { %1545 = vst.msk [vmem:[%s3377_s3 + $0x28] sm:$0xff] %vm1539_vm1, %v1528_v62  ;;  %v1463_v19 = vadd.f32 %v1462_v24, %v1414_v55  ;;  %v1416_v49 = vadd.f32 %v1415_v35, %v1366_v11 }
 0x1da   :  { %v1493_v45 = vmax.f32 %v1153_v17, %v1463_v19  ;;  %v3400_v19 = vmax.f32 %v3398_v58, %v3399_v47 }
 0x1dc   :  { %v1513_v44 = vadd.f32 %v3241_v53, %v1493_v45  ;;  %v1132_v22 = vpop.f32.mrf.mxu2 }
 0x1dd   :  { %v1133_v38 = vadd.f32 %v1132_v22, %v3150_v4 }
 0x1de   :  { %v1529_v31 = vmax.f32 %v1513_v44, 0.0  ;;  %v1369_v6 = vpop.f32.mrf.mxu0 }
 0x1df   :  { %v1464_v0 = vpop.f32.mrf.mxu3  ;;  %v1418_v36 = vpop.f32.mrf.mxu1  ;;  %v1157_v59 = vmax.f32 %v3394_v57, %v1133_v38 }
 0x1e0   :  { %1546 = vst.msk [vmem:[%s3377_s3 + $0x30] sm:$0xff] %vm1539_vm1, %v1529_v31  ;;  %v1465_v54 = vadd.f32 %v1464_v0, %v1416_v49  ;;  %v1419_v61 = vadd.f32 %v1418_v36, %v1369_v6 }
 0x1e2   :  { %v1494_v17 = vmax.f32 %v1154_v52, %v1465_v54 }
 0x1e4   :  { %v1514_v7 = vadd.f32 %v3241_v53, %v1494_v17  ;;  %v1134_v9 = vpop.f32.mrf.mxu2 }
 0x1e5   :  { %v1135_v4 = vadd.f32 %v1134_v9, %v3176_v3 }
 0x1e6   :  { %v1530_v41 = vmax.f32 %v1514_v7, 0.0  ;;  %v1371_v14 = vpop.f32.mrf.mxu0 }
 0x1e7   :  { %v1467_v30 = vpop.f32.mrf.mxu3  ;;  %v1420_v18 = vpop.f32.mrf.mxu1  ;;  %v1158_v5 = vmax.f32 %v3395_v13, %v1135_v4 }
 0x1e8   :  { %1547 = vst.msk [vmem:[%s3377_s3 + $0x38] sm:$0xff] %vm1539_vm1, %v1530_v41  ;;  %v1468_v40 = vadd.f32 %v1467_v30, %v1419_v61  ;;  %v1421_v37 = vadd.f32 %v1420_v18, %v1371_v14 }
 0x1ea   :  { %v1495_v52 = vmax.f32 %v1155_v25, %v1468_v40 }
 0x1ec   :  { %v1515_v10 = vadd.f32 %v3241_v53, %v1495_v52  ;;  %v1137_v43 = vpop.f32.mrf.mxu2 }
 0x1ed   :  { %v1138_v3 = vadd.f32 %v1137_v43, %v3184_v33 }
 0x1ee   :  { %v1531_v51 = vmax.f32 %v1515_v10, 0.0  ;;  %v1374_v12 = vpop.f32.mrf.mxu0 }
 0x1ef   :  { %v1469_v42 = vpop.f32.mrf.mxu3  ;;  %v1423_v2 = vpop.f32.mrf.mxu1  ;;  %v1159_v34 = vmax.f32 %v3397_v60, %v1138_v3 }
 0x1f0   :  { %1548 = vst.msk [vmem:[%s3377_s3 + $0x40] sm:$0xff] %vm1539_vm1, %v1531_v51  ;;  %v1470_v63 = vadd.f32 %v1469_v42, %v1421_v37  ;;  %v1424_v25 = vadd.f32 %v1423_v2, %v1374_v12 }
 0x1f2   :  { %v1496_v23 = vmax.f32 %v1156_v32, %v1470_v63 }
 0x1f4   :  { %v1516_v28 = vadd.f32 %v3241_v53, %v1496_v23  ;;  %v1139_v16 = vpop.f32.mrf.mxu2 }
 0x1f5   :  { %v1140_v33 = vadd.f32 %v1139_v16, %v3209_v48 }
 0x1f6   :  { %v1532_v8 = vmax.f32 %v1516_v28, 0.0  ;;  %v1376_v15 = vpop.f32.mrf.mxu0 }
 0x1f7   :  { %v1472_v55 = vpop.f32.mrf.mxu3  ;;  %v1425_v24 = vpop.f32.mrf.mxu1  ;;  %v1160_v11 = vmax.f32 %v3400_v19, %v1140_v33 }
 0x1f8   :  { %1549 = vst.msk [vmem:[%s3377_s3 + $0x48] sm:$0xff] %vm1539_vm1, %v1532_v8  ;;  %v1473_v62 = vadd.f32 %v1472_v55, %v1424_v25  ;;  %v1426_v45 = vadd.f32 %v1425_v24, %v1376_v15 }
 0x1fa   :  { %v1497_v35 = vmax.f32 %v1157_v59, %v1473_v62 }
 0x1fc   :  { %v1517_v46 = vadd.f32 %v3241_v53, %v1497_v35  ;;  %v1142_v44 = vpop.f32.mrf.mxu2 }
 0x1fd   :  { %v1143_v48 = vadd.f32 %v1142_v44, %v3221_v29 }
 0x1fe   :  { %v1533_v32 = vmax.f32 %v1517_v46, 0.0  ;;  %v1379_v22 = vpop.f32.mrf.mxu0 }
 0x1ff   :  { %v1474_v31 = vpop.f32.mrf.mxu3  ;;  %v1428_v0 = vpop.f32.mrf.mxu1  ;;  %v1161_v38 = vmax.f32 %v821_v27, %v1143_v48 }
 0x200   :  { %1550 = vst.msk [vmem:[%s3377_s3 + $0x50] sm:$0xff] %vm1539_vm1, %v1533_v32  ;;  %v1475_v49 = vadd.f32 %v1474_v31, %v1426_v45  ;;  %v1429_v36 = vadd.f32 %v1428_v0, %v1379_v22 }
 0x202   :  { %v1498_v54 = vmax.f32 %v1158_v5, %v1475_v49 }
 0x204   :  { %v1518_v6 = vadd.f32 %v3241_v53, %v1498_v54  ;;  %v1144_v59 = vpop.f32.mrf.mxu2 }
 0x205   :  { %v1145_v29 = vadd.f32 %v1144_v59, %v3231_v50 }
 0x206   :  { %v1534_v57 = vmax.f32 %v1518_v6, 0.0  ;;  %v1381_v61 = vpop.f32.mrf.mxu0 }
 0x207   :  { %v1477_v17 = vpop.f32.mrf.mxu3  ;;  %v1430_v41 = vpop.f32.mrf.mxu1  ;;  %v1162_v21 = vmax.f32 %v822_v56, %v1145_v29 }
 0x208   :  { %1551 = vst.msk [vmem:[%s3377_s3 + $0x58] sm:$0xff] %vm1539_vm1, %v1534_v57  ;;  %v1478_v7 = vadd.f32 %v1477_v17, %v1429_v36  ;;  %v1431_v30 = vadd.f32 %v1430_v41, %v1381_v61 }
 0x20a   :  { %v1499_v20 = vmax.f32 %v1159_v34, %v1478_v7 }
 0x20c   :  { %v1519_v27 = vadd.f32 %v3241_v53, %v1499_v20 }
 0x20e   :  { %v1535_v9 = vmax.f32 %v1519_v27, 0.0  ;;  %v1384_v50 = vpop.f32.mrf.mxu0 }
 0x20f   :  { %v1479_v4 = vpop.f32.mrf.mxu3  ;;  %v1433_v14 = vpop.f32.mrf.mxu1 }
 0x210   :  { %1552 = vst.msk [vmem:[%s3377_s3 + $0x60] sm:$0xff] %vm1539_vm1, %v1535_v9  ;;  %v1480_v40 = vadd.f32 %v1479_v4, %v1431_v30  ;;  %v1434_v5 = vadd.f32 %v1433_v14, %v1384_v50 }
 0x212   :  { %v1500_v18 = vmax.f32 %v1160_v11, %v1480_v40 }
 0x214   :  { %v1520_v13 = vadd.f32 %v3241_v53, %v1500_v18 }
 0x216   :  { %v1536_v39 = vmax.f32 %v1520_v13, 0.0  ;;  %v1386_v10 = vpop.f32.mrf.mxu0 }
 0x217   :  { %v1482_v1 = vpop.f32.mrf.mxu3  ;;  %v1435_v51 = vpop.f32.mrf.mxu1 }
 0x218   :  { %1553 = vst.msk [vmem:[%s3377_s3 + $0x68] sm:$0xff] %vm1539_vm1, %v1536_v39  ;;  %v1483_v56 = vadd.f32 %v1482_v1, %v1434_v5  ;;  %v1436_v42 = vadd.f32 %v1435_v51, %v1386_v10 }
 0x21a   :  { %v1501_v52 = vmax.f32 %v1161_v38, %v1483_v56 }
 0x21c   :  { %v1521_v37 = vadd.f32 %v3241_v53, %v1501_v52 }
 0x21e   :  { %v1537_v43 = vmax.f32 %v1521_v37, 0.0 }
 0x21f   :  { %v1484_v3 = vpop.f32.mrf.mxu3 }
 0x220   :  { %1554 = vst.msk [vmem:[%s3377_s3 + $0x70] sm:$0xff] %vm1539_vm1, %v1537_v43  ;;  %v1485_v63 = vadd.f32 %v1484_v3, %v1436_v42 }
 0x222   :  { %v1502_v12 = vmax.f32 %v1162_v21, %v1485_v63 }
 0x224   :  { %v1522_v2 = vadd.f32 %v3241_v53, %v1502_v12 }
 0x226   :  { %v1538_v26 = vmax.f32 %v1522_v2, 0.0 }
 0x228   :  { %1555 = vst.msk [vmem:[%s3377_s3 + $0x78] sm:$0xff] %vm1539_vm1, %v1538_v26 }

// kernel: cnn_forward.5
= control target key start
LH: loop header
LB: loop body
LE: loop exit
PB: predicated region body
PF: predicated region fallthrough
CT: control target
= control target key end

     0   :  { %10 = vsyncpa [#allocation4], 0  ;;  %s11547_s18 = smov 0   ;;  %s11549_s19 = smov 0   ;;  %s13838_s0 = inlined_call_operand.vmem [shape: bf16[2,4096], index: 0, kind: input, shape index: {}]   ;;  %s13839_s1 = inlined_call_operand.vmem [shape: bf16[4096,512], index: 1, kind: input, shape index: {}]   ;;  %s13840_s2 = inlined_call_operand.vmem [shape: f32[1,512], index: 2, kind: input, shape index: {}]   ;;  %s13841_s3 = inlined_call_operand.vmem [shape: bf16[512,128], index: 3, kind: input, shape index: {}]   ;;  %s13842_s4 = inlined_call_operand.vmem [shape: f32[1,128], index: 4, kind: input, shape index: {}]   ;;  %s13843_s5 = inlined_call_operand.hbm [shape: f32[2,128], index: 5, kind: output, shape index: {}]  }
   0x1   :  { %s11551_s20 = smov 0   ;;  %s11553_s21 = smov 0  }
   0x2   :  { %s11555_s22 = smov 0  }
   0x3 LB: > { %s8726_s23 = sadd.s32 4294967295, %s11513_s22   ;;  %s25_s24 = sadd.s32 1, %s11509_s21  ;;  %s11513_s22 = sphi %s11555_s22, %s16_s22   ;;  %s11509_s21 = sphi %s11553_s21, %s13847_s21   ;;  %s11505_s20 = sphi %s11551_s20, %s13846_s20   ;;  %s11501_s19 = sphi %s11549_s19, %s13845_s19   ;;  %s11497_s18 = sphi %s11547_s18, %s13844_s18  }
   0x4   : > { %p26_p0 = scmp.ge.s32.totalorder %s25_s24, 2  ;;  %p68_p1 = scmp.ne.s32.totalorder %s11501_s19, %s11497_s18 }
   0x5   : > { %p69_p2 = scmp.eq.s32.totalorder %s11513_s22, 0  ;;  %s61_s26 = sadd.s32 1, %s11501_s19 }
   0x6   : > { %s13849_s24 = smov (%p26_p0, %s25_s24), 0  ;;  %p8729_p5 = scmp.ge.s32.totalorder %s11513_s22, 2 }
   0x7   : > { %p70_p3 = por %p69_p2, %p68_p1  ;;  %s58_s25 = ssub.s32 %s11509_s21, %s13849_s24 }
   0x8   : > { %p59_p4 = scmp.eq.s32.totalorder %s58_s25, 0  ;;  %203 = sbr.rel (%p8729_p5) target bundleno = 529 (0x211), region = 24 }
   0xa   : > { %s11583_s27 = scalar_select %p59_p4, %s11501_s19, %s61_s26  }
   0xd   : > { %206 = sbr.rel (!%p70_p3) target bundleno = 529 (0x211), region = 28  ;;  %s208_s28 = sand.u32 (%p70_p3), 1, %s11501_s19  }
   0xe   : > { %s10856_s29 = sshll.u32 (%p70_p3), %s11509_s21, 3  ;;  %s8730_s30 = sshll.u32 (%p70_p3), %s208_s28, 12 }
   0xf   : > { %s11591_s8 = scalar_lea.vmem (%p70_p3), %s13839_s1, %s10856_s29  ;;  %s11596_s9 = scalar_lea.vmem (%p70_p3), [#allocation2], %s8730_s30 }
  0x10   : > { %v1265_v0 = vld [vmem:[%s11591_s8] sm:$0xff] (%p70_p3)  ;;  %v1267_v1 = vld [vmem:[%s11591_s8 + $0x10] sm:$0xff] (%p70_p3) }
  0x11   : > { %v1269_v2 = vld [vmem:[%s11591_s8 + $0x20] sm:$0xff] (%p70_p3)  ;;  %1266 = vst [vmem:[%s11596_s9] sm:$0xff] (%p70_p3), %v1265_v0  ;;  %v1271_v3 = vld [vmem:[%s11591_s8 + $0x30] sm:$0xff] (%p70_p3) }
  0x12   : > { %1268 = vst [vmem:[%s11596_s9 + $0x8] sm:$0xff] %v1267_v1  ;;  %v1273_v4 = vld [vmem:[%s11591_s8 + $0x40] sm:$0xff]  ;;  %v1275_v5 = vld [vmem:[%s11591_s8 + $0x50] sm:$0xff] }
  0x13   : > { %1270 = vst [vmem:[%s11596_s9 + $0x10] sm:$0xff] %v1269_v2  ;;  %v1277_v6 = vld [vmem:[%s11591_s8 + $0x60] sm:$0xff]  ;;  %v1279_v7 = vld [vmem:[%s11591_s8 + $0x70] sm:$0xff] }
  0x14   : > { %1272 = vst [vmem:[%s11596_s9 + $0x18] sm:$0xff] %v1271_v3  ;;  %v1281_v8 = vld [vmem:[%s11591_s8 + $0x80] sm:$0xff]  ;;  %v1283_v9 = vld [vmem:[%s11591_s8 + $0x90] sm:$0xff] }
  0x15   : > { %1274 = vst [vmem:[%s11596_s9 + $0x20] sm:$0xff] %v1273_v4  ;;  %v1285_v10 = vld [vmem:[%s11591_s8 + $0xa0] sm:$0xff]  ;;  %v1287_v11 = vld [vmem:[%s11591_s8 + $0xb0] sm:$0xff] }
  0x16   : > { %1276 = vst [vmem:[%s11596_s9 + $0x28] sm:$0xff] %v1275_v5  ;;  %v1289_v12 = vld [vmem:[%s11591_s8 + $0xc0] sm:$0xff]  ;;  %v1291_v13 = vld [vmem:[%s11591_s8 + $0xd0] sm:$0xff] }
  0x17   : > { %1278 = vst [vmem:[%s11596_s9 + $0x30] sm:$0xff] %v1277_v6  ;;  %v1293_v14 = vld [vmem:[%s11591_s8 + $0xe0] sm:$0xff]  ;;  %v1295_v15 = vld [vmem:[%s11591_s8 + $0xf0] sm:$0xff] }
  0x18   : > { %1280 = vst [vmem:[%s11596_s9 + $0x38] sm:$0xff] %v1279_v7  ;;  %v1297_v16 = vld [vmem:[%s11591_s8 + $0x100] sm:$0xff]  ;;  %v1299_v17 = vld [vmem:[%s11591_s8 + $0x110] sm:$0xff] }
  0x19   : > { %1282 = vst [vmem:[%s11596_s9 + $0x40] sm:$0xff] %v1281_v8  ;;  %v1301_v18 = vld [vmem:[%s11591_s8 + $0x120] sm:$0xff]  ;;  %v1303_v19 = vld [vmem:[%s11591_s8 + $0x130] sm:$0xff] }
  0x1a   : > { %1284 = vst [vmem:[%s11596_s9 + $0x48] sm:$0xff] %v1283_v9  ;;  %v1305_v20 = vld [vmem:[%s11591_s8 + $0x140] sm:$0xff]  ;;  %v1307_v21 = vld [vmem:[%s11591_s8 + $0x150] sm:$0xff] }
  0x1b   : > { %1286 = vst [vmem:[%s11596_s9 + $0x50] sm:$0xff] %v1285_v10  ;;  %v1309_v22 = vld [vmem:[%s11591_s8 + $0x160] sm:$0xff]  ;;  %v1311_v23 = vld [vmem:[%s11591_s8 + $0x170] sm:$0xff] }
  0x1c   : > { %1288 = vst [vmem:[%s11596_s9 + $0x58] sm:$0xff] %v1287_v11  ;;  %v1313_v24 = vld [vmem:[%s11591_s8 + $0x180] sm:$0xff]  ;;  %v1315_v25 = vld [vmem:[%s11591_s8 + $0x190] sm:$0xff] }
  0x1d   : > { %1290 = vst [vmem:[%s11596_s9 + $0x60] sm:$0xff] %v1289_v12  ;;  %v1317_v26 = vld [vmem:[%s11591_s8 + $0x1a0] sm:$0xff]  ;;  %v1319_v27 = vld [vmem:[%s11591_s8 + $0x1b0] sm:$0xff] }
  0x1e   : > { %1292 = vst [vmem:[%s11596_s9 + $0x68] sm:$0xff] %v1291_v13  ;;  %v1321_v28 = vld [vmem:[%s11591_s8 + $0x1c0] sm:$0xff]  ;;  %v1323_v29 = vld [vmem:[%s11591_s8 + $0x1d0] sm:$0xff] }
  0x1f   : > { %1294 = vst [vmem:[%s11596_s9 + $0x70] sm:$0xff] %v1293_v14  ;;  %v1325_v30 = vld [vmem:[%s11591_s8 + $0x1e0] sm:$0xff]  ;;  %v1327_v31 = vld [vmem:[%s11591_s8 + $0x1f0] sm:$0xff] }
  0x20   : > { %1296 = vst [vmem:[%s11596_s9 + $0x78] sm:$0xff] %v1295_v15  ;;  %v1329_v32 = vld [vmem:[%s11591_s8 + $0x200] sm:$0xff]  ;;  %v1331_v33 = vld [vmem:[%s11591_s8 + $0x210] sm:$0xff] }
  0x21   : > { %1298 = vst [vmem:[%s11596_s9 + $0x80] sm:$0xff] %v1297_v16  ;;  %v1333_v34 = vld [vmem:[%s11591_s8 + $0x220] sm:$0xff]  ;;  %v1335_v35 = vld [vmem:[%s11591_s8 + $0x230] sm:$0xff] }
  0x22   : > { %1300 = vst [vmem:[%s11596_s9 + $0x88] sm:$0xff] %v1299_v17  ;;  %v1337_v36 = vld [vmem:[%s11591_s8 + $0x240] sm:$0xff]  ;;  %v1339_v37 = vld [vmem:[%s11591_s8 + $0x250] sm:$0xff] }
  0x23   : > { %1302 = vst [vmem:[%s11596_s9 + $0x90] sm:$0xff] %v1301_v18  ;;  %v1341_v38 = vld [vmem:[%s11591_s8 + $0x260] sm:$0xff]  ;;  %v1343_v39 = vld [vmem:[%s11591_s8 + $0x270] sm:$0xff] }
  0x24   : > { %1304 = vst [vmem:[%s11596_s9 + $0x98] sm:$0xff] %v1303_v19  ;;  %v1345_v40 = vld [vmem:[%s11591_s8 + $0x280] sm:$0xff]  ;;  %v1347_v41 = vld [vmem:[%s11591_s8 + $0x290] sm:$0xff] }
  0x25   : > { %1306 = vst [vmem:[%s11596_s9 + $0xa0] sm:$0xff] %v1305_v20  ;;  %v1349_v42 = vld [vmem:[%s11591_s8 + $0x2a0] sm:$0xff]  ;;  %v1351_v43 = vld [vmem:[%s11591_s8 + $0x2b0] sm:$0xff] }
  0x26   : > { %1308 = vst [vmem:[%s11596_s9 + $0xa8] sm:$0xff] %v1307_v21  ;;  %v1353_v44 = vld [vmem:[%s11591_s8 + $0x2c0] sm:$0xff]  ;;  %v1355_v45 = vld [vmem:[%s11591_s8 + $0x2d0] sm:$0xff] }
  0x27   : > { %1310 = vst [vmem:[%s11596_s9 + $0xb0] sm:$0xff] %v1309_v22  ;;  %v1357_v46 = vld [vmem:[%s11591_s8 + $0x2e0] sm:$0xff]  ;;  %v1359_v47 = vld [vmem:[%s11591_s8 + $0x2f0] sm:$0xff] }
  0x28   : > { %1312 = vst [vmem:[%s11596_s9 + $0xb8] sm:$0xff] %v1311_v23  ;;  %v1361_v48 = vld [vmem:[%s11591_s8 + $0x300] sm:$0xff]  ;;  %v1363_v49 = vld [vmem:[%s11591_s8 + $0x310] sm:$0xff] }
  0x29   : > { %1314 = vst [vmem:[%s11596_s9 + $0xc0] sm:$0xff] %v1313_v24  ;;  %v1365_v50 = vld [vmem:[%s11591_s8 + $0x320] sm:$0xff]  ;;  %v1367_v51 = vld [vmem:[%s11591_s8 + $0x330] sm:$0xff] }
  0x2a   : > { %1316 = vst [vmem:[%s11596_s9 + $0xc8] sm:$0xff] %v1315_v25  ;;  %v1369_v52 = vld [vmem:[%s11591_s8 + $0x340] sm:$0xff]  ;;  %v1371_v53 = vld [vmem:[%s11591_s8 + $0x350] sm:$0xff] }
  0x2b   : > { %1318 = vst [vmem:[%s11596_s9 + $0xd0] sm:$0xff] %v1317_v26  ;;  %v1373_v54 = vld [vmem:[%s11591_s8 + $0x360] sm:$0xff]  ;;  %v1375_v55 = vld [vmem:[%s11591_s8 + $0x370] sm:$0xff] }
  0x2c   : > { %1320 = vst [vmem:[%s11596_s9 + $0xd8] sm:$0xff] %v1319_v27  ;;  %v1377_v56 = vld [vmem:[%s11591_s8 + $0x380] sm:$0xff]  ;;  %v1379_v57 = vld [vmem:[%s11591_s8 + $0x390] sm:$0xff] }
  0x2d   : > { %1322 = vst [vmem:[%s11596_s9 + $0xe0] sm:$0xff] %v1321_v28  ;;  %v1381_v58 = vld [vmem:[%s11591_s8 + $0x3a0] sm:$0xff]  ;;  %v1383_v59 = vld [vmem:[%s11591_s8 + $0x3b0] sm:$0xff] }
  0x2e   : > { %1324 = vst [vmem:[%s11596_s9 + $0xe8] sm:$0xff] %v1323_v29  ;;  %v1385_v60 = vld [vmem:[%s11591_s8 + $0x3c0] sm:$0xff]  ;;  %v1387_v61 = vld [vmem:[%s11591_s8 + $0x3d0] sm:$0xff] }
  0x2f   : > { %1326 = vst [vmem:[%s11596_s9 + $0xf0] sm:$0xff] %v1325_v30  ;;  %v1389_v62 = vld [vmem:[%s11591_s8 + $0x3e0] sm:$0xff]  ;;  %v1391_v63 = vld [vmem:[%s11591_s8 + $0x3f0] sm:$0xff] }
  0x30   : > { %1328 = vst [vmem:[%s11596_s9 + $0xf8] sm:$0xff] %v1327_v31  ;;  %v1393_v0 = vld [vmem:[%s11591_s8 + $0x400] sm:$0xff]  ;;  %v1395_v1 = vld [vmem:[%s11591_s8 + $0x410] sm:$0xff] }
  0x31   : > { %1330 = vst [vmem:[%s11596_s9 + $0x100] sm:$0xff] %v1329_v32  ;;  %v1397_v2 = vld [vmem:[%s11591_s8 + $0x420] sm:$0xff]  ;;  %v1399_v3 = vld [vmem:[%s11591_s8 + $0x430] sm:$0xff] }
  0x32   : > { %1332 = vst [vmem:[%s11596_s9 + $0x108] sm:$0xff] %v1331_v33  ;;  %v1401_v4 = vld [vmem:[%s11591_s8 + $0x440] sm:$0xff]  ;;  %v1403_v5 = vld [vmem:[%s11591_s8 + $0x450] sm:$0xff] }
  0x33   : > { %1334 = vst [vmem:[%s11596_s9 + $0x110] sm:$0xff] %v1333_v34  ;;  %v1405_v6 = vld [vmem:[%s11591_s8 + $0x460] sm:$0xff]  ;;  %v1407_v7 = vld [vmem:[%s11591_s8 + $0x470] sm:$0xff] }
  0x34   : > { %1336 = vst [vmem:[%s11596_s9 + $0x118] sm:$0xff] %v1335_v35  ;;  %v1409_v8 = vld [vmem:[%s11591_s8 + $0x480] sm:$0xff]  ;;  %v1411_v9 = vld [vmem:[%s11591_s8 + $0x490] sm:$0xff] }
  0x35   : > { %1338 = vst [vmem:[%s11596_s9 + $0x120] sm:$0xff] %v1337_v36  ;;  %v1413_v10 = vld [vmem:[%s11591_s8 + $0x4a0] sm:$0xff]  ;;  %v1415_v11 = vld [vmem:[%s11591_s8 + $0x4b0] sm:$0xff] }
  0x36   : > { %1340 = vst [vmem:[%s11596_s9 + $0x128] sm:$0xff] %v1339_v37  ;;  %v1417_v12 = vld [vmem:[%s11591_s8 + $0x4c0] sm:$0xff]  ;;  %v1419_v13 = vld [vmem:[%s11591_s8 + $0x4d0] sm:$0xff] }
  0x37   : > { %1342 = vst [vmem:[%s11596_s9 + $0x130] sm:$0xff] %v1341_v38  ;;  %v1421_v14 = vld [vmem:[%s11591_s8 + $0x4e0] sm:$0xff]  ;;  %v1423_v15 = vld [vmem:[%s11591_s8 + $0x4f0] sm:$0xff] }
  0x38   : > { %1344 = vst [vmem:[%s11596_s9 + $0x138] sm:$0xff] %v1343_v39  ;;  %v1425_v16 = vld [vmem:[%s11591_s8 + $0x500] sm:$0xff]  ;;  %v1427_v17 = vld [vmem:[%s11591_s8 + $0x510] sm:$0xff] }
  0x39   : > { %1346 = vst [vmem:[%s11596_s9 + $0x140] sm:$0xff] %v1345_v40  ;;  %v1429_v18 = vld [vmem:[%s11591_s8 + $0x520] sm:$0xff]  ;;  %v1431_v19 = vld [vmem:[%s11591_s8 + $0x530] sm:$0xff] }
  0x3a   : > { %1348 = vst [vmem:[%s11596_s9 + $0x148] sm:$0xff] %v1347_v41  ;;  %v1433_v20 = vld [vmem:[%s11591_s8 + $0x540] sm:$0xff]  ;;  %v1435_v21 = vld [vmem:[%s11591_s8 + $0x550] sm:$0xff] }
  0x3b   : > { %1350 = vst [vmem:[%s11596_s9 + $0x150] sm:$0xff] %v1349_v42  ;;  %v1437_v22 = vld [vmem:[%s11591_s8 + $0x560] sm:$0xff]  ;;  %v1439_v23 = vld [vmem:[%s11591_s8 + $0x570] sm:$0xff] }
  0x3c   : > { %1352 = vst [vmem:[%s11596_s9 + $0x158] sm:$0xff] %v1351_v43  ;;  %v1441_v24 = vld [vmem:[%s11591_s8 + $0x580] sm:$0xff]  ;;  %v1443_v25 = vld [vmem:[%s11591_s8 + $0x590] sm:$0xff] }
  0x3d   : > { %1354 = vst [vmem:[%s11596_s9 + $0x160] sm:$0xff] %v1353_v44  ;;  %v1445_v26 = vld [vmem:[%s11591_s8 + $0x5a0] sm:$0xff]  ;;  %v1447_v27 = vld [vmem:[%s11591_s8 + $0x5b0] sm:$0xff] }
  0x3e   : > { %1356 = vst [vmem:[%s11596_s9 + $0x168] sm:$0xff] %v1355_v45  ;;  %v1449_v28 = vld [vmem:[%s11591_s8 + $0x5c0] sm:$0xff]  ;;  %v1451_v29 = vld [vmem:[%s11591_s8 + $0x5d0] sm:$0xff] }
  0x3f   : > { %1358 = vst [vmem:[%s11596_s9 + $0x170] sm:$0xff] %v1357_v46  ;;  %v1453_v30 = vld [vmem:[%s11591_s8 + $0x5e0] sm:$0xff]  ;;  %v1455_v31 = vld [vmem:[%s11591_s8 + $0x5f0] sm:$0xff] }
  0x40   : > { %1360 = vst [vmem:[%s11596_s9 + $0x178] sm:$0xff] %v1359_v47  ;;  %v1457_v32 = vld [vmem:[%s11591_s8 + $0x600] sm:$0xff]  ;;  %v1459_v33 = vld [vmem:[%s11591_s8 + $0x610] sm:$0xff] }
  0x41   : > { %1362 = vst [vmem:[%s11596_s9 + $0x180] sm:$0xff] %v1361_v48  ;;  %v1461_v34 = vld [vmem:[%s11591_s8 + $0x620] sm:$0xff]  ;;  %v1463_v35 = vld [vmem:[%s11591_s8 + $0x630] sm:$0xff] }
  0x42   : > { %1364 = vst [vmem:[%s11596_s9 + $0x188] sm:$0xff] %v1363_v49  ;;  %v1465_v36 = vld [vmem:[%s11591_s8 + $0x640] sm:$0xff]  ;;  %v1467_v37 = vld [vmem:[%s11591_s8 + $0x650] sm:$0xff] }
  0x43   : > { %1366 = vst [vmem:[%s11596_s9 + $0x190] sm:$0xff] %v1365_v50  ;;  %v1469_v38 = vld [vmem:[%s11591_s8 + $0x660] sm:$0xff]  ;;  %v1471_v39 = vld [vmem:[%s11591_s8 + $0x670] sm:$0xff] }
  0x44   : > { %1368 = vst [vmem:[%s11596_s9 + $0x198] sm:$0xff] %v1367_v51  ;;  %v1473_v40 = vld [vmem:[%s11591_s8 + $0x680] sm:$0xff]  ;;  %v1475_v41 = vld [vmem:[%s11591_s8 + $0x690] sm:$0xff] }
  0x45   : > { %1370 = vst [vmem:[%s11596_s9 + $0x1a0] sm:$0xff] %v1369_v52  ;;  %v1477_v42 = vld [vmem:[%s11591_s8 + $0x6a0] sm:$0xff]  ;;  %v1479_v43 = vld [vmem:[%s11591_s8 + $0x6b0] sm:$0xff] }
  0x46   : > { %1372 = vst [vmem:[%s11596_s9 + $0x1a8] sm:$0xff] %v1371_v53  ;;  %v1481_v44 = vld [vmem:[%s11591_s8 + $0x6c0] sm:$0xff]  ;;  %v1483_v45 = vld [vmem:[%s11591_s8 + $0x6d0] sm:$0xff] }
  0x47   : > { %1374 = vst [vmem:[%s11596_s9 + $0x1b0] sm:$0xff] %v1373_v54  ;;  %v1485_v46 = vld [vmem:[%s11591_s8 + $0x6e0] sm:$0xff]  ;;  %v1487_v47 = vld [vmem:[%s11591_s8 + $0x6f0] sm:$0xff] }
  0x48   : > { %1376 = vst [vmem:[%s11596_s9 + $0x1b8] sm:$0xff] %v1375_v55  ;;  %v1489_v48 = vld [vmem:[%s11591_s8 + $0x700] sm:$0xff]  ;;  %v1491_v49 = vld [vmem:[%s11591_s8 + $0x710] sm:$0xff] }
  0x49   : > { %1378 = vst [vmem:[%s11596_s9 + $0x1c0] sm:$0xff] %v1377_v56  ;;  %v1493_v50 = vld [vmem:[%s11591_s8 + $0x720] sm:$0xff]  ;;  %v1495_v51 = vld [vmem:[%s11591_s8 + $0x730] sm:$0xff] }
  0x4a   : > { %1380 = vst [vmem:[%s11596_s9 + $0x1c8] sm:$0xff] %v1379_v57  ;;  %v1497_v52 = vld [vmem:[%s11591_s8 + $0x740] sm:$0xff]  ;;  %v1499_v53 = vld [vmem:[%s11591_s8 + $0x750] sm:$0xff] }
  0x4b   : > { %1382 = vst [vmem:[%s11596_s9 + $0x1d0] sm:$0xff] %v1381_v58  ;;  %v1501_v54 = vld [vmem:[%s11591_s8 + $0x760] sm:$0xff]  ;;  %v1503_v55 = vld [vmem:[%s11591_s8 + $0x770] sm:$0xff] }
  0x4c   : > { %1384 = vst [vmem:[%s11596_s9 + $0x1d8] sm:$0xff] %v1383_v59  ;;  %v1505_v56 = vld [vmem:[%s11591_s8 + $0x780] sm:$0xff]  ;;  %v1507_v57 = vld [vmem:[%s11591_s8 + $0x790] sm:$0xff] }
  0x4d   : > { %1386 = vst [vmem:[%s11596_s9 + $0x1e0] sm:$0xff] %v1385_v60  ;;  %v1509_v58 = vld [vmem:[%s11591_s8 + $0x7a0] sm:$0xff]  ;;  %v1511_v59 = vld [vmem:[%s11591_s8 + $0x7b0] sm:$0xff] }
  0x4e   : > { %1388 = vst [vmem:[%s11596_s9 + $0x1e8] sm:$0xff] %v1387_v61  ;;  %v1513_v60 = vld [vmem:[%s11591_s8 + $0x7c0] sm:$0xff]  ;;  %v1515_v61 = vld [vmem:[%s11591_s8 + $0x7d0] sm:$0xff] }
  0x4f   : > { %1390 = vst [vmem:[%s11596_s9 + $0x1f0] sm:$0xff] %v1389_v62  ;;  %v1517_v62 = vld [vmem:[%s11591_s8 + $0x7e0] sm:$0xff] }
  0x50   : > { %1392 = vst [vmem:[%s11596_s9 + $0x1f8] sm:$0xff] %v1391_v63  ;;  %v1519_v63 = vld [vmem:[%s11591_s8 + $0x7f0] sm:$0xff] }
  0x51   : > { %1394 = vst [vmem:[%s11596_s9 + $0x200] sm:$0xff] %v1393_v0  ;;  %v1521_v0 = vld [vmem:[%s11591_s8 + $0x800] sm:$0xff] }
  0x52   : > { %1396 = vst [vmem:[%s11596_s9 + $0x208] sm:$0xff] %v1395_v1  ;;  %v1523_v1 = vld [vmem:[%s11591_s8 + $0x810] sm:$0xff] }
  0x53   : > { %1398 = vst [vmem:[%s11596_s9 + $0x210] sm:$0xff] %v1397_v2  ;;  %v1525_v2 = vld [vmem:[%s11591_s8 + $0x820] sm:$0xff] }
  0x54   : > { %1400 = vst [vmem:[%s11596_s9 + $0x218] sm:$0xff] %v1399_v3  ;;  %v1527_v3 = vld [vmem:[%s11591_s8 + $0x830] sm:$0xff] }
  0x55   : > { %1402 = vst [vmem:[%s11596_s9 + $0x220] sm:$0xff] %v1401_v4  ;;  %v1529_v4 = vld [vmem:[%s11591_s8 + $0x840] sm:$0xff] }
  0x56   : > { %1404 = vst [vmem:[%s11596_s9 + $0x228] sm:$0xff] %v1403_v5  ;;  %v1531_v5 = vld [vmem:[%s11591_s8 + $0x850] sm:$0xff] }
  0x57   : > { %1406 = vst [vmem:[%s11596_s9 + $0x230] sm:$0xff] %v1405_v6  ;;  %v1533_v6 = vld [vmem:[%s11591_s8 + $0x860] sm:$0xff] }
  0x58   : > { %1408 = vst [vmem:[%s11596_s9 + $0x238] sm:$0xff] %v1407_v7  ;;  %v1535_v7 = vld [vmem:[%s11591_s8 + $0x870] sm:$0xff] }
  0x59   : > { %1410 = vst [vmem:[%s11596_s9 + $0x240] sm:$0xff] %v1409_v8  ;;  %v1537_v8 = vld [vmem:[%s11591_s8 + $0x880] sm:$0xff] }
  0x5a   : > { %1412 = vst [vmem:[%s11596_s9 + $0x248] sm:$0xff] %v1411_v9  ;;  %v1539_v9 = vld [vmem:[%s11591_s8 + $0x890] sm:$0xff] }
  0x5b   : > { %1414 = vst [vmem:[%s11596_s9 + $0x250] sm:$0xff] %v1413_v10  ;;  %v1541_v10 = vld [vmem:[%s11591_s8 + $0x8a0] sm:$0xff] }
  0x5c   : > { %1416 = vst [vmem:[%s11596_s9 + $0x258] sm:$0xff] %v1415_v11  ;;  %v1543_v11 = vld [vmem:[%s11591_s8 + $0x8b0] sm:$0xff] }
  0x5d   : > { %1418 = vst [vmem:[%s11596_s9 + $0x260] sm:$0xff] %v1417_v12  ;;  %v1545_v12 = vld [vmem:[%s11591_s8 + $0x8c0] sm:$0xff] }
  0x5e   : > { %1420 = vst [vmem:[%s11596_s9 + $0x268] sm:$0xff] %v1419_v13  ;;  %v1547_v13 = vld [vmem:[%s11591_s8 + $0x8d0] sm:$0xff] }
  0x5f   : > { %1422 = vst [vmem:[%s11596_s9 + $0x270] sm:$0xff] %v1421_v14  ;;  %v1549_v14 = vld [vmem:[%s11591_s8 + $0x8e0] sm:$0xff] }
  0x60   : > { %1424 = vst [vmem:[%s11596_s9 + $0x278] sm:$0xff] %v1423_v15  ;;  %v1551_v15 = vld [vmem:[%s11591_s8 + $0x8f0] sm:$0xff] }
  0x61   : > { %1426 = vst [vmem:[%s11596_s9 + $0x280] sm:$0xff] %v1425_v16  ;;  %v1553_v16 = vld [vmem:[%s11591_s8 + $0x900] sm:$0xff] }
  0x62   : > { %1428 = vst [vmem:[%s11596_s9 + $0x288] sm:$0xff] %v1427_v17  ;;  %v1555_v17 = vld [vmem:[%s11591_s8 + $0x910] sm:$0xff] }
  0x63   : > { %1430 = vst [vmem:[%s11596_s9 + $0x290] sm:$0xff] %v1429_v18  ;;  %v1557_v18 = vld [vmem:[%s11591_s8 + $0x920] sm:$0xff] }
  0x64   : > { %1432 = vst [vmem:[%s11596_s9 + $0x298] sm:$0xff] %v1431_v19  ;;  %v1559_v19 = vld [vmem:[%s11591_s8 + $0x930] sm:$0xff] }
  0x65   : > { %1434 = vst [vmem:[%s11596_s9 + $0x2a0] sm:$0xff] %v1433_v20  ;;  %v1561_v20 = vld [vmem:[%s11591_s8 + $0x940] sm:$0xff] }
  0x66   : > { %1436 = vst [vmem:[%s11596_s9 + $0x2a8] sm:$0xff] %v1435_v21  ;;  %v1563_v21 = vld [vmem:[%s11591_s8 + $0x950] sm:$0xff] }
  0x67   : > { %1438 = vst [vmem:[%s11596_s9 + $0x2b0] sm:$0xff] %v1437_v22  ;;  %v1565_v22 = vld [vmem:[%s11591_s8 + $0x960] sm:$0xff] }
  0x68   : > { %1440 = vst [vmem:[%s11596_s9 + $0x2b8] sm:$0xff] %v1439_v23  ;;  %v1567_v23 = vld [vmem:[%s11591_s8 + $0x970] sm:$0xff] }
  0x69   : > { %1442 = vst [vmem:[%s11596_s9 + $0x2c0] sm:$0xff] %v1441_v24  ;;  %v1569_v24 = vld [vmem:[%s11591_s8 + $0x980] sm:$0xff] }
  0x6a   : > { %1444 = vst [vmem:[%s11596_s9 + $0x2c8] sm:$0xff] %v1443_v25  ;;  %v1571_v25 = vld [vmem:[%s11591_s8 + $0x990] sm:$0xff] }
  0x6b   : > { %1446 = vst [vmem:[%s11596_s9 + $0x2d0] sm:$0xff] %v1445_v26  ;;  %v1573_v26 = vld [vmem:[%s11591_s8 + $0x9a0] sm:$0xff] }
  0x6c   : > { %1448 = vst [vmem:[%s11596_s9 + $0x2d8] sm:$0xff] %v1447_v27  ;;  %v1575_v27 = vld [vmem:[%s11591_s8 + $0x9b0] sm:$0xff] }
  0x6d   : > { %1450 = vst [vmem:[%s11596_s9 + $0x2e0] sm:$0xff] %v1449_v28  ;;  %v1577_v28 = vld [vmem:[%s11591_s8 + $0x9c0] sm:$0xff] }
  0x6e   : > { %1452 = vst [vmem:[%s11596_s9 + $0x2e8] sm:$0xff] %v1451_v29  ;;  %v1579_v29 = vld [vmem:[%s11591_s8 + $0x9d0] sm:$0xff] }
  0x6f   : > { %1454 = vst [vmem:[%s11596_s9 + $0x2f0] sm:$0xff] %v1453_v30  ;;  %v1581_v30 = vld [vmem:[%s11591_s8 + $0x9e0] sm:$0xff] }
  0x70   : > { %1456 = vst [vmem:[%s11596_s9 + $0x2f8] sm:$0xff] %v1455_v31  ;;  %v1583_v31 = vld [vmem:[%s11591_s8 + $0x9f0] sm:$0xff] }
  0x71   : > { %1458 = vst [vmem:[%s11596_s9 + $0x300] sm:$0xff] %v1457_v32  ;;  %v1585_v32 = vld [vmem:[%s11591_s8 + $0xa00] sm:$0xff] }
  0x72   : > { %1460 = vst [vmem:[%s11596_s9 + $0x308] sm:$0xff] %v1459_v33  ;;  %v1587_v33 = vld [vmem:[%s11591_s8 + $0xa10] sm:$0xff] }
  0x73   : > { %1462 = vst [vmem:[%s11596_s9 + $0x310] sm:$0xff] %v1461_v34  ;;  %v1589_v34 = vld [vmem:[%s11591_s8 + $0xa20] sm:$0xff] }
  0x74   : > { %1464 = vst [vmem:[%s11596_s9 + $0x318] sm:$0xff] %v1463_v35  ;;  %v1591_v35 = vld [vmem:[%s11591_s8 + $0xa30] sm:$0xff] }
  0x75   : > { %1466 = vst [vmem:[%s11596_s9 + $0x320] sm:$0xff] %v1465_v36  ;;  %v1593_v36 = vld [vmem:[%s11591_s8 + $0xa40] sm:$0xff] }
  0x76   : > { %1468 = vst [vmem:[%s11596_s9 + $0x328] sm:$0xff] %v1467_v37  ;;  %v1595_v37 = vld [vmem:[%s11591_s8 + $0xa50] sm:$0xff] }
  0x77   : > { %1470 = vst [vmem:[%s11596_s9 + $0x330] sm:$0xff] %v1469_v38  ;;  %v1597_v38 = vld [vmem:[%s11591_s8 + $0xa60] sm:$0xff] }
  0x78   : > { %1472 = vst [vmem:[%s11596_s9 + $0x338] sm:$0xff] %v1471_v39  ;;  %v1599_v39 = vld [vmem:[%s11591_s8 + $0xa70] sm:$0xff] }
  0x79   : > { %1474 = vst [vmem:[%s11596_s9 + $0x340] sm:$0xff] %v1473_v40  ;;  %v1601_v40 = vld [vmem:[%s11591_s8 + $0xa80] sm:$0xff] }
  0x7a   : > { %1476 = vst [vmem:[%s11596_s9 + $0x348] sm:$0xff] %v1475_v41  ;;  %v1603_v41 = vld [vmem:[%s11591_s8 + $0xa90] sm:$0xff] }
  0x7b   : > { %1478 = vst [vmem:[%s11596_s9 + $0x350] sm:$0xff] %v1477_v42  ;;  %v1605_v42 = vld [vmem:[%s11591_s8 + $0xaa0] sm:$0xff] }
  0x7c   : > { %1480 = vst [vmem:[%s11596_s9 + $0x358] sm:$0xff] %v1479_v43  ;;  %v1607_v43 = vld [vmem:[%s11591_s8 + $0xab0] sm:$0xff] }
  0x7d   : > { %1482 = vst [vmem:[%s11596_s9 + $0x360] sm:$0xff] %v1481_v44  ;;  %v1609_v44 = vld [vmem:[%s11591_s8 + $0xac0] sm:$0xff] }
  0x7e   : > { %1484 = vst [vmem:[%s11596_s9 + $0x368] sm:$0xff] %v1483_v45  ;;  %v1611_v45 = vld [vmem:[%s11591_s8 + $0xad0] sm:$0xff] }
  0x7f   : > { %1486 = vst [vmem:[%s11596_s9 + $0x370] sm:$0xff] %v1485_v46  ;;  %v1613_v46 = vld [vmem:[%s11591_s8 + $0xae0] sm:$0xff] }
  0x80   : > { %1488 = vst [vmem:[%s11596_s9 + $0x378] sm:$0xff] %v1487_v47  ;;  %v1615_v47 = vld [vmem:[%s11591_s8 + $0xaf0] sm:$0xff] }
  0x81   : > { %1490 = vst [vmem:[%s11596_s9 + $0x380] sm:$0xff] %v1489_v48  ;;  %v1617_v48 = vld [vmem:[%s11591_s8 + $0xb00] sm:$0xff] }
  0x82   : > { %1492 = vst [vmem:[%s11596_s9 + $0x388] sm:$0xff] %v1491_v49  ;;  %v1619_v49 = vld [vmem:[%s11591_s8 + $0xb10] sm:$0xff] }
  0x83   : > { %1494 = vst [vmem:[%s11596_s9 + $0x390] sm:$0xff] %v1493_v50  ;;  %v1621_v50 = vld [vmem:[%s11591_s8 + $0xb20] sm:$0xff] }
  0x84   : > { %1496 = vst [vmem:[%s11596_s9 + $0x398] sm:$0xff] %v1495_v51  ;;  %v1623_v51 = vld [vmem:[%s11591_s8 + $0xb30] sm:$0xff] }
  0x85   : > { %1498 = vst [vmem:[%s11596_s9 + $0x3a0] sm:$0xff] %v1497_v52  ;;  %v1625_v52 = vld [vmem:[%s11591_s8 + $0xb40] sm:$0xff] }
  0x86   : > { %1500 = vst [vmem:[%s11596_s9 + $0x3a8] sm:$0xff] %v1499_v53  ;;  %v1627_v53 = vld [vmem:[%s11591_s8 + $0xb50] sm:$0xff] }
  0x87   : > { %1502 = vst [vmem:[%s11596_s9 + $0x3b0] sm:$0xff] %v1501_v54  ;;  %v1629_v54 = vld [vmem:[%s11591_s8 + $0xb60] sm:$0xff] }
  0x88   : > { %1504 = vst [vmem:[%s11596_s9 + $0x3b8] sm:$0xff] %v1503_v55  ;;  %v1631_v55 = vld [vmem:[%s11591_s8 + $0xb70] sm:$0xff] }
  0x89   : > { %1506 = vst [vmem:[%s11596_s9 + $0x3c0] sm:$0xff] %v1505_v56  ;;  %v1633_v56 = vld [vmem:[%s11591_s8 + $0xb80] sm:$0xff] }
  0x8a   : > { %1508 = vst [vmem:[%s11596_s9 + $0x3c8] sm:$0xff] %v1507_v57  ;;  %v1635_v57 = vld [vmem:[%s11591_s8 + $0xb90] sm:$0xff] }
  0x8b   : > { %1510 = vst [vmem:[%s11596_s9 + $0x3d0] sm:$0xff] %v1509_v58  ;;  %v1637_v58 = vld [vmem:[%s11591_s8 + $0xba0] sm:$0xff] }
  0x8c   : > { %1512 = vst [vmem:[%s11596_s9 + $0x3d8] sm:$0xff] %v1511_v59  ;;  %v1639_v59 = vld [vmem:[%s11591_s8 + $0xbb0] sm:$0xff] }
  0x8d   : > { %1514 = vst [vmem:[%s11596_s9 + $0x3e0] sm:$0xff] %v1513_v60  ;;  %v1641_v60 = vld [vmem:[%s11591_s8 + $0xbc0] sm:$0xff] }
  0x8e   : > { %1516 = vst [vmem:[%s11596_s9 + $0x3e8] sm:$0xff] %v1515_v61  ;;  %v1643_v61 = vld [vmem:[%s11591_s8 + $0xbd0] sm:$0xff] }
  0x8f   : > { %1518 = vst [vmem:[%s11596_s9 + $0x3f0] sm:$0xff] %v1517_v62  ;;  %v1645_v62 = vld [vmem:[%s11591_s8 + $0xbe0] sm:$0xff] }
  0x90   : > { %1520 = vst [vmem:[%s11596_s9 + $0x3f8] sm:$0xff] %v1519_v63  ;;  %v1647_v63 = vld [vmem:[%s11591_s8 + $0xbf0] sm:$0xff] }
  0x91   : > { %1522 = vst [vmem:[%s11596_s9 + $0x400] sm:$0xff] %v1521_v0  ;;  %v1649_v0 = vld [vmem:[%s11591_s8 + $0xc00] sm:$0xff] }
  0x92   : > { %1524 = vst [vmem:[%s11596_s9 + $0x408] sm:$0xff] %v1523_v1  ;;  %v1651_v1 = vld [vmem:[%s11591_s8 + $0xc10] sm:$0xff] }
  0x93   : > { %1526 = vst [vmem:[%s11596_s9 + $0x410] sm:$0xff] %v1525_v2  ;;  %v1653_v2 = vld [vmem:[%s11591_s8 + $0xc20] sm:$0xff] }
  0x94   : > { %1528 = vst [vmem:[%s11596_s9 + $0x418] sm:$0xff] %v1527_v3  ;;  %v1655_v3 = vld [vmem:[%s11591_s8 + $0xc30] sm:$0xff] }
  0x95   : > { %1530 = vst [vmem:[%s11596_s9 + $0x420] sm:$0xff] %v1529_v4  ;;  %v1657_v4 = vld [vmem:[%s11591_s8 + $0xc40] sm:$0xff] }
  0x96   : > { %1532 = vst [vmem:[%s11596_s9 + $0x428] sm:$0xff] %v1531_v5  ;;  %v1659_v5 = vld [vmem:[%s11591_s8 + $0xc50] sm:$0xff] }
  0x97   : > { %1534 = vst [vmem:[%s11596_s9 + $0x430] sm:$0xff] %v1533_v6  ;;  %v1661_v6 = vld [vmem:[%s11591_s8 + $0xc60] sm:$0xff] }
  0x98   : > { %1536 = vst [vmem:[%s11596_s9 + $0x438] sm:$0xff] %v1535_v7  ;;  %v1663_v7 = vld [vmem:[%s11591_s8 + $0xc70] sm:$0xff] }
  0x99   : > { %1538 = vst [vmem:[%s11596_s9 + $0x440] sm:$0xff] %v1537_v8  ;;  %v1665_v8 = vld [vmem:[%s11591_s8 + $0xc80] sm:$0xff] }
  0x9a   : > { %1540 = vst [vmem:[%s11596_s9 + $0x448] sm:$0xff] %v1539_v9  ;;  %v1667_v9 = vld [vmem:[%s11591_s8 + $0xc90] sm:$0xff] }
  0x9b   : > { %1542 = vst [vmem:[%s11596_s9 + $0x450] sm:$0xff] %v1541_v10  ;;  %v1669_v10 = vld [vmem:[%s11591_s8 + $0xca0] sm:$0xff] }
  0x9c   : > { %1544 = vst [vmem:[%s11596_s9 + $0x458] sm:$0xff] %v1543_v11  ;;  %v1671_v11 = vld [vmem:[%s11591_s8 + $0xcb0] sm:$0xff] }
  0x9d   : > { %1546 = vst [vmem:[%s11596_s9 + $0x460] sm:$0xff] %v1545_v12  ;;  %v1673_v12 = vld [vmem:[%s11591_s8 + $0xcc0] sm:$0xff] }
  0x9e   : > { %1548 = vst [vmem:[%s11596_s9 + $0x468] sm:$0xff] %v1547_v13  ;;  %v1675_v13 = vld [vmem:[%s11591_s8 + $0xcd0] sm:$0xff] }
  0x9f   : > { %1550 = vst [vmem:[%s11596_s9 + $0x470] sm:$0xff] %v1549_v14  ;;  %v1677_v14 = vld [vmem:[%s11591_s8 + $0xce0] sm:$0xff] }
  0xa0   : > { %1552 = vst [vmem:[%s11596_s9 + $0x478] sm:$0xff] %v1551_v15  ;;  %v1679_v15 = vld [vmem:[%s11591_s8 + $0xcf0] sm:$0xff] }
  0xa1   : > { %1554 = vst [vmem:[%s11596_s9 + $0x480] sm:$0xff] %v1553_v16  ;;  %v1681_v16 = vld [vmem:[%s11591_s8 + $0xd00] sm:$0xff] }
  0xa2   : > { %1556 = vst [vmem:[%s11596_s9 + $0x488] sm:$0xff] %v1555_v17  ;;  %v1683_v17 = vld [vmem:[%s11591_s8 + $0xd10] sm:$0xff] }
  0xa3   : > { %1558 = vst [vmem:[%s11596_s9 + $0x490] sm:$0xff] %v1557_v18  ;;  %v1685_v18 = vld [vmem:[%s11591_s8 + $0xd20] sm:$0xff] }
  0xa4   : > { %1560 = vst [vmem:[%s11596_s9 + $0x498] sm:$0xff] %v1559_v19  ;;  %v1687_v19 = vld [vmem:[%s11591_s8 + $0xd30] sm:$0xff] }
  0xa5   : > { %1562 = vst [vmem:[%s11596_s9 + $0x4a0] sm:$0xff] %v1561_v20  ;;  %v1689_v20 = vld [vmem:[%s11591_s8 + $0xd40] sm:$0xff] }
  0xa6   : > { %1564 = vst [vmem:[%s11596_s9 + $0x4a8] sm:$0xff] %v1563_v21  ;;  %v1691_v21 = vld [vmem:[%s11591_s8 + $0xd50] sm:$0xff] }
  0xa7   : > { %1566 = vst [vmem:[%s11596_s9 + $0x4b0] sm:$0xff] %v1565_v22  ;;  %v1693_v22 = vld [vmem:[%s11591_s8 + $0xd60] sm:$0xff] }
  0xa8   : > { %1568 = vst [vmem:[%s11596_s9 + $0x4b8] sm:$0xff] %v1567_v23  ;;  %v1695_v23 = vld [vmem:[%s11591_s8 + $0xd70] sm:$0xff] }
  0xa9   : > { %1570 = vst [vmem:[%s11596_s9 + $0x4c0] sm:$0xff] %v1569_v24  ;;  %v1697_v24 = vld [vmem:[%s11591_s8 + $0xd80] sm:$0xff] }
  0xaa   : > { %1572 = vst [vmem:[%s11596_s9 + $0x4c8] sm:$0xff] %v1571_v25  ;;  %v1699_v25 = vld [vmem:[%s11591_s8 + $0xd90] sm:$0xff] }
  0xab   : > { %1574 = vst [vmem:[%s11596_s9 + $0x4d0] sm:$0xff] %v1573_v26  ;;  %v1701_v26 = vld [vmem:[%s11591_s8 + $0xda0] sm:$0xff] }
  0xac   : > { %1576 = vst [vmem:[%s11596_s9 + $0x4d8] sm:$0xff] %v1575_v27  ;;  %v1703_v27 = vld [vmem:[%s11591_s8 + $0xdb0] sm:$0xff] }
  0xad   : > { %1578 = vst [vmem:[%s11596_s9 + $0x4e0] sm:$0xff] %v1577_v28  ;;  %v1705_v28 = vld [vmem:[%s11591_s8 + $0xdc0] sm:$0xff] }
  0xae   : > { %1580 = vst [vmem:[%s11596_s9 + $0x4e8] sm:$0xff] %v1579_v29  ;;  %v1707_v29 = vld [vmem:[%s11591_s8 + $0xdd0] sm:$0xff] }
  0xaf   : > { %1582 = vst [vmem:[%s11596_s9 + $0x4f0] sm:$0xff] %v1581_v30  ;;  %v1709_v30 = vld [vmem:[%s11591_s8 + $0xde0] sm:$0xff] }
  0xb0   : > { %1584 = vst [vmem:[%s11596_s9 + $0x4f8] sm:$0xff] %v1583_v31  ;;  %v1711_v31 = vld [vmem:[%s11591_s8 + $0xdf0] sm:$0xff] }
  0xb1   : > { %1586 = vst [vmem:[%s11596_s9 + $0x500] sm:$0xff] %v1585_v32  ;;  %v1713_v32 = vld [vmem:[%s11591_s8 + $0xe00] sm:$0xff] }
  0xb2   : > { %1588 = vst [vmem:[%s11596_s9 + $0x508] sm:$0xff] %v1587_v33  ;;  %v1715_v33 = vld [vmem:[%s11591_s8 + $0xe10] sm:$0xff] }
  0xb3   : > { %1590 = vst [vmem:[%s11596_s9 + $0x510] sm:$0xff] %v1589_v34  ;;  %v1717_v34 = vld [vmem:[%s11591_s8 + $0xe20] sm:$0xff] }
  0xb4   : > { %1592 = vst [vmem:[%s11596_s9 + $0x518] sm:$0xff] %v1591_v35  ;;  %v1719_v35 = vld [vmem:[%s11591_s8 + $0xe30] sm:$0xff] }
  0xb5   : > { %1594 = vst [vmem:[%s11596_s9 + $0x520] sm:$0xff] %v1593_v36  ;;  %v1721_v36 = vld [vmem:[%s11591_s8 + $0xe40] sm:$0xff] }
  0xb6   : > { %1596 = vst [vmem:[%s11596_s9 + $0x528] sm:$0xff] %v1595_v37  ;;  %v1723_v37 = vld [vmem:[%s11591_s8 + $0xe50] sm:$0xff] }
  0xb7   : > { %1598 = vst [vmem:[%s11596_s9 + $0x530] sm:$0xff] %v1597_v38  ;;  %v1725_v38 = vld [vmem:[%s11591_s8 + $0xe60] sm:$0xff] }
  0xb8   : > { %1600 = vst [vmem:[%s11596_s9 + $0x538] sm:$0xff] %v1599_v39  ;;  %v1727_v39 = vld [vmem:[%s11591_s8 + $0xe70] sm:$0xff] }
  0xb9   : > { %1602 = vst [vmem:[%s11596_s9 + $0x540] sm:$0xff] %v1601_v40  ;;  %v1729_v40 = vld [vmem:[%s11591_s8 + $0xe80] sm:$0xff] }
  0xba   : > { %1604 = vst [vmem:[%s11596_s9 + $0x548] sm:$0xff] %v1603_v41  ;;  %v1731_v41 = vld [vmem:[%s11591_s8 + $0xe90] sm:$0xff] }
  0xbb   : > { %1606 = vst [vmem:[%s11596_s9 + $0x550] sm:$0xff] %v1605_v42  ;;  %v1733_v42 = vld [vmem:[%s11591_s8 + $0xea0] sm:$0xff] }
  0xbc   : > { %1608 = vst [vmem:[%s11596_s9 + $0x558] sm:$0xff] %v1607_v43  ;;  %v1735_v43 = vld [vmem:[%s11591_s8 + $0xeb0] sm:$0xff] }
  0xbd   : > { %1610 = vst [vmem:[%s11596_s9 + $0x560] sm:$0xff] %v1609_v44  ;;  %v1737_v44 = vld [vmem:[%s11591_s8 + $0xec0] sm:$0xff] }
  0xbe   : > { %1612 = vst [vmem:[%s11596_s9 + $0x568] sm:$0xff] %v1611_v45  ;;  %v1739_v45 = vld [vmem:[%s11591_s8 + $0xed0] sm:$0xff] }
  0xbf   : > { %1614 = vst [vmem:[%s11596_s9 + $0x570] sm:$0xff] %v1613_v46  ;;  %v1741_v46 = vld [vmem:[%s11591_s8 + $0xee0] sm:$0xff] }
  0xc0   : > { %1616 = vst [vmem:[%s11596_s9 + $0x578] sm:$0xff] %v1615_v47  ;;  %v1743_v47 = vld [vmem:[%s11591_s8 + $0xef0] sm:$0xff] }
  0xc1   : > { %1618 = vst [vmem:[%s11596_s9 + $0x580] sm:$0xff] %v1617_v48  ;;  %v1745_v48 = vld [vmem:[%s11591_s8 + $0xf00] sm:$0xff] }
  0xc2   : > { %1620 = vst [vmem:[%s11596_s9 + $0x588] sm:$0xff] %v1619_v49  ;;  %v1747_v49 = vld [vmem:[%s11591_s8 + $0xf10] sm:$0xff] }
  0xc3   : > { %1622 = vst [vmem:[%s11596_s9 + $0x590] sm:$0xff] %v1621_v50  ;;  %v1749_v50 = vld [vmem:[%s11591_s8 + $0xf20] sm:$0xff] }
  0xc4   : > { %1624 = vst [vmem:[%s11596_s9 + $0x598] sm:$0xff] %v1623_v51  ;;  %v1751_v51 = vld [vmem:[%s11591_s8 + $0xf30] sm:$0xff] }
  0xc5   : > { %1626 = vst [vmem:[%s11596_s9 + $0x5a0] sm:$0xff] %v1625_v52  ;;  %v1753_v52 = vld [vmem:[%s11591_s8 + $0xf40] sm:$0xff] }
  0xc6   : > { %1628 = vst [vmem:[%s11596_s9 + $0x5a8] sm:$0xff] %v1627_v53  ;;  %v1755_v53 = vld [vmem:[%s11591_s8 + $0xf50] sm:$0xff] }
  0xc7   : > { %1630 = vst [vmem:[%s11596_s9 + $0x5b0] sm:$0xff] %v1629_v54  ;;  %v1757_v54 = vld [vmem:[%s11591_s8 + $0xf60] sm:$0xff] }
  0xc8   : > { %1632 = vst [vmem:[%s11596_s9 + $0x5b8] sm:$0xff] %v1631_v55  ;;  %v1759_v55 = vld [vmem:[%s11591_s8 + $0xf70] sm:$0xff] }
  0xc9   : > { %1634 = vst [vmem:[%s11596_s9 + $0x5c0] sm:$0xff] %v1633_v56  ;;  %v1761_v56 = vld [vmem:[%s11591_s8 + $0xf80] sm:$0xff] }
  0xca   : > { %1636 = vst [vmem:[%s11596_s9 + $0x5c8] sm:$0xff] %v1635_v57  ;;  %v1763_v57 = vld [vmem:[%s11591_s8 + $0xf90] sm:$0xff] }
  0xcb   : > { %1638 = vst [vmem:[%s11596_s9 + $0x5d0] sm:$0xff] %v1637_v58  ;;  %v1765_v58 = vld [vmem:[%s11591_s8 + $0xfa0] sm:$0xff] }
  0xcc   : > { %1640 = vst [vmem:[%s11596_s9 + $0x5d8] sm:$0xff] %v1639_v59  ;;  %v1767_v59 = vld [vmem:[%s11591_s8 + $0xfb0] sm:$0xff] }
  0xcd   : > { %1642 = vst [vmem:[%s11596_s9 + $0x5e0] sm:$0xff] %v1641_v60  ;;  %v1769_v60 = vld [vmem:[%s11591_s8 + $0xfc0] sm:$0xff] }
  0xce   : > { %1644 = vst [vmem:[%s11596_s9 + $0x5e8] sm:$0xff] %v1643_v61  ;;  %v1771_v61 = vld [vmem:[%s11591_s8 + $0xfd0] sm:$0xff] }
  0xcf   : > { %1646 = vst [vmem:[%s11596_s9 + $0x5f0] sm:$0xff] %v1645_v62  ;;  %v1773_v62 = vld [vmem:[%s11591_s8 + $0xfe0] sm:$0xff] }
  0xd0   : > { %1648 = vst [vmem:[%s11596_s9 + $0x5f8] sm:$0xff] %v1647_v63  ;;  %v1775_v63 = vld [vmem:[%s11591_s8 + $0xff0] sm:$0xff] }
  0xd1   : > { %1650 = vst [vmem:[%s11596_s9 + $0x600] sm:$0xff] %v1649_v0  ;;  %v1777_v0 = vld [vmem:[%s11591_s8 + $0x1000] sm:$0xff] }
  0xd2   : > { %1652 = vst [vmem:[%s11596_s9 + $0x608] sm:$0xff] %v1651_v1  ;;  %v1779_v1 = vld [vmem:[%s11591_s8 + $0x1010] sm:$0xff] }
  0xd3   : > { %1654 = vst [vmem:[%s11596_s9 + $0x610] sm:$0xff] %v1653_v2  ;;  %v1781_v2 = vld [vmem:[%s11591_s8 + $0x1020] sm:$0xff] }
  0xd4   : > { %1656 = vst [vmem:[%s11596_s9 + $0x618] sm:$0xff] %v1655_v3  ;;  %v1783_v3 = vld [vmem:[%s11591_s8 + $0x1030] sm:$0xff] }
  0xd5   : > { %1658 = vst [vmem:[%s11596_s9 + $0x620] sm:$0xff] %v1657_v4  ;;  %v1785_v4 = vld [vmem:[%s11591_s8 + $0x1040] sm:$0xff] }
  0xd6   : > { %1660 = vst [vmem:[%s11596_s9 + $0x628] sm:$0xff] %v1659_v5  ;;  %v1787_v5 = vld [vmem:[%s11591_s8 + $0x1050] sm:$0xff] }
  0xd7   : > { %1662 = vst [vmem:[%s11596_s9 + $0x630] sm:$0xff] %v1661_v6  ;;  %v1789_v6 = vld [vmem:[%s11591_s8 + $0x1060] sm:$0xff] }
  0xd8   : > { %1664 = vst [vmem:[%s11596_s9 + $0x638] sm:$0xff] %v1663_v7  ;;  %v1791_v7 = vld [vmem:[%s11591_s8 + $0x1070] sm:$0xff] }
  0xd9   : > { %1666 = vst [vmem:[%s11596_s9 + $0x640] sm:$0xff] %v1665_v8  ;;  %v1793_v8 = vld [vmem:[%s11591_s8 + $0x1080] sm:$0xff] }
  0xda   : > { %1668 = vst [vmem:[%s11596_s9 + $0x648] sm:$0xff] %v1667_v9  ;;  %v1795_v9 = vld [vmem:[%s11591_s8 + $0x1090] sm:$0xff] }
  0xdb   : > { %1670 = vst [vmem:[%s11596_s9 + $0x650] sm:$0xff] %v1669_v10  ;;  %v1797_v10 = vld [vmem:[%s11591_s8 + $0x10a0] sm:$0xff] }
  0xdc   : > { %1672 = vst [vmem:[%s11596_s9 + $0x658] sm:$0xff] %v1671_v11  ;;  %v1799_v11 = vld [vmem:[%s11591_s8 + $0x10b0] sm:$0xff] }
  0xdd   : > { %1674 = vst [vmem:[%s11596_s9 + $0x660] sm:$0xff] %v1673_v12  ;;  %v1801_v12 = vld [vmem:[%s11591_s8 + $0x10c0] sm:$0xff] }
  0xde   : > { %1676 = vst [vmem:[%s11596_s9 + $0x668] sm:$0xff] %v1675_v13  ;;  %v1803_v13 = vld [vmem:[%s11591_s8 + $0x10d0] sm:$0xff] }
  0xdf   : > { %1678 = vst [vmem:[%s11596_s9 + $0x670] sm:$0xff] %v1677_v14  ;;  %v1805_v14 = vld [vmem:[%s11591_s8 + $0x10e0] sm:$0xff] }
  0xe0   : > { %1680 = vst [vmem:[%s11596_s9 + $0x678] sm:$0xff] %v1679_v15  ;;  %v1807_v15 = vld [vmem:[%s11591_s8 + $0x10f0] sm:$0xff] }
  0xe1   : > { %1682 = vst [vmem:[%s11596_s9 + $0x680] sm:$0xff] %v1681_v16  ;;  %v1809_v16 = vld [vmem:[%s11591_s8 + $0x1100] sm:$0xff] }
  0xe2   : > { %1684 = vst [vmem:[%s11596_s9 + $0x688] sm:$0xff] %v1683_v17  ;;  %v1811_v17 = vld [vmem:[%s11591_s8 + $0x1110] sm:$0xff] }
  0xe3   : > { %1686 = vst [vmem:[%s11596_s9 + $0x690] sm:$0xff] %v1685_v18  ;;  %v1813_v18 = vld [vmem:[%s11591_s8 + $0x1120] sm:$0xff] }
  0xe4   : > { %1688 = vst [vmem:[%s11596_s9 + $0x698] sm:$0xff] %v1687_v19  ;;  %v1815_v19 = vld [vmem:[%s11591_s8 + $0x1130] sm:$0xff] }
  0xe5   : > { %1690 = vst [vmem:[%s11596_s9 + $0x6a0] sm:$0xff] %v1689_v20  ;;  %v1817_v20 = vld [vmem:[%s11591_s8 + $0x1140] sm:$0xff] }
  0xe6   : > { %1692 = vst [vmem:[%s11596_s9 + $0x6a8] sm:$0xff] %v1691_v21  ;;  %v1819_v21 = vld [vmem:[%s11591_s8 + $0x1150] sm:$0xff] }
  0xe7   : > { %1694 = vst [vmem:[%s11596_s9 + $0x6b0] sm:$0xff] %v1693_v22  ;;  %v1821_v22 = vld [vmem:[%s11591_s8 + $0x1160] sm:$0xff] }
  0xe8   : > { %1696 = vst [vmem:[%s11596_s9 + $0x6b8] sm:$0xff] %v1695_v23  ;;  %v1823_v23 = vld [vmem:[%s11591_s8 + $0x1170] sm:$0xff] }
  0xe9   : > { %1698 = vst [vmem:[%s11596_s9 + $0x6c0] sm:$0xff] %v1697_v24  ;;  %v1825_v24 = vld [vmem:[%s11591_s8 + $0x1180] sm:$0xff] }
  0xea   : > { %1700 = vst [vmem:[%s11596_s9 + $0x6c8] sm:$0xff] %v1699_v25  ;;  %v1827_v25 = vld [vmem:[%s11591_s8 + $0x1190] sm:$0xff] }
  0xeb   : > { %1702 = vst [vmem:[%s11596_s9 + $0x6d0] sm:$0xff] %v1701_v26  ;;  %v1829_v26 = vld [vmem:[%s11591_s8 + $0x11a0] sm:$0xff] }
  0xec   : > { %1704 = vst [vmem:[%s11596_s9 + $0x6d8] sm:$0xff] %v1703_v27  ;;  %v1831_v27 = vld [vmem:[%s11591_s8 + $0x11b0] sm:$0xff] }
  0xed   : > { %1706 = vst [vmem:[%s11596_s9 + $0x6e0] sm:$0xff] %v1705_v28  ;;  %v1833_v28 = vld [vmem:[%s11591_s8 + $0x11c0] sm:$0xff] }
  0xee   : > { %1708 = vst [vmem:[%s11596_s9 + $0x6e8] sm:$0xff] %v1707_v29  ;;  %v1835_v29 = vld [vmem:[%s11591_s8 + $0x11d0] sm:$0xff] }
  0xef   : > { %1710 = vst [vmem:[%s11596_s9 + $0x6f0] sm:$0xff] %v1709_v30  ;;  %v1837_v30 = vld [vmem:[%s11591_s8 + $0x11e0] sm:$0xff] }
  0xf0   : > { %1712 = vst [vmem:[%s11596_s9 + $0x6f8] sm:$0xff] %v1711_v31  ;;  %v1839_v31 = vld [vmem:[%s11591_s8 + $0x11f0] sm:$0xff] }
  0xf1   : > { %1714 = vst [vmem:[%s11596_s9 + $0x700] sm:$0xff] %v1713_v32  ;;  %v1841_v32 = vld [vmem:[%s11591_s8 + $0x1200] sm:$0xff] }
  0xf2   : > { %1716 = vst [vmem:[%s11596_s9 + $0x708] sm:$0xff] %v1715_v33  ;;  %v1843_v33 = vld [vmem:[%s11591_s8 + $0x1210] sm:$0xff] }
  0xf3   : > { %1718 = vst [vmem:[%s11596_s9 + $0x710] sm:$0xff] %v1717_v34  ;;  %v1845_v34 = vld [vmem:[%s11591_s8 + $0x1220] sm:$0xff] }
  0xf4   : > { %1720 = vst [vmem:[%s11596_s9 + $0x718] sm:$0xff] %v1719_v35  ;;  %v1847_v35 = vld [vmem:[%s11591_s8 + $0x1230] sm:$0xff] }
  0xf5   : > { %1722 = vst [vmem:[%s11596_s9 + $0x720] sm:$0xff] %v1721_v36  ;;  %v1849_v36 = vld [vmem:[%s11591_s8 + $0x1240] sm:$0xff] }
  0xf6   : > { %1724 = vst [vmem:[%s11596_s9 + $0x728] sm:$0xff] %v1723_v37  ;;  %v1851_v37 = vld [vmem:[%s11591_s8 + $0x1250] sm:$0xff] }
  0xf7   : > { %1726 = vst [vmem:[%s11596_s9 + $0x730] sm:$0xff] %v1725_v38  ;;  %v1853_v38 = vld [vmem:[%s11591_s8 + $0x1260] sm:$0xff] }
  0xf8   : > { %1728 = vst [vmem:[%s11596_s9 + $0x738] sm:$0xff] %v1727_v39  ;;  %v1855_v39 = vld [vmem:[%s11591_s8 + $0x1270] sm:$0xff] }
  0xf9   : > { %1730 = vst [vmem:[%s11596_s9 + $0x740] sm:$0xff] %v1729_v40  ;;  %v1857_v40 = vld [vmem:[%s11591_s8 + $0x1280] sm:$0xff] }
  0xfa   : > { %1732 = vst [vmem:[%s11596_s9 + $0x748] sm:$0xff] %v1731_v41  ;;  %v1859_v41 = vld [vmem:[%s11591_s8 + $0x1290] sm:$0xff] }
  0xfb   : > { %1734 = vst [vmem:[%s11596_s9 + $0x750] sm:$0xff] %v1733_v42  ;;  %v1861_v42 = vld [vmem:[%s11591_s8 + $0x12a0] sm:$0xff] }
  0xfc   : > { %1736 = vst [vmem:[%s11596_s9 + $0x758] sm:$0xff] %v1735_v43  ;;  %v1863_v43 = vld [vmem:[%s11591_s8 + $0x12b0] sm:$0xff] }
  0xfd   : > { %1738 = vst [vmem:[%s11596_s9 + $0x760] sm:$0xff] %v1737_v44  ;;  %v1865_v44 = vld [vmem:[%s11591_s8 + $0x12c0] sm:$0xff] }
  0xfe   : > { %1740 = vst [vmem:[%s11596_s9 + $0x768] sm:$0xff] %v1739_v45  ;;  %v1867_v45 = vld [vmem:[%s11591_s8 + $0x12d0] sm:$0xff] }
  0xff   : > { %1742 = vst [vmem:[%s11596_s9 + $0x770] sm:$0xff] %v1741_v46  ;;  %v1869_v46 = vld [vmem:[%s11591_s8 + $0x12e0] sm:$0xff] }
 0x100   : > { %1744 = vst [vmem:[%s11596_s9 + $0x778] sm:$0xff] %v1743_v47  ;;  %v1871_v47 = vld [vmem:[%s11591_s8 + $0x12f0] sm:$0xff] }
 0x101   : > { %1746 = vst [vmem:[%s11596_s9 + $0x780] sm:$0xff] %v1745_v48  ;;  %v1873_v48 = vld [vmem:[%s11591_s8 + $0x1300] sm:$0xff] }
 0x102   : > { %1748 = vst [vmem:[%s11596_s9 + $0x788] sm:$0xff] %v1747_v49  ;;  %v1875_v49 = vld [vmem:[%s11591_s8 + $0x1310] sm:$0xff] }
 0x103   : > { %1750 = vst [vmem:[%s11596_s9 + $0x790] sm:$0xff] %v1749_v50  ;;  %v1877_v50 = vld [vmem:[%s11591_s8 + $0x1320] sm:$0xff] }
 0x104   : > { %1752 = vst [vmem:[%s11596_s9 + $0x798] sm:$0xff] %v1751_v51  ;;  %v1879_v51 = vld [vmem:[%s11591_s8 + $0x1330] sm:$0xff] }
 0x105   : > { %1754 = vst [vmem:[%s11596_s9 + $0x7a0] sm:$0xff] %v1753_v52  ;;  %v1881_v52 = vld [vmem:[%s11591_s8 + $0x1340] sm:$0xff] }
 0x106   : > { %1756 = vst [vmem:[%s11596_s9 + $0x7a8] sm:$0xff] %v1755_v53  ;;  %v1883_v53 = vld [vmem:[%s11591_s8 + $0x1350] sm:$0xff] }
 0x107   : > { %1758 = vst [vmem:[%s11596_s9 + $0x7b0] sm:$0xff] %v1757_v54  ;;  %v1885_v54 = vld [vmem:[%s11591_s8 + $0x1360] sm:$0xff] }
 0x108   : > { %1760 = vst [vmem:[%s11596_s9 + $0x7b8] sm:$0xff] %v1759_v55  ;;  %v1887_v55 = vld [vmem:[%s11591_s8 + $0x1370] sm:$0xff] }
 0x109   : > { %1762 = vst [vmem:[%s11596_s9 + $0x7c0] sm:$0xff] %v1761_v56  ;;  %v1889_v56 = vld [vmem:[%s11591_s8 + $0x1380] sm:$0xff] }
 0x10a   : > { %1764 = vst [vmem:[%s11596_s9 + $0x7c8] sm:$0xff] %v1763_v57  ;;  %v1891_v57 = vld [vmem:[%s11591_s8 + $0x1390] sm:$0xff] }
 0x10b   : > { %1766 = vst [vmem:[%s11596_s9 + $0x7d0] sm:$0xff] %v1765_v58  ;;  %v1893_v58 = vld [vmem:[%s11591_s8 + $0x13a0] sm:$0xff] }
 0x10c   : > { %1768 = vst [vmem:[%s11596_s9 + $0x7d8] sm:$0xff] %v1767_v59  ;;  %v1895_v59 = vld [vmem:[%s11591_s8 + $0x13b0] sm:$0xff] }
 0x10d   : > { %1770 = vst [vmem:[%s11596_s9 + $0x7e0] sm:$0xff] %v1769_v60  ;;  %v1897_v60 = vld [vmem:[%s11591_s8 + $0x13c0] sm:$0xff] }
 0x10e   : > { %1772 = vst [vmem:[%s11596_s9 + $0x7e8] sm:$0xff] %v1771_v61  ;;  %v1899_v61 = vld [vmem:[%s11591_s8 + $0x13d0] sm:$0xff] }
 0x10f   : > { %1774 = vst [vmem:[%s11596_s9 + $0x7f0] sm:$0xff] %v1773_v62  ;;  %v1901_v62 = vld [vmem:[%s11591_s8 + $0x13e0] sm:$0xff] }
 0x110   : > { %1776 = vst [vmem:[%s11596_s9 + $0x7f8] sm:$0xff] %v1775_v63  ;;  %v1903_v63 = vld [vmem:[%s11591_s8 + $0x13f0] sm:$0xff] }
 0x111   : > { %1778 = vst [vmem:[%s11596_s9 + $0x800] sm:$0xff] %v1777_v0  ;;  %v1905_v0 = vld [vmem:[%s11591_s8 + $0x1400] sm:$0xff] }
 0x112   : > { %1780 = vst [vmem:[%s11596_s9 + $0x808] sm:$0xff] %v1779_v1  ;;  %v1907_v1 = vld [vmem:[%s11591_s8 + $0x1410] sm:$0xff] }
 0x113   : > { %1782 = vst [vmem:[%s11596_s9 + $0x810] sm:$0xff] %v1781_v2  ;;  %v1909_v2 = vld [vmem:[%s11591_s8 + $0x1420] sm:$0xff] }
 0x114   : > { %1784 = vst [vmem:[%s11596_s9 + $0x818] sm:$0xff] %v1783_v3  ;;  %v1911_v3 = vld [vmem:[%s11591_s8 + $0x1430] sm:$0xff] }
 0x115   : > { %1786 = vst [vmem:[%s11596_s9 + $0x820] sm:$0xff] %v1785_v4  ;;  %v1913_v4 = vld [vmem:[%s11591_s8 + $0x1440] sm:$0xff] }
 0x116   : > { %1788 = vst [vmem:[%s11596_s9 + $0x828] sm:$0xff] %v1787_v5  ;;  %v1915_v5 = vld [vmem:[%s11591_s8 + $0x1450] sm:$0xff] }
 0x117   : > { %1790 = vst [vmem:[%s11596_s9 + $0x830] sm:$0xff] %v1789_v6  ;;  %v1917_v6 = vld [vmem:[%s11591_s8 + $0x1460] sm:$0xff] }
 0x118   : > { %1792 = vst [vmem:[%s11596_s9 + $0x838] sm:$0xff] %v1791_v7  ;;  %v1919_v7 = vld [vmem:[%s11591_s8 + $0x1470] sm:$0xff] }
 0x119   : > { %1794 = vst [vmem:[%s11596_s9 + $0x840] sm:$0xff] %v1793_v8  ;;  %v1921_v8 = vld [vmem:[%s11591_s8 + $0x1480] sm:$0xff] }
 0x11a   : > { %1796 = vst [vmem:[%s11596_s9 + $0x848] sm:$0xff] %v1795_v9  ;;  %v1923_v9 = vld [vmem:[%s11591_s8 + $0x1490] sm:$0xff] }
 0x11b   : > { %1798 = vst [vmem:[%s11596_s9 + $0x850] sm:$0xff] %v1797_v10  ;;  %v1925_v10 = vld [vmem:[%s11591_s8 + $0x14a0] sm:$0xff] }
 0x11c   : > { %1800 = vst [vmem:[%s11596_s9 + $0x858] sm:$0xff] %v1799_v11  ;;  %v1927_v11 = vld [vmem:[%s11591_s8 + $0x14b0] sm:$0xff] }
 0x11d   : > { %1802 = vst [vmem:[%s11596_s9 + $0x860] sm:$0xff] %v1801_v12  ;;  %v1929_v12 = vld [vmem:[%s11591_s8 + $0x14c0] sm:$0xff] }
 0x11e   : > { %1804 = vst [vmem:[%s11596_s9 + $0x868] sm:$0xff] %v1803_v13  ;;  %v1931_v13 = vld [vmem:[%s11591_s8 + $0x14d0] sm:$0xff] }
 0x11f   : > { %1806 = vst [vmem:[%s11596_s9 + $0x870] sm:$0xff] %v1805_v14  ;;  %v1933_v14 = vld [vmem:[%s11591_s8 + $0x14e0] sm:$0xff] }
 0x120   : > { %1808 = vst [vmem:[%s11596_s9 + $0x878] sm:$0xff] %v1807_v15  ;;  %v1935_v15 = vld [vmem:[%s11591_s8 + $0x14f0] sm:$0xff] }
 0x121   : > { %1810 = vst [vmem:[%s11596_s9 + $0x880] sm:$0xff] %v1809_v16  ;;  %v1937_v16 = vld [vmem:[%s11591_s8 + $0x1500] sm:$0xff] }
 0x122   : > { %1812 = vst [vmem:[%s11596_s9 + $0x888] sm:$0xff] %v1811_v17  ;;  %v1939_v17 = vld [vmem:[%s11591_s8 + $0x1510] sm:$0xff] }
 0x123   : > { %1814 = vst [vmem:[%s11596_s9 + $0x890] sm:$0xff] %v1813_v18  ;;  %v1941_v18 = vld [vmem:[%s11591_s8 + $0x1520] sm:$0xff] }
 0x124   : > { %1816 = vst [vmem:[%s11596_s9 + $0x898] sm:$0xff] %v1815_v19  ;;  %v1943_v19 = vld [vmem:[%s11591_s8 + $0x1530] sm:$0xff] }
 0x125   : > { %1818 = vst [vmem:[%s11596_s9 + $0x8a0] sm:$0xff] %v1817_v20  ;;  %v1945_v20 = vld [vmem:[%s11591_s8 + $0x1540] sm:$0xff] }
 0x126   : > { %1820 = vst [vmem:[%s11596_s9 + $0x8a8] sm:$0xff] %v1819_v21  ;;  %v1947_v21 = vld [vmem:[%s11591_s8 + $0x1550] sm:$0xff] }
 0x127   : > { %1822 = vst [vmem:[%s11596_s9 + $0x8b0] sm:$0xff] %v1821_v22  ;;  %v1949_v22 = vld [vmem:[%s11591_s8 + $0x1560] sm:$0xff] }
 0x128   : > { %1824 = vst [vmem:[%s11596_s9 + $0x8b8] sm:$0xff] %v1823_v23  ;;  %v1951_v23 = vld [vmem:[%s11591_s8 + $0x1570] sm:$0xff] }
 0x129   : > { %1826 = vst [vmem:[%s11596_s9 + $0x8c0] sm:$0xff] %v1825_v24  ;;  %v1953_v24 = vld [vmem:[%s11591_s8 + $0x1580] sm:$0xff] }
 0x12a   : > { %1828 = vst [vmem:[%s11596_s9 + $0x8c8] sm:$0xff] %v1827_v25  ;;  %v1955_v25 = vld [vmem:[%s11591_s8 + $0x1590] sm:$0xff] }
 0x12b   : > { %1830 = vst [vmem:[%s11596_s9 + $0x8d0] sm:$0xff] %v1829_v26  ;;  %v1957_v26 = vld [vmem:[%s11591_s8 + $0x15a0] sm:$0xff] }
 0x12c   : > { %1832 = vst [vmem:[%s11596_s9 + $0x8d8] sm:$0xff] %v1831_v27  ;;  %v1959_v27 = vld [vmem:[%s11591_s8 + $0x15b0] sm:$0xff] }
 0x12d   : > { %1834 = vst [vmem:[%s11596_s9 + $0x8e0] sm:$0xff] %v1833_v28  ;;  %v1961_v28 = vld [vmem:[%s11591_s8 + $0x15c0] sm:$0xff] }
 0x12e   : > { %1836 = vst [vmem:[%s11596_s9 + $0x8e8] sm:$0xff] %v1835_v29  ;;  %v1963_v29 = vld [vmem:[%s11591_s8 + $0x15d0] sm:$0xff] }
 0x12f   : > { %1838 = vst [vmem:[%s11596_s9 + $0x8f0] sm:$0xff] %v1837_v30  ;;  %v1965_v30 = vld [vmem:[%s11591_s8 + $0x15e0] sm:$0xff] }
 0x130   : > { %1840 = vst [vmem:[%s11596_s9 + $0x8f8] sm:$0xff] %v1839_v31  ;;  %v1967_v31 = vld [vmem:[%s11591_s8 + $0x15f0] sm:$0xff] }
 0x131   : > { %1842 = vst [vmem:[%s11596_s9 + $0x900] sm:$0xff] %v1841_v32  ;;  %v1969_v32 = vld [vmem:[%s11591_s8 + $0x1600] sm:$0xff] }
 0x132   : > { %1844 = vst [vmem:[%s11596_s9 + $0x908] sm:$0xff] %v1843_v33  ;;  %v1971_v33 = vld [vmem:[%s11591_s8 + $0x1610] sm:$0xff] }
 0x133   : > { %1846 = vst [vmem:[%s11596_s9 + $0x910] sm:$0xff] %v1845_v34  ;;  %v1973_v34 = vld [vmem:[%s11591_s8 + $0x1620] sm:$0xff] }
 0x134   : > { %1848 = vst [vmem:[%s11596_s9 + $0x918] sm:$0xff] %v1847_v35  ;;  %v1975_v35 = vld [vmem:[%s11591_s8 + $0x1630] sm:$0xff] }
 0x135   : > { %1850 = vst [vmem:[%s11596_s9 + $0x920] sm:$0xff] %v1849_v36  ;;  %v1977_v36 = vld [vmem:[%s11591_s8 + $0x1640] sm:$0xff] }
 0x136   : > { %1852 = vst [vmem:[%s11596_s9 + $0x928] sm:$0xff] %v1851_v37  ;;  %v1979_v37 = vld [vmem:[%s11591_s8 + $0x1650] sm:$0xff] }
 0x137   : > { %1854 = vst [vmem:[%s11596_s9 + $0x930] sm:$0xff] %v1853_v38  ;;  %v1981_v38 = vld [vmem:[%s11591_s8 + $0x1660] sm:$0xff] }
 0x138   : > { %1856 = vst [vmem:[%s11596_s9 + $0x938] sm:$0xff] %v1855_v39  ;;  %v1983_v39 = vld [vmem:[%s11591_s8 + $0x1670] sm:$0xff] }
 0x139   : > { %1858 = vst [vmem:[%s11596_s9 + $0x940] sm:$0xff] %v1857_v40  ;;  %v1985_v40 = vld [vmem:[%s11591_s8 + $0x1680] sm:$0xff] }
 0x13a   : > { %1860 = vst [vmem:[%s11596_s9 + $0x948] sm:$0xff] %v1859_v41  ;;  %v1987_v41 = vld [vmem:[%s11591_s8 + $0x1690] sm:$0xff] }
 0x13b   : > { %1862 = vst [vmem:[%s11596_s9 + $0x950] sm:$0xff] %v1861_v42  ;;  %v1989_v42 = vld [vmem:[%s11591_s8 + $0x16a0] sm:$0xff] }
 0x13c   : > { %1864 = vst [vmem:[%s11596_s9 + $0x958] sm:$0xff] %v1863_v43  ;;  %v1991_v43 = vld [vmem:[%s11591_s8 + $0x16b0] sm:$0xff] }
 0x13d   : > { %1866 = vst [vmem:[%s11596_s9 + $0x960] sm:$0xff] %v1865_v44  ;;  %v1993_v44 = vld [vmem:[%s11591_s8 + $0x16c0] sm:$0xff] }
 0x13e   : > { %1868 = vst [vmem:[%s11596_s9 + $0x968] sm:$0xff] %v1867_v45  ;;  %v1995_v45 = vld [vmem:[%s11591_s8 + $0x16d0] sm:$0xff] }
 0x13f   : > { %1870 = vst [vmem:[%s11596_s9 + $0x970] sm:$0xff] %v1869_v46  ;;  %v1997_v46 = vld [vmem:[%s11591_s8 + $0x16e0] sm:$0xff] }
 0x140   : > { %1872 = vst [vmem:[%s11596_s9 + $0x978] sm:$0xff] %v1871_v47  ;;  %v1999_v47 = vld [vmem:[%s11591_s8 + $0x16f0] sm:$0xff] }
 0x141   : > { %1874 = vst [vmem:[%s11596_s9 + $0x980] sm:$0xff] %v1873_v48  ;;  %v2001_v48 = vld [vmem:[%s11591_s8 + $0x1700] sm:$0xff] }
 0x142   : > { %1876 = vst [vmem:[%s11596_s9 + $0x988] sm:$0xff] %v1875_v49  ;;  %v2003_v49 = vld [vmem:[%s11591_s8 + $0x1710] sm:$0xff] }
 0x143   : > { %1878 = vst [vmem:[%s11596_s9 + $0x990] sm:$0xff] %v1877_v50  ;;  %v2005_v50 = vld [vmem:[%s11591_s8 + $0x1720] sm:$0xff] }
 0x144   : > { %1880 = vst [vmem:[%s11596_s9 + $0x998] sm:$0xff] %v1879_v51  ;;  %v2007_v51 = vld [vmem:[%s11591_s8 + $0x1730] sm:$0xff] }
 0x145   : > { %1882 = vst [vmem:[%s11596_s9 + $0x9a0] sm:$0xff] %v1881_v52  ;;  %v2009_v52 = vld [vmem:[%s11591_s8 + $0x1740] sm:$0xff] }
 0x146   : > { %1884 = vst [vmem:[%s11596_s9 + $0x9a8] sm:$0xff] %v1883_v53  ;;  %v2011_v53 = vld [vmem:[%s11591_s8 + $0x1750] sm:$0xff] }
 0x147   : > { %1886 = vst [vmem:[%s11596_s9 + $0x9b0] sm:$0xff] %v1885_v54  ;;  %v2013_v54 = vld [vmem:[%s11591_s8 + $0x1760] sm:$0xff] }
 0x148   : > { %1888 = vst [vmem:[%s11596_s9 + $0x9b8] sm:$0xff] %v1887_v55  ;;  %v2015_v55 = vld [vmem:[%s11591_s8 + $0x1770] sm:$0xff] }
 0x149   : > { %1890 = vst [vmem:[%s11596_s9 + $0x9c0] sm:$0xff] %v1889_v56  ;;  %v2017_v56 = vld [vmem:[%s11591_s8 + $0x1780] sm:$0xff] }
 0x14a   : > { %1892 = vst [vmem:[%s11596_s9 + $0x9c8] sm:$0xff] %v1891_v57  ;;  %v2019_v57 = vld [vmem:[%s11591_s8 + $0x1790] sm:$0xff] }
 0x14b   : > { %1894 = vst [vmem:[%s11596_s9 + $0x9d0] sm:$0xff] %v1893_v58  ;;  %v2021_v58 = vld [vmem:[%s11591_s8 + $0x17a0] sm:$0xff] }
 0x14c   : > { %1896 = vst [vmem:[%s11596_s9 + $0x9d8] sm:$0xff] %v1895_v59  ;;  %v2023_v59 = vld [vmem:[%s11591_s8 + $0x17b0] sm:$0xff] }
 0x14d   : > { %1898 = vst [vmem:[%s11596_s9 + $0x9e0] sm:$0xff] %v1897_v60  ;;  %v2025_v60 = vld [vmem:[%s11591_s8 + $0x17c0] sm:$0xff] }
 0x14e   : > { %1900 = vst [vmem:[%s11596_s9 + $0x9e8] sm:$0xff] %v1899_v61  ;;  %v2027_v61 = vld [vmem:[%s11591_s8 + $0x17d0] sm:$0xff] }
 0x14f   : > { %1902 = vst [vmem:[%s11596_s9 + $0x9f0] sm:$0xff] %v1901_v62  ;;  %v2029_v62 = vld [vmem:[%s11591_s8 + $0x17e0] sm:$0xff] }
 0x150   : > { %1904 = vst [vmem:[%s11596_s9 + $0x9f8] sm:$0xff] %v1903_v63  ;;  %v2031_v63 = vld [vmem:[%s11591_s8 + $0x17f0] sm:$0xff] }
 0x151   : > { %1906 = vst [vmem:[%s11596_s9 + $0xa00] sm:$0xff] %v1905_v0  ;;  %v2033_v0 = vld [vmem:[%s11591_s8 + $0x1800] sm:$0xff] }
 0x152   : > { %1908 = vst [vmem:[%s11596_s9 + $0xa08] sm:$0xff] %v1907_v1  ;;  %v2035_v1 = vld [vmem:[%s11591_s8 + $0x1810] sm:$0xff] }
 0x153   : > { %1910 = vst [vmem:[%s11596_s9 + $0xa10] sm:$0xff] %v1909_v2  ;;  %v2037_v2 = vld [vmem:[%s11591_s8 + $0x1820] sm:$0xff] }
 0x154   : > { %1912 = vst [vmem:[%s11596_s9 + $0xa18] sm:$0xff] %v1911_v3  ;;  %v2039_v3 = vld [vmem:[%s11591_s8 + $0x1830] sm:$0xff] }
 0x155   : > { %1914 = vst [vmem:[%s11596_s9 + $0xa20] sm:$0xff] %v1913_v4  ;;  %v2041_v4 = vld [vmem:[%s11591_s8 + $0x1840] sm:$0xff] }
 0x156   : > { %1916 = vst [vmem:[%s11596_s9 + $0xa28] sm:$0xff] %v1915_v5  ;;  %v2043_v5 = vld [vmem:[%s11591_s8 + $0x1850] sm:$0xff] }
 0x157   : > { %1918 = vst [vmem:[%s11596_s9 + $0xa30] sm:$0xff] %v1917_v6  ;;  %v2045_v6 = vld [vmem:[%s11591_s8 + $0x1860] sm:$0xff] }
 0x158   : > { %1920 = vst [vmem:[%s11596_s9 + $0xa38] sm:$0xff] %v1919_v7  ;;  %v2047_v7 = vld [vmem:[%s11591_s8 + $0x1870] sm:$0xff] }
 0x159   : > { %1922 = vst [vmem:[%s11596_s9 + $0xa40] sm:$0xff] %v1921_v8  ;;  %v2049_v8 = vld [vmem:[%s11591_s8 + $0x1880] sm:$0xff] }
 0x15a   : > { %1924 = vst [vmem:[%s11596_s9 + $0xa48] sm:$0xff] %v1923_v9  ;;  %v2051_v9 = vld [vmem:[%s11591_s8 + $0x1890] sm:$0xff] }
 0x15b   : > { %1926 = vst [vmem:[%s11596_s9 + $0xa50] sm:$0xff] %v1925_v10  ;;  %v2053_v10 = vld [vmem:[%s11591_s8 + $0x18a0] sm:$0xff] }
 0x15c   : > { %1928 = vst [vmem:[%s11596_s9 + $0xa58] sm:$0xff] %v1927_v11  ;;  %v2055_v11 = vld [vmem:[%s11591_s8 + $0x18b0] sm:$0xff] }
 0x15d   : > { %1930 = vst [vmem:[%s11596_s9 + $0xa60] sm:$0xff] %v1929_v12  ;;  %v2057_v12 = vld [vmem:[%s11591_s8 + $0x18c0] sm:$0xff] }
 0x15e   : > { %1932 = vst [vmem:[%s11596_s9 + $0xa68] sm:$0xff] %v1931_v13  ;;  %v2059_v13 = vld [vmem:[%s11591_s8 + $0x18d0] sm:$0xff] }
 0x15f   : > { %1934 = vst [vmem:[%s11596_s9 + $0xa70] sm:$0xff] %v1933_v14  ;;  %v2061_v14 = vld [vmem:[%s11591_s8 + $0x18e0] sm:$0xff] }
 0x160   : > { %1936 = vst [vmem:[%s11596_s9 + $0xa78] sm:$0xff] %v1935_v15  ;;  %v2063_v15 = vld [vmem:[%s11591_s8 + $0x18f0] sm:$0xff] }
 0x161   : > { %1938 = vst [vmem:[%s11596_s9 + $0xa80] sm:$0xff] %v1937_v16  ;;  %v2065_v16 = vld [vmem:[%s11591_s8 + $0x1900] sm:$0xff] }
 0x162   : > { %1940 = vst [vmem:[%s11596_s9 + $0xa88] sm:$0xff] %v1939_v17  ;;  %v2067_v17 = vld [vmem:[%s11591_s8 + $0x1910] sm:$0xff] }
 0x163   : > { %1942 = vst [vmem:[%s11596_s9 + $0xa90] sm:$0xff] %v1941_v18  ;;  %v2069_v18 = vld [vmem:[%s11591_s8 + $0x1920] sm:$0xff] }
 0x164   : > { %1944 = vst [vmem:[%s11596_s9 + $0xa98] sm:$0xff] %v1943_v19  ;;  %v2071_v19 = vld [vmem:[%s11591_s8 + $0x1930] sm:$0xff] }
 0x165   : > { %1946 = vst [vmem:[%s11596_s9 + $0xaa0] sm:$0xff] %v1945_v20  ;;  %v2073_v20 = vld [vmem:[%s11591_s8 + $0x1940] sm:$0xff] }
 0x166   : > { %1948 = vst [vmem:[%s11596_s9 + $0xaa8] sm:$0xff] %v1947_v21  ;;  %v2075_v21 = vld [vmem:[%s11591_s8 + $0x1950] sm:$0xff] }
 0x167   : > { %1950 = vst [vmem:[%s11596_s9 + $0xab0] sm:$0xff] %v1949_v22  ;;  %v2077_v22 = vld [vmem:[%s11591_s8 + $0x1960] sm:$0xff] }
 0x168   : > { %1952 = vst [vmem:[%s11596_s9 + $0xab8] sm:$0xff] %v1951_v23  ;;  %v2079_v23 = vld [vmem:[%s11591_s8 + $0x1970] sm:$0xff] }
 0x169   : > { %1954 = vst [vmem:[%s11596_s9 + $0xac0] sm:$0xff] %v1953_v24  ;;  %v2081_v24 = vld [vmem:[%s11591_s8 + $0x1980] sm:$0xff] }
 0x16a   : > { %1956 = vst [vmem:[%s11596_s9 + $0xac8] sm:$0xff] %v1955_v25  ;;  %v2083_v25 = vld [vmem:[%s11591_s8 + $0x1990] sm:$0xff] }
 0x16b   : > { %1958 = vst [vmem:[%s11596_s9 + $0xad0] sm:$0xff] %v1957_v26  ;;  %v2085_v26 = vld [vmem:[%s11591_s8 + $0x19a0] sm:$0xff] }
 0x16c   : > { %1960 = vst [vmem:[%s11596_s9 + $0xad8] sm:$0xff] %v1959_v27  ;;  %v2087_v27 = vld [vmem:[%s11591_s8 + $0x19b0] sm:$0xff] }
 0x16d   : > { %1962 = vst [vmem:[%s11596_s9 + $0xae0] sm:$0xff] %v1961_v28  ;;  %v2089_v28 = vld [vmem:[%s11591_s8 + $0x19c0] sm:$0xff] }
 0x16e   : > { %1964 = vst [vmem:[%s11596_s9 + $0xae8] sm:$0xff] %v1963_v29  ;;  %v2091_v29 = vld [vmem:[%s11591_s8 + $0x19d0] sm:$0xff] }
 0x16f   : > { %1966 = vst [vmem:[%s11596_s9 + $0xaf0] sm:$0xff] %v1965_v30  ;;  %v2093_v30 = vld [vmem:[%s11591_s8 + $0x19e0] sm:$0xff] }
 0x170   : > { %1968 = vst [vmem:[%s11596_s9 + $0xaf8] sm:$0xff] %v1967_v31  ;;  %v2095_v31 = vld [vmem:[%s11591_s8 + $0x19f0] sm:$0xff] }
 0x171   : > { %1970 = vst [vmem:[%s11596_s9 + $0xb00] sm:$0xff] %v1969_v32  ;;  %v2097_v32 = vld [vmem:[%s11591_s8 + $0x1a00] sm:$0xff] }
 0x172   : > { %1972 = vst [vmem:[%s11596_s9 + $0xb08] sm:$0xff] %v1971_v33  ;;  %v2099_v33 = vld [vmem:[%s11591_s8 + $0x1a10] sm:$0xff] }
 0x173   : > { %1974 = vst [vmem:[%s11596_s9 + $0xb10] sm:$0xff] %v1973_v34  ;;  %v2101_v34 = vld [vmem:[%s11591_s8 + $0x1a20] sm:$0xff] }
 0x174   : > { %1976 = vst [vmem:[%s11596_s9 + $0xb18] sm:$0xff] %v1975_v35  ;;  %v2103_v35 = vld [vmem:[%s11591_s8 + $0x1a30] sm:$0xff] }
 0x175   : > { %1978 = vst [vmem:[%s11596_s9 + $0xb20] sm:$0xff] %v1977_v36  ;;  %v2105_v36 = vld [vmem:[%s11591_s8 + $0x1a40] sm:$0xff] }
 0x176   : > { %1980 = vst [vmem:[%s11596_s9 + $0xb28] sm:$0xff] %v1979_v37  ;;  %v2107_v37 = vld [vmem:[%s11591_s8 + $0x1a50] sm:$0xff] }
 0x177   : > { %1982 = vst [vmem:[%s11596_s9 + $0xb30] sm:$0xff] %v1981_v38  ;;  %v2109_v38 = vld [vmem:[%s11591_s8 + $0x1a60] sm:$0xff] }
 0x178   : > { %1984 = vst [vmem:[%s11596_s9 + $0xb38] sm:$0xff] %v1983_v39  ;;  %v2111_v39 = vld [vmem:[%s11591_s8 + $0x1a70] sm:$0xff] }
 0x179   : > { %1986 = vst [vmem:[%s11596_s9 + $0xb40] sm:$0xff] %v1985_v40  ;;  %v2113_v40 = vld [vmem:[%s11591_s8 + $0x1a80] sm:$0xff] }
 0x17a   : > { %1988 = vst [vmem:[%s11596_s9 + $0xb48] sm:$0xff] %v1987_v41  ;;  %v2115_v41 = vld [vmem:[%s11591_s8 + $0x1a90] sm:$0xff] }
 0x17b   : > { %1990 = vst [vmem:[%s11596_s9 + $0xb50] sm:$0xff] %v1989_v42  ;;  %v2117_v42 = vld [vmem:[%s11591_s8 + $0x1aa0] sm:$0xff] }
 0x17c   : > { %1992 = vst [vmem:[%s11596_s9 + $0xb58] sm:$0xff] %v1991_v43  ;;  %v2119_v43 = vld [vmem:[%s11591_s8 + $0x1ab0] sm:$0xff] }
 0x17d   : > { %1994 = vst [vmem:[%s11596_s9 + $0xb60] sm:$0xff] %v1993_v44  ;;  %v2121_v44 = vld [vmem:[%s11591_s8 + $0x1ac0] sm:$0xff] }
 0x17e   : > { %1996 = vst [vmem:[%s11596_s9 + $0xb68] sm:$0xff] %v1995_v45  ;;  %v2123_v45 = vld [vmem:[%s11591_s8 + $0x1ad0] sm:$0xff] }
 0x17f   : > { %1998 = vst [vmem:[%s11596_s9 + $0xb70] sm:$0xff] %v1997_v46  ;;  %v2125_v46 = vld [vmem:[%s11591_s8 + $0x1ae0] sm:$0xff] }
 0x180   : > { %2000 = vst [vmem:[%s11596_s9 + $0xb78] sm:$0xff] %v1999_v47  ;;  %v2127_v47 = vld [vmem:[%s11591_s8 + $0x1af0] sm:$0xff] }
 0x181   : > { %2002 = vst [vmem:[%s11596_s9 + $0xb80] sm:$0xff] %v2001_v48  ;;  %v2129_v48 = vld [vmem:[%s11591_s8 + $0x1b00] sm:$0xff] }
 0x182   : > { %2004 = vst [vmem:[%s11596_s9 + $0xb88] sm:$0xff] %v2003_v49  ;;  %v2131_v49 = vld [vmem:[%s11591_s8 + $0x1b10] sm:$0xff] }
 0x183   : > { %2006 = vst [vmem:[%s11596_s9 + $0xb90] sm:$0xff] %v2005_v50  ;;  %v2133_v50 = vld [vmem:[%s11591_s8 + $0x1b20] sm:$0xff] }
 0x184   : > { %2008 = vst [vmem:[%s11596_s9 + $0xb98] sm:$0xff] %v2007_v51  ;;  %v2135_v51 = vld [vmem:[%s11591_s8 + $0x1b30] sm:$0xff] }
 0x185   : > { %2010 = vst [vmem:[%s11596_s9 + $0xba0] sm:$0xff] %v2009_v52  ;;  %v2137_v52 = vld [vmem:[%s11591_s8 + $0x1b40] sm:$0xff] }
 0x186   : > { %2012 = vst [vmem:[%s11596_s9 + $0xba8] sm:$0xff] %v2011_v53  ;;  %v2139_v53 = vld [vmem:[%s11591_s8 + $0x1b50] sm:$0xff] }
 0x187   : > { %2014 = vst [vmem:[%s11596_s9 + $0xbb0] sm:$0xff] %v2013_v54  ;;  %v2141_v54 = vld [vmem:[%s11591_s8 + $0x1b60] sm:$0xff] }
 0x188   : > { %2016 = vst [vmem:[%s11596_s9 + $0xbb8] sm:$0xff] %v2015_v55  ;;  %v2143_v55 = vld [vmem:[%s11591_s8 + $0x1b70] sm:$0xff] }
 0x189   : > { %2018 = vst [vmem:[%s11596_s9 + $0xbc0] sm:$0xff] %v2017_v56  ;;  %v2145_v56 = vld [vmem:[%s11591_s8 + $0x1b80] sm:$0xff] }
 0x18a   : > { %2020 = vst [vmem:[%s11596_s9 + $0xbc8] sm:$0xff] %v2019_v57  ;;  %v2147_v57 = vld [vmem:[%s11591_s8 + $0x1b90] sm:$0xff] }
 0x18b   : > { %2022 = vst [vmem:[%s11596_s9 + $0xbd0] sm:$0xff] %v2021_v58  ;;  %v2149_v58 = vld [vmem:[%s11591_s8 + $0x1ba0] sm:$0xff] }
 0x18c   : > { %2024 = vst [vmem:[%s11596_s9 + $0xbd8] sm:$0xff] %v2023_v59  ;;  %v2151_v59 = vld [vmem:[%s11591_s8 + $0x1bb0] sm:$0xff] }
 0x18d   : > { %2026 = vst [vmem:[%s11596_s9 + $0xbe0] sm:$0xff] %v2025_v60  ;;  %v2153_v60 = vld [vmem:[%s11591_s8 + $0x1bc0] sm:$0xff] }
 0x18e   : > { %2028 = vst [vmem:[%s11596_s9 + $0xbe8] sm:$0xff] %v2027_v61  ;;  %v2155_v61 = vld [vmem:[%s11591_s8 + $0x1bd0] sm:$0xff] }
 0x18f   : > { %2030 = vst [vmem:[%s11596_s9 + $0xbf0] sm:$0xff] %v2029_v62  ;;  %v2157_v62 = vld [vmem:[%s11591_s8 + $0x1be0] sm:$0xff] }
 0x190   : > { %2032 = vst [vmem:[%s11596_s9 + $0xbf8] sm:$0xff] %v2031_v63  ;;  %v2159_v63 = vld [vmem:[%s11591_s8 + $0x1bf0] sm:$0xff] }
 0x191   : > { %2034 = vst [vmem:[%s11596_s9 + $0xc00] sm:$0xff] %v2033_v0  ;;  %v2161_v0 = vld [vmem:[%s11591_s8 + $0x1c00] sm:$0xff] }
 0x192   : > { %2036 = vst [vmem:[%s11596_s9 + $0xc08] sm:$0xff] %v2035_v1  ;;  %v2163_v1 = vld [vmem:[%s11591_s8 + $0x1c10] sm:$0xff] }
 0x193   : > { %2038 = vst [vmem:[%s11596_s9 + $0xc10] sm:$0xff] %v2037_v2  ;;  %v2165_v2 = vld [vmem:[%s11591_s8 + $0x1c20] sm:$0xff] }
 0x194   : > { %2040 = vst [vmem:[%s11596_s9 + $0xc18] sm:$0xff] %v2039_v3  ;;  %v2167_v3 = vld [vmem:[%s11591_s8 + $0x1c30] sm:$0xff] }
 0x195   : > { %2042 = vst [vmem:[%s11596_s9 + $0xc20] sm:$0xff] %v2041_v4  ;;  %v2169_v4 = vld [vmem:[%s11591_s8 + $0x1c40] sm:$0xff] }
 0x196   : > { %2044 = vst [vmem:[%s11596_s9 + $0xc28] sm:$0xff] %v2043_v5  ;;  %v2171_v5 = vld [vmem:[%s11591_s8 + $0x1c50] sm:$0xff] }
 0x197   : > { %2046 = vst [vmem:[%s11596_s9 + $0xc30] sm:$0xff] %v2045_v6  ;;  %v2173_v6 = vld [vmem:[%s11591_s8 + $0x1c60] sm:$0xff] }
 0x198   : > { %2048 = vst [vmem:[%s11596_s9 + $0xc38] sm:$0xff] %v2047_v7  ;;  %v2175_v7 = vld [vmem:[%s11591_s8 + $0x1c70] sm:$0xff] }
 0x199   : > { %2050 = vst [vmem:[%s11596_s9 + $0xc40] sm:$0xff] %v2049_v8  ;;  %v2177_v8 = vld [vmem:[%s11591_s8 + $0x1c80] sm:$0xff] }
 0x19a   : > { %2052 = vst [vmem:[%s11596_s9 + $0xc48] sm:$0xff] %v2051_v9  ;;  %v2179_v9 = vld [vmem:[%s11591_s8 + $0x1c90] sm:$0xff] }
 0x19b   : > { %2054 = vst [vmem:[%s11596_s9 + $0xc50] sm:$0xff] %v2053_v10  ;;  %v2181_v10 = vld [vmem:[%s11591_s8 + $0x1ca0] sm:$0xff] }
 0x19c   : > { %2056 = vst [vmem:[%s11596_s9 + $0xc58] sm:$0xff] %v2055_v11  ;;  %v2183_v11 = vld [vmem:[%s11591_s8 + $0x1cb0] sm:$0xff] }
 0x19d   : > { %2058 = vst [vmem:[%s11596_s9 + $0xc60] sm:$0xff] %v2057_v12  ;;  %v2185_v12 = vld [vmem:[%s11591_s8 + $0x1cc0] sm:$0xff] }
 0x19e   : > { %2060 = vst [vmem:[%s11596_s9 + $0xc68] sm:$0xff] %v2059_v13  ;;  %v2187_v13 = vld [vmem:[%s11591_s8 + $0x1cd0] sm:$0xff] }
 0x19f   : > { %2062 = vst [vmem:[%s11596_s9 + $0xc70] sm:$0xff] %v2061_v14  ;;  %v2189_v14 = vld [vmem:[%s11591_s8 + $0x1ce0] sm:$0xff] }
 0x1a0   : > { %2064 = vst [vmem:[%s11596_s9 + $0xc78] sm:$0xff] %v2063_v15  ;;  %v2191_v15 = vld [vmem:[%s11591_s8 + $0x1cf0] sm:$0xff] }
 0x1a1   : > { %2066 = vst [vmem:[%s11596_s9 + $0xc80] sm:$0xff] %v2065_v16  ;;  %v2193_v16 = vld [vmem:[%s11591_s8 + $0x1d00] sm:$0xff] }
 0x1a2   : > { %2068 = vst [vmem:[%s11596_s9 + $0xc88] sm:$0xff] %v2067_v17  ;;  %v2195_v17 = vld [vmem:[%s11591_s8 + $0x1d10] sm:$0xff] }
 0x1a3   : > { %2070 = vst [vmem:[%s11596_s9 + $0xc90] sm:$0xff] %v2069_v18  ;;  %v2197_v18 = vld [vmem:[%s11591_s8 + $0x1d20] sm:$0xff] }
 0x1a4   : > { %2072 = vst [vmem:[%s11596_s9 + $0xc98] sm:$0xff] %v2071_v19  ;;  %v2199_v19 = vld [vmem:[%s11591_s8 + $0x1d30] sm:$0xff] }
 0x1a5   : > { %2074 = vst [vmem:[%s11596_s9 + $0xca0] sm:$0xff] %v2073_v20  ;;  %v2201_v20 = vld [vmem:[%s11591_s8 + $0x1d40] sm:$0xff] }
 0x1a6   : > { %2076 = vst [vmem:[%s11596_s9 + $0xca8] sm:$0xff] %v2075_v21  ;;  %v2203_v21 = vld [vmem:[%s11591_s8 + $0x1d50] sm:$0xff] }
 0x1a7   : > { %2078 = vst [vmem:[%s11596_s9 + $0xcb0] sm:$0xff] %v2077_v22  ;;  %v2205_v22 = vld [vmem:[%s11591_s8 + $0x1d60] sm:$0xff] }
 0x1a8   : > { %2080 = vst [vmem:[%s11596_s9 + $0xcb8] sm:$0xff] %v2079_v23  ;;  %v2207_v23 = vld [vmem:[%s11591_s8 + $0x1d70] sm:$0xff] }
 0x1a9   : > { %2082 = vst [vmem:[%s11596_s9 + $0xcc0] sm:$0xff] %v2081_v24  ;;  %v2209_v24 = vld [vmem:[%s11591_s8 + $0x1d80] sm:$0xff] }
 0x1aa   : > { %2084 = vst [vmem:[%s11596_s9 + $0xcc8] sm:$0xff] %v2083_v25  ;;  %v2211_v25 = vld [vmem:[%s11591_s8 + $0x1d90] sm:$0xff] }
 0x1ab   : > { %2086 = vst [vmem:[%s11596_s9 + $0xcd0] sm:$0xff] %v2085_v26  ;;  %v2213_v26 = vld [vmem:[%s11591_s8 + $0x1da0] sm:$0xff] }
 0x1ac   : > { %2088 = vst [vmem:[%s11596_s9 + $0xcd8] sm:$0xff] %v2087_v27  ;;  %v2215_v27 = vld [vmem:[%s11591_s8 + $0x1db0] sm:$0xff] }
 0x1ad   : > { %2090 = vst [vmem:[%s11596_s9 + $0xce0] sm:$0xff] %v2089_v28  ;;  %v2217_v28 = vld [vmem:[%s11591_s8 + $0x1dc0] sm:$0xff] }
 0x1ae   : > { %2092 = vst [vmem:[%s11596_s9 + $0xce8] sm:$0xff] %v2091_v29  ;;  %v2219_v29 = vld [vmem:[%s11591_s8 + $0x1dd0] sm:$0xff] }
 0x1af   : > { %2094 = vst [vmem:[%s11596_s9 + $0xcf0] sm:$0xff] %v2093_v30  ;;  %v2221_v30 = vld [vmem:[%s11591_s8 + $0x1de0] sm:$0xff] }
 0x1b0   : > { %2096 = vst [vmem:[%s11596_s9 + $0xcf8] sm:$0xff] %v2095_v31  ;;  %v2223_v31 = vld [vmem:[%s11591_s8 + $0x1df0] sm:$0xff] }
 0x1b1   : > { %2098 = vst [vmem:[%s11596_s9 + $0xd00] sm:$0xff] %v2097_v32  ;;  %v2225_v32 = vld [vmem:[%s11591_s8 + $0x1e00] sm:$0xff] }
 0x1b2   : > { %2100 = vst [vmem:[%s11596_s9 + $0xd08] sm:$0xff] %v2099_v33  ;;  %v2227_v33 = vld [vmem:[%s11591_s8 + $0x1e10] sm:$0xff] }
 0x1b3   : > { %2102 = vst [vmem:[%s11596_s9 + $0xd10] sm:$0xff] %v2101_v34  ;;  %v2229_v34 = vld [vmem:[%s11591_s8 + $0x1e20] sm:$0xff] }
 0x1b4   : > { %2104 = vst [vmem:[%s11596_s9 + $0xd18] sm:$0xff] %v2103_v35  ;;  %v2231_v35 = vld [vmem:[%s11591_s8 + $0x1e30] sm:$0xff] }
 0x1b5   : > { %2106 = vst [vmem:[%s11596_s9 + $0xd20] sm:$0xff] %v2105_v36  ;;  %v2233_v36 = vld [vmem:[%s11591_s8 + $0x1e40] sm:$0xff] }
 0x1b6   : > { %2108 = vst [vmem:[%s11596_s9 + $0xd28] sm:$0xff] %v2107_v37  ;;  %v2235_v37 = vld [vmem:[%s11591_s8 + $0x1e50] sm:$0xff] }
 0x1b7   : > { %2110 = vst [vmem:[%s11596_s9 + $0xd30] sm:$0xff] %v2109_v38  ;;  %v2237_v38 = vld [vmem:[%s11591_s8 + $0x1e60] sm:$0xff] }
 0x1b8   : > { %2112 = vst [vmem:[%s11596_s9 + $0xd38] sm:$0xff] %v2111_v39  ;;  %v2239_v39 = vld [vmem:[%s11591_s8 + $0x1e70] sm:$0xff] }
 0x1b9   : > { %2114 = vst [vmem:[%s11596_s9 + $0xd40] sm:$0xff] %v2113_v40  ;;  %v2241_v40 = vld [vmem:[%s11591_s8 + $0x1e80] sm:$0xff] }
 0x1ba   : > { %2116 = vst [vmem:[%s11596_s9 + $0xd48] sm:$0xff] %v2115_v41  ;;  %v2243_v41 = vld [vmem:[%s11591_s8 + $0x1e90] sm:$0xff] }
 0x1bb   : > { %2118 = vst [vmem:[%s11596_s9 + $0xd50] sm:$0xff] %v2117_v42  ;;  %v2245_v42 = vld [vmem:[%s11591_s8 + $0x1ea0] sm:$0xff] }
 0x1bc   : > { %2120 = vst [vmem:[%s11596_s9 + $0xd58] sm:$0xff] %v2119_v43  ;;  %v2247_v43 = vld [vmem:[%s11591_s8 + $0x1eb0] sm:$0xff] }
 0x1bd   : > { %2122 = vst [vmem:[%s11596_s9 + $0xd60] sm:$0xff] %v2121_v44  ;;  %v2249_v44 = vld [vmem:[%s11591_s8 + $0x1ec0] sm:$0xff] }
 0x1be   : > { %2124 = vst [vmem:[%s11596_s9 + $0xd68] sm:$0xff] %v2123_v45  ;;  %v2251_v45 = vld [vmem:[%s11591_s8 + $0x1ed0] sm:$0xff] }
 0x1bf   : > { %2126 = vst [vmem:[%s11596_s9 + $0xd70] sm:$0xff] %v2125_v46  ;;  %v2253_v46 = vld [vmem:[%s11591_s8 + $0x1ee0] sm:$0xff] }
 0x1c0   : > { %2128 = vst [vmem:[%s11596_s9 + $0xd78] sm:$0xff] %v2127_v47  ;;  %v2255_v47 = vld [vmem:[%s11591_s8 + $0x1ef0] sm:$0xff] }
 0x1c1   : > { %2130 = vst [vmem:[%s11596_s9 + $0xd80] sm:$0xff] %v2129_v48  ;;  %v2257_v48 = vld [vmem:[%s11591_s8 + $0x1f00] sm:$0xff] }
 0x1c2   : > { %2132 = vst [vmem:[%s11596_s9 + $0xd88] sm:$0xff] %v2131_v49  ;;  %v2259_v49 = vld [vmem:[%s11591_s8 + $0x1f10] sm:$0xff] }
 0x1c3   : > { %2134 = vst [vmem:[%s11596_s9 + $0xd90] sm:$0xff] %v2133_v50  ;;  %v2261_v50 = vld [vmem:[%s11591_s8 + $0x1f20] sm:$0xff] }
 0x1c4   : > { %2136 = vst [vmem:[%s11596_s9 + $0xd98] sm:$0xff] %v2135_v51  ;;  %v2263_v51 = vld [vmem:[%s11591_s8 + $0x1f30] sm:$0xff] }
 0x1c5   : > { %2138 = vst [vmem:[%s11596_s9 + $0xda0] sm:$0xff] %v2137_v52  ;;  %v2265_v52 = vld [vmem:[%s11591_s8 + $0x1f40] sm:$0xff] }
 0x1c6   : > { %2140 = vst [vmem:[%s11596_s9 + $0xda8] sm:$0xff] %v2139_v53  ;;  %v2267_v53 = vld [vmem:[%s11591_s8 + $0x1f50] sm:$0xff] }
 0x1c7   : > { %2142 = vst [vmem:[%s11596_s9 + $0xdb0] sm:$0xff] %v2141_v54  ;;  %v2269_v54 = vld [vmem:[%s11591_s8 + $0x1f60] sm:$0xff] }
 0x1c8   : > { %2144 = vst [vmem:[%s11596_s9 + $0xdb8] sm:$0xff] %v2143_v55  ;;  %v2271_v55 = vld [vmem:[%s11591_s8 + $0x1f70] sm:$0xff] }
 0x1c9   : > { %2146 = vst [vmem:[%s11596_s9 + $0xdc0] sm:$0xff] %v2145_v56  ;;  %v2273_v56 = vld [vmem:[%s11591_s8 + $0x1f80] sm:$0xff] }
 0x1ca   : > { %2148 = vst [vmem:[%s11596_s9 + $0xdc8] sm:$0xff] %v2147_v57  ;;  %v2275_v57 = vld [vmem:[%s11591_s8 + $0x1f90] sm:$0xff] }
 0x1cb   : > { %2150 = vst [vmem:[%s11596_s9 + $0xdd0] sm:$0xff] %v2149_v58  ;;  %v2277_v58 = vld [vmem:[%s11591_s8 + $0x1fa0] sm:$0xff] }
 0x1cc   : > { %2152 = vst [vmem:[%s11596_s9 + $0xdd8] sm:$0xff] %v2151_v59  ;;  %v2279_v59 = vld [vmem:[%s11591_s8 + $0x1fb0] sm:$0xff] }
 0x1cd   : > { %2154 = vst [vmem:[%s11596_s9 + $0xde0] sm:$0xff] %v2153_v60  ;;  %v2281_v60 = vld [vmem:[%s11591_s8 + $0x1fc0] sm:$0xff] }
 0x1ce   : > { %2156 = vst [vmem:[%s11596_s9 + $0xde8] sm:$0xff] %v2155_v61  ;;  %v2283_v61 = vld [vmem:[%s11591_s8 + $0x1fd0] sm:$0xff] }
 0x1cf   : > { %2158 = vst [vmem:[%s11596_s9 + $0xdf0] sm:$0xff] %v2157_v62  ;;  %v2285_v62 = vld [vmem:[%s11591_s8 + $0x1fe0] sm:$0xff] }
 0x1d0   : > { %2160 = vst [vmem:[%s11596_s9 + $0xdf8] sm:$0xff] %v2159_v63  ;;  %v2287_v63 = vld [vmem:[%s11591_s8 + $0x1ff0] sm:$0xff] }
 0x1d1   : > { %2162 = vst [vmem:[%s11596_s9 + $0xe00] sm:$0xff] %v2161_v0 }
 0x1d2   : > { %2164 = vst [vmem:[%s11596_s9 + $0xe08] sm:$0xff] %v2163_v1 }
 0x1d3   : > { %2166 = vst [vmem:[%s11596_s9 + $0xe10] sm:$0xff] %v2165_v2 }
 0x1d4   : > { %2168 = vst [vmem:[%s11596_s9 + $0xe18] sm:$0xff] %v2167_v3 }
 0x1d5   : > { %2170 = vst [vmem:[%s11596_s9 + $0xe20] sm:$0xff] %v2169_v4 }
 0x1d6   : > { %2172 = vst [vmem:[%s11596_s9 + $0xe28] sm:$0xff] %v2171_v5 }
 0x1d7   : > { %2174 = vst [vmem:[%s11596_s9 + $0xe30] sm:$0xff] %v2173_v6 }
 0x1d8   : > { %2176 = vst [vmem:[%s11596_s9 + $0xe38] sm:$0xff] %v2175_v7 }
 0x1d9   : > { %2178 = vst [vmem:[%s11596_s9 + $0xe40] sm:$0xff] %v2177_v8 }
 0x1da   : > { %2180 = vst [vmem:[%s11596_s9 + $0xe48] sm:$0xff] %v2179_v9 }
 0x1db   : > { %2182 = vst [vmem:[%s11596_s9 + $0xe50] sm:$0xff] %v2181_v10 }
 0x1dc   : > { %2184 = vst [vmem:[%s11596_s9 + $0xe58] sm:$0xff] %v2183_v11 }
 0x1dd   : > { %2186 = vst [vmem:[%s11596_s9 + $0xe60] sm:$0xff] %v2185_v12 }
 0x1de   : > { %2188 = vst [vmem:[%s11596_s9 + $0xe68] sm:$0xff] %v2187_v13 }
 0x1df   : > { %2190 = vst [vmem:[%s11596_s9 + $0xe70] sm:$0xff] %v2189_v14 }
 0x1e0   : > { %2192 = vst [vmem:[%s11596_s9 + $0xe78] sm:$0xff] %v2191_v15 }
 0x1e1   : > { %2194 = vst [vmem:[%s11596_s9 + $0xe80] sm:$0xff] %v2193_v16 }
 0x1e2   : > { %2196 = vst [vmem:[%s11596_s9 + $0xe88] sm:$0xff] %v2195_v17 }
 0x1e3   : > { %2198 = vst [vmem:[%s11596_s9 + $0xe90] sm:$0xff] %v2197_v18 }
 0x1e4   : > { %2200 = vst [vmem:[%s11596_s9 + $0xe98] sm:$0xff] %v2199_v19 }
 0x1e5   : > { %2202 = vst [vmem:[%s11596_s9 + $0xea0] sm:$0xff] %v2201_v20 }
 0x1e6   : > { %2204 = vst [vmem:[%s11596_s9 + $0xea8] sm:$0xff] %v2203_v21 }
 0x1e7   : > { %2206 = vst [vmem:[%s11596_s9 + $0xeb0] sm:$0xff] %v2205_v22 }
 0x1e8   : > { %2208 = vst [vmem:[%s11596_s9 + $0xeb8] sm:$0xff] %v2207_v23 }
 0x1e9   : > { %2210 = vst [vmem:[%s11596_s9 + $0xec0] sm:$0xff] %v2209_v24 }
 0x1ea   : > { %2212 = vst [vmem:[%s11596_s9 + $0xec8] sm:$0xff] %v2211_v25 }
 0x1eb   : > { %2214 = vst [vmem:[%s11596_s9 + $0xed0] sm:$0xff] %v2213_v26 }
 0x1ec   : > { %2216 = vst [vmem:[%s11596_s9 + $0xed8] sm:$0xff] %v2215_v27 }
 0x1ed   : > { %2218 = vst [vmem:[%s11596_s9 + $0xee0] sm:$0xff] %v2217_v28 }
 0x1ee   : > { %2220 = vst [vmem:[%s11596_s9 + $0xee8] sm:$0xff] %v2219_v29 }
 0x1ef   : > { %2222 = vst [vmem:[%s11596_s9 + $0xef0] sm:$0xff] %v2221_v30 }
 0x1f0   : > { %2224 = vst [vmem:[%s11596_s9 + $0xef8] sm:$0xff] %v2223_v31 }
 0x1f1   : > { %2226 = vst [vmem:[%s11596_s9 + $0xf00] sm:$0xff] %v2225_v32 }
 0x1f2   : > { %2228 = vst [vmem:[%s11596_s9 + $0xf08] sm:$0xff] %v2227_v33 }
 0x1f3   : > { %2230 = vst [vmem:[%s11596_s9 + $0xf10] sm:$0xff] %v2229_v34 }
 0x1f4   : > { %2232 = vst [vmem:[%s11596_s9 + $0xf18] sm:$0xff] %v2231_v35 }
 0x1f5   : > { %2234 = vst [vmem:[%s11596_s9 + $0xf20] sm:$0xff] %v2233_v36 }
 0x1f6   : > { %2236 = vst [vmem:[%s11596_s9 + $0xf28] sm:$0xff] %v2235_v37 }
 0x1f7   : > { %2238 = vst [vmem:[%s11596_s9 + $0xf30] sm:$0xff] %v2237_v38 }
 0x1f8   : > { %2240 = vst [vmem:[%s11596_s9 + $0xf38] sm:$0xff] %v2239_v39 }
 0x1f9   : > { %2242 = vst [vmem:[%s11596_s9 + $0xf40] sm:$0xff] %v2241_v40 }
 0x1fa   : > { %2244 = vst [vmem:[%s11596_s9 + $0xf48] sm:$0xff] %v2243_v41 }
 0x1fb   : > { %2246 = vst [vmem:[%s11596_s9 + $0xf50] sm:$0xff] %v2245_v42 }
 0x1fc   : > { %2248 = vst [vmem:[%s11596_s9 + $0xf58] sm:$0xff] %v2247_v43 }
 0x1fd   : > { %2250 = vst [vmem:[%s11596_s9 + $0xf60] sm:$0xff] %v2249_v44 }
 0x1fe   : > { %2252 = vst [vmem:[%s11596_s9 + $0xf68] sm:$0xff] %v2251_v45 }
 0x1ff   : > { %2254 = vst [vmem:[%s11596_s9 + $0xf70] sm:$0xff] %v2253_v46 }
 0x200   : > { %2256 = vst [vmem:[%s11596_s9 + $0xf78] sm:$0xff] %v2255_v47 }
 0x201   : > { %2258 = vst [vmem:[%s11596_s9 + $0xf80] sm:$0xff] %v2257_v48 }
 0x202   : > { %2260 = vst [vmem:[%s11596_s9 + $0xf88] sm:$0xff] %v2259_v49 }
 0x203   : > { %2262 = vst [vmem:[%s11596_s9 + $0xf90] sm:$0xff] %v2261_v50 }
 0x204   : > { %2264 = vst [vmem:[%s11596_s9 + $0xf98] sm:$0xff] %v2263_v51 }
 0x205   : > { %2266 = vst [vmem:[%s11596_s9 + $0xfa0] sm:$0xff] %v2265_v52 }
 0x206   : > { %2268 = vst [vmem:[%s11596_s9 + $0xfa8] sm:$0xff] %v2267_v53 }
 0x207   : > { %2270 = vst [vmem:[%s11596_s9 + $0xfb0] sm:$0xff] %v2269_v54 }
 0x208   : > { %2272 = vst [vmem:[%s11596_s9 + $0xfb8] sm:$0xff] %v2271_v55 }
 0x209   : > { %2274 = vst [vmem:[%s11596_s9 + $0xfc0] sm:$0xff] %v2273_v56 }
 0x20a   : > { %2276 = vst [vmem:[%s11596_s9 + $0xfc8] sm:$0xff] %v2275_v57 }
 0x20b   : > { %2278 = vst [vmem:[%s11596_s9 + $0xfd0] sm:$0xff] %v2277_v58 }
 0x20c   : > { %2280 = vst [vmem:[%s11596_s9 + $0xfd8] sm:$0xff] %v2279_v59 }
 0x20d   : > { %2282 = vst [vmem:[%s11596_s9 + $0xfe0] sm:$0xff] %v2281_v60 }
 0x20e   : > { %2284 = vst [vmem:[%s11596_s9 + $0xfe8] sm:$0xff] %v2283_v61 }
 0x20f   : > { %2286 = vst [vmem:[%s11596_s9 + $0xff0] sm:$0xff] %v2285_v62 }
 0x210   : > { %2288 = vst [vmem:[%s11596_s9 + $0xff8] sm:$0xff] %v2287_v63 }
 0x211 PF: > { %p8733_p6 = scmp.ge.s32.totalorder %s11513_s22, 1  ;;  %p4393_p7 = scmp.lt.s32.totalorder %s11513_s22, 3 }
 0x213   : > { %p4394_p8 = pnand %p8733_p6, %p4393_p7 }
 0x214   : > { %s4400_s10 = sand.u32 (!%p4394_p8), 1, %s11497_s18   ;;  %s8735_s11 = sshll.u32 (!%p4394_p8), %s11505_s20, 1 }
 0x215   : > { %4397 = sbr.rel (%p4394_p8) target bundleno = 1350 (0x546), region = 88  ;;  %s8734_s12 = sshll.u32 (!%p4394_p8), %s4400_s10, 12 }
 0x216   : > { %p4441_p9 = scmp.lt.s32.totalorder (!%p4394_p8), %s8735_s11, 3  ;;  %s8736_s13 = sshll.u32 (!%p4394_p8), %s11505_s20, 5 }
 0x217   : > { %p4446_p10 = scmp.lt.s32.totalorder (!%p4394_p8), %s8736_s13, 63  ;;  %s12634_s29 = scalar_lea.vmem (!%p4394_p8), [#allocation2], %s8734_s12 }
 0x218   : > { %p8738_p11 = scmp.ne.s32.totalorder (!%p4394_p8), %s11505_s20, 0 }
 0x21a   : > { %s13851_s11 = smov (!%p4441_p9, %s8735_s11), 3  ;;  %s13853_s13 = smov (!%p4446_p10, %s8736_s13), 63 }
 0x21b   : > { %s12627_s16 = scalar_lea.vmem %s13840_s2, %s13851_s11  ;;  %s8737_s17 = sshll.u32 %s13853_s13, 2 }
 0x21c   : > { %s12632_s28 = scalar_lea.vmem %s13841_s3, %s8737_s17  ;;  %4454 = sbr.rel (%p8738_p11) target bundleno = 547 (0x223), region = 96 }
 0x221   : > { %v11515_v0 = vmov 0.0  }
 0x222   : > { %4455 = vst [vmem:[#allocation3] sm:$0x3] %v11515_v0 }
 0x223 PF: > { %v8797_v1 = vld [vmem:[%s12634_s29 + $0x70] sm:$0xf]  ;;  %v10872_v2 = vld [vmem:[%s12634_s29 + $0x74] sm:$0xf0]  ;;  %v8789_v12 = vld [vmem:[%s12634_s29 + $0x60] sm:$0xf] }
 0x224   : > { %v8861_v3 = vld [vmem:[%s12634_s29 + $0xf0] sm:$0xf]  ;;  %v8798_v4 = vor.u32 %v10872_v2, %v8797_v1  ;;  %v10888_v5 = vld [vmem:[%s12634_s29 + $0xf4] sm:$0xf0]  ;;  %v10870_v14 = vld [vmem:[%s12634_s29 + $0x64] sm:$0xf0] }
 0x225   : > { %v8925_v6 = vld [vmem:[%s12634_s29 + $0x170] sm:$0xf]  ;;  %v10904_v7 = vld [vmem:[%s12634_s29 + $0x174] sm:$0xf0]  ;;  %v8862_v8 = vor.u32 %v10888_v5, %v8861_v3  ;;  %v8853_v15 = vld [vmem:[%s12634_s29 + $0xe0] sm:$0xf]  ;;  %v8790_v17 = vor.u32 %v10870_v14, %v8789_v12 }
 0x226   : > { %v8926_v9 = vor.u32 %v10904_v7, %v8925_v6  ;;  %v8989_v10 = vld [vmem:[%s12634_s29 + $0x1f0] sm:$0xf]  ;;  %v10920_v11 = vld [vmem:[%s12634_s29 + $0x1f4] sm:$0xf0]  ;;  %7610 = vmatpush.bf16.msra.mxu0 %v8798_v4  ;;  %v10886_v16 = vld [vmem:[%s12634_s29 + $0xe4] sm:$0xf0] }
 0x227   : > { %v8990_v13 = vor.u32 %v10920_v11, %v8989_v10  ;;  %7623 = vmatpush.bf16.msra.mxu1 %v8862_v8  ;;  %v8854_v18 = vor.u32 %v10886_v16, %v8853_v15  ;;  %v8917_v19 = vld [vmem:[%s12634_s29 + $0x160] sm:$0xf]  ;;  %v10902_v20 = vld [vmem:[%s12634_s29 + $0x164] sm:$0xf0]  ;;  %v8781_v24 = vld [vmem:[%s12634_s29 + $0x50] sm:$0xf] }
 0x228   : > { %7636 = vmatpush.bf16.msra.mxu2 %v8926_v9  ;;  %v8981_v21 = vld [vmem:[%s12634_s29 + $0x1e0] sm:$0xf]  ;;  %v8918_v22 = vor.u32 %v10902_v20, %v8917_v19  ;;  %v10918_v23 = vld [vmem:[%s12634_s29 + $0x1e4] sm:$0xf0]  ;;  %v10868_v25 = vld [vmem:[%s12634_s29 + $0x54] sm:$0xf0] }
 0x229   : > { %7649 = vmatpush.bf16.msra.mxu3 %v8990_v13  ;;  %v8982_v26 = vor.u32 %v10918_v23, %v8981_v21  ;;  %v8845_v27 = vld [vmem:[%s12634_s29 + $0xd0] sm:$0xf]  ;;  %v10884_v28 = vld [vmem:[%s12634_s29 + $0xd4] sm:$0xf0]  ;;  %v8782_v30 = vor.u32 %v10868_v25, %v8781_v24  ;;  %v8773_v36 = vld [vmem:[%s12634_s29 + $0x40] sm:$0xf] }
 0x22a   : > { %v8909_v29 = vld [vmem:[%s12634_s29 + $0x150] sm:$0xf]  ;;  %7611 = vmatpush.bf16.msra.mxu0 %v8790_v17  ;;  %v10900_v31 = vld [vmem:[%s12634_s29 + $0x154] sm:$0xf0]  ;;  %v8846_v34 = vor.u32 %v10884_v28, %v8845_v27  ;;  %v10866_v37 = vld [vmem:[%s12634_s29 + $0x44] sm:$0xf0] }
 0x22b   : > { %v8973_v32 = vld [vmem:[%s12634_s29 + $0x1d0] sm:$0xf]  ;;  %v10916_v33 = vld [vmem:[%s12634_s29 + $0x1d4] sm:$0xf0]  ;;  %7624 = vmatpush.bf16.msra.mxu1 %v8854_v18  ;;  %v8910_v35 = vor.u32 %v10900_v31, %v8909_v29  ;;  %v8837_v38 = vld [vmem:[%s12634_s29 + $0xc0] sm:$0xf]  ;;  %v8774_v45 = vor.u32 %v10866_v37, %v8773_v36 }
 0x22c   : > { %7637 = vmatpush.bf16.msra.mxu2 %v8918_v22  ;;  %v8974_v39 = vor.u32 %v10916_v33, %v8973_v32  ;;  %v10882_v40 = vld [vmem:[%s12634_s29 + $0xc4] sm:$0xf0]  ;;  %v8901_v41 = vld [vmem:[%s12634_s29 + $0x140] sm:$0xf]  ;;  %v8765_v48 = vld [vmem:[%s12634_s29 + $0x30] sm:$0xf] }
 0x22d   : > { %7650 = vmatpush.bf16.msra.mxu3 %v8982_v26  ;;  %v10898_v42 = vld [vmem:[%s12634_s29 + $0x144] sm:$0xf0]  ;;  %v8965_v43 = vld [vmem:[%s12634_s29 + $0x1c0] sm:$0xf]  ;;  %v8838_v46 = vor.u32 %v10882_v40, %v8837_v38  ;;  %v10864_v49 = vld [vmem:[%s12634_s29 + $0x34] sm:$0xf0] }
 0x22e   : > { %v10914_v44 = vld [vmem:[%s12634_s29 + $0x1c4] sm:$0xf0]  ;;  %7612 = vmatpush.bf16.msra.mxu0 %v8782_v30  ;;  %v8902_v47 = vor.u32 %v10898_v42, %v8901_v41  ;;  %v8829_v50 = vld [vmem:[%s12634_s29 + $0xb0] sm:$0xf]  ;;  %v10880_v52 = vld [vmem:[%s12634_s29 + $0xb4] sm:$0xf0]  ;;  %v8766_v57 = vor.u32 %v10864_v49, %v8765_v48 }
 0x22f   : > { %7625 = vmatpush.bf16.msra.mxu1 %v8846_v34  ;;  %v8966_v51 = vor.u32 %v10914_v44, %v8965_v43  ;;  %v8893_v53 = vld [vmem:[%s12634_s29 + $0x130] sm:$0xf]  ;;  %v10896_v54 = vld [vmem:[%s12634_s29 + $0x134] sm:$0xf0]  ;;  %v8830_v58 = vor.u32 %v10880_v52, %v8829_v50  ;;  %v8757_v60 = vld [vmem:[%s12634_s29 + $0x20] sm:$0xf] }
 0x230   : > { %7638 = vmatpush.bf16.msra.mxu2 %v8910_v35  ;;  %v8957_v55 = vld [vmem:[%s12634_s29 + $0x1b0] sm:$0xf]  ;;  %v10912_v56 = vld [vmem:[%s12634_s29 + $0x1b4] sm:$0xf0]  ;;  %v8894_v59 = vor.u32 %v10896_v54, %v8893_v53  ;;  %v10862_v61 = vld [vmem:[%s12634_s29 + $0x24] sm:$0xf0] }
 0x231   : > { %7651 = vmatpush.bf16.msra.mxu3 %v8974_v39  ;;  %v8821_v62 = vld [vmem:[%s12634_s29 + $0xa0] sm:$0xf]  ;;  %v8958_v63 = vor.u32 %v10912_v56, %v8957_v55  ;;  %v10878_v0 = vld [vmem:[%s12634_s29 + $0xa4] sm:$0xf0]  ;;  %v8758_v5 = vor.u32 %v10862_v61, %v8757_v60  ;;  %v8749_v8 = vld [vmem:[%s12634_s29 + $0x10] sm:$0xf] }
 0x232   : > { %7613 = vmatpush.bf16.msra.mxu0 %v8774_v45  ;;  %v8885_v1 = vld [vmem:[%s12634_s29 + $0x120] sm:$0xf]  ;;  %v10894_v2 = vld [vmem:[%s12634_s29 + $0x124] sm:$0xf0]  ;;  %v8822_v6 = vor.u32 %v10878_v0, %v8821_v62  ;;  %v10860_v9 = vld [vmem:[%s12634_s29 + $0x14] sm:$0xf0] }
 0x233   : > { %7626 = vmatpush.bf16.msra.mxu1 %v8838_v46  ;;  %v8949_v3 = vld [vmem:[%s12634_s29 + $0x1a0] sm:$0xf]  ;;  %v10910_v4 = vld [vmem:[%s12634_s29 + $0x1a4] sm:$0xf0]  ;;  %v8886_v7 = vor.u32 %v10894_v2, %v8885_v1  ;;  %v8813_v10 = vld [vmem:[%s12634_s29 + $0x90] sm:$0xf]  ;;  %v8750_v17 = vor.u32 %v10860_v9, %v8749_v8 }
 0x234   : > { %7639 = vmatpush.bf16.msra.mxu2 %v8902_v47  ;;  %v8950_v11 = vor.u32 %v10910_v4, %v8949_v3  ;;  %v10876_v12 = vld [vmem:[%s12634_s29 + $0x94] sm:$0xf0]  ;;  %v8877_v13 = vld [vmem:[%s12634_s29 + $0x110] sm:$0xf]  ;;  %v8741_v18 = vld [vmem:[%s12634_s29] sm:$0xf] }
 0x235   : > { %7652 = vmatpush.bf16.msra.mxu3 %v8966_v51  ;;  %v10892_v14 = vld [vmem:[%s12634_s29 + $0x114] sm:$0xf0]  ;;  %v8941_v15 = vld [vmem:[%s12634_s29 + $0x190] sm:$0xf]  ;;  %v10858_v19 = vld [vmem:[%s12634_s29 + $0x4] sm:$0xf0]  ;;  %v8814_v20 = vor.u32 %v10876_v12, %v8813_v10 }
 0x236   : > { %7614 = vmatpush.bf16.msra.mxu0 %v8766_v57  ;;  %v10908_v16 = vld [vmem:[%s12634_s29 + $0x194] sm:$0xf0]  ;;  %v8878_v21 = vor.u32 %v10892_v14, %v8877_v13  ;;  %v8805_v22 = vld [vmem:[%s12634_s29 + $0x80] sm:$0xf]  ;;  %v10874_v23 = vld [vmem:[%s12634_s29 + $0x84] sm:$0xf0]  ;;  %v8742_v32 = vor.u32 %v10858_v19, %v8741_v18 }
 0x237   : > { %7627 = vmatpush.bf16.msra.mxu1 %v8830_v58  ;;  %v8869_v24 = vld [vmem:[%s12634_s29 + $0x100] sm:$0xf]  ;;  %v8942_v25 = vor.u32 %v10908_v16, %v8941_v15  ;;  %v10890_v26 = vld [vmem:[%s12634_s29 + $0x104] sm:$0xf0]  ;;  %v9053_v29 = vld [vmem:[%s12634_s29 + $0x270] sm:$0xf]  ;;  %v8806_v36 = vor.u32 %v10874_v23, %v8805_v22 }
 0x238   : > { %7640 = vmatpush.bf16.msra.mxu2 %v8894_v59  ;;  %v8933_v27 = vld [vmem:[%s12634_s29 + $0x180] sm:$0xf]  ;;  %v10906_v28 = vld [vmem:[%s12634_s29 + $0x184] sm:$0xf0]  ;;  %v10936_v30 = vld [vmem:[%s12634_s29 + $0x274] sm:$0xf0]  ;;  %v8870_v37 = vor.u32 %v10890_v26, %v8869_v24 }
 0x239   : > { %7653 = vmatpush.bf16.msra.mxu3 %v8958_v63  ;;  %v9117_v31 = vld [vmem:[%s12634_s29 + $0x2f0] sm:$0xf]  ;;  %v10952_v33 = vld [vmem:[%s12634_s29 + $0x2f4] sm:$0xf0]  ;;  %v8934_v40 = vor.u32 %v10906_v28, %v8933_v27  ;;  %v9054_v41 = vor.u32 %v10936_v30, %v9053_v29  ;;  %v9045_v44 = vld [vmem:[%s12634_s29 + $0x260] sm:$0xf] }
 0x23a   : > { %7615 = vmatpush.bf16.msra.mxu0 %v8758_v5  ;;  %v9181_v34 = vld [vmem:[%s12634_s29 + $0x370] sm:$0xf]  ;;  %v10968_v35 = vld [vmem:[%s12634_s29 + $0x374] sm:$0xf0]  ;;  %v9118_v42 = vor.u32 %v10952_v33, %v9117_v31  ;;  %v10934_v45 = vld [vmem:[%s12634_s29 + $0x264] sm:$0xf0] }
 0x23b   : > { %7628 = vmatpush.bf16.msra.mxu1 %v8822_v6  ;;  %v9245_v38 = vld [vmem:[%s12634_s29 + $0x3f0] sm:$0xf]  ;;  %v10984_v39 = vld [vmem:[%s12634_s29 + $0x3f4] sm:$0xf0]  ;;  %v9182_v43 = vor.u32 %v10968_v35, %v9181_v34  ;;  %v9109_v46 = vld [vmem:[%s12634_s29 + $0x2e0] sm:$0xf]  ;;  %v9046_v53 = vor.u32 %v10934_v45, %v9045_v44 }
 0x23c   : > { %7641 = vmatpush.bf16.msra.mxu2 %v8886_v7  ;;  %v9246_v47 = vor.u32 %v10984_v39, %v9245_v38  ;;  %v10950_v48 = vld [vmem:[%s12634_s29 + $0x2e4] sm:$0xf0]  ;;  %v9173_v49 = vld [vmem:[%s12634_s29 + $0x360] sm:$0xf]  ;;  %v9037_v56 = vld [vmem:[%s12634_s29 + $0x250] sm:$0xf] }
 0x23d   : > { %7654 = vmatpush.bf16.msra.mxu3 %v8950_v11  ;;  %v10966_v50 = vld [vmem:[%s12634_s29 + $0x364] sm:$0xf0]  ;;  %v9237_v51 = vld [vmem:[%s12634_s29 + $0x3e0] sm:$0xf]  ;;  %v9110_v54 = vor.u32 %v10950_v48, %v9109_v46  ;;  %v10932_v57 = vld [vmem:[%s12634_s29 + $0x254] sm:$0xf0] }
 0x23e   : > { %7616 = vmatpush.bf16.msra.mxu0 %v8750_v17  ;;  %v10982_v52 = vld [vmem:[%s12634_s29 + $0x3e4] sm:$0xf0]  ;;  %v9174_v55 = vor.u32 %v10966_v50, %v9173_v49  ;;  %v9101_v58 = vld [vmem:[%s12634_s29 + $0x2d0] sm:$0xf]  ;;  %v10948_v60 = vld [vmem:[%s12634_s29 + $0x2d4] sm:$0xf0]  ;;  %v9038_v1 = vor.u32 %v10932_v57, %v9037_v56 }
 0x23f   : > { %7629 = vmatpush.bf16.msra.mxu1 %v8814_v20  ;;  %v9238_v59 = vor.u32 %v10982_v52, %v9237_v51  ;;  %v9165_v61 = vld [vmem:[%s12634_s29 + $0x350] sm:$0xf]  ;;  %v10964_v62 = vld [vmem:[%s12634_s29 + $0x354] sm:$0xf0]  ;;  %v9029_v2 = vld [vmem:[%s12634_s29 + $0x240] sm:$0xf]  ;;  %v9102_v4 = vor.u32 %v10948_v60, %v9101_v58 }
 0x240   : > { %7642 = vmatpush.bf16.msra.mxu2 %v8878_v21  ;;  %v9229_v63 = vld [vmem:[%s12634_s29 + $0x3d0] sm:$0xf]  ;;  %v10980_v0 = vld [vmem:[%s12634_s29 + $0x3d4] sm:$0xf0]  ;;  %v9166_v5 = vor.u32 %v10964_v62, %v9165_v61  ;;  %v10930_v6 = vld [vmem:[%s12634_s29 + $0x244] sm:$0xf0] }
 0x241   : > { %7655 = vmatpush.bf16.msra.mxu3 %v8942_v25  ;;  %v4456_v3 = vld [vmem:[%s13838_s0] sm:$0xff]  ;;  %v9093_v7 = vld [vmem:[%s12634_s29 + $0x2c0] sm:$0xf]  ;;  %v9230_v8 = vor.u32 %v10980_v0, %v9229_v63  ;;  %v10946_v9 = vld [vmem:[%s12634_s29 + $0x2c4] sm:$0xf0]  ;;  %v9030_v14 = vor.u32 %v10930_v6, %v9029_v2  ;;  %p10851_p12 = scmp.ne.s32.totalorder %s11505_s20, 1 }
 0x242   : > { %7617 = vmatpush.bf16.msra.mxu0 %v8742_v32  ;;  %4979 = vst [vmem:[#allocation1] ss:$9 sm:$0xff] %v4456_v3  ;;  %v9157_v10 = vld [vmem:[%s12634_s29 + $0x340] sm:$0xf]  ;;  %v10962_v11 = vld [vmem:[%s12634_s29 + $0x344] sm:$0xf0]  ;;  %v9094_v15 = vor.u32 %v10946_v9, %v9093_v7 }
 0x243   : > { %7630 = vmatpush.bf16.msra.mxu1 %v8806_v36  ;;  %v9221_v12 = vld [vmem:[%s12634_s29 + $0x3c0] sm:$0xf]  ;;  %v10978_v13 = vld [vmem:[%s12634_s29 + $0x3c4] sm:$0xf0]  ;;  %v9158_v16 = vor.u32 %v10962_v11, %v9157_v10  ;;  %v9021_v17 = vld [vmem:[%s12634_s29 + $0x230] sm:$0xf] }
 0x244   : > { %7643 = vmatpush.bf16.msra.mxu2 %v8870_v37  ;;  %v10928_v18 = vld [vmem:[%s12634_s29 + $0x234] sm:$0xf0]  ;;  %v9085_v19 = vld [vmem:[%s12634_s29 + $0x2b0] sm:$0xf]  ;;  %v9222_v20 = vor.u32 %v10978_v13, %v9221_v12  ;;  %v9013_v26 = vld [vmem:[%s12634_s29 + $0x220] sm:$0xf] }
 0x245   : > { %7656 = vmatpush.bf16.msra.mxu3 %v8934_v40  ;;  %v10944_v21 = vld [vmem:[%s12634_s29 + $0x2b4] sm:$0xf0]  ;;  %v9149_v22 = vld [vmem:[%s12634_s29 + $0x330] sm:$0xf]  ;;  %v9022_v27 = vor.u32 %v10928_v18, %v9021_v17  ;;  %v10926_v33 = vld [vmem:[%s12634_s29 + $0x224] sm:$0xf0] }
 0x246   : > { %7662 = vmatpush.bf16.msrb.mxu0 %v9054_v41  ;;  %v10960_v23 = vld [vmem:[%s12634_s29 + $0x334] sm:$0xf0]  ;;  %v9213_v24 = vld [vmem:[%s12634_s29 + $0x3b0] sm:$0xf]  ;;  %v9086_v31 = vor.u32 %v10944_v21, %v9085_v19  ;;  %v9077_v34 = vld [vmem:[%s12634_s29 + $0x2a0] sm:$0xf] }
 0x247   : > { %7675 = vmatpush.bf16.msrb.mxu1 %v9118_v42  ;;  %v10976_v25 = vld [vmem:[%s12634_s29 + $0x3b4] sm:$0xf0]  ;;  %v9150_v32 = vor.u32 %v10960_v23, %v9149_v22  ;;  %v10942_v37 = vld [vmem:[%s12634_s29 + $0x2a4] sm:$0xf0]  ;;  %v9141_v38 = vld [vmem:[%s12634_s29 + $0x320] sm:$0xf]  ;;  %v9014_v42 = vor.u32 %v10926_v33, %v9013_v26 }
 0x248   : > { %7688 = vmatpush.bf16.msrb.mxu2 %v9182_v43  ;;  %v9214_v36 = vor.u32 %v10976_v25, %v9213_v24  ;;  %v10958_v39 = vld [vmem:[%s12634_s29 + $0x324] sm:$0xf0]  ;;  %v9205_v40 = vld [vmem:[%s12634_s29 + $0x3a0] sm:$0xf]  ;;  %v9005_v43 = vld [vmem:[%s12634_s29 + $0x210] sm:$0xf]  ;;  %v9078_v44 = vor.u32 %v10942_v37, %v9077_v34 }
 0x249   : > { %7701 = vmatpush.bf16.msrb.mxu3 %v9246_v47  ;;  %v12745_v28 = vld [vmem:[#allocation1 + $0x12] sm:$0xff]  ;;  %v12747_v29 = vld [vmem:[#allocation1] sm:$0xff]  ;;  %v12753_v35 = vld [vmem:[#allocation1 + $0x9] sm:$0xff]  ;;  %v9142_v45 = vor.u32 %v10958_v39, %v9141_v38 }
 0x24a   : > { %7663 = vmatpush.bf16.msrb.mxu0 %v9046_v53  ;;  %v12749_v30 = vld [vmem:[#allocation1 + $0x1b] sm:$0xff]  ;;  %7644 = vmatmul.bf16.vlgmr.msra.gmra.mxu2 %v12745_v28  ;;  %v10974_v41 = vld [vmem:[%s12634_s29 + $0x3a4] sm:$0xf0]  ;;  %v9061_v57 = vld [vmem:[%s12634_s29 + $0x280] sm:$0xf] }
 0x24b   : > { %7676 = vmatpush.bf16.msrb.mxu1 %v9110_v54  ;;  %7618 = vmatmul.bf16.vlgmr.msra.gmra.mxu0 %v12747_v29  ;;  %v10924_v46 = vld [vmem:[%s12634_s29 + $0x214] sm:$0xf0]  ;;  %v9069_v47 = vld [vmem:[%s12634_s29 + $0x290] sm:$0xf]  ;;  %v9206_v49 = vor.u32 %v10974_v41, %v9205_v40  ;;  %v8997_v54 = vld [vmem:[%s12634_s29 + $0x200] sm:$0xf] }
 0x24c   : > { %7689 = vmatpush.bf16.msrb.mxu2 %v9174_v55  ;;  %7657 = vmatmul.bf16.vlgmr.msra.gmra.mxu3 %v12749_v30  ;;  %v10940_v48 = vld [vmem:[%s12634_s29 + $0x294] sm:$0xf0]  ;;  %v9133_v50 = vld [vmem:[%s12634_s29 + $0x310] sm:$0xf]  ;;  %v10922_v55 = vld [vmem:[%s12634_s29 + $0x204] sm:$0xf0]  ;;  %v9006_v56 = vor.u32 %v10924_v46, %v9005_v43 }
 0x24d   : > { %7702 = vmatpush.bf16.msrb.mxu3 %v9238_v59  ;;  %7631 = vmatmul.bf16.vlgmr.msra.gmra.mxu1 %v12753_v35  ;;  %v10956_v51 = vld [vmem:[%s12634_s29 + $0x314] sm:$0xf0]  ;;  %v9197_v52 = vld [vmem:[%s12634_s29 + $0x390] sm:$0xf]  ;;  %v10938_v58 = vld [vmem:[%s12634_s29 + $0x284] sm:$0xf0]  ;;  %v9070_v63 = vor.u32 %v10940_v48, %v9069_v47  ;;  %v8998_v10 = vor.u32 %v10922_v55, %v8997_v54 }
 0x24e   : > { %7664 = vmatpush.bf16.msrb.mxu0 %v9038_v1  ;;  %v10972_v53 = vld [vmem:[%s12634_s29 + $0x394] sm:$0xf0]  ;;  %v9125_v59 = vld [vmem:[%s12634_s29 + $0x300] sm:$0xf]  ;;  %v10954_v60 = vld [vmem:[%s12634_s29 + $0x304] sm:$0xf0]  ;;  %v9134_v0 = vor.u32 %v10956_v51, %v9133_v50 }
 0x24f   : > { %7677 = vmatpush.bf16.msrb.mxu1 %v9102_v4  ;;  %v12778_v61 = vld [vmem:[#allocation1 + $0x36] sm:$0xff]  ;;  %v4457_v62 = vld [vmem:[%s13838_s0 + $0x8] sm:$0xff]  ;;  %v12785_v2 = vld [vmem:[#allocation1 + $0x3f] sm:$0xff]  ;;  %v9198_v4 = vor.u32 %v10972_v53, %v9197_v52 }
 0x250   : > { %7690 = vmatpush.bf16.msrb.mxu2 %v9166_v5  ;;  %v12783_v1 = vld [vmem:[#allocation1 + $0x24] sm:$0xff]  ;;  %v12787_v3 = vld [vmem:[#allocation1 + $0x2d] sm:$0xff]  ;;  %v9309_v7 = vld [vmem:[%s12634_s29 + $0x470] sm:$0xf] }
 0x251   : > { %7703 = vmatpush.bf16.msrb.mxu3 %v9230_v8  ;;  %v9189_v5 = vld [vmem:[%s12634_s29 + $0x380] sm:$0xf]  ;;  %v10970_v6 = vld [vmem:[%s12634_s29 + $0x384] sm:$0xf0]  ;;  %4989 = vst [vmem:[#allocation1] ss:$9 sm:$0xff] %v4457_v62 }
 0x252   : > { %7665 = vmatpush.bf16.msrb.mxu0 %v9030_v14  ;;  %v11000_v8 = vld [vmem:[%s12634_s29 + $0x474] sm:$0xf0]  ;;  %v9373_v9 = vld [vmem:[%s12634_s29 + $0x4f0] sm:$0xf]  ;;  %v9062_v14 = vor.u32 %v10938_v58, %v9061_v57  ;;  %v9190_v18 = vor.u32 %v10970_v6, %v9189_v5  ;;  %v9301_v22 = vld [vmem:[%s12634_s29 + $0x460] sm:$0xf] }
 0x253   : > { %7678 = vmatpush.bf16.msrb.mxu1 %v9094_v15  ;;  %v11016_v11 = vld [vmem:[%s12634_s29 + $0x4f4] sm:$0xf0]  ;;  %v9437_v12 = vld [vmem:[%s12634_s29 + $0x570] sm:$0xf]  ;;  %v9126_v15 = vor.u32 %v10954_v60, %v9125_v59  ;;  %v9310_v19 = vor.u32 %v11000_v8, %v9309_v7  ;;  %v10998_v23 = vld [vmem:[%s12634_s29 + $0x464] sm:$0xf0] }
 0x254   : > { %7691 = vmatpush.bf16.msrb.mxu2 %v9158_v16  ;;  %v11032_v13 = vld [vmem:[%s12634_s29 + $0x574] sm:$0xf0]  ;;  %v9501_v16 = vld [vmem:[%s12634_s29 + $0x5f0] sm:$0xf]  ;;  %v9365_v24 = vld [vmem:[%s12634_s29 + $0x4e0] sm:$0xf]  ;;  %v9302_v34 = vor.u32 %v10998_v23, %v9301_v22 }
 0x255   : > { %7704 = vmatpush.bf16.msrb.mxu3 %v9222_v20  ;;  %v11048_v17 = vld [vmem:[%s12634_s29 + $0x5f4] sm:$0xf0]  ;;  %v9374_v20 = vor.u32 %v11016_v11, %v9373_v9  ;;  %v9438_v21 = vor.u32 %v11032_v13, %v9437_v12  ;;  %v11014_v26 = vld [vmem:[%s12634_s29 + $0x4e4] sm:$0xf0]  ;;  %v9293_v38 = vld [vmem:[%s12634_s29 + $0x450] sm:$0xf] }
 0x256   : > { %7666 = vmatpush.bf16.msrb.mxu0 %v9022_v27  ;;  %v9502_v25 = vor.u32 %v11048_v17, %v9501_v16  ;;  %v9429_v27 = vld [vmem:[%s12634_s29 + $0x560] sm:$0xf]  ;;  %v11046_v33 = vld [vmem:[%s12634_s29 + $0x5e4] sm:$0xf0]  ;;  %v10996_v39 = vld [vmem:[%s12634_s29 + $0x454] sm:$0xf0] }
 0x257   : > { %7679 = vmatpush.bf16.msrb.mxu1 %v9086_v31  ;;  %v11030_v31 = vld [vmem:[%s12634_s29 + $0x564] sm:$0xf0]  ;;  %v9357_v40 = vld [vmem:[%s12634_s29 + $0x4d0] sm:$0xf]  ;;  %v11044_v46 = vld [vmem:[%s12634_s29 + $0x5d4] sm:$0xf0]  ;;  %v9294_v47 = vor.u32 %v10996_v39, %v9293_v38 }
 0x258   : > { %7692 = vmatpush.bf16.msrb.mxu2 %v9150_v32  ;;  %v9493_v32 = vld [vmem:[%s12634_s29 + $0x5e0] sm:$0xf]  ;;  %v9430_v37 = vor.u32 %v11030_v31, %v9429_v27  ;;  %v9421_v43 = vld [vmem:[%s12634_s29 + $0x550] sm:$0xf]  ;;  %v10994_v51 = vld [vmem:[%s12634_s29 + $0x444] sm:$0xf0] }
 0x259   : > { %7705 = vmatpush.bf16.msrb.mxu3 %v9214_v36  ;;  %v9366_v36 = vor.u32 %v11014_v26, %v9365_v24  ;;  %v9494_v41 = vor.u32 %v11046_v33, %v9493_v32  ;;  %v9285_v50 = vld [vmem:[%s12634_s29 + $0x440] sm:$0xf]  ;;  %v11010_v54 = vld [vmem:[%s12634_s29 + $0x4c4] sm:$0xf0]  ;;  %v11008_v6 = vld [vmem:[%s12634_s29 + $0x4b4] sm:$0xf0] }
 0x25a   : > { %7667 = vmatpush.bf16.msrb.mxu0 %v9014_v42  ;;  %v11012_v42 = vld [vmem:[%s12634_s29 + $0x4d4] sm:$0xf0]  ;;  %v9349_v52 = vld [vmem:[%s12634_s29 + $0x4c0] sm:$0xf]  ;;  %v11042_v58 = vld [vmem:[%s12634_s29 + $0x5c4] sm:$0xf0]  ;;  %v9286_v59 = vor.u32 %v10994_v51, %v9285_v50 }
 0x25b   : > { %7680 = vmatpush.bf16.msrb.mxu1 %v9078_v44  ;;  %v11028_v44 = vld [vmem:[%s12634_s29 + $0x554] sm:$0xf0]  ;;  %v9358_v48 = vor.u32 %v11012_v42, %v9357_v40  ;;  %v9413_v55 = vld [vmem:[%s12634_s29 + $0x540] sm:$0xf]  ;;  %v9350_v60 = vor.u32 %v11010_v54, %v9349_v52  ;;  %v9405_v7 = vld [vmem:[%s12634_s29 + $0x530] sm:$0xf] }
 0x25c   : > { %7693 = vmatpush.bf16.msrb.mxu2 %v9142_v45  ;;  %v9485_v45 = vld [vmem:[%s12634_s29 + $0x5d0] sm:$0xf]  ;;  %v9477_v57 = vld [vmem:[%s12634_s29 + $0x5c0] sm:$0xf]  ;;  %v11024_v8 = vld [vmem:[%s12634_s29 + $0x534] sm:$0xf0] }
 0x25d   : > { %7706 = vmatpush.bf16.msrb.mxu3 %v9206_v49  ;;  %v9422_v49 = vor.u32 %v11028_v44, %v9421_v43  ;;  %v9486_v53 = vor.u32 %v11044_v46, %v9485_v45  ;;  %v9478_v5 = vor.u32 %v11042_v58, %v9477_v57  ;;  %v9469_v9 = vld [vmem:[%s12634_s29 + $0x5b0] sm:$0xf]  ;;  %v9406_v13 = vor.u32 %v11024_v8, %v9405_v7  ;;  %v9333_v16 = vld [vmem:[%s12634_s29 + $0x4a0] sm:$0xf]  ;;  %v11038_v22 = vld [vmem:[%s12634_s29 + $0x5a4] sm:$0xf0] }
 0x25e   : > { %7668 = vmatpush.bf16.msrb.mxu0 %v9006_v56  ;;  %v11026_v56 = vld [vmem:[%s12634_s29 + $0x544] sm:$0xf0]  ;;  %v9261_v26 = vld [vmem:[%s12634_s29 + $0x410] sm:$0xf]  ;;  %v10988_v27 = vld [vmem:[%s12634_s29 + $0x414] sm:$0xf0] }
 0x25f   : > { %7681 = vmatpush.bf16.msrb.mxu1 %v9070_v63  ;;  %v9414_v62 = vor.u32 %v11026_v56, %v9413_v55  ;;  %v9277_v63 = vld [vmem:[%s12634_s29 + $0x430] sm:$0xf]  ;;  %v11004_v33 = vld [vmem:[%s12634_s29 + $0x494] sm:$0xf0]  ;;  %v9262_v39 = vor.u32 %v10988_v27, %v9261_v26  ;;  %v9253_v40 = vld [vmem:[%s12634_s29 + $0x400] sm:$0xf] }
 0x260   : > { %7694 = vmatpush.bf16.msrb.mxu2 %v9134_v0  ;;  %v10992_v0 = vld [vmem:[%s12634_s29 + $0x434] sm:$0xf0]  ;;  %v9325_v31 = vld [vmem:[%s12634_s29 + $0x490] sm:$0xf]  ;;  %v9317_v44 = vld [vmem:[%s12634_s29 + $0x480] sm:$0xf] }
 0x261   : > { %7707 = vmatpush.bf16.msrb.mxu3 %v9198_v4  ;;  %v9341_v4 = vld [vmem:[%s12634_s29 + $0x4b0] sm:$0xf]  ;;  %v9278_v11 = vor.u32 %v10992_v0, %v9277_v63  ;;  %v11036_v38 = vld [vmem:[%s12634_s29 + $0x594] sm:$0xf0]  ;;  %v9326_v42 = vor.u32 %v11004_v33, %v9325_v31  ;;  %v11002_v45 = vld [vmem:[%s12634_s29 + $0x484] sm:$0xf0] }
 0x262   : > { %7669 = vmatpush.bf16.msrb.mxu0 %v8998_v10  ;;  %v11040_v10 = vld [vmem:[%s12634_s29 + $0x5b4] sm:$0xf0]  ;;  %v9342_v12 = vor.u32 %v11008_v6, %v9341_v4  ;;  %v9381_v46 = vld [vmem:[%s12634_s29 + $0x500] sm:$0xf]  ;;  %v11034_v50 = vld [vmem:[%s12634_s29 + $0x584] sm:$0xf0]  ;;  %v9318_v58 = vor.u32 %v11002_v45, %v9317_v44 }
 0x263   : > { %7682 = vmatpush.bf16.msrb.mxu1 %v9062_v14  ;;  %v9269_v14 = vld [vmem:[%s12634_s29 + $0x420] sm:$0xf]  ;;  %v9470_v17 = vor.u32 %v11040_v10, %v9469_v9  ;;  %v9565_v51 = vld [vmem:[%s12634_s29 + $0x670] sm:$0xf]  ;;  %v11064_v52 = vld [vmem:[%s12634_s29 + $0x674] sm:$0xf0] }
 0x264   : > { %7695 = vmatpush.bf16.msrb.mxu2 %v9126_v15  ;;  %v10990_v15 = vld [vmem:[%s12634_s29 + $0x424] sm:$0xf0]  ;;  %v11080_v55 = vld [vmem:[%s12634_s29 + $0x6f4] sm:$0xf0]  ;;  %v9693_v56 = vld [vmem:[%s12634_s29 + $0x770] sm:$0xf]  ;;  %v9566_v0 = vor.u32 %v11064_v52, %v9565_v51 }
 0x265   : > { %7708 = vmatpush.bf16.msrb.mxu3 %v9190_v18  ;;  %7670 = vmatmul.bf16.vlgmr.msrb.gmra.mxu0 %v12783_v1  ;;  %v11006_v18 = vld [vmem:[%s12634_s29 + $0x4a4] sm:$0xf0]  ;;  %v9270_v23 = vor.u32 %v10990_v15, %v9269_v14  ;;  %v11096_v57 = vld [vmem:[%s12634_s29 + $0x774] sm:$0xf0]  ;;  %v9557_v6 = vld [vmem:[%s12634_s29 + $0x660] sm:$0xf] }
 0x266   : > { %7714 = vmatpush.bf16.msra.mxu0 %v9310_v19  ;;  %7683 = vmatmul.bf16.vlgmr.msrb.gmra.mxu1 %v12787_v3  ;;  %v9397_v19 = vld [vmem:[%s12634_s29 + $0x520] sm:$0xf]  ;;  %v9334_v24 = vor.u32 %v11006_v18, %v9333_v16  ;;  %v11062_v7 = vld [vmem:[%s12634_s29 + $0x664] sm:$0xf0]  ;;  %v12881_v18 = vld [vmem:[#allocation1 + $0x1b] sm:$0xff] }
 0x267   : > { %7727 = vmatpush.bf16.msra.mxu1 %v9374_v20  ;;  %7696 = vmatmul.bf16.vlgmr.msrb.gmra.mxu2 %v12778_v61  ;;  %v11022_v20 = vld [vmem:[%s12634_s29 + $0x524] sm:$0xf0]  ;;  %v9621_v8 = vld [vmem:[%s12634_s29 + $0x6e0] sm:$0xf]  ;;  %v11076_v26 = vld [vmem:[%s12634_s29 + $0x6d4] sm:$0xf0] }
 0x268   : > { %7740 = vmatpush.bf16.msra.mxu2 %v9438_v21  ;;  %7709 = vmatmul.bf16.vlgmr.msrb.gmra.mxu3 %v12785_v2  ;;  %v9461_v21 = vld [vmem:[%s12634_s29 + $0x5a0] sm:$0xf]  ;;  %v11078_v10 = vld [vmem:[%s12634_s29 + $0x6e4] sm:$0xf0]  ;;  %v9677_v27 = vld [vmem:[%s12634_s29 + $0x750] sm:$0xf] }
 0x269   : > { %7753 = vmatpush.bf16.msra.mxu3 %v9502_v25  ;;  %v9398_v25 = vor.u32 %v11022_v20, %v9397_v19  ;;  %v9462_v32 = vor.u32 %v11038_v22, %v9461_v21  ;;  %v9749_v14 = vld [vmem:[%s12634_s29 + $0x7e0] sm:$0xf]  ;;  %v11110_v15 = vld [vmem:[%s12634_s29 + $0x7e4] sm:$0xf0]  ;;  %v9558_v19 = vor.u32 %v11062_v7, %v9557_v6  ;;  %v9622_v20 = vor.u32 %v11078_v10, %v9621_v8  ;;  %v9549_v22 = vld [vmem:[%s12634_s29 + $0x650] sm:$0xf] }
 0x26a   : > { %7715 = vmatpush.bf16.msra.mxu0 %v9302_v34  ;;  %v9389_v34 = vld [vmem:[%s12634_s29 + $0x510] sm:$0xf]  ;;  %v11092_v31 = vld [vmem:[%s12634_s29 + $0x754] sm:$0xf0]  ;;  %v11090_v44 = vld [vmem:[%s12634_s29 + $0x744] sm:$0xf0] }
 0x26b   : > { %7728 = vmatpush.bf16.msra.mxu1 %v9366_v36  ;;  %v11020_v36 = vld [vmem:[%s12634_s29 + $0x514] sm:$0xf0]  ;;  %v12877_v16 = vld [vmem:[#allocation1 + $0x12] sm:$0xff]  ;;  %v9733_v45 = vld [vmem:[%s12634_s29 + $0x7c0] sm:$0xf] }
 0x26c   : > { %7741 = vmatpush.bf16.msra.mxu2 %v9430_v37  ;;  %v9453_v37 = vld [vmem:[%s12634_s29 + $0x590] sm:$0xf]  ;;  %v9390_v43 = vor.u32 %v11020_v36, %v9389_v34  ;;  %v11108_v33 = vld [vmem:[%s12634_s29 + $0x7d4] sm:$0xf0]  ;;  %v11070_v6 = vld [vmem:[%s12634_s29 + $0x6a4] sm:$0xf0] }
 0x26d   : > { %7754 = vmatpush.bf16.msra.mxu3 %v9494_v41  ;;  %v10986_v41 = vld [vmem:[%s12634_s29 + $0x404] sm:$0xf0]  ;;  %v11056_v51 = vld [vmem:[%s12634_s29 + $0x634] sm:$0xf0]  ;;  %v9597_v52 = vld [vmem:[%s12634_s29 + $0x6b0] sm:$0xf] }
 0x26e   : > { %7716 = vmatpush.bf16.msra.mxu0 %v9294_v47  ;;  %v9454_v47 = vor.u32 %v11036_v38, %v9453_v37  ;;  %v9254_v54 = vor.u32 %v10986_v41, %v9253_v40  ;;  %v9678_v37 = vor.u32 %v11092_v31, %v9677_v27  ;;  %v9541_v38 = vld [vmem:[%s12634_s29 + $0x640] sm:$0xf]  ;;  %v11086_v8 = vld [vmem:[%s12634_s29 + $0x724] sm:$0xf0] }
 0x26f   : > { %7729 = vmatpush.bf16.msra.mxu1 %v9358_v48  ;;  %v11018_v48 = vld [vmem:[%s12634_s29 + $0x504] sm:$0xf0]  ;;  %v9605_v40 = vld [vmem:[%s12634_s29 + $0x6c0] sm:$0xf] }
 0x270   : > { %7742 = vmatpush.bf16.msra.mxu2 %v9422_v49  ;;  %v9445_v49 = vld [vmem:[%s12634_s29 + $0x580] sm:$0xf]  ;;  %v11102_v10 = vld [vmem:[%s12634_s29 + $0x7a4] sm:$0xf0] }
 0x271   : > { %7755 = vmatpush.bf16.msra.mxu3 %v9486_v53  ;;  %v9629_v53 = vld [vmem:[%s12634_s29 + $0x6f0] sm:$0xf]  ;;  %v9446_v63 = vor.u32 %v11034_v50, %v9445_v49  ;;  %v9653_v7 = vld [vmem:[%s12634_s29 + $0x720] sm:$0xf]  ;;  %v11050_v31 = vld [vmem:[%s12634_s29 + $0x604] sm:$0xf0] }
 0x272   : > { %7717 = vmatpush.bf16.msra.mxu0 %v9286_v59  ;;  %v9382_v59 = vor.u32 %v11018_v48, %v9381_v46  ;;  %v9630_v4 = vor.u32 %v11080_v55, %v9629_v53  ;;  %v11106_v46 = vld [vmem:[%s12634_s29 + $0x7c4] sm:$0xf0]  ;;  %v9533_v50 = vld [vmem:[%s12634_s29 + $0x630] sm:$0xf]  ;;  %v9509_v27 = vld [vmem:[%s12634_s29 + $0x600] sm:$0xf] }
 0x273   : > { %7730 = vmatpush.bf16.msra.mxu1 %v9350_v60  ;;  %v9757_v60 = vld [vmem:[%s12634_s29 + $0x7f0] sm:$0xf]  ;;  %v9734_v53 = vor.u32 %v11106_v46, %v9733_v45  ;;  %v11144_v46 = vld [vmem:[%s12634_s29 + $0x8f4] sm:$0xf0] }
 0x274   : > { %7743 = vmatpush.bf16.msra.mxu2 %v9414_v62  ;;  %v11112_v62 = vld [vmem:[%s12634_s29 + $0x7f4] sm:$0xf0]  ;;  %v9661_v55 = vld [vmem:[%s12634_s29 + $0x730] sm:$0xf] }
 0x275   : > { %7756 = vmatpush.bf16.msra.mxu3 %v9478_v5  ;;  %v9694_v5 = vor.u32 %v11096_v57, %v9693_v56  ;;  %v9758_v9 = vor.u32 %v11112_v62, %v9757_v60  ;;  %v11088_v56 = vld [vmem:[%s12634_s29 + $0x734] sm:$0xf0]  ;;  %v9725_v57 = vld [vmem:[%s12634_s29 + $0x7b0] sm:$0xf] }
 0x276   : > { %7718 = vmatpush.bf16.msra.mxu0 %v9278_v11  ;;  %v9685_v11 = vld [vmem:[%s12634_s29 + $0x760] sm:$0xf]  ;;  %v9662_v62 = vor.u32 %v11088_v56, %v9661_v55  ;;  %v9885_v45 = vld [vmem:[%s12634_s29 + $0x8f0] sm:$0xf] }
 0x277   : > { %7731 = vmatpush.bf16.msra.mxu1 %v9342_v12  ;;  %v11094_v12 = vld [vmem:[%s12634_s29 + $0x764] sm:$0xf0] }
 0x278   : > { %7744 = vmatpush.bf16.msra.mxu2 %v9406_v13  ;;  %v12873_v13 = vld [vmem:[#allocation1] sm:$0xff]  ;;  %v9686_v21 = vor.u32 %v11094_v12, %v9685_v11  ;;  %v9517_v12 = vld [vmem:[%s12634_s29 + $0x610] sm:$0xf] }
 0x279   : > { %7757 = vmatpush.bf16.msra.mxu3 %v9470_v17  ;;  %v12879_v17 = vld [vmem:[#allocation1 + $0x9] sm:$0xff] }
 0x27a   : > { %7719 = vmatpush.bf16.msra.mxu0 %v9270_v23  ;;  %v11060_v23 = vld [vmem:[%s12634_s29 + $0x654] sm:$0xf0] }
 0x27b   : > { %7732 = vmatpush.bf16.msra.mxu1 %v9334_v24  ;;  %v9613_v24 = vld [vmem:[%s12634_s29 + $0x6d0] sm:$0xf]  ;;  %v9550_v34 = vor.u32 %v11060_v23, %v9549_v22 }
 0x27c   : > { %7745 = vmatpush.bf16.msra.mxu2 %v9398_v25  ;;  %v9750_v25 = vor.u32 %v11110_v15, %v9749_v14  ;;  %v9614_v36 = vor.u32 %v11076_v26, %v9613_v24  ;;  %v9654_v15 = vor.u32 %v11086_v8, %v9653_v7  ;;  %v9645_v23 = vld [vmem:[%s12634_s29 + $0x710] sm:$0xf]  ;;  %v11084_v24 = vld [vmem:[%s12634_s29 + $0x714] sm:$0xf0]  ;;  %v11142_v7 = vld [vmem:[%s12634_s29 + $0x8e4] sm:$0xf0] }
 0x27d   : > { %7758 = vmatpush.bf16.msra.mxu3 %v9462_v32  ;;  %v9741_v32 = vld [vmem:[%s12634_s29 + $0x7d0] sm:$0xf]  ;;  %v11100_v26 = vld [vmem:[%s12634_s29 + $0x794] sm:$0xf0]  ;;  %v9941_v8 = vld [vmem:[%s12634_s29 + $0x960] sm:$0xf] }
 0x27e   : > { %7720 = vmatpush.bf16.msra.mxu0 %v9262_v39  ;;  %v11058_v39 = vld [vmem:[%s12634_s29 + $0x644] sm:$0xf0]  ;;  %v9742_v41 = vor.u32 %v11108_v33, %v9741_v32  ;;  %v9573_v33 = vld [vmem:[%s12634_s29 + $0x680] sm:$0xf] }
 0x27f   : > { %7733 = vmatpush.bf16.msra.mxu1 %v9326_v42  ;;  %v11074_v42 = vld [vmem:[%s12634_s29 + $0x6c4] sm:$0xf0] }
 0x280   : > { %7746 = vmatpush.bf16.msra.mxu2 %v9390_v43  ;;  %v9669_v43 = vld [vmem:[%s12634_s29 + $0x740] sm:$0xf]  ;;  %v9606_v48 = vor.u32 %v11074_v42, %v9605_v40  ;;  %v9821_v42 = vld [vmem:[%s12634_s29 + $0x870] sm:$0xf] }
 0x281   : > { %7759 = vmatpush.bf16.msra.mxu3 %v9454_v47  ;;  %v9542_v47 = vor.u32 %v11058_v39, %v9541_v38  ;;  %v9670_v49 = vor.u32 %v11090_v44, %v9669_v43  ;;  %v9646_v39 = vor.u32 %v11084_v24, %v9645_v23  ;;  %v9701_v40 = vld [vmem:[%s12634_s29 + $0x780] sm:$0xf]  ;;  %v11128_v43 = vld [vmem:[%s12634_s29 + $0x874] sm:$0xf0]  ;;  %v9933_v24 = vld [vmem:[%s12634_s29 + $0x950] sm:$0xf] }
 0x282   : > { %7721 = vmatpush.bf16.msra.mxu0 %v9254_v54  ;;  %v11072_v54 = vld [vmem:[%s12634_s29 + $0x6b4] sm:$0xf0] }
 0x283   : > { %7734 = vmatpush.bf16.msra.mxu1 %v9318_v58  ;;  %v11104_v58 = vld [vmem:[%s12634_s29 + $0x7b4] sm:$0xf0]  ;;  %v9598_v60 = vor.u32 %v11072_v54, %v9597_v52  ;;  %v9510_v52 = vor.u32 %v11050_v31, %v9509_v27 }
 0x284   : > { %7747 = vmatpush.bf16.msra.mxu2 %v9382_v59  ;;  %v9534_v59 = vor.u32 %v11056_v51, %v9533_v50  ;;  %v12945_v50 = vld [vmem:[#allocation1 + $0x3f] sm:$0xff]  ;;  %v4458_v51 = vld [vmem:[%s13838_s0 + $0x10] sm:$0xff] }
 0x285   : > { %7760 = vmatpush.bf16.msra.mxu3 %v9446_v63  ;;  %7722 = vmatmul.bf16.vlgmr.msra.gmra.mxu0 %v12873_v13  ;;  %v9525_v63 = vld [vmem:[%s12634_s29 + $0x620] sm:$0xf]  ;;  %v11160_v54 = vld [vmem:[%s12634_s29 + $0x974] sm:$0xf0] }
 0x286   : > { %7766 = vmatpush.bf16.msrb.mxu0 %v9566_v0  ;;  %7735 = vmatmul.bf16.vlgmr.msra.gmra.mxu1 %v12879_v17  ;;  %v11054_v0 = vld [vmem:[%s12634_s29 + $0x624] sm:$0xf0]  ;;  %v11140_v23 = vld [vmem:[%s12634_s29 + $0x8d4] sm:$0xf0] }
 0x287   : > { %7779 = vmatpush.bf16.msrb.mxu1 %v9630_v4  ;;  %7748 = vmatmul.bf16.vlgmr.msra.gmra.mxu2 %v12877_v16  ;;  %v9589_v4 = vld [vmem:[%s12634_s29 + $0x6a0] sm:$0xf]  ;;  %v9526_v11 = vor.u32 %v11054_v0, %v9525_v63  ;;  %v11172_v27 = vld [vmem:[%s12634_s29 + $0x9d4] sm:$0xf0] }
 0x288   : > { %7792 = vmatpush.bf16.msrb.mxu2 %v9694_v5  ;;  %7761 = vmatmul.bf16.vlgmr.msra.gmra.mxu3 %v12881_v18  ;;  %v9726_v5 = vor.u32 %v11104_v58, %v9725_v57  ;;  %v9590_v14 = vor.u32 %v11070_v6, %v9589_v4  ;;  %v10013_v57 = vld [vmem:[%s12634_s29 + $0x9f0] sm:$0xf]  ;;  %v11176_v58 = vld [vmem:[%s12634_s29 + $0x9f4] sm:$0xf0]  ;;  %v9813_v0 = vld [vmem:[%s12634_s29 + $0x860] sm:$0xf] }
 0x289   : > { %7805 = vmatpush.bf16.msrb.mxu3 %v9758_v9  ;;  %v9717_v9 = vld [vmem:[%s12634_s29 + $0x7a0] sm:$0xf]  ;;  %v11126_v4 = vld [vmem:[%s12634_s29 + $0x864] sm:$0xf0]  ;;  %v10014_v6 = vor.u32 %v11176_v58, %v10013_v57  ;;  %v11152_v57 = vld [vmem:[%s12634_s29 + $0x934] sm:$0xf0] }
 0x28a   : > { %7767 = vmatpush.bf16.msrb.mxu0 %v9558_v19  ;;  %v11052_v19 = vld [vmem:[%s12634_s29 + $0x614] sm:$0xf0]  ;;  %v9718_v22 = vor.u32 %v11102_v10, %v9717_v9  ;;  %v11158_v9 = vld [vmem:[%s12634_s29 + $0x964] sm:$0xf0]  ;;  %v10005_v10 = vld [vmem:[%s12634_s29 + $0x9e0] sm:$0xf] }
 0x28b   : > { %7780 = vmatpush.bf16.msrb.mxu1 %v9622_v20  ;;  %v9581_v20 = vld [vmem:[%s12634_s29 + $0x690] sm:$0xf]  ;;  %v9518_v32 = vor.u32 %v11052_v19, %v9517_v12  ;;  %v9814_v12 = vor.u32 %v11126_v4, %v9813_v0  ;;  %v9781_v0 = vld [vmem:[%s12634_s29 + $0x820] sm:$0xf]  ;;  %v11118_v4 = vld [vmem:[%s12634_s29 + $0x824] sm:$0xf0] }
 0x28c   : > { %7793 = vmatpush.bf16.msrb.mxu2 %v9686_v21  ;;  %v11068_v21 = vld [vmem:[%s12634_s29 + $0x694] sm:$0xf0]  ;;  %v9805_v19 = vld [vmem:[%s12634_s29 + $0x850] sm:$0xf] }
 0x28d   : > { %7806 = vmatpush.bf16.msrb.mxu3 %v9750_v25  ;;  %v9709_v25 = vld [vmem:[%s12634_s29 + $0x790] sm:$0xf]  ;;  %v9582_v38 = vor.u32 %v11068_v21, %v9581_v20  ;;  %v11124_v20 = vld [vmem:[%s12634_s29 + $0x854] sm:$0xf0] }
 0x28e   : > { %7768 = vmatpush.bf16.msrb.mxu0 %v9550_v34  ;;  %v11066_v34 = vld [vmem:[%s12634_s29 + $0x684] sm:$0xf0]  ;;  %v9710_v44 = vor.u32 %v11100_v26, %v9709_v25  ;;  %v9869_v21 = vld [vmem:[%s12634_s29 + $0x8d0] sm:$0xf]  ;;  %v11156_v25 = vld [vmem:[%s12634_s29 + $0x954] sm:$0xf0]  ;;  %v9806_v31 = vor.u32 %v11124_v20, %v9805_v19 }
 0x28f   : > { %7781 = vmatpush.bf16.msrb.mxu1 %v9614_v36  ;;  %v9637_v36 = vld [vmem:[%s12634_s29 + $0x700] sm:$0xf]  ;;  %v9574_v55 = vor.u32 %v11066_v34, %v9573_v33  ;;  %v9997_v26 = vld [vmem:[%s12634_s29 + $0x9d0] sm:$0xf]  ;;  %v9934_v33 = vor.u32 %v11156_v25, %v9933_v24  ;;  %v11116_v20 = vld [vmem:[%s12634_s29 + $0x814] sm:$0xf0] }
 0x290   : > { %7794 = vmatpush.bf16.msrb.mxu2 %v9678_v37  ;;  %v11082_v37 = vld [vmem:[%s12634_s29 + $0x704] sm:$0xf0]  ;;  %v9797_v34 = vld [vmem:[%s12634_s29 + $0x840] sm:$0xf]  ;;  %v9981_v58 = vld [vmem:[%s12634_s29 + $0x9b0] sm:$0xf] }
 0x291   : > { %7807 = vmatpush.bf16.msrb.mxu3 %v9742_v41  ;;  %v11098_v41 = vld [vmem:[%s12634_s29 + $0x784] sm:$0xf0]  ;;  %v9638_v56 = vor.u32 %v11082_v37, %v9637_v36  ;;  %v9861_v37 = vld [vmem:[%s12634_s29 + $0x8c0] sm:$0xf]  ;;  %v9773_v19 = vld [vmem:[%s12634_s29 + $0x810] sm:$0xf] }
 0x292   : > { %7769 = vmatpush.bf16.msrb.mxu0 %v9542_v47  ;;  %v12939_v47 = vld [vmem:[#allocation1 + $0x24] sm:$0xff]  ;;  %v11122_v36 = vld [vmem:[%s12634_s29 + $0x844] sm:$0xf0]  ;;  %v9901_v24 = vld [vmem:[%s12634_s29 + $0x910] sm:$0xf] }
 0x293   : > { %7782 = vmatpush.bf16.msrb.mxu1 %v9606_v48  ;;  %v12941_v48 = vld [vmem:[#allocation1 + $0x36] sm:$0xff]  ;;  %v11148_v25 = vld [vmem:[%s12634_s29 + $0x914] sm:$0xf0] }
 0x294   : > { %7795 = vmatpush.bf16.msrb.mxu2 %v9670_v49  ;;  %v12943_v49 = vld [vmem:[#allocation1 + $0x2d] sm:$0xff] }
 0x295   : > { %7808 = vmatpush.bf16.msrb.mxu3 %v9734_v53  ;;  %v9949_v53 = vld [vmem:[%s12634_s29 + $0x970] sm:$0xf]  ;;  %4999 = vst [vmem:[#allocation1] ss:$9 sm:$0xff] %v4458_v51 }
 0x296   : > { %7770 = vmatpush.bf16.msrb.mxu0 %v9534_v59  ;;  %v9702_v59 = vor.u32 %v11098_v41, %v9701_v40  ;;  %v9950_v63 = vor.u32 %v11160_v54, %v9949_v53  ;;  %v9925_v40 = vld [vmem:[%s12634_s29 + $0x940] sm:$0xf]  ;;  %v11154_v41 = vld [vmem:[%s12634_s29 + $0x944] sm:$0xf0]  ;;  %v9789_v51 = vld [vmem:[%s12634_s29 + $0x830] sm:$0xf] }
 0x297   : > { %7783 = vmatpush.bf16.msrb.mxu1 %v9598_v60  ;;  %v9822_v60 = vor.u32 %v11128_v43, %v9821_v42  ;;  %v9989_v42 = vld [vmem:[%s12634_s29 + $0x9c0] sm:$0xf]  ;;  %v11170_v43 = vld [vmem:[%s12634_s29 + $0x9c4] sm:$0xf0]  ;;  %v9853_v53 = vld [vmem:[%s12634_s29 + $0x8b0] sm:$0xf] }
 0x298   : > { %7796 = vmatpush.bf16.msrb.mxu2 %v9662_v62  ;;  %v9886_v62 = vor.u32 %v11144_v46, %v9885_v45  ;;  %v9926_v46 = vor.u32 %v11154_v41, %v9925_v40  ;;  %v9990_v54 = vor.u32 %v11170_v43, %v9989_v42  ;;  %v11146_v41 = vld [vmem:[%s12634_s29 + $0x904] sm:$0xf0]  ;;  %v9957_v42 = vld [vmem:[%s12634_s29 + $0x980] sm:$0xf] }
 0x299   : > { %7809 = vmatpush.bf16.msrb.mxu3 %v9726_v5  ;;  %v9877_v5 = vld [vmem:[%s12634_s29 + $0x8e0] sm:$0xf]  ;;  %v11162_v43 = vld [vmem:[%s12634_s29 + $0x984] sm:$0xf0] }
 0x29a   : > { %7771 = vmatpush.bf16.msrb.mxu0 %v9526_v11  ;;  %v11174_v11 = vld [vmem:[%s12634_s29 + $0x9e4] sm:$0xf0] }
 0x29b   : > { %7784 = vmatpush.bf16.msrb.mxu1 %v9590_v14  ;;  %v9878_v14 = vor.u32 %v11142_v7, %v9877_v5  ;;  %v9845_v5 = vld [vmem:[%s12634_s29 + $0x8a0] sm:$0xf]  ;;  %v11134_v7 = vld [vmem:[%s12634_s29 + $0x8a4] sm:$0xf0] }
 0x29c   : > { %7797 = vmatpush.bf16.msrb.mxu2 %v9654_v15  ;;  %v9942_v15 = vor.u32 %v11158_v9, %v9941_v8  ;;  %v9909_v8 = vld [vmem:[%s12634_s29 + $0x920] sm:$0xf]  ;;  %v11150_v9 = vld [vmem:[%s12634_s29 + $0x924] sm:$0xf0] }
 0x29d   : > { %7810 = vmatpush.bf16.msrb.mxu3 %v9718_v22  ;;  %v10006_v22 = vor.u32 %v11174_v11, %v10005_v10  ;;  %v9973_v10 = vld [vmem:[%s12634_s29 + $0x9a0] sm:$0xf]  ;;  %v11166_v11 = vld [vmem:[%s12634_s29 + $0x9a4] sm:$0xf0] }
 0x29e   : > { %7772 = vmatpush.bf16.msrb.mxu0 %v9518_v32  ;;  %v9870_v32 = vor.u32 %v11140_v23, %v9869_v21  ;;  %v9837_v21 = vld [vmem:[%s12634_s29 + $0x890] sm:$0xf]  ;;  %v11132_v23 = vld [vmem:[%s12634_s29 + $0x894] sm:$0xf0] }
 0x29f   : > { %7785 = vmatpush.bf16.msrb.mxu1 %v9582_v38  ;;  %v9998_v38 = vor.u32 %v11172_v27, %v9997_v26  ;;  %v9965_v26 = vld [vmem:[%s12634_s29 + $0x990] sm:$0xf]  ;;  %v11164_v27 = vld [vmem:[%s12634_s29 + $0x994] sm:$0xf0] }
 0x2a0   : > { %7798 = vmatpush.bf16.msrb.mxu2 %v9646_v39  ;;  %v11138_v39 = vld [vmem:[%s12634_s29 + $0x8c4] sm:$0xf0]  ;;  %v9966_v40 = vor.u32 %v11164_v27, %v9965_v26  ;;  %v11204_v27 = vld [vmem:[%s12634_s29 + $0xad4] sm:$0xf0] }
 0x2a1   : > { %7811 = vmatpush.bf16.msrb.mxu3 %v9710_v44  ;;  %v9798_v44 = vor.u32 %v11122_v36, %v9797_v34  ;;  %v9862_v45 = vor.u32 %v11138_v39, %v9861_v37  ;;  %v9838_v34 = vor.u32 %v11132_v23, %v9837_v21  ;;  %v9902_v36 = vor.u32 %v11148_v25, %v9901_v24  ;;  %v9829_v37 = vld [vmem:[%s12634_s29 + $0x880] sm:$0xf]  ;;  %v10061_v23 = vld [vmem:[%s12634_s29 + $0xa50] sm:$0xf]  ;;  %v11188_v24 = vld [vmem:[%s12634_s29 + $0xa54] sm:$0xf0] }
 0x2a2   : > { %7773 = vmatpush.bf16.msrb.mxu0 %v9510_v52  ;;  %v11120_v52 = vld [vmem:[%s12634_s29 + $0x834] sm:$0xf0]  ;;  %v9893_v39 = vld [vmem:[%s12634_s29 + $0x900] sm:$0xf]  ;;  %v10125_v25 = vld [vmem:[%s12634_s29 + $0xad0] sm:$0xf] }
 0x2a3   : > { %7786 = vmatpush.bf16.msrb.mxu1 %v9574_v55  ;;  %v11136_v55 = vld [vmem:[%s12634_s29 + $0x8b4] sm:$0xf0] }
 0x2a4   : > { %7799 = vmatpush.bf16.msrb.mxu2 %v9638_v56  ;;  %v9917_v56 = vld [vmem:[%s12634_s29 + $0x930] sm:$0xf] }
 0x2a5   : > { %7812 = vmatpush.bf16.msrb.mxu3 %v9702_v59  ;;  %7774 = vmatmul.bf16.vlgmr.msrb.gmra.mxu0 %v12939_v47  ;;  %v11168_v59 = vld [vmem:[%s12634_s29 + $0x9b4] sm:$0xf0] }
 0x2a6   : > { %7818 = vmatpush.bf16.msra.mxu0 %v9822_v60  ;;  %7787 = vmatmul.bf16.vlgmr.msrb.gmra.mxu1 %v12943_v49  ;;  %v9790_v60 = vor.u32 %v11120_v52, %v9789_v51  ;;  %v11208_v52 = vld [vmem:[%s12634_s29 + $0xaf4] sm:$0xf0] }
 0x2a7   : > { %7831 = vmatpush.bf16.msra.mxu1 %v9886_v62  ;;  %7800 = vmatmul.bf16.vlgmr.msrb.gmra.mxu2 %v12941_v48  ;;  %v9854_v62 = vor.u32 %v11136_v55, %v9853_v53  ;;  %v10205_v53 = vld [vmem:[%s12634_s29 + $0xb70] sm:$0xf] }
 0x2a8   : > { %7844 = vmatpush.bf16.msra.mxu2 %v9950_v63  ;;  %7813 = vmatmul.bf16.vlgmr.msrb.gmra.mxu3 %v12945_v50  ;;  %v9918_v63 = vor.u32 %v11152_v57, %v9917_v56  ;;  %v9894_v56 = vor.u32 %v11146_v41, %v9893_v39  ;;  %v10269_v57 = vld [vmem:[%s12634_s29 + $0xbf0] sm:$0xf]  ;;  %v10053_v39 = vld [vmem:[%s12634_s29 + $0xa40] sm:$0xf] }
 0x2a9   : > { %7857 = vmatpush.bf16.msra.mxu3 %v10014_v6  ;;  %v9982_v6 = vor.u32 %v11168_v59, %v9981_v58  ;;  %v11240_v58 = vld [vmem:[%s12634_s29 + $0xbf4] sm:$0xf0]  ;;  %v9958_v59 = vor.u32 %v11162_v43, %v9957_v42  ;;  %v10117_v41 = vld [vmem:[%s12634_s29 + $0xac0] sm:$0xf]  ;;  %v11202_v43 = vld [vmem:[%s12634_s29 + $0xac4] sm:$0xf0] }
 0x2aa   : > { %7819 = vmatpush.bf16.msra.mxu0 %v9814_v12  ;;  %v9782_v12 = vor.u32 %v11118_v4, %v9781_v0  ;;  %v10069_v0 = vld [vmem:[%s12634_s29 + $0xa60] sm:$0xf]  ;;  %v11190_v4 = vld [vmem:[%s12634_s29 + $0xa64] sm:$0xf0] }
 0x2ab   : > { %7832 = vmatpush.bf16.msra.mxu1 %v9878_v14  ;;  %v9846_v14 = vor.u32 %v11134_v7, %v9845_v5  ;;  %v10133_v5 = vld [vmem:[%s12634_s29 + $0xae0] sm:$0xf]  ;;  %v11206_v7 = vld [vmem:[%s12634_s29 + $0xae4] sm:$0xf0] }
 0x2ac   : > { %7845 = vmatpush.bf16.msra.mxu2 %v9942_v15  ;;  %v9910_v15 = vor.u32 %v11150_v9, %v9909_v8  ;;  %v10197_v8 = vld [vmem:[%s12634_s29 + $0xb60] sm:$0xf]  ;;  %v11222_v9 = vld [vmem:[%s12634_s29 + $0xb64] sm:$0xf0]  ;;  %v10134_v21 = vor.u32 %v11206_v7, %v10133_v5 }
 0x2ad   : > { %7858 = vmatpush.bf16.msra.mxu3 %v10006_v22  ;;  %v9974_v22 = vor.u32 %v11166_v11, %v9973_v10  ;;  %v13028_v10 = vld [vmem:[#allocation1] sm:$0xff]  ;;  %v10261_v11 = vld [vmem:[%s12634_s29 + $0xbe0] sm:$0xf] }
 0x2ae   : > { %7820 = vmatpush.bf16.msra.mxu0 %v9806_v31  ;;  %v9774_v31 = vor.u32 %v11116_v20, %v9773_v19  ;;  %v13036_v19 = vld [vmem:[#allocation1 + $0x1b] sm:$0xff]  ;;  %v10070_v20 = vor.u32 %v11190_v4, %v10069_v0  ;;  %v10037_v5 = vld [vmem:[%s12634_s29 + $0xa20] sm:$0xf] }
 0x2af   : > { %7833 = vmatpush.bf16.msra.mxu1 %v9870_v32  ;;  %v9765_v32 = vld [vmem:[%s12634_s29 + $0x800] sm:$0xf]  ;;  %v11232_v0 = vld [vmem:[%s12634_s29 + $0xbb4] sm:$0xf0] }
 0x2b0   : > { %7846 = vmatpush.bf16.msra.mxu2 %v9934_v33  ;;  %v11114_v33 = vld [vmem:[%s12634_s29 + $0x804] sm:$0xf0] }
 0x2b1   : > { %7859 = vmatpush.bf16.msra.mxu3 %v9998_v38  ;;  %v11130_v38 = vld [vmem:[%s12634_s29 + $0x884] sm:$0xf0]  ;;  %v9766_v51 = vor.u32 %v11114_v33, %v9765_v32  ;;  %v11220_v32 = vld [vmem:[%s12634_s29 + $0xb54] sm:$0xf0]  ;;  %v10253_v33 = vld [vmem:[%s12634_s29 + $0xbd0] sm:$0xf] }
 0x2b2   : > { %7821 = vmatpush.bf16.msra.mxu0 %v9798_v44  ;;  %v10077_v44 = vld [vmem:[%s12634_s29 + $0xa70] sm:$0xf]  ;;  %v9830_v55 = vor.u32 %v11130_v38, %v9829_v37  ;;  %v10126_v37 = vor.u32 %v11204_v27, %v10125_v25  ;;  %v11180_v27 = vld [vmem:[%s12634_s29 + $0xa14] sm:$0xf0] }
 0x2b3   : > { %7834 = vmatpush.bf16.msra.mxu1 %v9862_v45  ;;  %v11192_v45 = vld [vmem:[%s12634_s29 + $0xa74] sm:$0xf0] }
 0x2b4   : > { %7847 = vmatpush.bf16.msra.mxu2 %v9926_v46  ;;  %v10141_v46 = vld [vmem:[%s12634_s29 + $0xaf0] sm:$0xf] }
 0x2b5   : > { %7860 = vmatpush.bf16.msra.mxu3 %v9990_v54  ;;  %v11224_v54 = vld [vmem:[%s12634_s29 + $0xb74] sm:$0xf0] }
 0x2b6   : > { %7822 = vmatpush.bf16.msra.mxu0 %v9790_v60  ;;  %v10078_v60 = vor.u32 %v11192_v45, %v10077_v44  ;;  %v10181_v44 = vld [vmem:[%s12634_s29 + $0xb40] sm:$0xf]  ;;  %v11218_v45 = vld [vmem:[%s12634_s29 + $0xb44] sm:$0xf0] }
 0x2b7   : > { %7835 = vmatpush.bf16.msra.mxu1 %v9854_v62  ;;  %v10142_v62 = vor.u32 %v11208_v52, %v10141_v46  ;;  %v10245_v46 = vld [vmem:[%s12634_s29 + $0xbc0] sm:$0xf] }
 0x2b8   : > { %7848 = vmatpush.bf16.msra.mxu2 %v9918_v63  ;;  %v10206_v63 = vor.u32 %v11224_v54, %v10205_v53  ;;  %v10118_v53 = vor.u32 %v11202_v43, %v10117_v41  ;;  %v10182_v54 = vor.u32 %v11218_v45, %v10181_v44  ;;  %v11228_v41 = vld [vmem:[%s12634_s29 + $0xb94] sm:$0xf0]  ;;  %v11178_v43 = vld [vmem:[%s12634_s29 + $0xa04] sm:$0xf0]  ;;  %v10085_v45 = vld [vmem:[%s12634_s29 + $0xa80] sm:$0xf] }
 0x2b9   : > { %7861 = vmatpush.bf16.msra.mxu3 %v9982_v6  ;;  %v10270_v6 = vor.u32 %v11240_v58, %v10269_v57  ;;  %v10109_v57 = vld [vmem:[%s12634_s29 + $0xab0] sm:$0xf] }
 0x2ba   : > { %7823 = vmatpush.bf16.msra.mxu0 %v9782_v12  ;;  %v11238_v12 = vld [vmem:[%s12634_s29 + $0xbe4] sm:$0xf0] }
 0x2bb   : > { %7836 = vmatpush.bf16.msra.mxu1 %v9846_v14  ;;  %v13032_v14 = vld [vmem:[#allocation1 + $0x12] sm:$0xff]  ;;  %v10262_v26 = vor.u32 %v11238_v12, %v10261_v11 }
 0x2bc   : > { %7849 = vmatpush.bf16.msra.mxu2 %v9910_v15  ;;  %v13034_v15 = vld [vmem:[#allocation1 + $0x9] sm:$0xff] }
 0x2bd   : > { %7862 = vmatpush.bf16.msra.mxu3 %v9974_v22  ;;  %v10198_v22 = vor.u32 %v11222_v9, %v10197_v8  ;;  %v11182_v8 = vld [vmem:[%s12634_s29 + $0xa24] sm:$0xf0]  ;;  %v10101_v9 = vld [vmem:[%s12634_s29 + $0xaa0] sm:$0xf] }
 0x2be   : > { %7824 = vmatpush.bf16.msra.mxu0 %v9774_v31  ;;  %v10189_v31 = vld [vmem:[%s12634_s29 + $0xb50] sm:$0xf]  ;;  %v11198_v11 = vld [vmem:[%s12634_s29 + $0xaa4] sm:$0xf0]  ;;  %v10038_v25 = vor.u32 %v11182_v8, %v10037_v5  ;;  %v13095_v5 = vld [vmem:[#allocation1 + $0x24] sm:$0xff] }
 0x2bf   : > { %7837 = vmatpush.bf16.msra.mxu1 %v9838_v34  ;;  %v11236_v34 = vld [vmem:[%s12634_s29 + $0xbd4] sm:$0xf0]  ;;  %v10190_v38 = vor.u32 %v11220_v32, %v10189_v31  ;;  %v10102_v31 = vor.u32 %v11198_v11, %v10101_v9  ;;  %v4459_v11 = vld [vmem:[%s13838_s0 + $0x18] sm:$0xff] }
 0x2c0   : > { %7850 = vmatpush.bf16.msra.mxu2 %v9902_v36  ;;  %v10062_v36 = vor.u32 %v11188_v24, %v10061_v23  ;;  %v10254_v42 = vor.u32 %v11236_v34, %v10253_v33  ;;  %v10229_v23 = vld [vmem:[%s12634_s29 + $0xba0] sm:$0xf]  ;;  %v11230_v24 = vld [vmem:[%s12634_s29 + $0xba4] sm:$0xf0]  ;;  %v10093_v33 = vld [vmem:[%s12634_s29 + $0xa90] sm:$0xf] }
 0x2c1   : > { %7863 = vmatpush.bf16.msra.mxu3 %v9966_v40  ;;  %v11186_v40 = vld [vmem:[%s12634_s29 + $0xa44] sm:$0xf0]  ;;  %v11196_v34 = vld [vmem:[%s12634_s29 + $0xa94] sm:$0xf0] }
 0x2c2   : > { %7825 = vmatpush.bf16.msra.mxu0 %v9766_v51  ;;  %v11234_v51 = vld [vmem:[%s12634_s29 + $0xbc4] sm:$0xf0]  ;;  %v10054_v52 = vor.u32 %v11186_v40, %v10053_v39  ;;  %v11212_v39 = vld [vmem:[%s12634_s29 + $0xb14] sm:$0xf0]  ;;  %v10221_v40 = vld [vmem:[%s12634_s29 + $0xb90] sm:$0xf] }
 0x2c3   : > { %7838 = vmatpush.bf16.msra.mxu1 %v9830_v55  ;;  %v10045_v55 = vld [vmem:[%s12634_s29 + $0xa30] sm:$0xf]  ;;  %v10246_v58 = vor.u32 %v11234_v51, %v10245_v46  ;;  %v11194_v46 = vld [vmem:[%s12634_s29 + $0xa84] sm:$0xf0]  ;;  %v10149_v51 = vld [vmem:[%s12634_s29 + $0xb00] sm:$0xf] }
 0x2c4   : > { %7851 = vmatpush.bf16.msra.mxu2 %v9894_v56  ;;  %v11184_v56 = vld [vmem:[%s12634_s29 + $0xa34] sm:$0xf0] }
 0x2c5   : > { %7864 = vmatpush.bf16.msra.mxu3 %v9958_v59  ;;  %7826 = vmatmul.bf16.vlgmr.msra.gmra.mxu0 %v13028_v10  ;;  %v11200_v59 = vld [vmem:[%s12634_s29 + $0xab4] sm:$0xf0]  ;;  %v10046_v4 = vor.u32 %v11184_v56, %v10045_v55  ;;  %v10213_v56 = vld [vmem:[%s12634_s29 + $0xb80] sm:$0xf] }
 0x2c6   : > { %7870 = vmatpush.bf16.msrb.mxu0 %v10078_v60  ;;  %7839 = vmatmul.bf16.vlgmr.msra.gmra.mxu1 %v13034_v15  ;;  %v10173_v60 = vld [vmem:[%s12634_s29 + $0xb30] sm:$0xf]  ;;  %v13101_v8 = vld [vmem:[#allocation1 + $0x3f] sm:$0xff] }
 0x2c7   : > { %7883 = vmatpush.bf16.msrb.mxu1 %v10142_v62  ;;  %7852 = vmatmul.bf16.vlgmr.msra.gmra.mxu2 %v13032_v14  ;;  %v11216_v62 = vld [vmem:[%s12634_s29 + $0xb34] sm:$0xf0] }
 0x2c8   : > { %7896 = vmatpush.bf16.msrb.mxu2 %v10206_v63  ;;  %7865 = vmatmul.bf16.vlgmr.msra.gmra.mxu3 %v13036_v19  ;;  %v10237_v63 = vld [vmem:[%s12634_s29 + $0xbb0] sm:$0xf]  ;;  %v10174_v7 = vor.u32 %v11216_v62, %v10173_v60 }
 0x2c9   : > { %7909 = vmatpush.bf16.msrb.mxu3 %v10270_v6  ;;  %v10110_v6 = vor.u32 %v11200_v59, %v10109_v57  ;;  %v10238_v12 = vor.u32 %v11232_v0, %v10237_v63  ;;  %v11226_v57 = vld [vmem:[%s12634_s29 + $0xb84] sm:$0xf0]  ;;  %v11256_v59 = vld [vmem:[%s12634_s29 + $0xc74] sm:$0xf0]  ;;  %v10222_v63 = vor.u32 %v11228_v41, %v10221_v40  ;;  %v10397_v0 = vld [vmem:[%s12634_s29 + $0xcf0] sm:$0xf] }
 0x2ca   : > { %7871 = vmatpush.bf16.msrb.mxu0 %v10070_v20  ;;  %v10165_v20 = vld [vmem:[%s12634_s29 + $0xb20] sm:$0xf]  ;;  %v7632_v62 = vpop.f32.mrf.mxu1  ;;  %v11270_v41 = vld [vmem:[%s12634_s29 + $0xce4] sm:$0xf0] }
 0x2cb   : > { %7884 = vmatpush.bf16.msrb.mxu1 %v10134_v21  ;;  %v11214_v21 = vld [vmem:[%s12634_s29 + $0xb24] sm:$0xf0] }
 0x2cc   : > { %7897 = vmatpush.bf16.msrb.mxu2 %v10198_v22  ;;  %v4972_v22 = vld [vmem:[%s12627_s16] sm:$0x3]  ;;  %v10166_v32 = vor.u32 %v11214_v21, %v10165_v20  ;;  %v10461_v20 = vld [vmem:[%s12634_s29 + $0xd70] sm:$0xf] }
 0x2cd   : > { %7910 = vmatpush.bf16.msrb.mxu3 %v10262_v26  ;;  %v10029_v26 = vld [vmem:[%s12634_s29 + $0xa10] sm:$0xf]  ;;  %v11288_v21 = vld [vmem:[%s12634_s29 + $0xd74] sm:$0xf0] }
 0x2ce   : > { %7872 = vmatpush.bf16.msrb.mxu0 %v10062_v36  ;;  %v4974_v36 = vperm.slane %v4972_v22, 0  ;;  %v10030_v44 = vor.u32 %v11180_v27, %v10029_v26  ;;  %v10086_v22 = vor.u32 %v11194_v46, %v10085_v45  ;;  %v7645_v26 = vpop.f32.mrf.mxu2  ;;  %v10214_v27 = vor.u32 %v11226_v57, %v10213_v56  ;;  %v10517_v46 = vld [vmem:[%s12634_s29 + $0xde0] sm:$0xf]  ;;  %v10317_v56 = vld [vmem:[%s12634_s29 + $0xc50] sm:$0xf] }
 0x2cf   : > { %7885 = vmatpush.bf16.msrb.mxu1 %v10126_v37  ;;  %v10230_v37 = vor.u32 %v11230_v24, %v10229_v23  ;;  %v10525_v24 = vld [vmem:[%s12634_s29 + $0xdf0] sm:$0xf]  ;;  %v11252_v57 = vld [vmem:[%s12634_s29 + $0xc54] sm:$0xf0] }
 0x2d0   : > { %7898 = vmatpush.bf16.msrb.mxu2 %v10190_v38  ;;  %v10157_v38 = vld [vmem:[%s12634_s29 + $0xb10] sm:$0xf] }
 0x2d1   : > { %7911 = vmatpush.bf16.msrb.mxu3 %v10254_v42  ;;  %v10021_v42 = vld [vmem:[%s12634_s29 + $0xa00] sm:$0xf]  ;;  %v10158_v55 = vor.u32 %v11212_v39, %v10157_v38  ;;  %v11254_v38 = vld [vmem:[%s12634_s29 + $0xc64] sm:$0xf0] }
 0x2d2   : > { %7873 = vmatpush.bf16.msrb.mxu0 %v10054_v52  ;;  %v11210_v52 = vld [vmem:[%s12634_s29 + $0xb04] sm:$0xf0]  ;;  %v10389_v39 = vld [vmem:[%s12634_s29 + $0xce0] sm:$0xf] }
 0x2d3   : > { %7886 = vmatpush.bf16.msrb.mxu1 %v10118_v53  ;;  %v7619_v53 = vpop.f32.mrf.mxu0  ;;  %v10150_v23 = vor.u32 %v11210_v52, %v10149_v51  ;;  %v11302_v51 = vld [vmem:[%s12634_s29 + $0xde4] sm:$0xf0]  ;;  %v7634_v52 = vpop.f32.mrf.mxu1 }
 0x2d4   : > { %7899 = vmatpush.bf16.msrb.mxu2 %v10182_v54  ;;  %v10094_v54 = vor.u32 %v11196_v34, %v10093_v33  ;;  %v7620_v60 = vadd.f32 %v7619_v53, %v4974_v36  ;;  %v7658_v33 = vpop.f32.mrf.mxu3  ;;  %v10462_v36 = vor.u32 %v11288_v21, %v10461_v20  ;;  %v11280_v52 = vld [vmem:[%s12634_s29 + $0xd34] sm:$0xf0] }
 0x2d5   : > { %7912 = vmatpush.bf16.msrb.mxu3 %v10246_v58  ;;  %v10333_v58 = vld [vmem:[%s12634_s29 + $0xc70] sm:$0xf] }
 0x2d6   : > { %7874 = vmatpush.bf16.msrb.mxu0 %v10046_v4  ;;  %v11272_v4 = vld [vmem:[%s12634_s29 + $0xcf4] sm:$0xf0]  ;;  %v7633_v9 = vadd.f32 %v7632_v62, %v7620_v60  ;;  %v10445_v62 = vld [vmem:[%s12634_s29 + $0xd50] sm:$0xf] }
 0x2d7   : > { %7887 = vmatpush.bf16.msrb.mxu1 %v10110_v6  ;;  %v13097_v6 = vld [vmem:[#allocation1 + $0x36] sm:$0xff]  ;;  %v10398_v34 = vor.u32 %v11272_v4, %v10397_v0  ;;  %v11268_v60 = vld [vmem:[%s12634_s29 + $0xcd4] sm:$0xf0] }
 0x2d8   : > { %7900 = vmatpush.bf16.msrb.mxu2 %v10174_v7  ;;  %v13099_v7 = vld [vmem:[#allocation1 + $0x2d] sm:$0xff]  ;;  %v10509_v0 = vld [vmem:[%s12634_s29 + $0xdd0] sm:$0xf]  ;;  %v11300_v4 = vld [vmem:[%s12634_s29 + $0xdd4] sm:$0xf0] }
 0x2d9   : > { %7913 = vmatpush.bf16.msrb.mxu3 %v10238_v12  ;;  %v10022_v12 = vor.u32 %v11178_v43, %v10021_v42  ;;  %5009 = vst [vmem:[#allocation1] ss:$9 sm:$0xff] %v4459_v11  ;;  %v10453_v42 = vld [vmem:[%s12634_s29 + $0xd60] sm:$0xf]  ;;  %v11286_v43 = vld [vmem:[%s12634_s29 + $0xd64] sm:$0xf0]  ;;  %v10318_v11 = vor.u32 %v11252_v57, %v10317_v56 }
 0x2da   : > { %7875 = vmatpush.bf16.msrb.mxu0 %v10038_v25  ;;  %v11304_v25 = vld [vmem:[%s12634_s29 + $0xdf4] sm:$0xf0] }
 0x2db   : > { %7888 = vmatpush.bf16.msrb.mxu1 %v10102_v31  ;;  %v10334_v31 = vor.u32 %v11256_v59, %v10333_v58  ;;  %v10526_v40 = vor.u32 %v11304_v25, %v10525_v24  ;;  %v7621_v45 = vpop.f32.mrf.mxu0  ;;  %v10381_v58 = vld [vmem:[%s12634_s29 + $0xcd0] sm:$0xf]  ;;  %v10518_v59 = vor.u32 %v11302_v51, %v10517_v46  ;;  %v10373_v24 = vld [vmem:[%s12634_s29 + $0xcc0] sm:$0xf]  ;;  %v10510_v25 = vor.u32 %v11300_v4, %v10509_v0  ;;  %v11264_v46 = vld [vmem:[%s12634_s29 + $0xcb4] sm:$0xf0] }
 0x2dc   : > { %7901 = vmatpush.bf16.msrb.mxu2 %v10166_v32  ;;  %v7646_v32 = vadd.f32 %v7645_v26, %v7633_v9  ;;  %v7647_v9 = vpop.f32.mrf.mxu2  ;;  %v10382_v20 = vor.u32 %v11268_v60, %v10381_v58  ;;  %v11266_v26 = vld [vmem:[%s12634_s29 + $0xcc4] sm:$0xf0]  ;;  %v10429_v51 = vld [vmem:[%s12634_s29 + $0xd30] sm:$0xf]  ;;  %v10293_v58 = vld [vmem:[%s12634_s29 + $0xc20] sm:$0xf] }
 0x2dd   : > { %7914 = vmatpush.bf16.msrb.mxu3 %v10230_v37  ;;  %v10325_v37 = vld [vmem:[%s12634_s29 + $0xc60] sm:$0xf]  ;;  %v10430_v57 = vor.u32 %v11280_v52, %v10429_v51  ;;  %v11262_v0 = vld [vmem:[%s12634_s29 + $0xca4] sm:$0xf0] }
 0x2de   : > { %7876 = vmatpush.bf16.msrb.mxu0 %v10030_v44  ;;  %v7659_v44 = vadd.f32 %v7658_v33, %v7646_v32  ;;  %v10326_v53 = vor.u32 %v11254_v38, %v10325_v37  ;;  %v10501_v32 = vld [vmem:[%s12634_s29 + $0xdc0] sm:$0xf]  ;;  %v11298_v33 = vld [vmem:[%s12634_s29 + $0xdc4] sm:$0xf0]  ;;  %v10374_v37 = vor.u32 %v11266_v26, %v10373_v24 }
 0x2df   : > { %7889 = vmatpush.bf16.msrb.mxu1 %v10094_v54  ;;  %v10390_v54 = vor.u32 %v11270_v41, %v10389_v39  ;;  %v10301_v39 = vld [vmem:[%s12634_s29 + $0xc30] sm:$0xf]  ;;  %v10502_v45 = vor.u32 %v11298_v33, %v10501_v32  ;;  %v10357_v60 = vld [vmem:[%s12634_s29 + $0xca0] sm:$0xf]  ;;  %v11278_v9 = vld [vmem:[%s12634_s29 + $0xd24] sm:$0xf0] }
 0x2e0   : > { %7902 = vmatpush.bf16.msrb.mxu2 %v10158_v55  ;;  %v10454_v55 = vor.u32 %v11286_v43, %v10453_v42  ;;  %v10365_v41 = vld [vmem:[%s12634_s29 + $0xcb0] sm:$0xf]  ;;  %v10421_v4 = vld [vmem:[%s12634_s29 + $0xd20] sm:$0xf]  ;;  %v11258_v52 = vld [vmem:[%s12634_s29 + $0xc84] sm:$0xf0] }
 0x2e1   : > { %7915 = vmatpush.bf16.msrb.mxu3 %v10222_v63  ;;  %v11284_v63 = vld [vmem:[%s12634_s29 + $0xd54] sm:$0xf0]  ;;  %v10422_v26 = vor.u32 %v11278_v9, %v10421_v4  ;;  %v10349_v32 = vld [vmem:[%s12634_s29 + $0xc90] sm:$0xf]  ;;  %v10341_v51 = vld [vmem:[%s12634_s29 + $0xc80] sm:$0xf] }
 0x2e2   : > { %7877 = vmatpush.bf16.msrb.mxu0 %v10022_v12  ;;  %v7660_v12 = vpop.f32.mrf.mxu3  ;;  %v10446_v21 = vor.u32 %v11284_v63, %v10445_v62  ;;  %v10717_v4 = vld [vmem:[%s12634_s29 + $0xf70] sm:$0xf]  ;;  %v11352_v9 = vld [vmem:[%s12634_s29 + $0xf74] sm:$0xf0] }
 0x2e3   : > { %7890 = vmatpush.bf16.msrb.mxu1 %v10086_v22  ;;  %v10309_v22 = vld [vmem:[%s12634_s29 + $0xc40] sm:$0xf]  ;;  %v7684_v43 = vpop.f32.mrf.mxu1 }
 0x2e4   : > { %7903 = vmatpush.bf16.msrb.mxu2 %v10150_v23  ;;  %v11250_v23 = vld [vmem:[%s12634_s29 + $0xc44] sm:$0xf0] }
 0x2e5   : > { %7916 = vmatpush.bf16.msrb.mxu3 %v10214_v27  ;;  %7878 = vmatmul.bf16.vlgmr.msrb.gmra.mxu0 %v13095_v5  ;;  %v10437_v27 = vld [vmem:[%s12634_s29 + $0xd40] sm:$0xf] }
 0x2e6   : > { %7922 = vmatpush.bf16.msra.mxu0 %v10334_v31  ;;  %7891 = vmatmul.bf16.vlgmr.msrb.gmra.mxu1 %v13099_v7  ;;  %v11282_v31 = vld [vmem:[%s12634_s29 + $0xd44] sm:$0xf0] }
 0x2e7   : > { %7935 = vmatpush.bf16.msra.mxu1 %v10398_v34  ;;  %7904 = vmatmul.bf16.vlgmr.msrb.gmra.mxu2 %v13097_v6  ;;  %v10310_v34 = vor.u32 %v11250_v23, %v10309_v22  ;;  %v10438_v38 = vor.u32 %v11282_v31, %v10437_v27  ;;  %v10285_v27 = vld [vmem:[%s12634_s29 + $0xc10] sm:$0xf]  ;;  %v11244_v31 = vld [vmem:[%s12634_s29 + $0xc14] sm:$0xf0] }
 0x2e8   : > { %7948 = vmatpush.bf16.msra.mxu2 %v10462_v36  ;;  %7917 = vmatmul.bf16.vlgmr.msrb.gmra.mxu3 %v13101_v8  ;;  %v7671_v36 = vpop.f32.mrf.mxu0 }
 0x2e9   : > { %7961 = vmatpush.bf16.msra.mxu3 %v10526_v40  ;;  %v11248_v40 = vld [vmem:[%s12634_s29 + $0xc34] sm:$0xf0]  ;;  %v7672_v42 = vadd.f32 %v7671_v36, %v7659_v44  ;;  %v10366_v44 = vor.u32 %v11264_v46, %v10365_v41  ;;  %v10286_v41 = vor.u32 %v11244_v31, %v10285_v27  ;;  %v10581_v27 = vld [vmem:[%s12634_s29 + $0xe60] sm:$0xf]  ;;  %v11318_v31 = vld [vmem:[%s12634_s29 + $0xe64] sm:$0xf0] }
 0x2ea   : > { %7923 = vmatpush.bf16.msra.mxu0 %v10326_v53  ;;  %v10493_v53 = vld [vmem:[%s12634_s29 + $0xdb0] sm:$0xf]  ;;  %v10302_v56 = vor.u32 %v11248_v40, %v10301_v39  ;;  %v7697_v62 = vpop.f32.mrf.mxu2  ;;  %v11260_v36 = vld [vmem:[%s12634_s29 + $0xc94] sm:$0xf0] }
 0x2eb   : > { %7936 = vmatpush.bf16.msra.mxu1 %v10390_v54  ;;  %v11296_v54 = vld [vmem:[%s12634_s29 + $0xdb4] sm:$0xf0]  ;;  %v7710_v12 = vpop.f32.mrf.mxu3  ;;  %v7686_v33 = vpop.f32.mrf.mxu1  ;;  %v10477_v39 = vld [vmem:[%s12634_s29 + $0xd90] sm:$0xf] }
 0x2ec   : > { %7949 = vmatpush.bf16.msra.mxu2 %v10454_v55  ;;  %v7685_v55 = vadd.f32 %v7684_v43, %v7672_v42  ;;  %v10494_v63 = vor.u32 %v11296_v54, %v10493_v53  ;;  %v11292_v40 = vld [vmem:[%s12634_s29 + $0xd94] sm:$0xf0]  ;;  %v10277_v42 = vld [vmem:[%s12634_s29 + $0xc00] sm:$0xf]  ;;  %v11242_v43 = vld [vmem:[%s12634_s29 + $0xc04] sm:$0xf0] }
 0x2ed   : > { %7962 = vmatpush.bf16.msra.mxu3 %v10518_v59  ;;  %v11246_v59 = vld [vmem:[%s12634_s29 + $0xc24] sm:$0xf0]  ;;  %v10405_v53 = vld [vmem:[%s12634_s29 + $0xd00] sm:$0xf] }
 0x2ee   : > { %7924 = vmatpush.bf16.msra.mxu0 %v10318_v11  ;;  %v7698_v11 = vadd.f32 %v7697_v62, %v7685_v55  ;;  %v10294_v22 = vor.u32 %v11246_v59, %v10293_v58  ;;  %v10478_v55 = vor.u32 %v11292_v40, %v10477_v39  ;;  %v10589_v59 = vld [vmem:[%s12634_s29 + $0xe70] sm:$0xf]  ;;  %v10773_v39 = vld [vmem:[%s12634_s29 + $0xfe0] sm:$0xf]  ;;  %v11366_v40 = vld [vmem:[%s12634_s29 + $0xfe4] sm:$0xf0] }
 0x2ef   : > { %7937 = vmatpush.bf16.msra.mxu1 %v10382_v20  ;;  %v10485_v20 = vld [vmem:[%s12634_s29 + $0xda0] sm:$0xf]  ;;  %v10653_v62 = vld [vmem:[%s12634_s29 + $0xef0] sm:$0xf] }
 0x2f0   : > { %7950 = vmatpush.bf16.msra.mxu2 %v10446_v21  ;;  %v11294_v21 = vld [vmem:[%s12634_s29 + $0xda4] sm:$0xf0]  ;;  %v13154_v23 = vadd.f32 %v7710_v12, %v7698_v11  ;;  %v7673_v24 = vpop.f32.mrf.mxu0  ;;  %v10342_v11 = vor.u32 %v11258_v52, %v10341_v51  ;;  %v10573_v52 = vld [vmem:[%s12634_s29 + $0xe50] sm:$0xf] }
 0x2f1   : > { %7963 = vmatpush.bf16.msra.mxu3 %v10510_v25  ;;  %v10358_v25 = vor.u32 %v11262_v0, %v10357_v60  ;;  %v11320_v60 = vld [vmem:[%s12634_s29 + $0xe74] sm:$0xf0] }
 0x2f2   : > { %7925 = vmatpush.bf16.msra.mxu0 %v10310_v34  ;;  %v10486_v34 = vor.u32 %v11294_v21, %v10485_v20  ;;  %v7699_v54 = vpop.f32.mrf.mxu2  ;;  %v11336_v0 = vld [vmem:[%s12634_s29 + $0xef4] sm:$0xf0]  ;;  %v10781_v20 = vld [vmem:[%s12634_s29 + $0xff0] sm:$0xf]  ;;  %v10590_v24 = vor.u32 %v11320_v60, %v10589_v59 }
 0x2f3   : > { %7938 = vmatpush.bf16.msra.mxu1 %v10374_v37  ;;  %v10413_v37 = vld [vmem:[%s12634_s29 + $0xd10] sm:$0xf]  ;;  %v7712_v58 = vpop.f32.mrf.mxu3  ;;  %v11368_v21 = vld [vmem:[%s12634_s29 + $0xff4] sm:$0xf0] }
 0x2f4   : > { %7951 = vmatpush.bf16.msra.mxu2 %v10438_v38  ;;  %v11276_v38 = vld [vmem:[%s12634_s29 + $0xd14] sm:$0xf0]  ;;  %v10782_v33 = vor.u32 %v11368_v21, %v10781_v20  ;;  %v10637_v54 = vld [vmem:[%s12634_s29 + $0xed0] sm:$0xf]  ;;  %v10693_v20 = vld [vmem:[%s12634_s29 + $0xf40] sm:$0xf] }
 0x2f5   : > { %7964 = vmatpush.bf16.msra.mxu3 %v10502_v45  ;;  %v10350_v45 = vor.u32 %v11260_v36, %v10349_v32  ;;  %v10414_v46 = vor.u32 %v11276_v38, %v10413_v37  ;;  %v10645_v32 = vld [vmem:[%s12634_s29 + $0xee0] sm:$0xf]  ;;  %v11350_v37 = vld [vmem:[%s12634_s29 + $0xf64] sm:$0xf0]  ;;  %v5010_v38 = vld [vmem:[#allocation1] sm:$0xff] }
 0x2f6   : > { %7926 = vmatpush.bf16.msra.mxu0 %v10302_v56  ;;  %v11274_v56 = vld [vmem:[%s12634_s29 + $0xd04] sm:$0xf0]  ;;  %v10709_v36 = vld [vmem:[%s12634_s29 + $0xf60] sm:$0xf]  ;;  %v10765_v58 = vld [vmem:[%s12634_s29 + $0xfd0] sm:$0xf] }
 0x2f7   : > { %7939 = vmatpush.bf16.msra.mxu1 %v10366_v44  ;;  %v10469_v44 = vld [vmem:[%s12634_s29 + $0xd80] sm:$0xf]  ;;  %v10406_v12 = vor.u32 %v11274_v56, %v10405_v53  ;;  %v10710_v51 = vor.u32 %v11350_v37, %v10709_v36  ;;  %v11316_v53 = vld [vmem:[%s12634_s29 + $0xe54] sm:$0xf0]  ;;  %v11346_v21 = vld [vmem:[%s12634_s29 + $0xf44] sm:$0xf0] }
 0x2f8   : > { %7952 = vmatpush.bf16.msra.mxu2 %v10430_v57  ;;  %v11290_v57 = vld [vmem:[%s12634_s29 + $0xd84] sm:$0xf0]  ;;  %v11332_v56 = vld [vmem:[%s12634_s29 + $0xed4] sm:$0xf0]  ;;  %v10574_v60 = vor.u32 %v11316_v53, %v10573_v52  ;;  %v10621_v37 = vld [vmem:[%s12634_s29 + $0xeb0] sm:$0xf] }
 0x2f9   : > { %7965 = vmatpush.bf16.msra.mxu3 %v10494_v63  ;;  %v10278_v63 = vor.u32 %v11242_v43, %v10277_v42  ;;  %v5011_v42 = vld [vmem:[#allocation1 + $0x9] sm:$0xff]  ;;  %v5013_v43 = vld [vmem:[#allocation1 + $0x1b] sm:$0xff] }
 0x2fa   : > { %7927 = vmatpush.bf16.msra.mxu0 %v10294_v22  ;;  %v10470_v22 = vor.u32 %v11290_v57, %v10469_v44  ;;  %v10701_v44 = vld [vmem:[%s12634_s29 + $0xf50] sm:$0xf]  ;;  %v11348_v57 = vld [vmem:[%s12634_s29 + $0xf54] sm:$0xf0]  ;;  %v10549_v52 = vld [vmem:[%s12634_s29 + $0xe20] sm:$0xf] }
 0x2fb   : > { %7940 = vmatpush.bf16.msra.mxu1 %v10358_v25  ;;  %v10654_v25 = vor.u32 %v11336_v0, %v10653_v62  ;;  %v11364_v59 = vld [vmem:[%s12634_s29 + $0xfd4] sm:$0xf0]  ;;  %v10638_v62 = vor.u32 %v11332_v56, %v10637_v54  ;;  %v10565_v0 = vld [vmem:[%s12634_s29 + $0xe40] sm:$0xf]  ;;  %v11310_v53 = vld [vmem:[%s12634_s29 + $0xe24] sm:$0xf0] }
 0x2fc   : > { %7953 = vmatpush.bf16.msra.mxu2 %v10422_v26  ;;  %v10718_v26 = vor.u32 %v11352_v9, %v10717_v4  ;;  %v11314_v4 = vld [vmem:[%s12634_s29 + $0xe44] sm:$0xf0]  ;;  %v10629_v9 = vld [vmem:[%s12634_s29 + $0xec0] sm:$0xf]  ;;  %v11312_v36 = vld [vmem:[%s12634_s29 + $0xe34] sm:$0xf0] }
 0x2fd   : > { %7966 = vmatpush.bf16.msra.mxu3 %v10486_v34  ;;  %v11334_v34 = vld [vmem:[%s12634_s29 + $0xee4] sm:$0xf0]  ;;  %v10613_v54 = vld [vmem:[%s12634_s29 + $0xea0] sm:$0xf] }
 0x2fe   : > { %7928 = vmatpush.bf16.msra.mxu0 %v10286_v41  ;;  %v5012_v41 = vld [vmem:[#allocation1 + $0x12] sm:$0xff] }
 0x2ff   : > { %7941 = vmatpush.bf16.msra.mxu1 %v10350_v45  ;;  %v10582_v45 = vor.u32 %v11318_v31, %v10581_v27  ;;  %v10566_v27 = vor.u32 %v11314_v4, %v10565_v0  ;;  %v10550_v4 = vor.u32 %v11310_v53, %v10549_v52  ;;  %v10871_v52 = vld [vmem:[%s12634_s29 + $0x74] sm:$0xf]  ;;  %v8799_v53 = vld [vmem:[%s12634_s29 + $0x78] sm:$0xf0] }
 0x300   : > { %7954 = vmatpush.bf16.msra.mxu2 %v10414_v46  ;;  %v10646_v46 = vor.u32 %v11334_v34, %v10645_v32  ;;  %v10557_v34 = vld [vmem:[%s12634_s29 + $0xe30] sm:$0xf] }
 0x301   : > { %7967 = vmatpush.bf16.msra.mxu3 %v10478_v55  ;;  %v10774_v55 = vor.u32 %v11366_v40, %v10773_v39  ;;  %v11328_v40 = vld [vmem:[%s12634_s29 + $0xeb4] sm:$0xf0] }
 0x302   : > { %7929 = vmatpush.bf16.msra.mxu0 %v10278_v63  ;;  %v10702_v63 = vor.u32 %v11348_v57, %v10701_v44  ;;  %v11326_v44 = vld [vmem:[%s12634_s29 + $0xea4] sm:$0xf0]  ;;  %v10677_v57 = vld [vmem:[%s12634_s29 + $0xf20] sm:$0xf] }
 0x303   : > { %7942 = vmatpush.bf16.msra.mxu1 %v10342_v11  ;;  %v10766_v11 = vor.u32 %v11364_v59, %v10765_v58  ;;  %v7736_v31 = vpop.f32.mrf.mxu1  ;;  %v11342_v58 = vld [vmem:[%s12634_s29 + $0xf24] sm:$0xf0] }
 0x304   : > { %7955 = vmatpush.bf16.msra.mxu2 %v10406_v12  ;;  %v11330_v12 = vld [vmem:[%s12634_s29 + $0xec4] sm:$0xf0] }
 0x305   : > { %7968 = vmatpush.bf16.msra.mxu3 %v10470_v22  ;;  %7930 = vmatmul.bf16.vlgmr.msra.gmra.mxu0 %v5010_v38  ;;  %v7723_v22 = vpop.f32.mrf.mxu0  ;;  %v10630_v32 = vor.u32 %v11330_v12, %v10629_v9  ;;  %v10614_v12 = vor.u32 %v11326_v44, %v10613_v54  ;;  %v10887_v54 = vld [vmem:[%s12634_s29 + $0xf4] sm:$0xf]  ;;  %v8863_v44 = vld [vmem:[%s12634_s29 + $0xf8] sm:$0xf0] }
 0x306   : > { %7974 = vmatpush.bf16.msrb.mxu0 %v10590_v24  ;;  %7943 = vmatmul.bf16.vlgmr.msra.gmra.mxu1 %v5011_v42  ;;  %v10757_v24 = vld [vmem:[%s12634_s29 + $0xfc0] sm:$0xf]  ;;  %v10749_v42 = vld [vmem:[%s12634_s29 + $0xfb0] sm:$0xf] }
 0x307   : > { %7987 = vmatpush.bf16.msrb.mxu1 %v10654_v25  ;;  %7956 = vmatmul.bf16.vlgmr.msra.gmra.mxu2 %v5012_v41  ;;  %v11362_v25 = vld [vmem:[%s12634_s29 + $0xfc4] sm:$0xf0]  ;;  %v10685_v41 = vld [vmem:[%s12634_s29 + $0xf30] sm:$0xf] }
 0x308   : > { %8000 = vmatpush.bf16.msrb.mxu2 %v10718_v26  ;;  %7969 = vmatmul.bf16.vlgmr.msra.gmra.mxu3 %v5013_v43  ;;  %v7724_v26 = vadd.f32 %v7723_v22, %v13154_v23  ;;  %v10758_v38 = vor.u32 %v11362_v25, %v10757_v24  ;;  %v11344_v23 = vld [vmem:[%s12634_s29 + $0xf34] sm:$0xf0]  ;;  %v10605_v24 = vld [vmem:[%s12634_s29 + $0xe90] sm:$0xf] }
 0x309   : > { %8013 = vmatpush.bf16.msrb.mxu3 %v10782_v33  ;;  %v10694_v33 = vor.u32 %v11346_v21, %v10693_v20  ;;  %v11360_v43 = vld [vmem:[%s12634_s29 + $0xfb4] sm:$0xf0]  ;;  %v10678_v20 = vor.u32 %v11342_v58, %v10677_v57  ;;  %v10541_v21 = vld [vmem:[%s12634_s29 + $0xe10] sm:$0xf]  ;;  %v10903_v57 = vld [vmem:[%s12634_s29 + $0x174] sm:$0xf] }
 0x30a   : > { %7975 = vmatpush.bf16.msrb.mxu0 %v10582_v45  ;;  %v7737_v39 = vadd.f32 %v7736_v31, %v7724_v26  ;;  %v10558_v45 = vor.u32 %v11312_v36, %v10557_v34  ;;  %v7749_v56 = vpop.f32.mrf.mxu2  ;;  %v11308_v22 = vld [vmem:[%s12634_s29 + $0xe14] sm:$0xf0]  ;;  %v10533_v36 = vld [vmem:[%s12634_s29 + $0xe00] sm:$0xf]  ;;  %v8927_v58 = vld [vmem:[%s12634_s29 + $0x178] sm:$0xf0] }
 0x30b   : > { %7988 = vmatpush.bf16.msrb.mxu1 %v10646_v46  ;;  %v10622_v46 = vor.u32 %v11328_v40, %v10621_v37  ;;  %v7738_v9 = vpop.f32.mrf.mxu1  ;;  %v11324_v26 = vld [vmem:[%s12634_s29 + $0xe94] sm:$0xf0]  ;;  %v10542_v34 = vor.u32 %v11308_v22, %v10541_v21  ;;  %v11306_v37 = vld [vmem:[%s12634_s29 + $0xe04] sm:$0xf0]  ;;  %v10597_v40 = vld [vmem:[%s12634_s29 + $0xe80] sm:$0xf] }
 0x30c   : > { %8001 = vmatpush.bf16.msrb.mxu2 %v10710_v51  ;;  %v10686_v51 = vor.u32 %v11344_v23, %v10685_v41  ;;  %v7750_v59 = vadd.f32 %v7749_v56, %v7737_v39  ;;  %v11340_v31 = vld [vmem:[%s12634_s29 + $0xf14] sm:$0xf0]  ;;  %v11322_v41 = vld [vmem:[%s12634_s29 + $0xe84] sm:$0xf0]  ;;  %v10661_v23 = vld [vmem:[%s12634_s29 + $0xf00] sm:$0xf]  ;;  %v10534_v56 = vor.u32 %v11306_v37, %v10533_v36  ;;  %v8866_v9 = vor.u32 %v10887_v54, %v8863_v44 }
 0x30d   : > { %8014 = vmatpush.bf16.msrb.mxu3 %v10774_v55  ;;  %v10750_v55 = vor.u32 %v11360_v43, %v10749_v42  ;;  %v7725_v0 = vpop.f32.mrf.mxu0  ;;  %v11338_v43 = vld [vmem:[%s12634_s29 + $0xf04] sm:$0xf0]  ;;  %v8791_v21 = vld [vmem:[%s12634_s29 + $0x68] sm:$0xf0]  ;;  %v10885_v22 = vld [vmem:[%s12634_s29 + $0xe4] sm:$0xf] }
 0x30e   : > { %7976 = vmatpush.bf16.msrb.mxu0 %v10574_v60  ;;  %v7762_v60 = vpop.f32.mrf.mxu3  ;;  %v5015_v36 = vld [vmem:[#allocation1 + $0x2d] sm:$0xff]  ;;  %v5017_v37 = vld [vmem:[#allocation1 + $0x3f] sm:$0xff] }
 0x30f   : > { %7989 = vmatpush.bf16.msrb.mxu1 %v10638_v62  ;;  %v10741_v62 = vld [vmem:[%s12634_s29 + $0xfa0] sm:$0xf]  ;;  %v10865_v44 = vld [vmem:[%s12634_s29 + $0x44] sm:$0xf] }
 0x310   : > { %8002 = vmatpush.bf16.msrb.mxu2 %v10702_v63  ;;  %v11358_v63 = vld [vmem:[%s12634_s29 + $0xfa4] sm:$0xf0] }
 0x311   : > { %8015 = vmatpush.bf16.msrb.mxu3 %v10766_v11  ;;  %v13221_v11 = vadd.f32 %v7762_v60, %v7750_v59  ;;  %v10742_v25 = vor.u32 %v11358_v63, %v10741_v62  ;;  %v10598_v59 = vor.u32 %v11322_v41, %v10597_v40  ;;  %v10662_v60 = vor.u32 %v11338_v43, %v10661_v23  ;;  %v10919_v62 = vld [vmem:[%s12634_s29 + $0x1f4] sm:$0xf]  ;;  %v8991_v63 = vld [vmem:[%s12634_s29 + $0x1f8] sm:$0xf0] }
 0x312   : > { %7977 = vmatpush.bf16.msrb.mxu0 %v10566_v27  ;;  %v10669_v27 = vld [vmem:[%s12634_s29 + $0xf10] sm:$0xf]  ;;  %v10867_v41 = vld [vmem:[%s12634_s29 + $0x54] sm:$0xf]  ;;  %v8783_v23 = vld [vmem:[%s12634_s29 + $0x58] sm:$0xf0] }
 0x313   : > { %7990 = vmatpush.bf16.msrb.mxu1 %v10630_v32  ;;  %v10733_v32 = vld [vmem:[%s12634_s29 + $0xf90] sm:$0xf]  ;;  %v10670_v39 = vor.u32 %v11340_v31, %v10669_v27  ;;  %v8919_v27 = vld [vmem:[%s12634_s29 + $0x168] sm:$0xf0]  ;;  %v5014_v31 = vld [vmem:[#allocation1 + $0x24] sm:$0xff]  ;;  %v8786_v54 = vor.u32 %v10867_v41, %v8783_v23 }
 0x314   : > { %8003 = vmatpush.bf16.msrb.mxu2 %v10694_v33  ;;  %v11356_v33 = vld [vmem:[%s12634_s29 + $0xf94] sm:$0xf0]  ;;  %v10861_v41 = vld [vmem:[%s12634_s29 + $0x24] sm:$0xf]  ;;  %v8759_v23 = vld [vmem:[%s12634_s29 + $0x28] sm:$0xf0] }
 0x315   : > { %8016 = vmatpush.bf16.msrb.mxu3 %v10758_v38  ;;  %v10606_v38 = vor.u32 %v11324_v26, %v10605_v24  ;;  %v10734_v42 = vor.u32 %v11356_v33, %v10733_v32  ;;  %v8994_v24 = vor.u32 %v10919_v62, %v8991_v63  ;;  %v10901_v26 = vld [vmem:[%s12634_s29 + $0x164] sm:$0xf]  ;;  %v8983_v33 = vld [vmem:[%s12634_s29 + $0x1e8] sm:$0xf0] }
 0x316   : > { %7978 = vmatpush.bf16.msrb.mxu0 %v10558_v45  ;;  %v10725_v45 = vld [vmem:[%s12634_s29 + $0xf80] sm:$0xf]  ;;  %v10917_v32 = vld [vmem:[%s12634_s29 + $0x1e4] sm:$0xf]  ;;  %v8922_v40 = vor.u32 %v10901_v26, %v8919_v27  ;;  %v8903_v63 = vld [vmem:[%s12634_s29 + $0x148] sm:$0xf0] }
 0x317   : > { %7991 = vmatpush.bf16.msrb.mxu1 %v10622_v46  ;;  %v11354_v46 = vld [vmem:[%s12634_s29 + $0xf84] sm:$0xf0]  ;;  %v8986_v43 = vor.u32 %v10917_v32, %v8983_v33  ;;  %v10897_v62 = vld [vmem:[%s12634_s29 + $0x144] sm:$0xf]  ;;  %v8767_v26 = vld [vmem:[%s12634_s29 + $0x38] sm:$0xf0] }
 0x318   : > { %8004 = vmatpush.bf16.msrb.mxu2 %v10686_v51  ;;  %v7751_v51 = vpop.f32.mrf.mxu2  ;;  %v10726_v0 = vor.u32 %v11354_v46, %v10725_v45  ;;  %v8847_v45 = vld [vmem:[%s12634_s29 + $0xd8] sm:$0xf0]  ;;  %v10899_v46 = vld [vmem:[%s12634_s29 + $0x154] sm:$0xf] }
 0x319   : > { %8017 = vmatpush.bf16.msrb.mxu3 %v10750_v55  ;;  %v7764_v55 = vpop.f32.mrf.mxu3  ;;  %v8911_v51 = vld [vmem:[%s12634_s29 + $0x158] sm:$0xf0]  ;;  %v10879_v27 = vld [vmem:[%s12634_s29 + $0xb4] sm:$0xf] }
 0x31a   : > { %7979 = vmatpush.bf16.msrb.mxu0 %v10550_v4  ;;  %v8802_v4 = vor.u32 %v10871_v52, %v8799_v53  ;;  %v10915_v52 = vld [vmem:[%s12634_s29 + $0x1d4] sm:$0xf]  ;;  %v8975_v53 = vld [vmem:[%s12634_s29 + $0x1d8] sm:$0xf0] }
 0x31b   : > { %7992 = vmatpush.bf16.msrb.mxu1 %v10614_v12  ;;  %v8930_v12 = vor.u32 %v10903_v57, %v8927_v58  ;;  %v8775_v57 = vld [vmem:[%s12634_s29 + $0x48] sm:$0xf0]  ;;  %v10881_v58 = vld [vmem:[%s12634_s29 + $0xc4] sm:$0xf]  ;;  %v8831_v33 = vld [vmem:[%s12634_s29 + $0xb8] sm:$0xf0] }
 0x31c   : > { %8005 = vmatpush.bf16.msrb.mxu2 %v10678_v20  ;;  %v10869_v20 = vld [vmem:[%s12634_s29 + $0x64] sm:$0xf] }
 0x31d   : > { %8018 = vmatpush.bf16.msrb.mxu3 %v10742_v25  ;;  %v8855_v25 = vld [vmem:[%s12634_s29 + $0xe8] sm:$0xf0] }
 0x31e   : > { %7980 = vmatpush.bf16.msrb.mxu0 %v10542_v34  ;;  %v5016_v34 = vld [vmem:[#allocation1 + $0x36] sm:$0xff] }
 0x31f   : > { %7993 = vmatpush.bf16.msrb.mxu1 %v10606_v38  ;;  %v8794_v38 = vor.u32 %v10869_v20, %v8791_v21  ;;  %v8778_v20 = vor.u32 %v10865_v44, %v8775_v57  ;;  %v8762_v57 = vor.u32 %v10861_v41, %v8759_v23  ;;  %v10935_v41 = vld [vmem:[%s12634_s29 + $0x274] sm:$0xf]  ;;  %v9055_v23 = vld [vmem:[%s12634_s29 + $0x278] sm:$0xf0] }
 0x320   : > { %8006 = vmatpush.bf16.msrb.mxu2 %v10670_v39  ;;  %v8858_v39 = vor.u32 %v10885_v22, %v8855_v25  ;;  %v10863_v25 = vld [vmem:[%s12634_s29 + $0x34] sm:$0xf] }
 0x321   : > { %8019 = vmatpush.bf16.msrb.mxu3 %v10734_v42  ;;  %v10883_v42 = vld [vmem:[%s12634_s29 + $0xd4] sm:$0xf] }
 0x322   : > { %7981 = vmatpush.bf16.msrb.mxu0 %v10534_v56  ;;  %v8850_v55 = vor.u32 %v10883_v42, %v8847_v45  ;;  %v8914_v56 = vor.u32 %v10899_v46, %v8911_v51  ;;  %v10877_v42 = vld [vmem:[%s12634_s29 + $0xa4] sm:$0xf]  ;;  %v8823_v46 = vld [vmem:[%s12634_s29 + $0xa8] sm:$0xf0] }
 0x323   : > { %7994 = vmatpush.bf16.msrb.mxu1 %v10598_v59  ;;  %v8978_v59 = vor.u32 %v10915_v52, %v8975_v53  ;;  %v7788_v21 = vpop.f32.mrf.mxu1  ;;  %v10893_v51 = vld [vmem:[%s12634_s29 + $0x124] sm:$0xf]  ;;  %v8887_v52 = vld [vmem:[%s12634_s29 + $0x128] sm:$0xf0] }
 0x324   : > { %8007 = vmatpush.bf16.msrb.mxu2 %v10662_v60  ;;  %v8839_v60 = vld [vmem:[%s12634_s29 + $0xc8] sm:$0xf0] }
 0x325   : > { %8020 = vmatpush.bf16.msrb.mxu3 %v10726_v0  ;;  %7982 = vmatmul.bf16.vlgmr.msrb.gmra.mxu0 %v5014_v31  ;;  %v7775_v0 = vpop.f32.mrf.mxu0  ;;  %v8842_v22 = vor.u32 %v10881_v58, %v8839_v60  ;;  %v8826_v60 = vor.u32 %v10877_v42, %v8823_v46  ;;  %v10951_v42 = vld [vmem:[%s12634_s29 + $0x2f4] sm:$0xf]  ;;  %v9119_v46 = vld [vmem:[%s12634_s29 + $0x2f8] sm:$0xf0] }
 0x326   : > { %8026 = vmatpush.bf16.msra.mxu0 %v8802_v4  ;;  %7995 = vmatmul.bf16.vlgmr.msrb.gmra.mxu1 %v5015_v36  ;;  %v10913_v4 = vld [vmem:[%s12634_s29 + $0x1c4] sm:$0xf]  ;;  %v10911_v36 = vld [vmem:[%s12634_s29 + $0x1b4] sm:$0xf] }
 0x327   : > { %8039 = vmatpush.bf16.msra.mxu1 %v8866_v9  ;;  %8008 = vmatmul.bf16.vlgmr.msrb.gmra.mxu2 %v5016_v34  ;;  %v8967_v9 = vld [vmem:[%s12634_s29 + $0x1c8] sm:$0xf0]  ;;  %v10895_v34 = vld [vmem:[%s12634_s29 + $0x134] sm:$0xf] }
 0x328   : > { %8052 = vmatpush.bf16.msra.mxu2 %v8930_v12  ;;  %8021 = vmatmul.bf16.vlgmr.msrb.gmra.mxu3 %v5017_v37  ;;  %v7776_v12 = vadd.f32 %v7775_v0, %v13221_v11  ;;  %v8970_v31 = vor.u32 %v10913_v4, %v8967_v9  ;;  %v8895_v11 = vld [vmem:[%s12634_s29 + $0x138] sm:$0xf0]  ;;  %v10875_v4 = vld [vmem:[%s12634_s29 + $0x94] sm:$0xf] }
 0x329   : > { %8065 = vmatpush.bf16.msra.mxu3 %v8994_v24  ;;  %v8906_v24 = vor.u32 %v10897_v62, %v8903_v63  ;;  %v8959_v37 = vld [vmem:[%s12634_s29 + $0x1b8] sm:$0xf0]  ;;  %v8890_v62 = vor.u32 %v10893_v51, %v8887_v52  ;;  %v10859_v63 = vld [vmem:[%s12634_s29 + $0x14] sm:$0xf] }
 0x32a   : > { %8027 = vmatpush.bf16.msra.mxu0 %v8794_v38  ;;  %v7789_v32 = vadd.f32 %v7788_v21, %v7776_v12  ;;  %v8770_v38 = vor.u32 %v10863_v25, %v8767_v26  ;;  %v7801_v45 = vpop.f32.mrf.mxu2  ;;  %v8751_v0 = vld [vmem:[%s12634_s29 + $0x18] sm:$0xf0]  ;;  %v10857_v26 = vld [vmem:[%s12634_s29 + $0x4] sm:$0xf]  ;;  %v10967_v51 = vld [vmem:[%s12634_s29 + $0x374] sm:$0xf] }
 0x32b   : > { %8040 = vmatpush.bf16.msra.mxu1 %v8858_v39  ;;  %v8834_v39 = vor.u32 %v10879_v27, %v8831_v33  ;;  %v7790_v58 = vpop.f32.mrf.mxu1  ;;  %v8815_v12 = vld [vmem:[%s12634_s29 + $0x98] sm:$0xf0]  ;;  %v8754_v25 = vor.u32 %v10859_v63, %v8751_v0  ;;  %v8743_v27 = vld [vmem:[%s12634_s29 + $0x8] sm:$0xf0]  ;;  %v10873_v33 = vld [vmem:[%s12634_s29 + $0x84] sm:$0xf] }
 0x32c   : > { %8053 = vmatpush.bf16.msra.mxu2 %v8922_v40  ;;  %v8898_v40 = vor.u32 %v10895_v34, %v8895_v11  ;;  %v7802_v53 = vadd.f32 %v7801_v45, %v7789_v32  ;;  %v8879_v21 = vld [vmem:[%s12634_s29 + $0x118] sm:$0xf0]  ;;  %v8807_v34 = vld [vmem:[%s12634_s29 + $0x88] sm:$0xf0]  ;;  %v10889_v11 = vld [vmem:[%s12634_s29 + $0x104] sm:$0xf]  ;;  %v8746_v45 = vor.u32 %v10857_v26, %v8743_v27  ;;  %v9122_v58 = vor.u32 %v10951_v42, %v9119_v46 }
 0x32d   : > { %8066 = vmatpush.bf16.msra.mxu3 %v8986_v43  ;;  %v8962_v43 = vor.u32 %v10911_v36, %v8959_v37  ;;  %v7777_v44 = vpop.f32.mrf.mxu0  ;;  %v8871_v37 = vld [vmem:[%s12634_s29 + $0x108] sm:$0xf0]  ;;  %v9183_v52 = vld [vmem:[%s12634_s29 + $0x378] sm:$0xf0]  ;;  %v10949_v0 = vld [vmem:[%s12634_s29 + $0x2e4] sm:$0xf] }
 0x32e   : > { %8028 = vmatpush.bf16.msra.mxu0 %v8786_v54  ;;  %v7814_v54 = vpop.f32.mrf.mxu3  ;;  %v9047_v63 = vld [vmem:[%s12634_s29 + $0x268] sm:$0xf0]  ;;  %v10931_v27 = vld [vmem:[%s12634_s29 + $0x254] sm:$0xf]  ;;  %v10945_v42 = vld [vmem:[%s12634_s29 + $0x2c4] sm:$0xf] }
 0x32f   : > { %8041 = vmatpush.bf16.msra.mxu1 %v8850_v55  ;;  %v10909_v55 = vld [vmem:[%s12634_s29 + $0x1a4] sm:$0xf] }
 0x330   : > { %8054 = vmatpush.bf16.msra.mxu2 %v8914_v56  ;;  %v8951_v56 = vld [vmem:[%s12634_s29 + $0x1a8] sm:$0xf0] }
 0x331   : > { %8067 = vmatpush.bf16.msra.mxu3 %v8978_v59  ;;  %v13288_v59 = vadd.f32 %v7814_v54, %v7802_v53  ;;  %v8954_v9 = vor.u32 %v10909_v55, %v8951_v56  ;;  %v8810_v53 = vor.u32 %v10873_v33, %v8807_v34  ;;  %v8874_v54 = vor.u32 %v10889_v11, %v8871_v37  ;;  %v10983_v55 = vld [vmem:[%s12634_s29 + $0x3f4] sm:$0xf]  ;;  %v9247_v56 = vld [vmem:[%s12634_s29 + $0x3f8] sm:$0xf0] }
 0x332   : > { %8029 = vmatpush.bf16.msra.mxu0 %v8778_v20  ;;  %v10891_v20 = vld [vmem:[%s12634_s29 + $0x114] sm:$0xf]  ;;  %v9103_v34 = vld [vmem:[%s12634_s29 + $0x2d8] sm:$0xf0] }
 0x333   : > { %8042 = vmatpush.bf16.msra.mxu1 %v8842_v22  ;;  %v10907_v22 = vld [vmem:[%s12634_s29 + $0x194] sm:$0xf]  ;;  %v8882_v32 = vor.u32 %v10891_v20, %v8879_v21  ;;  %v9175_v20 = vld [vmem:[%s12634_s29 + $0x368] sm:$0xf0]  ;;  %v10981_v21 = vld [vmem:[%s12634_s29 + $0x3e4] sm:$0xf] }
 0x334   : > { %8055 = vmatpush.bf16.msra.mxu2 %v8906_v24  ;;  %v8943_v24 = vld [vmem:[%s12634_s29 + $0x198] sm:$0xf0]  ;;  %v10963_v11 = vld [vmem:[%s12634_s29 + $0x354] sm:$0xf] }
 0x335   : > { %8068 = vmatpush.bf16.msra.mxu3 %v8970_v31  ;;  %v8818_v31 = vor.u32 %v10875_v4, %v8815_v12  ;;  %v8946_v36 = vor.u32 %v10907_v22, %v8943_v24  ;;  %v9250_v4 = vor.u32 %v10983_v55, %v9247_v56  ;;  %v10965_v12 = vld [vmem:[%s12634_s29 + $0x364] sm:$0xf]  ;;  %v9239_v22 = vld [vmem:[%s12634_s29 + $0x3e8] sm:$0xf0]  ;;  %v10979_v37 = vld [vmem:[%s12634_s29 + $0x3d4] sm:$0xf] }
 0x336   : > { %8030 = vmatpush.bf16.msra.mxu0 %v8770_v38  ;;  %v10905_v38 = vld [vmem:[%s12634_s29 + $0x184] sm:$0xf]  ;;  %v9178_v26 = vor.u32 %v10965_v12, %v9175_v20  ;;  %v9242_v33 = vor.u32 %v10981_v21, %v9239_v22 }
 0x337   : > { %8043 = vmatpush.bf16.msra.mxu1 %v8834_v39  ;;  %v8935_v39 = vld [vmem:[%s12634_s29 + $0x188] sm:$0xf0]  ;;  %v10925_v22 = vld [vmem:[%s12634_s29 + $0x224] sm:$0xf] }
 0x338   : > { %8056 = vmatpush.bf16.msra.mxu2 %v8898_v40  ;;  %v7803_v40 = vpop.f32.mrf.mxu2  ;;  %v8938_v44 = vor.u32 %v10905_v38, %v8935_v39  ;;  %v9231_v38 = vld [vmem:[%s12634_s29 + $0x3d8] sm:$0xf0] }
 0x339   : > { %8069 = vmatpush.bf16.msra.mxu3 %v8962_v43  ;;  %v7816_v43 = vpop.f32.mrf.mxu3 }
 0x33a   : > { %8031 = vmatpush.bf16.msra.mxu0 %v8762_v57  ;;  %v9058_v57 = vor.u32 %v10935_v41, %v9055_v23  ;;  %v9031_v23 = vld [vmem:[%s12634_s29 + $0x248] sm:$0xf0]  ;;  %v9234_v43 = vor.u32 %v10979_v37, %v9231_v38 }
 0x33b   : > { %8044 = vmatpush.bf16.msra.mxu1 %v8826_v60  ;;  %v9186_v60 = vor.u32 %v10967_v51, %v9183_v52  ;;  %v10977_v51 = vld [vmem:[%s12634_s29 + $0x3c4] sm:$0xf]  ;;  %v9223_v52 = vld [vmem:[%s12634_s29 + $0x3c8] sm:$0xf0] }
 0x33c   : > { %8057 = vmatpush.bf16.msra.mxu2 %v8890_v62  ;;  %v10933_v62 = vld [vmem:[%s12634_s29 + $0x264] sm:$0xf]  ;;  %v9207_v37 = vld [vmem:[%s12634_s29 + $0x3a8] sm:$0xf0] }
 0x33d   : > { %8070 = vmatpush.bf16.msra.mxu3 %v8954_v9  ;;  %v9111_v9 = vld [vmem:[%s12634_s29 + $0x2e8] sm:$0xf0]  ;;  %v9050_v24 = vor.u32 %v10933_v62, %v9047_v63  ;;  %v9087_v63 = vld [vmem:[%s12634_s29 + $0x2b8] sm:$0xf0] }
 0x33e   : > { %8032 = vmatpush.bf16.msra.mxu0 %v8754_v25  ;;  %v9114_v25 = vor.u32 %v10949_v0, %v9111_v9  ;;  %v10959_v0 = vld [vmem:[%s12634_s29 + $0x334] sm:$0xf]  ;;  %v9215_v9 = vld [vmem:[%s12634_s29 + $0x3b8] sm:$0xf0] }
 0x33f   : > { %8045 = vmatpush.bf16.msra.mxu1 %v8818_v31  ;;  %v9039_v31 = vld [vmem:[%s12634_s29 + $0x258] sm:$0xf0] }
 0x340   : > { %8058 = vmatpush.bf16.msra.mxu2 %v8882_v32  ;;  %v10947_v32 = vld [vmem:[%s12634_s29 + $0x2d4] sm:$0xf]  ;;  %v9042_v39 = vor.u32 %v10931_v27, %v9039_v31  ;;  %v9079_v31 = vld [vmem:[%s12634_s29 + $0x2a8] sm:$0xf0] }
 0x341   : > { %8071 = vmatpush.bf16.msra.mxu3 %v8946_v36  ;;  %v9167_v36 = vld [vmem:[%s12634_s29 + $0x358] sm:$0xf0]  ;;  %v9106_v40 = vor.u32 %v10947_v32, %v9103_v34  ;;  %v10957_v32 = vld [vmem:[%s12634_s29 + $0x324] sm:$0xf] }
 0x342   : > { %8033 = vmatpush.bf16.msra.mxu0 %v8746_v45  ;;  %v9170_v41 = vor.u32 %v10963_v11, %v9167_v36  ;;  %v9159_v45 = vld [vmem:[%s12634_s29 + $0x348] sm:$0xf0]  ;;  %v7827_v46 = vpop.f32.mrf.mxu0  ;;  %v10973_v36 = vld [vmem:[%s12634_s29 + $0x3a4] sm:$0xf] }
 0x343   : > { %8046 = vmatpush.bf16.msra.mxu1 %v8810_v53 }
 0x344   : > { %8059 = vmatpush.bf16.msra.mxu2 %v8874_v54  ;;  %v7840_v54 = vpop.f32.mrf.mxu1 }
 0x345   : > { %8072 = vmatpush.bf16.msra.mxu3 %v8938_v44  ;;  %8034 = vmatmul.bf16.vlgmr.msra.gmra.mxu0 %v12747_v29  ;;  %v9095_v29 = vld [vmem:[%s12634_s29 + $0x2c8] sm:$0xf0]  ;;  %v10927_v44 = vld [vmem:[%s12634_s29 + $0x234] sm:$0xf] }
 0x346   : > { %8078 = vmatpush.bf16.msrb.mxu0 %v9058_v57  ;;  %8047 = vmatmul.bf16.vlgmr.msra.gmra.mxu1 %v12753_v35  ;;  %v7828_v35 = vadd.f32 %v7827_v46, %v13288_v59  ;;  %v9098_v55 = vor.u32 %v10945_v42, %v9095_v29  ;;  %v9023_v57 = vld [vmem:[%s12634_s29 + $0x238] sm:$0xf0]  ;;  %v10923_v42 = vld [vmem:[%s12634_s29 + $0x214] sm:$0xf] }
 0x347   : > { %8091 = vmatpush.bf16.msrb.mxu1 %v9122_v58  ;;  %8060 = vmatmul.bf16.vlgmr.msra.gmra.mxu2 %v12745_v28  ;;  %v10929_v28 = vld [vmem:[%s12634_s29 + $0x244] sm:$0xf]  ;;  %v10943_v58 = vld [vmem:[%s12634_s29 + $0x2b4] sm:$0xf]  ;;  %v9151_v59 = vld [vmem:[%s12634_s29 + $0x338] sm:$0xf0]  ;;  %v9026_v12 = vor.u32 %v10927_v44, %v9023_v57 }
 0x348   : > { %8104 = vmatpush.bf16.msrb.mxu2 %v9186_v60  ;;  %8073 = vmatmul.bf16.vlgmr.msra.gmra.mxu3 %v12749_v30  ;;  %v10961_v30 = vld [vmem:[%s12634_s29 + $0x344] sm:$0xf]  ;;  %v9034_v53 = vor.u32 %v10929_v28, %v9031_v23  ;;  %v9226_v60 = vor.u32 %v10977_v51, %v9223_v52  ;;  %v7841_v62 = vadd.f32 %v7840_v54, %v7828_v35  ;;  %v10939_v29 = vld [vmem:[%s12634_s29 + $0x294] sm:$0xf]  ;;  %v9135_v51 = vld [vmem:[%s12634_s29 + $0x318] sm:$0xf0] }
 0x349   : > { %8117 = vmatpush.bf16.msrb.mxu3 %v9250_v4  ;;  %v9162_v56 = vor.u32 %v10961_v30, %v9159_v45  ;;  %v10975_v4 = vld [vmem:[%s12634_s29 + $0x3b4] sm:$0xf]  ;;  %v9090_v20 = vor.u32 %v10943_v58, %v9087_v63  ;;  %v9154_v21 = vor.u32 %v10959_v0, %v9151_v59  ;;  %v9210_v30 = vor.u32 %v10973_v36, %v9207_v37  ;;  %v9071_v45 = vld [vmem:[%s12634_s29 + $0x298] sm:$0xf0]  ;;  %v10921_v54 = vld [vmem:[%s12634_s29 + $0x204] sm:$0xf] }
 0x34a   : > { %8079 = vmatpush.bf16.msrb.mxu0 %v9050_v24  ;;  %v9015_v24 = vld [vmem:[%s12634_s29 + $0x228] sm:$0xf0]  ;;  %v7853_v27 = vpop.f32.mrf.mxu2  ;;  %v7829_v38 = vpop.f32.mrf.mxu0  ;;  %v10955_v46 = vld [vmem:[%s12634_s29 + $0x314] sm:$0xf]  ;;  %v9199_v35 = vld [vmem:[%s12634_s29 + $0x398] sm:$0xf0] }
 0x34b   : > { %8092 = vmatpush.bf16.msrb.mxu1 %v9114_v25  ;;  %v10941_v25 = vld [vmem:[%s12634_s29 + $0x2a4] sm:$0xf]  ;;  %v7854_v34 = vadd.f32 %v7853_v27, %v7841_v62  ;;  %v7866_v11 = vpop.f32.mrf.mxu3  ;;  %v10971_v52 = vld [vmem:[%s12634_s29 + $0x394] sm:$0xf]  ;;  %v9138_v44 = vor.u32 %v10955_v46, %v9135_v51  ;;  %v9063_v58 = vld [vmem:[%s12634_s29 + $0x288] sm:$0xf0] }
 0x34c   : > { %8105 = vmatpush.bf16.msrb.mxu2 %v9178_v26  ;;  %v9218_v26 = vor.u32 %v10975_v4, %v9215_v9  ;;  %v9082_v28 = vor.u32 %v10941_v25, %v9079_v31  ;;  %v10937_v57 = vld [vmem:[%s12634_s29 + $0x284] sm:$0xf]  ;;  %v9202_v62 = vor.u32 %v10971_v52, %v9199_v35  ;;  %v9127_v63 = vld [vmem:[%s12634_s29 + $0x308] sm:$0xf0]  ;;  %v10999_v9 = vld [vmem:[%s12634_s29 + $0x474] sm:$0xf] }
 0x34d   : > { %8118 = vmatpush.bf16.msrb.mxu3 %v9242_v33  ;;  %v9143_v33 = vld [vmem:[%s12634_s29 + $0x328] sm:$0xf0]  ;;  %v10969_v0 = vld [vmem:[%s12634_s29 + $0x384] sm:$0xf]  ;;  %v11031_v25 = vld [vmem:[%s12634_s29 + $0x574] sm:$0xf]  ;;  %v9066_v27 = vor.u32 %v10937_v57, %v9063_v58 }
 0x34e   : > { %8080 = vmatpush.bf16.msrb.mxu0 %v9042_v39  ;;  %v9018_v39 = vor.u32 %v10925_v22, %v9015_v24  ;;  %v9146_v23 = vor.u32 %v10957_v32, %v9143_v33  ;;  %v9191_v59 = vld [vmem:[%s12634_s29 + $0x388] sm:$0xf0]  ;;  %v9375_v24 = vld [vmem:[%s12634_s29 + $0x4f8] sm:$0xf0]  ;;  %v11047_v32 = vld [vmem:[%s12634_s29 + $0x5f4] sm:$0xf] }
 0x34f   : > { %8093 = vmatpush.bf16.msrb.mxu1 %v9106_v40  ;;  %v7842_v40 = vpop.f32.mrf.mxu1  ;;  %v9503_v33 = vld [vmem:[%s12634_s29 + $0x5f8] sm:$0xf0]  ;;  %v10997_v38 = vld [vmem:[%s12634_s29 + $0x464] sm:$0xf]  ;;  %v10995_v52 = vld [vmem:[%s12634_s29 + $0x454] sm:$0xf] }
 0x350   : > { %8106 = vmatpush.bf16.msrb.mxu2 %v9170_v41  ;;  %v13359_v41 = vadd.f32 %v7866_v11, %v7854_v34  ;;  %v9194_v34 = vor.u32 %v10969_v0, %v9191_v59  ;;  %v11013_v40 = vld [vmem:[%s12634_s29 + $0x4e4] sm:$0xf]  ;;  %v9295_v35 = vld [vmem:[%s12634_s29 + $0x458] sm:$0xf0]  ;;  %v11043_v57 = vld [vmem:[%s12634_s29 + $0x5d4] sm:$0xf] }
 0x351   : > { %8119 = vmatpush.bf16.msrb.mxu3 %v9234_v43  ;;  %v9007_v43 = vld [vmem:[%s12634_s29 + $0x218] sm:$0xf0]  ;;  %v9287_v0 = vld [vmem:[%s12634_s29 + $0x448] sm:$0xf0]  ;;  %v11009_v59 = vld [vmem:[%s12634_s29 + $0x4c4] sm:$0xf] }
 0x352   : > { %8081 = vmatpush.bf16.msrb.mxu0 %v9034_v53  ;;  %v9010_v53 = vor.u32 %v10923_v42, %v9007_v43  ;;  %v7855_v4 = vpop.f32.mrf.mxu2  ;;  %v11029_v42 = vld [vmem:[%s12634_s29 + $0x564] sm:$0xf]  ;;  %v9431_v43 = vld [vmem:[%s12634_s29 + $0x568] sm:$0xf0]  ;;  %v9487_v58 = vld [vmem:[%s12634_s29 + $0x5d8] sm:$0xf0] }
 0x353   : > { %8094 = vmatpush.bf16.msrb.mxu1 %v9098_v55  ;;  %v8999_v55 = vld [vmem:[%s12634_s29 + $0x208] sm:$0xf0]  ;;  %v9434_v51 = vor.u32 %v11029_v42, %v9431_v43  ;;  %v9490_v4 = vor.u32 %v11043_v57, %v9487_v58  ;;  %v11005_v43 = vld [vmem:[%s12634_s29 + $0x4a4] sm:$0xf] }
 0x354   : > { %8107 = vmatpush.bf16.msrb.mxu2 %v9162_v56  ;;  %v9074_v56 = vor.u32 %v10939_v29, %v9071_v45  ;;  %v9002_v22 = vor.u32 %v10921_v54, %v8999_v55  ;;  %v11045_v29 = vld [vmem:[%s12634_s29 + $0x5e4] sm:$0xf]  ;;  %v9359_v55 = vld [vmem:[%s12634_s29 + $0x4d8] sm:$0xf0]  ;;  %v9271_v42 = vld [vmem:[%s12634_s29 + $0x428] sm:$0xf0] }
 0x355   : > { %8120 = vmatpush.bf16.msrb.mxu3 %v9226_v60  ;;  %v10953_v60 = vld [vmem:[%s12634_s29 + $0x304] sm:$0xf] }
 0x356   : > { %8082 = vmatpush.bf16.msrb.mxu0 %v9026_v12  ;;  %v9311_v12 = vld [vmem:[%s12634_s29 + $0x478] sm:$0xf0]  ;;  %v9130_v31 = vor.u32 %v10953_v60, %v9127_v63  ;;  %v9298_v60 = vor.u32 %v10995_v52, %v9295_v35  ;;  %v10993_v63 = vld [vmem:[%s12634_s29 + $0x444] sm:$0xf] }
 0x357   : > { %8095 = vmatpush.bf16.msrb.mxu1 %v9090_v20  ;;  %v11015_v20 = vld [vmem:[%s12634_s29 + $0x4f4] sm:$0xf]  ;;  %v9314_v11 = vor.u32 %v10999_v9, %v9311_v12  ;;  %v9415_v9 = vld [vmem:[%s12634_s29 + $0x548] sm:$0xf0] }
 0x358   : > { %8108 = vmatpush.bf16.msrb.mxu2 %v9154_v21  ;;  %v7868_v21 = vpop.f32.mrf.mxu3  ;;  %v9378_v36 = vor.u32 %v11015_v20, %v9375_v24  ;;  %v11041_v20 = vld [vmem:[%s12634_s29 + $0x5c4] sm:$0xf] }
 0x359   : > { %8121 = vmatpush.bf16.msrb.mxu3 %v9218_v26  ;;  %v9439_v26 = vld [vmem:[%s12634_s29 + $0x578] sm:$0xf0]  ;;  %v9479_v21 = vld [vmem:[%s12634_s29 + $0x5c8] sm:$0xf0] }
 0x35a   : > { %8083 = vmatpush.bf16.msrb.mxu0 %v9018_v39  ;;  %v9442_v37 = vor.u32 %v11031_v25, %v9439_v26  ;;  %v9303_v39 = vld [vmem:[%s12634_s29 + $0x468] sm:$0xf0] }
 0x35b   : > { %8096 = vmatpush.bf16.msrb.mxu1 %v9082_v28  ;;  %v9506_v28 = vor.u32 %v11047_v32, %v9503_v33  ;;  %v9306_v45 = vor.u32 %v10997_v38, %v9303_v39  ;;  %v11007_v32 = vld [vmem:[%s12634_s29 + $0x4b4] sm:$0xf]  ;;  %v9482_v33 = vor.u32 %v11041_v20, %v9479_v21  ;;  %v9471_v38 = vld [vmem:[%s12634_s29 + $0x5b8] sm:$0xf0]  ;;  %v10985_v20 = vld [vmem:[%s12634_s29 + $0x404] sm:$0xf] }
 0x35c   : > { %8109 = vmatpush.bf16.msrb.mxu2 %v9146_v23  ;;  %v9367_v23 = vld [vmem:[%s12634_s29 + $0x4e8] sm:$0xf0] }
 0x35d   : > { %8122 = vmatpush.bf16.msrb.mxu3 %v9210_v30  ;;  %v9495_v30 = vld [vmem:[%s12634_s29 + $0x5e8] sm:$0xf0]  ;;  %v9370_v46 = vor.u32 %v11013_v40, %v9367_v23  ;;  %v10989_v23 = vld [vmem:[%s12634_s29 + $0x424] sm:$0xf] }
 0x35e   : > { %8084 = vmatpush.bf16.msrb.mxu0 %v9010_v53  ;;  %v11011_v53 = vld [vmem:[%s12634_s29 + $0x4d4] sm:$0xf]  ;;  %v9498_v54 = vor.u32 %v11045_v29, %v9495_v30  ;;  %v9255_v21 = vld [vmem:[%s12634_s29 + $0x408] sm:$0xf0] }
 0x35f   : > { %8097 = vmatpush.bf16.msrb.mxu1 %v9074_v56  ;;  %v11027_v56 = vld [vmem:[%s12634_s29 + $0x554] sm:$0xf] }
 0x360   : > { %8110 = vmatpush.bf16.msrb.mxu2 %v9138_v44  ;;  %v9423_v44 = vld [vmem:[%s12634_s29 + $0x558] sm:$0xf0] }
 0x361   : > { %8123 = vmatpush.bf16.msrb.mxu3 %v9202_v62  ;;  %v9426_v62 = vor.u32 %v11027_v56, %v9423_v44  ;;  %v9274_v56 = vor.u32 %v10989_v23, %v9271_v42 }
 0x362   : > { %8085 = vmatpush.bf16.msrb.mxu0 %v9002_v22  ;;  %v7879_v12 = vpop.f32.mrf.mxu0  ;;  %v9290_v22 = vor.u32 %v10993_v63, %v9287_v0  ;;  %v11003_v63 = vld [vmem:[%s12634_s29 + $0x494] sm:$0xf] }
 0x363   : > { %8098 = vmatpush.bf16.msrb.mxu1 %v9066_v27  ;;  %v7892_v24 = vpop.f32.mrf.mxu1  ;;  %v10991_v27 = vld [vmem:[%s12634_s29 + $0x434] sm:$0xf] }
 0x364   : > { %8111 = vmatpush.bf16.msrb.mxu2 %v9130_v31  ;;  %v9279_v31 = vld [vmem:[%s12634_s29 + $0x438] sm:$0xf0] }
 0x365   : > { %8124 = vmatpush.bf16.msrb.mxu3 %v9194_v34  ;;  %8086 = vmatmul.bf16.vlgmr.msrb.gmra.mxu0 %v12783_v1  ;;  %v9351_v1 = vld [vmem:[%s12634_s29 + $0x4c8] sm:$0xf0]  ;;  %v9282_v39 = vor.u32 %v10991_v27, %v9279_v31 }
 0x366   : > { %8130 = vmatpush.bf16.msra.mxu0 %v9314_v11  ;;  %8099 = vmatmul.bf16.vlgmr.msrb.gmra.mxu1 %v12787_v3  ;;  %v7880_v3 = vadd.f32 %v7879_v12, %v13359_v41  ;;  %v9354_v25 = vor.u32 %v11009_v59, %v9351_v1  ;;  %v9343_v11 = vld [vmem:[%s12634_s29 + $0x4b8] sm:$0xf0]  ;;  %v9383_v31 = vld [vmem:[%s12634_s29 + $0x508] sm:$0xf0] }
 0x367   : > { %8143 = vmatpush.bf16.msra.mxu1 %v9378_v36  ;;  %8112 = vmatmul.bf16.vlgmr.msrb.gmra.mxu2 %v12778_v61  ;;  %v9362_v61 = vor.u32 %v11011_v53, %v9359_v55  ;;  %v11023_v36 = vld [vmem:[%s12634_s29 + $0x534] sm:$0xf]  ;;  %v9407_v41 = vld [vmem:[%s12634_s29 + $0x538] sm:$0xf0]  ;;  %v9346_v40 = vor.u32 %v11007_v32, %v9343_v11  ;;  %v11037_v53 = vld [vmem:[%s12634_s29 + $0x5a4] sm:$0xf] }
 0x368   : > { %8156 = vmatpush.bf16.msra.mxu2 %v9442_v37  ;;  %8125 = vmatmul.bf16.vlgmr.msrb.gmra.mxu3 %v12785_v2  ;;  %v11025_v2 = vld [vmem:[%s12634_s29 + $0x544] sm:$0xf]  ;;  %v7893_v34 = vadd.f32 %v7892_v24, %v7880_v3  ;;  %v11039_v37 = vld [vmem:[%s12634_s29 + $0x5b4] sm:$0xf]  ;;  %v9327_v59 = vld [vmem:[%s12634_s29 + $0x498] sm:$0xf0] }
 0x369   : > { %8169 = vmatpush.bf16.msra.mxu3 %v9506_v28  ;;  %v9418_v26 = vor.u32 %v11025_v2, %v9415_v9  ;;  %v9410_v28 = vor.u32 %v11023_v36, %v9407_v41  ;;  %v9474_v29 = vor.u32 %v11039_v37, %v9471_v38  ;;  %v9391_v1 = vld [vmem:[%s12634_s29 + $0x518] sm:$0xf0]  ;;  %v11035_v2 = vld [vmem:[%s12634_s29 + $0x594] sm:$0xf]  ;;  %v9330_v3 = vor.u32 %v11003_v63, %v9327_v59  ;;  %v11001_v24 = vld [vmem:[%s12634_s29 + $0x484] sm:$0xf] }
 0x36a   : > { %8131 = vmatpush.bf16.msra.mxu0 %v9306_v45  ;;  %v7905_v30 = vpop.f32.mrf.mxu2  ;;  %v9335_v45 = vld [vmem:[%s12634_s29 + $0x4a8] sm:$0xf0]  ;;  %v7881_v55 = vpop.f32.mrf.mxu0  ;;  %v9455_v9 = vld [vmem:[%s12634_s29 + $0x598] sm:$0xf0]  ;;  %v11033_v32 = vld [vmem:[%s12634_s29 + $0x584] sm:$0xf]  ;;  %v9258_v38 = vor.u32 %v10985_v20, %v9255_v21 }
 0x36b   : > { %8144 = vmatpush.bf16.msra.mxu1 %v9370_v46  ;;  %v11021_v46 = vld [vmem:[%s12634_s29 + $0x524] sm:$0xf]  ;;  %v7906_v52 = vadd.f32 %v7905_v30, %v7893_v34  ;;  %v7918_v35 = vpop.f32.mrf.mxu3  ;;  %v7894_v44 = vpop.f32.mrf.mxu1  ;;  %v9338_v58 = vor.u32 %v11005_v43, %v9335_v45  ;;  %v9458_v27 = vor.u32 %v11035_v2, %v9455_v9  ;;  %v11063_v11 = vld [vmem:[%s12634_s29 + $0x674] sm:$0xf]  ;;  %v9567_v36 = vld [vmem:[%s12634_s29 + $0x678] sm:$0xf0] }
 0x36c   : > { %8157 = vmatpush.bf16.msra.mxu2 %v9434_v51  ;;  %v9399_v51 = vld [vmem:[%s12634_s29 + $0x528] sm:$0xf0]  ;;  %v11079_v41 = vld [vmem:[%s12634_s29 + $0x6f4] sm:$0xf]  ;;  %v9570_v45 = vor.u32 %v11063_v11, %v9567_v36  ;;  %v9551_v59 = vld [vmem:[%s12634_s29 + $0x658] sm:$0xf0] }
 0x36d   : > { %8170 = vmatpush.bf16.msra.mxu3 %v9498_v54  ;;  %v9463_v54 = vld [vmem:[%s12634_s29 + $0x5a8] sm:$0xf0]  ;;  %v13430_v57 = vadd.f32 %v7918_v35, %v7906_v52  ;;  %v11111_v43 = vld [vmem:[%s12634_s29 + $0x7f4] sm:$0xf]  ;;  %v11061_v52 = vld [vmem:[%s12634_s29 + $0x664] sm:$0xf] }
 0x36e   : > { %8132 = vmatpush.bf16.msra.mxu0 %v9298_v60  ;;  %v9402_v60 = vor.u32 %v11021_v46, %v9399_v51  ;;  %v9466_v0 = vor.u32 %v11037_v53, %v9463_v54  ;;  %v9559_v35 = vld [vmem:[%s12634_s29 + $0x668] sm:$0xf0]  ;;  %v11077_v53 = vld [vmem:[%s12634_s29 + $0x6e4] sm:$0xf]  ;;  %v9615_v2 = vld [vmem:[%s12634_s29 + $0x6d8] sm:$0xf0] }
 0x36f   : > { %8145 = vmatpush.bf16.msra.mxu1 %v9362_v61  ;;  %v10987_v61 = vld [vmem:[%s12634_s29 + $0x414] sm:$0xf]  ;;  %v9623_v55 = vld [vmem:[%s12634_s29 + $0x6e8] sm:$0xf0]  ;;  %v9743_v21 = vld [vmem:[%s12634_s29 + $0x7d8] sm:$0xf0] }
 0x370   : > { %8158 = vmatpush.bf16.msra.mxu2 %v9426_v62  ;;  %v9263_v62 = vld [vmem:[%s12634_s29 + $0x418] sm:$0xf0]  ;;  %v9687_v44 = vld [vmem:[%s12634_s29 + $0x768] sm:$0xf0]  ;;  %v11091_v9 = vld [vmem:[%s12634_s29 + $0x754] sm:$0xf] }
 0x371   : > { %8171 = vmatpush.bf16.msra.mxu3 %v9490_v4  ;;  %v11019_v4 = vld [vmem:[%s12634_s29 + $0x514] sm:$0xf]  ;;  %v9266_v12 = vor.u32 %v10987_v61, %v9263_v62  ;;  %v9562_v61 = vor.u32 %v11061_v52, %v9559_v35  ;;  %v9626_v62 = vor.u32 %v11077_v53, %v9623_v55  ;;  %v11053_v52 = vld [vmem:[%s12634_s29 + $0x624] sm:$0xf]  ;;  %v9527_v35 = vld [vmem:[%s12634_s29 + $0x628] sm:$0xf0] }
 0x372   : > { %8133 = vmatpush.bf16.msra.mxu0 %v9290_v22  ;;  %v9394_v22 = vor.u32 %v11019_v4, %v9391_v1  ;;  %v7907_v34 = vpop.f32.mrf.mxu2  ;;  %v11075_v4 = vld [vmem:[%s12634_s29 + $0x6d4] sm:$0xf]  ;;  %v11069_v53 = vld [vmem:[%s12634_s29 + $0x6a4] sm:$0xf] }
 0x373   : > { %8146 = vmatpush.bf16.msra.mxu1 %v9354_v25  ;;  %v9319_v25 = vld [vmem:[%s12634_s29 + $0x488] sm:$0xf0]  ;;  %v7920_v37 = vpop.f32.mrf.mxu3  ;;  %v11107_v20 = vld [vmem:[%s12634_s29 + $0x7d4] sm:$0xf] }
 0x374   : > { %8159 = vmatpush.bf16.msra.mxu2 %v9418_v26  ;;  %v11017_v26 = vld [vmem:[%s12634_s29 + $0x504] sm:$0xf]  ;;  %v9322_v23 = vor.u32 %v11001_v24, %v9319_v25  ;;  %v9543_v25 = vld [vmem:[%s12634_s29 + $0x648] sm:$0xf0] }
 0x375   : > { %8172 = vmatpush.bf16.msra.mxu3 %v9482_v33  ;;  %v9447_v33 = vld [vmem:[%s12634_s29 + $0x588] sm:$0xf0]  ;;  %v9386_v42 = vor.u32 %v11017_v26, %v9383_v31  ;;  %v11057_v24 = vld [vmem:[%s12634_s29 + $0x644] sm:$0xf] }
 0x376   : > { %8134 = vmatpush.bf16.msra.mxu0 %v9282_v39  ;;  %v9631_v39 = vld [vmem:[%s12634_s29 + $0x6f8] sm:$0xf0]  ;;  %v9450_v30 = vor.u32 %v11033_v32, %v9447_v33  ;;  %v9607_v26 = vld [vmem:[%s12634_s29 + $0x6c8] sm:$0xf0]  ;;  %v11105_v32 = vld [vmem:[%s12634_s29 + $0x7c4] sm:$0xf]  ;;  %v9546_v11 = vor.u32 %v11057_v24, %v9543_v25 }
 0x377   : > { %8147 = vmatpush.bf16.msra.mxu1 %v9346_v40  ;;  %v11095_v40 = vld [vmem:[%s12634_s29 + $0x774] sm:$0xf]  ;;  %v9634_v46 = vor.u32 %v11079_v41, %v9631_v39  ;;  %v9671_v31 = vld [vmem:[%s12634_s29 + $0x748] sm:$0xf0]  ;;  %v9535_v39 = vld [vmem:[%s12634_s29 + $0x638] sm:$0xf0] }
 0x378   : > { %8160 = vmatpush.bf16.msra.mxu2 %v9410_v28  ;;  %v9695_v28 = vld [vmem:[%s12634_s29 + $0x778] sm:$0xf0]  ;;  %v9735_v33 = vld [vmem:[%s12634_s29 + $0x7c8] sm:$0xf0]  ;;  %v11099_v25 = vld [vmem:[%s12634_s29 + $0x794] sm:$0xf] }
 0x379   : > { %8173 = vmatpush.bf16.msra.mxu3 %v9474_v29  ;;  %v9759_v29 = vld [vmem:[%s12634_s29 + $0x7f8] sm:$0xf0]  ;;  %v9698_v51 = vor.u32 %v11095_v40, %v9695_v28  ;;  %v11071_v40 = vld [vmem:[%s12634_s29 + $0x6b4] sm:$0xf]  ;;  %v9738_v28 = vor.u32 %v11105_v32, %v9735_v33  ;;  %v11065_v32 = vld [vmem:[%s12634_s29 + $0x684] sm:$0xf] }
 0x37a   : > { %8135 = vmatpush.bf16.msra.mxu0 %v9274_v56  ;;  %v9762_v54 = vor.u32 %v11111_v43, %v9759_v29  ;;  %v11093_v56 = vld [vmem:[%s12634_s29 + $0x764] sm:$0xf]  ;;  %v11087_v43 = vld [vmem:[%s12634_s29 + $0x734] sm:$0xf]  ;;  %v9647_v24 = vld [vmem:[%s12634_s29 + $0x718] sm:$0xf0] }
 0x37b   : > { %8148 = vmatpush.bf16.msra.mxu1 %v9338_v58  ;;  %v11109_v58 = vld [vmem:[%s12634_s29 + $0x7e4] sm:$0xf]  ;;  %v9690_v63 = vor.u32 %v11093_v56, %v9687_v44  ;;  %v11103_v29 = vld [vmem:[%s12634_s29 + $0x7b4] sm:$0xf]  ;;  %v9591_v56 = vld [vmem:[%s12634_s29 + $0x6a8] sm:$0xf0] }
 0x37c   : > { %8161 = vmatpush.bf16.msra.mxu2 %v9402_v60  ;;  %v9751_v60 = vld [vmem:[%s12634_s29 + $0x7e8] sm:$0xf0]  ;;  %v11085_v44 = vld [vmem:[%s12634_s29 + $0x724] sm:$0xf] }
 0x37d   : > { %8174 = vmatpush.bf16.msra.mxu3 %v9466_v0  ;;  %v11059_v0 = vld [vmem:[%s12634_s29 + $0x654] sm:$0xf]  ;;  %v9754_v1 = vor.u32 %v11109_v58, %v9751_v60  ;;  %v9655_v58 = vld [vmem:[%s12634_s29 + $0x728] sm:$0xf0] }
 0x37e   : > { %8136 = vmatpush.bf16.msra.mxu0 %v9266_v12  ;;  %v9679_v12 = vld [vmem:[%s12634_s29 + $0x758] sm:$0xf0]  ;;  %v9575_v33 = vld [vmem:[%s12634_s29 + $0x688] sm:$0xf0] }
 0x37f   : > { %8149 = vmatpush.bf16.msra.mxu1 %v9330_v3  ;;  %v9618_v3 = vor.u32 %v11075_v4, %v9615_v2  ;;  %v9594_v2 = vor.u32 %v11069_v53, %v9591_v56  ;;  %v9815_v56 = vld [vmem:[%s12634_s29 + $0x868] sm:$0xf0] }
 0x380   : > { %8162 = vmatpush.bf16.msra.mxu2 %v9394_v22  ;;  %v9682_v22 = vor.u32 %v11091_v9, %v9679_v12  ;;  %v9658_v9 = vor.u32 %v11085_v44, %v9655_v58  ;;  %v11051_v12 = vld [vmem:[%s12634_s29 + $0x614] sm:$0xf]  ;;  %v11141_v44 = vld [vmem:[%s12634_s29 + $0x8e4] sm:$0xf] }
 0x381   : > { %8175 = vmatpush.bf16.msra.mxu3 %v9458_v27  ;;  %v11089_v27 = vld [vmem:[%s12634_s29 + $0x744] sm:$0xf] }
 0x382   : > { %8137 = vmatpush.bf16.msra.mxu0 %v9258_v38  ;;  %v9674_v37 = vor.u32 %v11089_v27, %v9671_v31  ;;  %v11055_v38 = vld [vmem:[%s12634_s29 + $0x634] sm:$0xf]  ;;  %v9511_v27 = vld [vmem:[%s12634_s29 + $0x608] sm:$0xf0] }
 0x383   : > { %8150 = vmatpush.bf16.msra.mxu1 %v9322_v23  ;;  %v7944_v36 = vpop.f32.mrf.mxu1 }
 0x384   : > { %8163 = vmatpush.bf16.msra.mxu2 %v9386_v42  ;;  %v9599_v42 = vld [vmem:[%s12634_s29 + $0x6b8] sm:$0xf0] }
 0x385   : > { %8176 = vmatpush.bf16.msra.mxu3 %v9450_v30  ;;  %8138 = vmatmul.bf16.vlgmr.msra.gmra.mxu0 %v12873_v13  ;;  %v9554_v13 = vor.u32 %v11059_v0, %v9551_v59  ;;  %v9727_v30 = vld [vmem:[%s12634_s29 + $0x7b8] sm:$0xf0]  ;;  %v9530_v59 = vor.u32 %v11053_v52, %v9527_v35 }
 0x386   : > { %8182 = vmatpush.bf16.msrb.mxu0 %v9570_v45  ;;  %8151 = vmatmul.bf16.vlgmr.msra.gmra.mxu1 %v12879_v17  ;;  %v9746_v17 = vor.u32 %v11107_v20, %v9743_v21  ;;  %v9538_v45 = vor.u32 %v11055_v38, %v9535_v39  ;;  %v9519_v20 = vld [vmem:[%s12634_s29 + $0x618] sm:$0xf0]  ;;  %v11067_v21 = vld [vmem:[%s12634_s29 + $0x694] sm:$0xf] }
 0x387   : > { %8195 = vmatpush.bf16.msrb.mxu1 %v9634_v46  ;;  %8164 = vmatmul.bf16.vlgmr.msra.gmra.mxu2 %v12877_v16  ;;  %v11073_v16 = vld [vmem:[%s12634_s29 + $0x6c4] sm:$0xf]  ;;  %v9602_v46 = vor.u32 %v11071_v40, %v9599_v42  ;;  %v11127_v39 = vld [vmem:[%s12634_s29 + $0x874] sm:$0xf]  ;;  %v9823_v40 = vld [vmem:[%s12634_s29 + $0x878] sm:$0xf0] }
 0x388   : > { %8208 = vmatpush.bf16.msrb.mxu2 %v9698_v51  ;;  %8177 = vmatmul.bf16.vlgmr.msra.gmra.mxu3 %v12881_v18  ;;  %v7931_v18 = vpop.f32.mrf.mxu0  ;;  %v9610_v41 = vor.u32 %v11073_v16, %v9607_v26  ;;  %v9711_v16 = vld [vmem:[%s12634_s29 + $0x798] sm:$0xf0]  ;;  %v11049_v26 = vld [vmem:[%s12634_s29 + $0x604] sm:$0xf]  ;;  %v9826_v35 = vor.u32 %v11127_v39, %v9823_v40  ;;  %v11119_v39 = vld [vmem:[%s12634_s29 + $0x834] sm:$0xf] }
 0x389   : > { %8221 = vmatpush.bf16.msrb.mxu3 %v9762_v54  ;;  %v7932_v34 = vadd.f32 %v7931_v18, %v13430_v57  ;;  %v9663_v57 = vld [vmem:[%s12634_s29 + $0x738] sm:$0xf0]  ;;  %v9730_v54 = vor.u32 %v11103_v29, %v9727_v30  ;;  %v9514_v42 = vor.u32 %v11049_v26, %v9511_v27  ;;  %v9578_v30 = vor.u32 %v11065_v32, %v9575_v33  ;;  %v11121_v26 = vld [vmem:[%s12634_s29 + $0x844] sm:$0xf]  ;;  %v9799_v27 = vld [vmem:[%s12634_s29 + $0x848] sm:$0xf0] }
 0x38a   : > { %8183 = vmatpush.bf16.msrb.mxu0 %v9562_v61  ;;  %v9666_v51 = vor.u32 %v11087_v43, %v9663_v57  ;;  %v7957_v55 = vpop.f32.mrf.mxu2  ;;  %v9887_v43 = vld [vmem:[%s12634_s29 + $0x8f8] sm:$0xf0]  ;;  %v11159_v57 = vld [vmem:[%s12634_s29 + $0x974] sm:$0xf]  ;;  %v9927_v32 = vld [vmem:[%s12634_s29 + $0x948] sm:$0xf0] }
 0x38b   : > { %8196 = vmatpush.bf16.msrb.mxu1 %v9626_v62  ;;  %v7945_v23 = vadd.f32 %v7944_v36, %v7932_v34  ;;  %v7970_v61 = vpop.f32.mrf.mxu3  ;;  %v11101_v62 = vld [vmem:[%s12634_s29 + $0x7a4] sm:$0xf]  ;;  %v7946_v4 = vpop.f32.mrf.mxu1  ;;  %v9639_v36 = vld [vmem:[%s12634_s29 + $0x708] sm:$0xf0]  ;;  %v9951_v29 = vld [vmem:[%s12634_s29 + $0x978] sm:$0xf0] }
 0x38c   : > { %8209 = vmatpush.bf16.msrb.mxu2 %v9690_v63  ;;  %v9719_v63 = vld [vmem:[%s12634_s29 + $0x7a8] sm:$0xf0]  ;;  %v11081_v34 = vld [vmem:[%s12634_s29 + $0x704] sm:$0xf]  ;;  %v9791_v40 = vld [vmem:[%s12634_s29 + $0x838] sm:$0xf0] }
 0x38d   : > { %8222 = vmatpush.bf16.msrb.mxu3 %v9754_v1  ;;  %v7958_v60 = vadd.f32 %v7957_v55, %v7945_v23  ;;  %v11125_v55 = vld [vmem:[%s12634_s29 + $0x864] sm:$0xf] }
 0x38e   : > { %8184 = vmatpush.bf16.msrb.mxu0 %v9554_v13  ;;  %v9722_v13 = vor.u32 %v11101_v62, %v9719_v63  ;;  %v9943_v62 = vld [vmem:[%s12634_s29 + $0x968] sm:$0xf0]  ;;  %v11173_v63 = vld [vmem:[%s12634_s29 + $0x9e4] sm:$0xf] }
 0x38f   : > { %8197 = vmatpush.bf16.msrb.mxu1 %v9618_v3  ;;  %v13501_v1 = vadd.f32 %v7970_v61, %v7958_v60  ;;  %v9583_v3 = vld [vmem:[%s12634_s29 + $0x698] sm:$0xf0]  ;;  %v9879_v60 = vld [vmem:[%s12634_s29 + $0x8e8] sm:$0xf0]  ;;  %v11157_v61 = vld [vmem:[%s12634_s29 + $0x964] sm:$0xf] }
 0x390   : > { %8210 = vmatpush.bf16.msrb.mxu2 %v9682_v22  ;;  %v7933_v0 = vpop.f32.mrf.mxu0  ;;  %v11083_v22 = vld [vmem:[%s12634_s29 + $0x714] sm:$0xf]  ;;  %v9586_v31 = vor.u32 %v11067_v21, %v9583_v3  ;;  %v9882_v4 = vor.u32 %v11141_v44, %v9879_v60  ;;  %v11169_v33 = vld [vmem:[%s12634_s29 + $0x9c4] sm:$0xf] }
 0x391   : > { %8223 = vmatpush.bf16.msrb.mxu3 %v9746_v17  ;;  %v9522_v17 = vor.u32 %v11051_v12, %v9519_v20  ;;  %v9650_v18 = vor.u32 %v11083_v22, %v9647_v24  ;;  %v10007_v0 = vld [vmem:[%s12634_s29 + $0x9e8] sm:$0xf0]  ;;  %v9807_v12 = vld [vmem:[%s12634_s29 + $0x858] sm:$0xf0]  ;;  %v11139_v20 = vld [vmem:[%s12634_s29 + $0x8d4] sm:$0xf] }
 0x392   : > { %8185 = vmatpush.bf16.msrb.mxu0 %v9546_v11  ;;  %v9714_v11 = vor.u32 %v11099_v25, %v9711_v16  ;;  %v7959_v38 = vpop.f32.mrf.mxu2  ;;  %v10010_v21 = vor.u32 %v11173_v63, %v10007_v0  ;;  %v11155_v3 = vld [vmem:[%s12634_s29 + $0x954] sm:$0xf]  ;;  %v9935_v22 = vld [vmem:[%s12634_s29 + $0x958] sm:$0xf0]  ;;  %v11149_v44 = vld [vmem:[%s12634_s29 + $0x924] sm:$0xf] }
 0x393   : > { %8198 = vmatpush.bf16.msrb.mxu1 %v9610_v41  ;;  %v11097_v41 = vld [vmem:[%s12634_s29 + $0x784] sm:$0xf]  ;;  %v7972_v23 = vpop.f32.mrf.mxu3  ;;  %v11171_v24 = vld [vmem:[%s12634_s29 + $0x9d4] sm:$0xf]  ;;  %v9999_v25 = vld [vmem:[%s12634_s29 + $0x9d8] sm:$0xf0] }
 0x394   : > { %8211 = vmatpush.bf16.msrb.mxu2 %v9674_v37  ;;  %v9703_v37 = vld [vmem:[%s12634_s29 + $0x788] sm:$0xf0] }
 0x395   : > { %8224 = vmatpush.bf16.msrb.mxu3 %v9738_v28  ;;  %v11143_v28 = vld [vmem:[%s12634_s29 + $0x8f4] sm:$0xf]  ;;  %v9706_v52 = vor.u32 %v11097_v41, %v9703_v37  ;;  %v9975_v63 = vld [vmem:[%s12634_s29 + $0x9a8] sm:$0xf0] }
 0x396   : > { %8186 = vmatpush.bf16.msrb.mxu0 %v9538_v45  ;;  %v9642_v45 = vor.u32 %v11081_v34, %v9639_v36  ;;  %v9890_v53 = vor.u32 %v11143_v28, %v9887_v43  ;;  %v9991_v34 = vld [vmem:[%s12634_s29 + $0x9c8] sm:$0xf0]  ;;  %v9802_v36 = vor.u32 %v11121_v26, %v9799_v27  ;;  %v11135_v28 = vld [vmem:[%s12634_s29 + $0x8b4] sm:$0xf]  ;;  %v9855_v43 = vld [vmem:[%s12634_s29 + $0x8b8] sm:$0xf0] }
 0x397   : > { %8199 = vmatpush.bf16.msrb.mxu1 %v9602_v46  ;;  %v11175_v46 = vld [vmem:[%s12634_s29 + $0x9f4] sm:$0xf]  ;;  %v9994_v23 = vor.u32 %v11169_v33, %v9991_v34  ;;  %v11113_v26 = vld [vmem:[%s12634_s29 + $0x804] sm:$0xf]  ;;  %v9767_v27 = vld [vmem:[%s12634_s29 + $0x808] sm:$0xf0] }
 0x398   : > { %8212 = vmatpush.bf16.msrb.mxu2 %v9666_v51  ;;  %v10015_v51 = vld [vmem:[%s12634_s29 + $0x9f8] sm:$0xf0]  ;;  %v9895_v33 = vld [vmem:[%s12634_s29 + $0x908] sm:$0xf0]  ;;  %v11161_v34 = vld [vmem:[%s12634_s29 + $0x984] sm:$0xf] }
 0x399   : > { %8225 = vmatpush.bf16.msrb.mxu3 %v9730_v54  ;;  %v9954_v54 = vor.u32 %v11159_v57, %v9951_v29  ;;  %v10018_v58 = vor.u32 %v11175_v46, %v10015_v51  ;;  %v11151_v57 = vld [vmem:[%s12634_s29 + $0x934] sm:$0xf]  ;;  %v9858_v46 = vor.u32 %v11135_v28, %v9855_v43  ;;  %v10143_v28 = vld [vmem:[%s12634_s29 + $0xaf8] sm:$0xf0] }
 0x39a   : > { %8187 = vmatpush.bf16.msrb.mxu0 %v9530_v59  ;;  %v9818_v59 = vor.u32 %v11125_v55, %v9815_v56  ;;  %v11167_v29 = vld [vmem:[%s12634_s29 + $0x9b4] sm:$0xf]  ;;  %v9847_v56 = vld [vmem:[%s12634_s29 + $0x8a8] sm:$0xf0] }
 0x39b   : > { %8200 = vmatpush.bf16.msrb.mxu1 %v9594_v2  ;;  %v9946_v2 = vor.u32 %v11157_v61, %v9943_v62  ;;  %v11165_v62 = vld [vmem:[%s12634_s29 + $0x9a4] sm:$0xf] }
 0x39c   : > { %8213 = vmatpush.bf16.msrb.mxu2 %v9658_v9  ;;  %v11123_v9 = vld [vmem:[%s12634_s29 + $0x854] sm:$0xf] }
 0x39d   : > { %8226 = vmatpush.bf16.msrb.mxu3 %v9722_v13  ;;  %v9871_v13 = vld [vmem:[%s12634_s29 + $0x8d8] sm:$0xf0] }
 0x39e   : > { %8188 = vmatpush.bf16.msrb.mxu0 %v9522_v17  ;;  %v9874_v16 = vor.u32 %v11139_v20, %v9871_v13  ;;  %v9938_v17 = vor.u32 %v11155_v3, %v9935_v22  ;;  %v11115_v20 = vld [vmem:[%s12634_s29 + $0x814] sm:$0xf]  ;;  %v9978_v3 = vor.u32 %v11165_v62, %v9975_v63  ;;  %v9839_v22 = vld [vmem:[%s12634_s29 + $0x898] sm:$0xf0] }
 0x39f   : > { %8201 = vmatpush.bf16.msrb.mxu1 %v9586_v31  ;;  %v9863_v31 = vld [vmem:[%s12634_s29 + $0x8c8] sm:$0xf0]  ;;  %v11131_v13 = vld [vmem:[%s12634_s29 + $0x894] sm:$0xf] }
 0x3a0   : > { %8214 = vmatpush.bf16.msrb.mxu2 %v9650_v18  ;;  %v11153_v18 = vld [vmem:[%s12634_s29 + $0x944] sm:$0xf] }
 0x3a1   : > { %8227 = vmatpush.bf16.msrb.mxu3 %v9714_v11  ;;  %v9930_v38 = vor.u32 %v11153_v18, %v9927_v32  ;;  %v9831_v18 = vld [vmem:[%s12634_s29 + $0x888] sm:$0xf0]  ;;  %v11145_v32 = vld [vmem:[%s12634_s29 + $0x904] sm:$0xf] }
 0x3a2   : > { %8189 = vmatpush.bf16.msrb.mxu0 %v9514_v42 }
 0x3a3   : > { %8202 = vmatpush.bf16.msrb.mxu1 %v9578_v30  ;;  %v7996_v41 = vpop.f32.mrf.mxu1  ;;  %v9983_v30 = vld [vmem:[%s12634_s29 + $0x9b8] sm:$0xf0] }
 0x3a4   : > { %8215 = vmatpush.bf16.msrb.mxu2 %v9642_v45  ;;  %v9794_v45 = vor.u32 %v11119_v39, %v9791_v40  ;;  %v9770_v40 = vor.u32 %v11113_v26, %v9767_v27  ;;  %v11217_v26 = vld [vmem:[%s12634_s29 + $0xb44] sm:$0xf]  ;;  %v10183_v27 = vld [vmem:[%s12634_s29 + $0xb48] sm:$0xf0] }
 0x3a5   : > { %8228 = vmatpush.bf16.msrb.mxu3 %v9706_v52  ;;  %8190 = vmatmul.bf16.vlgmr.msrb.gmra.mxu0 %v12939_v47  ;;  %v9810_v47 = vor.u32 %v11123_v9, %v9807_v12  ;;  %v11117_v52 = vld [vmem:[%s12634_s29 + $0x824] sm:$0xf] }
 0x3a6   : > { %8234 = vmatpush.bf16.msra.mxu0 %v9826_v35  ;;  %8203 = vmatmul.bf16.vlgmr.msrb.gmra.mxu1 %v12943_v49  ;;  %v10002_v49 = vor.u32 %v11171_v24, %v9999_v25  ;;  %v9783_v35 = vld [vmem:[%s12634_s29 + $0x828] sm:$0xf0]  ;;  %v11147_v24 = vld [vmem:[%s12634_s29 + $0x914] sm:$0xf]  ;;  %v9903_v25 = vld [vmem:[%s12634_s29 + $0x918] sm:$0xf0] }
 0x3a7   : > { %8247 = vmatpush.bf16.msra.mxu1 %v9890_v53  ;;  %8216 = vmatmul.bf16.vlgmr.msrb.gmra.mxu2 %v12941_v48  ;;  %v11137_v48 = vld [vmem:[%s12634_s29 + $0x8c4] sm:$0xf] }
 0x3a8   : > { %8260 = vmatpush.bf16.msra.mxu2 %v9954_v54  ;;  %8229 = vmatmul.bf16.vlgmr.msrb.gmra.mxu3 %v12945_v50  ;;  %v7983_v50 = vpop.f32.mrf.mxu0  ;;  %v9866_v37 = vor.u32 %v11137_v48, %v9863_v31  ;;  %v11133_v53 = vld [vmem:[%s12634_s29 + $0x8a4] sm:$0xf]  ;;  %v9986_v54 = vor.u32 %v11167_v29, %v9983_v30  ;;  %v9842_v48 = vor.u32 %v11131_v13, %v9839_v22  ;;  %v10271_v29 = vld [vmem:[%s12634_s29 + $0xbf8] sm:$0xf0]  ;;  %v11235_v13 = vld [vmem:[%s12634_s29 + $0xbd4] sm:$0xf] }
 0x3a9   : > { %8273 = vmatpush.bf16.msra.mxu3 %v10018_v58  ;;  %v7984_v11 = vadd.f32 %v7983_v50, %v13501_v1  ;;  %v9919_v1 = vld [vmem:[%s12634_s29 + $0x938] sm:$0xf0]  ;;  %v9911_v58 = vld [vmem:[%s12634_s29 + $0x928] sm:$0xf0]  ;;  %v9850_v9 = vor.u32 %v11133_v53, %v9847_v56  ;;  %v11129_v31 = vld [vmem:[%s12634_s29 + $0x884] sm:$0xf] }
 0x3aa   : > { %8235 = vmatpush.bf16.msra.mxu0 %v9818_v59  ;;  %v9922_v51 = vor.u32 %v11151_v57, %v9919_v1  ;;  %v8009_v55 = vpop.f32.mrf.mxu2  ;;  %v9786_v59 = vor.u32 %v11117_v52, %v9783_v35  ;;  %v9914_v12 = vor.u32 %v11149_v44, %v9911_v58  ;;  %v9834_v43 = vor.u32 %v11129_v31, %v9831_v18  ;;  %v11239_v1 = vld [vmem:[%s12634_s29 + $0xbf4] sm:$0xf]  ;;  %v11189_v52 = vld [vmem:[%s12634_s29 + $0xa64] sm:$0xf]  ;;  %v10071_v35 = vld [vmem:[%s12634_s29 + $0xa68] sm:$0xf0] }
 0x3ab   : > { %8248 = vmatpush.bf16.msra.mxu1 %v9882_v4  ;;  %v7997_v42 = vadd.f32 %v7996_v41, %v7984_v11  ;;  %v8022_v61 = vpop.f32.mrf.mxu3  ;;  %v7998_v4 = vpop.f32.mrf.mxu1  ;;  %v9959_v11 = vld [vmem:[%s12634_s29 + $0x988] sm:$0xf0]  ;;  %v11191_v41 = vld [vmem:[%s12634_s29 + $0xa74] sm:$0xf]  ;;  %v9898_v57 = vor.u32 %v11145_v32, %v9895_v33  ;;  %v11205_v53 = vld [vmem:[%s12634_s29 + $0xae4] sm:$0xf] }
 0x3ac   : > { %8261 = vmatpush.bf16.msra.mxu2 %v9946_v2  ;;  %v9962_v30 = vor.u32 %v11161_v34, %v9959_v11  ;;  %v11221_v56 = vld [vmem:[%s12634_s29 + $0xb64] sm:$0xf]  ;;  %v10199_v44 = vld [vmem:[%s12634_s29 + $0xb68] sm:$0xf0]  ;;  %v11203_v4 = vld [vmem:[%s12634_s29 + $0xad4] sm:$0xf] }
 0x3ad   : > { %8274 = vmatpush.bf16.msra.mxu3 %v10010_v21  ;;  %v8010_v60 = vadd.f32 %v8009_v55, %v7997_v42  ;;  %v9775_v21 = vld [vmem:[%s12634_s29 + $0x818] sm:$0xf0]  ;;  %v10135_v55 = vld [vmem:[%s12634_s29 + $0xae8] sm:$0xf0]  ;;  %v11237_v58 = vld [vmem:[%s12634_s29 + $0xbe4] sm:$0xf]  ;;  %v10202_v63 = vor.u32 %v11221_v56, %v10199_v44 }
 0x3ae   : > { %8236 = vmatpush.bf16.msra.mxu0 %v9810_v47  ;;  %v11163_v47 = vld [vmem:[%s12634_s29 + $0x994] sm:$0xf]  ;;  %v10207_v42 = vld [vmem:[%s12634_s29 + $0xb78] sm:$0xf0]  ;;  %v10138_v62 = vor.u32 %v11205_v53, %v10135_v55  ;;  %v11185_v22 = vld [vmem:[%s12634_s29 + $0xa44] sm:$0xf] }
 0x3af   : > { %8249 = vmatpush.bf16.msra.mxu1 %v9874_v16  ;;  %v13572_v2 = vadd.f32 %v8022_v61, %v8010_v60  ;;  %v9967_v16 = vld [vmem:[%s12634_s29 + $0x998] sm:$0xf0]  ;;  %v10263_v60 = vld [vmem:[%s12634_s29 + $0xbe8] sm:$0xf0]  ;;  %v10074_v61 = vor.u32 %v11189_v52, %v10071_v35  ;;  %v11183_v33 = vld [vmem:[%s12634_s29 + $0xa34] sm:$0xf] }
 0x3b0   : > { %8262 = vmatpush.bf16.msra.mxu2 %v9938_v17  ;;  %v7985_v0 = vpop.f32.mrf.mxu0  ;;  %v9778_v17 = vor.u32 %v11115_v20, %v9775_v21  ;;  %v9970_v50 = vor.u32 %v11163_v47, %v9967_v16  ;;  %v11219_v20 = vld [vmem:[%s12634_s29 + $0xb54] sm:$0xf]  ;;  %v10191_v21 = vld [vmem:[%s12634_s29 + $0xb58] sm:$0xf0]  ;;  %v10055_v47 = vld [vmem:[%s12634_s29 + $0xa48] sm:$0xf0] }
 0x3b1   : > { %8275 = vmatpush.bf16.msra.mxu3 %v10002_v49  ;;  %v9906_v49 = vor.u32 %v11147_v24, %v9903_v25  ;;  %v11187_v0 = vld [vmem:[%s12634_s29 + $0xa54] sm:$0xf]  ;;  %v10194_v25 = vor.u32 %v11219_v20, %v10191_v21  ;;  %v11433_v16 = vld [vmem:[%s12627_s16] sm:$0x3]  ;;  %v10058_v31 = vor.u32 %v11185_v22, %v10055_v47  ;;  %v10047_v34 = vld [vmem:[%s12634_s29 + $0xa38] sm:$0xf0] }
 0x3b2   : > { %8237 = vmatpush.bf16.msra.mxu0 %v9802_v36  ;;  %v8011_v36 = vpop.f32.mrf.mxu2  ;;  %v11199_v11 = vld [vmem:[%s12634_s29 + $0xab4] sm:$0xf]  ;;  %v10103_v52 = vld [vmem:[%s12634_s29 + $0xaa8] sm:$0xf0]  ;;  %v11213_v35 = vld [vmem:[%s12634_s29 + $0xb24] sm:$0xf] }
 0x3b3   : > { %8250 = vmatpush.bf16.msra.mxu1 %v9866_v37  ;;  %v10079_v37 = vld [vmem:[%s12634_s29 + $0xa78] sm:$0xf0]  ;;  %v8024_v39 = vpop.f32.mrf.mxu3  ;;  %v10167_v53 = vld [vmem:[%s12634_s29 + $0xb28] sm:$0xf0]  ;;  %v11229_v56 = vld [vmem:[%s12634_s29 + $0xba4] sm:$0xf] }
 0x3b4   : > { %8263 = vmatpush.bf16.msra.mxu2 %v9930_v38  ;;  %v11207_v38 = vld [vmem:[%s12634_s29 + $0xaf4] sm:$0xf]  ;;  %v10231_v44 = vld [vmem:[%s12634_s29 + $0xba8] sm:$0xf0]  ;;  %v10095_v20 = vld [vmem:[%s12634_s29 + $0xa98] sm:$0xf0] }
 0x3b5   : > { %8276 = vmatpush.bf16.msra.mxu3 %v9994_v23  ;;  %v11223_v23 = vld [vmem:[%s12634_s29 + $0xb74] sm:$0xf] }
 0x3b6   : > { %8238 = vmatpush.bf16.msra.mxu0 %v9794_v45  ;;  %v10082_v45 = vor.u32 %v11191_v41, %v10079_v37  ;;  %v11215_v39 = vld [vmem:[%s12634_s29 + $0xb34] sm:$0xf] }
 0x3b7   : > { %8251 = vmatpush.bf16.msra.mxu1 %v9858_v46  ;;  %v10146_v46 = vor.u32 %v11207_v38, %v10143_v28  ;;  %v10111_v38 = vld [vmem:[%s12634_s29 + $0xab8] sm:$0xf0]  ;;  %v11231_v28 = vld [vmem:[%s12634_s29 + $0xbb4] sm:$0xf] }
 0x3b8   : > { %8264 = vmatpush.bf16.msra.mxu2 %v9922_v51  ;;  %v10210_v51 = vor.u32 %v11223_v23, %v10207_v42  ;;  %v10239_v23 = vld [vmem:[%s12634_s29 + $0xbb8] sm:$0xf0]  ;;  %v11211_v21 = vld [vmem:[%s12634_s29 + $0xb14] sm:$0xf] }
 0x3b9   : > { %8277 = vmatpush.bf16.msra.mxu3 %v9986_v54  ;;  %v10274_v54 = vor.u32 %v11239_v1, %v10271_v29  ;;  %v11181_v29 = vld [vmem:[%s12634_s29 + $0xa24] sm:$0xf] }
 0x3ba   : > { %8239 = vmatpush.bf16.msra.mxu0 %v9786_v59  ;;  %v10063_v59 = vld [vmem:[%s12634_s29 + $0xa58] sm:$0xf0] }
 0x3bb   : > { %8252 = vmatpush.bf16.msra.mxu1 %v9850_v9  ;;  %v10266_v9 = vor.u32 %v11237_v58, %v10263_v60 }
 0x3bc   : > { %8265 = vmatpush.bf16.msra.mxu2 %v9914_v12  ;;  %v10127_v12 = vld [vmem:[%s12634_s29 + $0xad8] sm:$0xf0] }
 0x3bd   : > { %8278 = vmatpush.bf16.msra.mxu3 %v9978_v3  ;;  %v10255_v3 = vld [vmem:[%s12634_s29 + $0xbd8] sm:$0xf0]  ;;  %v10130_v24 = vor.u32 %v11203_v4, %v10127_v12  ;;  %v11195_v4 = vld [vmem:[%s12634_s29 + $0xa94] sm:$0xf]  ;;  %v10234_v12 = vor.u32 %v11229_v56, %v10231_v44 }
 0x3be   : > { %8240 = vmatpush.bf16.msra.mxu0 %v9778_v17  ;;  %v10258_v17 = vor.u32 %v11235_v13, %v10255_v3  ;;  %v10159_v13 = vld [vmem:[%s12634_s29 + $0xb18] sm:$0xf0]  ;;  %v11227_v3 = vld [vmem:[%s12634_s29 + $0xb94] sm:$0xf]  ;;  %v10098_v47 = vor.u32 %v11195_v4, %v10095_v20  ;;  %v10311_v20 = vld [vmem:[%s12634_s29 + $0xc48] sm:$0xf0] }
 0x3bf   : > { %8253 = vmatpush.bf16.msra.mxu1 %v9842_v48  ;;  %v11233_v48 = vld [vmem:[%s12634_s29 + $0xbc4] sm:$0xf]  ;;  %v10319_v56 = vld [vmem:[%s12634_s29 + $0xc58] sm:$0xf0]  ;;  %v11267_v44 = vld [vmem:[%s12634_s29 + $0xcd4] sm:$0xf] }
 0x3c0   : > { %8266 = vmatpush.bf16.msra.mxu2 %v9906_v49  ;;  %v10247_v49 = vld [vmem:[%s12634_s29 + $0xbc8] sm:$0xf0] }
 0x3c1   : > { %8279 = vmatpush.bf16.msra.mxu3 %v9970_v50  ;;  %v10186_v50 = vor.u32 %v11217_v26, %v10183_v27  ;;  %v10250_v37 = vor.u32 %v11233_v48, %v10247_v49  ;;  %v10151_v27 = vld [vmem:[%s12634_s29 + $0xb08] sm:$0xf0]  ;;  %v11225_v48 = vld [vmem:[%s12634_s29 + $0xb84] sm:$0xf] }
 0x3c2   : > { %8241 = vmatpush.bf16.msra.mxu0 %v9770_v40  ;;  %v8035_v18 = vpop.f32.mrf.mxu0  ;;  %v10175_v40 = vld [vmem:[%s12634_s29 + $0xb38] sm:$0xf0]  ;;  %v10215_v49 = vld [vmem:[%s12634_s29 + $0xb88] sm:$0xf0] }
 0x3c3   : > { %8254 = vmatpush.bf16.msra.mxu1 %v9834_v43  ;;  %v8048_v41 = vpop.f32.mrf.mxu1  ;;  %v10050_v43 = vor.u32 %v11183_v33, %v10047_v34  ;;  %v10178_v1 = vor.u32 %v11215_v39, %v10175_v40  ;;  %v10399_v34 = vld [vmem:[%s12634_s29 + $0xcf8] sm:$0xf0]  ;;  %v10218_v40 = vor.u32 %v11225_v48, %v10215_v49  ;;  %v11279_v48 = vld [vmem:[%s12634_s29 + $0xd34] sm:$0xf] }
 0x3c4   : > { %8267 = vmatpush.bf16.msra.mxu2 %v9898_v57  ;;  %v10114_v57 = vor.u32 %v11199_v11, %v10111_v38  ;;  %v11287_v11 = vld [vmem:[%s12634_s29 + $0xd74] sm:$0xf]  ;;  %v10527_v39 = vld [vmem:[%s12634_s29 + $0xdf8] sm:$0xf0] }
 0x3c5   : > { %8280 = vmatpush.bf16.msra.mxu3 %v9962_v30  ;;  %8242 = vmatmul.bf16.vlgmr.msra.gmra.mxu0 %v13028_v10  ;;  %v10066_v10 = vor.u32 %v11187_v0, %v10063_v59  ;;  %v10039_v30 = vld [vmem:[%s12634_s29 + $0xa28] sm:$0xf0]  ;;  %v11179_v0 = vld [vmem:[%s12634_s29 + $0xa14] sm:$0xf]  ;;  %v10031_v59 = vld [vmem:[%s12634_s29 + $0xa18] sm:$0xf0] }
 0x3c6   : > { %8286 = vmatpush.bf16.msrb.mxu0 %v10082_v45  ;;  %8255 = vmatmul.bf16.vlgmr.msra.gmra.mxu1 %v13034_v15  ;;  %v4975_v15 = vperm.slane %v11433_v16, 1  ;;  %v11197_v45 = vld [vmem:[%s12634_s29 + $0xaa4] sm:$0xf]  ;;  %v10042_v58 = vor.u32 %v11181_v29, %v10039_v30  ;;  %v10034_v22 = vor.u32 %v11179_v0, %v10031_v59  ;;  %v11303_v38 = vld [vmem:[%s12634_s29 + $0xdf4] sm:$0xf] }
 0x3c7   : > { %8299 = vmatpush.bf16.msrb.mxu1 %v10146_v46  ;;  %8268 = vmatmul.bf16.vlgmr.msra.gmra.mxu2 %v13032_v14  ;;  %v11201_v14 = vld [vmem:[%s12634_s29 + $0xac4] sm:$0xf]  ;;  %v10530_v29 = vor.u32 %v11303_v38, %v10527_v39  ;;  %v10391_v30 = vld [vmem:[%s12634_s29 + $0xce8] sm:$0xf0]  ;;  %v11299_v0 = vld [vmem:[%s12634_s29 + $0xdd4] sm:$0xf] }
 0x3c8   : > { %8312 = vmatpush.bf16.msrb.mxu2 %v10210_v51  ;;  %8281 = vmatmul.bf16.vlgmr.msra.gmra.mxu3 %v13036_v19  ;;  %v10119_v19 = vld [vmem:[%s12634_s29 + $0xac8] sm:$0xf0]  ;;  %v8036_v36 = vadd.f32 %v8035_v18, %v4975_v15  ;;  %v10242_v51 = vor.u32 %v11231_v28, %v10239_v23  ;;  %v11193_v16 = vld [vmem:[%s12634_s29 + $0xa84] sm:$0xf]  ;;  %v11255_v18 = vld [vmem:[%s12634_s29 + $0xc74] sm:$0xf] }
 0x3c9   : > { %8325 = vmatpush.bf16.msrb.mxu3 %v10274_v54  ;;  %v10122_v32 = vor.u32 %v11201_v14, %v10119_v19  ;;  %v10162_v14 = vor.u32 %v11211_v21, %v10159_v13  ;;  %v10087_v15 = vld [vmem:[%s12634_s29 + $0xa88] sm:$0xf0]  ;;  %v10511_v59 = vld [vmem:[%s12634_s29 + $0xdd8] sm:$0xf0]  ;;  %v11281_v13 = vld [vmem:[%s12634_s29 + $0xd44] sm:$0xf] }
 0x3ca   : > { %8287 = vmatpush.bf16.msrb.mxu0 %v10074_v61  ;;  %v8049_v42 = vadd.f32 %v8048_v41, %v8036_v36  ;;  %v8061_v46 = vpop.f32.mrf.mxu2  ;;  %v8037_v61 = vpop.f32.mrf.mxu0  ;;  %v10463_v36 = vld [vmem:[%s12634_s29 + $0xd78] sm:$0xf0]  ;;  %v10090_v41 = vor.u32 %v11193_v16, %v10087_v15  ;;  %v10375_v21 = vld [vmem:[%s12634_s29 + $0xcc8] sm:$0xf0]  ;;  %v11263_v15 = vld [vmem:[%s12634_s29 + $0xcb4] sm:$0xf] }
 0x3cb   : > { %8300 = vmatpush.bf16.msrb.mxu1 %v10138_v62  ;;  %v8074_v55 = vpop.f32.mrf.mxu3  ;;  %v10106_v62 = vor.u32 %v11197_v45, %v10103_v52  ;;  %v11285_v45 = vld [vmem:[%s12634_s29 + $0xd64] sm:$0xf]  ;;  %v10519_v52 = vld [vmem:[%s12634_s29 + $0xde8] sm:$0xf0]  ;;  %v10383_v61 = vld [vmem:[%s12634_s29 + $0xcd8] sm:$0xf0] }
 0x3cc   : > { %8313 = vmatpush.bf16.msrb.mxu2 %v10202_v63  ;;  %v8062_v54 = vadd.f32 %v8061_v46, %v8049_v42  ;;  %v10170_v63 = vor.u32 %v11213_v35, %v10167_v53  ;;  %v10466_v42 = vor.u32 %v11287_v11, %v10463_v36  ;;  %v10455_v46 = vld [vmem:[%s12634_s29 + $0xd68] sm:$0xf0]  ;;  %v10386_v4 = vor.u32 %v11267_v44, %v10383_v61  ;;  %v10303_v16 = vld [vmem:[%s12634_s29 + $0xc38] sm:$0xf0]  ;;  %v11261_v36 = vld [vmem:[%s12634_s29 + $0xca4] sm:$0xf] }
 0x3cd   : > { %8326 = vmatpush.bf16.msrb.mxu3 %v10266_v9  ;;  %v8050_v9 = vpop.f32.mrf.mxu1  ;;  %v10431_v49 = vld [vmem:[%s12634_s29 + $0xd38] sm:$0xf0]  ;;  %v10295_v11 = vld [vmem:[%s12634_s29 + $0xc28] sm:$0xf0]  ;;  %v11277_v39 = vld [vmem:[%s12634_s29 + $0xd24] sm:$0xf] }
 0x3ce   : > { %8288 = vmatpush.bf16.msrb.mxu0 %v10066_v10  ;;  %v13643_v60 = vadd.f32 %v8074_v55, %v8062_v54  ;;  %v10223_v10 = vld [vmem:[%s12634_s29 + $0xb98] sm:$0xf0]  ;;  %v10458_v54 = vor.u32 %v11285_v45, %v10455_v46  ;;  %v11251_v55 = vld [vmem:[%s12634_s29 + $0xc54] sm:$0xf]  ;;  %v10359_v38 = vld [vmem:[%s12634_s29 + $0xca8] sm:$0xf0] }
 0x3cf   : > { %8301 = vmatpush.bf16.msrb.mxu1 %v10130_v24  ;;  %v11177_v24 = vld [vmem:[%s12634_s29 + $0xa04] sm:$0xf]  ;;  %v10226_v26 = vor.u32 %v11227_v3, %v10223_v10  ;;  %v10439_v3 = vld [vmem:[%s12634_s29 + $0xd48] sm:$0xf0]  ;;  %v11243_v46 = vld [vmem:[%s12634_s29 + $0xc14] sm:$0xf] }
 0x3d0   : > { %8314 = vmatpush.bf16.msrb.mxu2 %v10194_v25  ;;  %v10023_v25 = vld [vmem:[%s12634_s29 + $0xa08] sm:$0xf0]  ;;  %v11297_v10 = vld [vmem:[%s12634_s29 + $0xdc4] sm:$0xf]  ;;  %v11291_v44 = vld [vmem:[%s12634_s29 + $0xd94] sm:$0xf] }
 0x3d1   : > { %8327 = vmatpush.bf16.msrb.mxu3 %v10258_v17  ;;  %v11209_v17 = vld [vmem:[%s12634_s29 + $0xb04] sm:$0xf]  ;;  %v10026_v33 = vor.u32 %v11177_v24, %v10023_v25 }
 0x3d2   : > { %8289 = vmatpush.bf16.msrb.mxu0 %v10058_v31  ;;  %v8063_v19 = vpop.f32.mrf.mxu2 }
 0x3d3   : > { %8302 = vmatpush.bf16.msrb.mxu1 %v10122_v32  ;;  %v8076_v31 = vpop.f32.mrf.mxu3  ;;  %v10335_v32 = vld [vmem:[%s12634_s29 + $0xc78] sm:$0xf0] }
 0x3d4   : > { %8315 = vmatpush.bf16.msrb.mxu2 %v10186_v50  ;;  %v11271_v50 = vld [vmem:[%s12634_s29 + $0xcf4] sm:$0xf]  ;;  %v10338_v28 = vor.u32 %v11255_v18, %v10335_v32  ;;  %v10495_v18 = vld [vmem:[%s12634_s29 + $0xdb8] sm:$0xf0] }
 0x3d5   : > { %8328 = vmatpush.bf16.msrb.mxu3 %v10250_v37  ;;  %v10154_v37 = vor.u32 %v11209_v17, %v10151_v27  ;;  %v10402_v23 = vor.u32 %v11271_v50, %v10399_v34  ;;  %v10367_v27 = vld [vmem:[%s12634_s29 + $0xcb8] sm:$0xf0]  ;;  %v11295_v31 = vld [vmem:[%s12634_s29 + $0xdb4] sm:$0xf]  ;;  %v11245_v34 = vld [vmem:[%s12634_s29 + $0xc24] sm:$0xf] }
 0x3d6   : > { %8290 = vmatpush.bf16.msrb.mxu0 %v10050_v43  ;;  %v11253_v43 = vld [vmem:[%s12634_s29 + $0xc64] sm:$0xf] }
 0x3d7   : > { %8303 = vmatpush.bf16.msrb.mxu1 %v10114_v57  ;;  %v10327_v57 = vld [vmem:[%s12634_s29 + $0xc68] sm:$0xf0] }
 0x3d8   : > { %8316 = vmatpush.bf16.msrb.mxu2 %v10178_v1  ;;  %v11269_v1 = vld [vmem:[%s12634_s29 + $0xce4] sm:$0xf]  ;;  %v10330_v35 = vor.u32 %v11253_v43, %v10327_v57  ;;  %v10487_v43 = vld [vmem:[%s12634_s29 + $0xda8] sm:$0xf0]  ;;  %v10298_v57 = vor.u32 %v11245_v34, %v10295_v11 }
 0x3d9   : > { %8329 = vmatpush.bf16.msrb.mxu3 %v10242_v51  ;;  %v11301_v51 = vld [vmem:[%s12634_s29 + $0xde4] sm:$0xf]  ;;  %v10394_v53 = vor.u32 %v11269_v1, %v10391_v30  ;;  %v10362_v30 = vor.u32 %v11261_v36, %v10359_v38  ;;  %v10775_v11 = vld [vmem:[%s12634_s29 + $0xfe8] sm:$0xf0]  ;;  %v11315_v38 = vld [vmem:[%s12634_s29 + $0xe54] sm:$0xf] }
 0x3da   : > { %8291 = vmatpush.bf16.msrb.mxu0 %v10042_v58  ;;  %v10522_v58 = vor.u32 %v11301_v51, %v10519_v52  ;;  %v10287_v51 = vld [vmem:[%s12634_s29 + $0xc18] sm:$0xf0]  ;;  %v11259_v52 = vld [vmem:[%s12634_s29 + $0xc94] sm:$0xf]  ;;  %v11365_v34 = vld [vmem:[%s12634_s29 + $0xfe4] sm:$0xf] }
 0x3db   : > { %8304 = vmatpush.bf16.msrb.mxu1 %v10106_v62  ;;  %v11283_v62 = vld [vmem:[%s12634_s29 + $0xd54] sm:$0xf]  ;;  %v10290_v61 = vor.u32 %v11243_v46, %v10287_v51  ;;  %v10767_v46 = vld [vmem:[%s12634_s29 + $0xfd8] sm:$0xf0] }
 0x3dc   : > { %8317 = vmatpush.bf16.msrb.mxu2 %v10170_v63  ;;  %v10447_v63 = vld [vmem:[%s12634_s29 + $0xd58] sm:$0xf0]  ;;  %v11437_v51 = vld [vmem:[#allocation1 + $0x1b] sm:$0xff] }
 0x3dd   : > { %8330 = vmatpush.bf16.msrb.mxu3 %v10234_v12  ;;  %v10450_v9 = vor.u32 %v11283_v62, %v10447_v63  ;;  %v11249_v12 = vld [vmem:[%s12634_s29 + $0xc44] sm:$0xf]  ;;  %v10279_v63 = vld [vmem:[%s12634_s29 + $0xc08] sm:$0xf0] }
 0x3de   : > { %8292 = vmatpush.bf16.msrb.mxu0 %v10034_v22  ;;  %v10314_v22 = vor.u32 %v11249_v12, %v10311_v20  ;;  %v11241_v62 = vld [vmem:[%s12634_s29 + $0xc04] sm:$0xf] }
 0x3df   : > { %8305 = vmatpush.bf16.msrb.mxu1 %v10098_v47  ;;  %v10442_v47 = vor.u32 %v11281_v13, %v10439_v3  ;;  %v11319_v3 = vld [vmem:[%s12634_s29 + $0xe74] sm:$0xf] }
 0x3e0   : > { %8318 = vmatpush.bf16.msrb.mxu2 %v10162_v14  ;;  %v11247_v14 = vld [vmem:[%s12634_s29 + $0xc34] sm:$0xf] }
 0x3e1   : > { %8331 = vmatpush.bf16.msrb.mxu3 %v10226_v26  ;;  %v10306_v50 = vor.u32 %v11247_v14, %v10303_v16 }
 0x3e2   : > { %8293 = vmatpush.bf16.msrb.mxu0 %v10026_v33  ;;  %v8087_v24 = vpop.f32.mrf.mxu0  ;;  %v10434_v33 = vor.u32 %v11279_v48, %v10431_v49  ;;  %v11317_v49 = vld [vmem:[%s12634_s29 + $0xe64] sm:$0xf] }
 0x3e3   : > { %8306 = vmatpush.bf16.msrb.mxu1 %v10090_v41  ;;  %v8088_v17 = vadd.f32 %v8087_v24, %v13643_v60  ;;  %v8100_v19 = vpop.f32.mrf.mxu1  ;;  %v10370_v60 = vor.u32 %v11263_v15, %v10367_v27  ;;  %v10655_v24 = vld [vmem:[%s12634_s29 + $0xef8] sm:$0xf0]  ;;  %v11367_v15 = vld [vmem:[%s12634_s29 + $0xff4] sm:$0xf] }
 0x3e4   : > { %8319 = vmatpush.bf16.msrb.mxu2 %v10154_v37  ;;  %v10498_v37 = vor.u32 %v11295_v31, %v10495_v18  ;;  %v10583_v31 = vld [vmem:[%s12634_s29 + $0xe68] sm:$0xf0]  ;;  %v11333_v18 = vld [vmem:[%s12634_s29 + $0xee4] sm:$0xf] }
 0x3e5   : > { %8332 = vmatpush.bf16.msrb.mxu3 %v10218_v40  ;;  %8294 = vmatmul.bf16.vlgmr.msrb.gmra.mxu0 %v13095_v5  ;;  %v10322_v5 = vor.u32 %v11251_v55, %v10319_v56  ;;  %v8101_v32 = vadd.f32 %v8100_v19, %v8088_v17  ;;  %v10423_v40 = vld [vmem:[%s12634_s29 + $0xd28] sm:$0xf0]  ;;  %v11275_v55 = vld [vmem:[%s12634_s29 + $0xd14] sm:$0xf]  ;;  %v10415_v56 = vld [vmem:[%s12634_s29 + $0xd18] sm:$0xf0]  ;;  %v10586_v36 = vor.u32 %v11317_v49, %v10583_v31 }
 0x3e6   : > { %8338 = vmatpush.bf16.msra.mxu0 %v10338_v28  ;;  %8307 = vmatmul.bf16.vlgmr.msrb.gmra.mxu1 %v13099_v7  ;;  %v10514_v7 = vor.u32 %v11299_v0, %v10511_v59  ;;  %v10426_v45 = vor.u32 %v11277_v39, %v10423_v40  ;;  %v10418_v59 = vor.u32 %v11275_v55, %v10415_v56  ;;  %v10783_v17 = vld [vmem:[%s12634_s29 + $0xff8] sm:$0xf0]  ;;  %v11331_v40 = vld [vmem:[%s12634_s29 + $0xed4] sm:$0xf]  ;;  %v10567_v55 = vld [vmem:[%s12634_s29 + $0xe48] sm:$0xf0] }
 0x3e7   : > { %8351 = vmatpush.bf16.msra.mxu1 %v10402_v23  ;;  %8320 = vmatmul.bf16.vlgmr.msrb.gmra.mxu2 %v13097_v6  ;;  %v11265_v6 = vld [vmem:[%s12634_s29 + $0xcc4] sm:$0xf]  ;;  %v10575_v39 = vld [vmem:[%s12634_s29 + $0xe58] sm:$0xf0]  ;;  %v10679_v49 = vld [vmem:[%s12634_s29 + $0xf28] sm:$0xf0] }
 0x3e8   : > { %8364 = vmatpush.bf16.msra.mxu2 %v10466_v42  ;;  %8333 = vmatmul.bf16.vlgmr.msrb.gmra.mxu3 %v13101_v8  ;;  %v10503_v8 = vld [vmem:[%s12634_s29 + $0xdc8] sm:$0xf0]  ;;  %v10378_v25 = vor.u32 %v11265_v6, %v10375_v21  ;;  %v11293_v42 = vld [vmem:[%s12634_s29 + $0xda4] sm:$0xf] }
 0x3e9   : > { %8377 = vmatpush.bf16.msra.mxu3 %v10530_v29  ;;  %v10506_v26 = vor.u32 %v11297_v10, %v10503_v8  ;;  %v10407_v6 = vld [vmem:[%s12634_s29 + $0xd08] sm:$0xf0]  ;;  %v10591_v10 = vld [vmem:[%s12634_s29 + $0xe78] sm:$0xf0]  ;;  %v11335_v8 = vld [vmem:[%s12634_s29 + $0xef4] sm:$0xf] }
 0x3ea   : > { %8339 = vmatpush.bf16.msra.mxu0 %v10330_v35  ;;  %v8113_v41 = vpop.f32.mrf.mxu2  ;;  %v8089_v29 = vpop.f32.mrf.mxu0  ;;  %v10471_v21 = vld [vmem:[%s12634_s29 + $0xd88] sm:$0xf0]  ;;  %v10658_v27 = vor.u32 %v11335_v8, %v10655_v24  ;;  %v11329_v56 = vld [vmem:[%s12634_s29 + $0xec4] sm:$0xf]  ;;  %v11343_v8 = vld [vmem:[%s12634_s29 + $0xf34] sm:$0xf] }
 0x3eb   : > { %8352 = vmatpush.bf16.msra.mxu1 %v10394_v53  ;;  %v8114_v28 = vadd.f32 %v8113_v41, %v8101_v32  ;;  %v8126_v23 = vpop.f32.mrf.mxu3  ;;  %v8102_v35 = vpop.f32.mrf.mxu1  ;;  %v10490_v53 = vor.u32 %v11293_v42, %v10487_v43  ;;  %v10786_v32 = vor.u32 %v11367_v15, %v10783_v17  ;;  %v10639_v42 = vld [vmem:[%s12634_s29 + $0xed8] sm:$0xf0]  ;;  %v11347_v43 = vld [vmem:[%s12634_s29 + $0xf54] sm:$0xf]  ;;  %v11435_v29 = vld [vmem:[#allocation1 + $0x12] sm:$0xff] }
 0x3ec   : > { %8365 = vmatpush.bf16.msra.mxu2 %v10458_v54  ;;  %v10351_v54 = vld [vmem:[%s12634_s29 + $0xc98] sm:$0xf0]  ;;  %v10642_v35 = vor.u32 %v11331_v40, %v10639_v42  ;;  %v10551_v15 = vld [vmem:[%s12634_s29 + $0xe28] sm:$0xf0]  ;;  %v11325_v17 = vld [vmem:[%s12634_s29 + $0xea4] sm:$0xf] }
 0x3ed   : > { %8378 = vmatpush.bf16.msra.mxu3 %v10522_v58  ;;  %v13714_v1 = vadd.f32 %v8126_v23, %v8114_v28  ;;  %v10479_v58 = vld [vmem:[%s12634_s29 + $0xd98] sm:$0xf0]  ;;  %v10354_v0 = vor.u32 %v11259_v52, %v10351_v54  ;;  %v10778_v23 = vor.u32 %v11365_v34, %v10775_v11  ;;  %v10578_v52 = vor.u32 %v11315_v38, %v10575_v39  ;;  %v11313_v54 = vld [vmem:[%s12634_s29 + $0xe44] sm:$0xf]  ;;  %v11323_v39 = vld [vmem:[%s12634_s29 + $0xe94] sm:$0xf] }
 0x3ee   : > { %8340 = vmatpush.bf16.msra.mxu0 %v10322_v5  ;;  %v11257_v5 = vld [vmem:[%s12634_s29 + $0xc84] sm:$0xf]  ;;  %v10482_v20 = vor.u32 %v11291_v44, %v10479_v58  ;;  %v11434_v28 = vld [vmem:[#allocation1] sm:$0xff]  ;;  %v10631_v58 = vld [vmem:[%s12634_s29 + $0xec8] sm:$0xf0] }
 0x3ef   : > { %8353 = vmatpush.bf16.msra.mxu1 %v10386_v4  ;;  %v10343_v4 = vld [vmem:[%s12634_s29 + $0xc88] sm:$0xf0]  ;;  %v10751_v24 = vld [vmem:[%s12634_s29 + $0xfb8] sm:$0xf0] }
 0x3f0   : > { %8366 = vmatpush.bf16.msra.mxu2 %v10450_v9  ;;  %v11273_v9 = vld [vmem:[%s12634_s29 + $0xd04] sm:$0xf]  ;;  %v10346_v14 = vor.u32 %v11257_v5, %v10343_v4  ;;  %v10570_v4 = vor.u32 %v11313_v54, %v10567_v55  ;;  %v10543_v38 = vld [vmem:[%s12634_s29 + $0xe18] sm:$0xf0]  ;;  %v10663_v55 = vld [vmem:[%s12634_s29 + $0xf08] sm:$0xf0] }
 0x3f1   : > { %8379 = vmatpush.bf16.msra.mxu3 %v10514_v7  ;;  %v11289_v7 = vld [vmem:[%s12634_s29 + $0xd84] sm:$0xf]  ;;  %v10410_v16 = vor.u32 %v11273_v9, %v10407_v6  ;;  %v11311_v6 = vld [vmem:[%s12634_s29 + $0xe34] sm:$0xf]  ;;  %v10671_v42 = vld [vmem:[%s12634_s29 + $0xf18] sm:$0xf0] }
 0x3f2   : > { %8341 = vmatpush.bf16.msra.mxu0 %v10314_v22  ;;  %v8115_v12 = vpop.f32.mrf.mxu2  ;;  %v10282_v22 = vor.u32 %v11241_v62, %v10279_v63  ;;  %v10474_v19 = vor.u32 %v11289_v7, %v10471_v21  ;;  %v10695_v62 = vld [vmem:[%s12634_s29 + $0xf48] sm:$0xf0]  ;;  %v10559_v7 = vld [vmem:[%s12634_s29 + $0xe38] sm:$0xf0]  ;;  %v11327_v21 = vld [vmem:[%s12634_s29 + $0xeb4] sm:$0xf] }
 0x3f3   : > { %8354 = vmatpush.bf16.msra.mxu1 %v10378_v25  ;;  %v8128_v13 = vpop.f32.mrf.mxu3  ;;  %v11351_v25 = vld [vmem:[%s12634_s29 + $0xf74] sm:$0xf]  ;;  %v10634_v12 = vor.u32 %v11329_v56, %v10631_v58  ;;  %v11337_v54 = vld [vmem:[%s12634_s29 + $0xf04] sm:$0xf]  ;;  %v10727_v58 = vld [vmem:[%s12634_s29 + $0xf88] sm:$0xf0] }
 0x3f4   : > { %8367 = vmatpush.bf16.msra.mxu2 %v10442_v47  ;;  %v10719_v47 = vld [vmem:[%s12634_s29 + $0xf78] sm:$0xf0] }
 0x3f5   : > { %8380 = vmatpush.bf16.msra.mxu3 %v10506_v26  ;;  %v10594_v26 = vor.u32 %v11319_v3, %v10591_v10  ;;  %v10722_v48 = vor.u32 %v11351_v25, %v10719_v47  ;;  %v10623_v10 = vld [vmem:[%s12634_s29 + $0xeb8] sm:$0xf0]  ;;  %v10562_v25 = vor.u32 %v11311_v6, %v10559_v7  ;;  %v11374_v7 = vld [vmem:[%s12632_s28 + $0x28] sm:$0xff] }
 0x3f6   : > { %8342 = vmatpush.bf16.msra.mxu0 %v10306_v50  ;;  %v10647_v50 = vld [vmem:[%s12634_s29 + $0xee8] sm:$0xf0]  ;;  %v10626_v47 = vor.u32 %v11327_v21, %v10623_v10  ;;  %v11441_v6 = vld [vmem:[#allocation1 + $0x3f] sm:$0xff] }
 0x3f7   : > { %8355 = vmatpush.bf16.msra.mxu1 %v10370_v60  ;;  %v11349_v60 = vld [vmem:[%s12634_s29 + $0xf64] sm:$0xf]  ;;  %v10650_v41 = vor.u32 %v11333_v18, %v10647_v50  ;;  %v10743_v50 = vld [vmem:[%s12634_s29 + $0xfa8] sm:$0xf0] }
 0x3f8   : > { %8368 = vmatpush.bf16.msra.mxu2 %v10434_v33  ;;  %v10711_v33 = vld [vmem:[%s12634_s29 + $0xf68] sm:$0xf0] }
 0x3f9   : > { %8381 = vmatpush.bf16.msra.mxu3 %v10498_v37  ;;  %v10714_v37 = vor.u32 %v11349_v60, %v10711_v33 }
 0x3fa   : > { %8343 = vmatpush.bf16.msra.mxu0 %v10298_v57  ;;  %v10703_v57 = vld [vmem:[%s12634_s29 + $0xf58] sm:$0xf0] }
 0x3fb   : > { %8356 = vmatpush.bf16.msra.mxu1 %v10362_v30  ;;  %v11436_v30 = vld [vmem:[#allocation1 + $0x9] sm:$0xff] }
 0x3fc   : > { %8369 = vmatpush.bf16.msra.mxu2 %v10426_v45  ;;  %v11363_v45 = vld [vmem:[%s12634_s29 + $0xfd4] sm:$0xf] }
 0x3fd   : > { %8382 = vmatpush.bf16.msra.mxu3 %v10490_v53  ;;  %v10706_v53 = vor.u32 %v11347_v43, %v10703_v57  ;;  %v10770_v44 = vor.u32 %v11363_v45, %v10767_v46  ;;  %v11355_v43 = vld [vmem:[%s12634_s29 + $0xf94] sm:$0xf]  ;;  %v10735_v57 = vld [vmem:[%s12634_s29 + $0xf98] sm:$0xf0]  ;;  %v11305_v46 = vld [vmem:[%s12634_s29 + $0xe04] sm:$0xf] }
 0x3fe   : > { %8344 = vmatpush.bf16.msra.mxu0 %v10290_v61  ;;  %v11345_v61 = vld [vmem:[%s12634_s29 + $0xf44] sm:$0xf] }
 0x3ff   : > { %8357 = vmatpush.bf16.msra.mxu1 %v10354_v0  ;;  %v11361_v0 = vld [vmem:[%s12634_s29 + $0xfc4] sm:$0xf] }
 0x400   : > { %8370 = vmatpush.bf16.msra.mxu2 %v10418_v59  ;;  %v10759_v59 = vld [vmem:[%s12634_s29 + $0xfc8] sm:$0xf0] }
 0x401   : > { %8383 = vmatpush.bf16.msra.mxu3 %v10482_v20  ;;  %v10698_v20 = vor.u32 %v11345_v61, %v10695_v62  ;;  %v10762_v13 = vor.u32 %v11361_v0, %v10759_v59  ;;  %v10666_v0 = vor.u32 %v11337_v54, %v10663_v55  ;;  %v11378_v54 = vld [vmem:[%s12632_s28 + $0x48] sm:$0xff] }
 0x402   : > { %8345 = vmatpush.bf16.msra.mxu0 %v10282_v22  ;;  %v8139_v63 = vpop.f32.mrf.mxu0  ;;  %v11359_v22 = vld [vmem:[%s12634_s29 + $0xfb4] sm:$0xf] }
 0x403   : > { %8358 = vmatpush.bf16.msra.mxu1 %v10346_v14  ;;  %v8140_v5 = vadd.f32 %v8139_v63, %v13714_v1  ;;  %v8152_v9 = vpop.f32.mrf.mxu1  ;;  %v10687_v1 = vld [vmem:[%s12634_s29 + $0xf38] sm:$0xf0] }
 0x404   : > { %8371 = vmatpush.bf16.msra.mxu2 %v10410_v16  ;;  %v10690_v14 = vor.u32 %v11343_v8, %v10687_v1  ;;  %v11309_v16 = vld [vmem:[%s12634_s29 + $0xe24] sm:$0xf]  ;;  %v11372_v1 = vld [vmem:[%s12632_s28 + $0x18] sm:$0xff] }
 0x405   : > { %8384 = vmatpush.bf16.msra.mxu3 %v10474_v19  ;;  %8346 = vmatmul.bf16.vlgmr.msra.gmra.mxu0 %v11434_v28  ;;  %v8153_v3 = vadd.f32 %v8152_v9, %v8140_v5  ;;  %v10754_v19 = vor.u32 %v11359_v22, %v10751_v24  ;;  %v10554_v33 = vor.u32 %v11309_v16, %v10551_v15  ;;  %v10607_v28 = vld [vmem:[%s12634_s29 + $0xe98] sm:$0xf0]  ;;  %v11376_v5 = vld [vmem:[%s12632_s28 + $0x38] sm:$0xff] }
 0x406   : > { %8390 = vmatpush.bf16.msrb.mxu0 %v10594_v26  ;;  %8359 = vmatmul.bf16.vlgmr.msra.gmra.mxu1 %v11436_v30  ;;  %v10610_v30 = vor.u32 %v11323_v39, %v10607_v28  ;;  %v11438_v9 = vld [vmem:[#allocation1 + $0x24] sm:$0xff] }
 0x407   : > { %8403 = vmatpush.bf16.msrb.mxu1 %v10658_v27  ;;  %8372 = vmatmul.bf16.vlgmr.msra.gmra.mxu2 %v11435_v29  ;;  %v10615_v27 = vld [vmem:[%s12634_s29 + $0xea8] sm:$0xf0] }
 0x408   : > { %8416 = vmatpush.bf16.msrb.mxu2 %v10722_v48  ;;  %8385 = vmatmul.bf16.vlgmr.msra.gmra.mxu3 %v11437_v51  ;;  %v11341_v48 = vld [vmem:[%s12634_s29 + $0xf24] sm:$0xf]  ;;  %v10535_v51 = vld [vmem:[%s12634_s29 + $0xe08] sm:$0xf0] }
 0x409   : > { %8429 = vmatpush.bf16.msrb.mxu3 %v10786_v32  ;;  %v11357_v32 = vld [vmem:[%s12634_s29 + $0xfa4] sm:$0xf]  ;;  %v10538_v62 = vor.u32 %v11305_v46, %v10535_v51  ;;  %v11381_v46 = vld [vmem:[%s12632_s28 + $0x60] sm:$0xff]  ;;  %v11380_v51 = vld [vmem:[%s12632_s28 + $0x58] sm:$0xff] }
 0x40a   : > { %8391 = vmatpush.bf16.msrb.mxu0 %v10586_v36  ;;  %v8165_v26 = vpop.f32.mrf.mxu2  ;;  %v8141_v60 = vpop.f32.mrf.mxu0  ;;  %v10618_v36 = vor.u32 %v11325_v17, %v10615_v27  ;;  %v10746_v40 = vor.u32 %v11357_v32, %v10743_v50  ;;  %v11370_v17 = vld [vmem:[%s12632_s28 + $0x8] sm:$0xff]  ;;  %v11369_v27 = vld [vmem:[%s12632_s28] sm:$0xff] }
 0x40b   : > { %8404 = vmatpush.bf16.msrb.mxu1 %v10650_v41  ;;  %v8166_v31 = vadd.f32 %v8165_v26, %v8153_v3  ;;  %v8178_v18 = vpop.f32.mrf.mxu3  ;;  %v8154_v34 = vpop.f32.mrf.mxu1  ;;  %v10682_v41 = vor.u32 %v11341_v48, %v10679_v49  ;;  %v11373_v3 = vld [vmem:[%s12632_s28 + $0x20] sm:$0xff]  ;;  %v8442_v48 = vmax.f32 %v13572_v2, 0.0 }
 0x40c   : > { %8417 = vmatpush.bf16.msrb.mxu2 %v10714_v37  ;;  %v11307_v37 = vld [vmem:[%s12634_s29 + $0xe14] sm:$0xf] }
 0x40d   : > { %8430 = vmatpush.bf16.msrb.mxu3 %v10778_v23  ;;  %v8179_v11 = vadd.f32 %v8178_v18, %v8166_v31  ;;  %v11339_v23 = vld [vmem:[%s12634_s29 + $0xf14] sm:$0xf]  ;;  %v10546_v29 = vor.u32 %v11307_v37, %v10543_v38  ;;  %v8445_v49 = vpack.c.bf16 %v8442_v48, %v8442_v48 }
 0x40e   : > { %8392 = vmatpush.bf16.msrb.mxu0 %v10578_v52  ;;  %v10674_v45 = vor.u32 %v11339_v23, %v10671_v42  ;;  %v11321_v52 = vld [vmem:[%s12634_s29 + $0xe84] sm:$0xf]  ;;  %v11384_v42 = vld [vmem:[%s12632_s28 + $0x78] sm:$0xff] }
 0x40f   : > { %8405 = vmatpush.bf16.msrb.mxu1 %v10642_v35  ;;  %v10738_v35 = vor.u32 %v11355_v43, %v10735_v57  ;;  %v11383_v57 = vld [vmem:[%s12632_s28 + $0x70] sm:$0xff] }
 0x410   : > { %8418 = vmatpush.bf16.msrb.mxu2 %v10706_v53  ;;  %v10599_v53 = vld [vmem:[%s12634_s29 + $0xe88] sm:$0xf0] }
 0x411   : > { %8431 = vmatpush.bf16.msrb.mxu3 %v10770_v44  ;;  %v11353_v44 = vld [vmem:[%s12634_s29 + $0xf84] sm:$0xf]  ;;  %v10602_v63 = vor.u32 %v11321_v52, %v10599_v53 }
 0x412   : > { %8393 = vmatpush.bf16.msrb.mxu0 %v10570_v4  ;;  %v8167_v56 = vpop.f32.mrf.mxu2  ;;  %v10730_v59 = vor.u32 %v11353_v44, %v10727_v58  ;;  %v11375_v4 = vld [vmem:[%s12632_s28 + $0x30] sm:$0xff] }
 0x413   : > { %8406 = vmatpush.bf16.msrb.mxu1 %v10634_v12  ;;  %v8180_v61 = vpop.f32.mrf.mxu3  ;;  %v11439_v12 = vld [vmem:[#allocation1 + $0x2d] sm:$0xff] }
 0x414   : > { %8419 = vmatpush.bf16.msrb.mxu2 %v10698_v20  ;;  %v11440_v20 = vld [vmem:[#allocation1 + $0x36] sm:$0xff] }
 0x415   : > { %8432 = vmatpush.bf16.msrb.mxu3 %v10762_v13 }
 0x416   : > { %8394 = vmatpush.bf16.msrb.mxu0 %v10562_v25 }
 0x417   : > { %8407 = vmatpush.bf16.msrb.mxu1 %v10626_v47 }
 0x418   : > { %8420 = vmatpush.bf16.msrb.mxu2 %v10690_v14  ;;  %v11371_v14 = vld [vmem:[%s12632_s28 + $0x10] sm:$0xff] }
 0x419   : > { %8433 = vmatpush.bf16.msrb.mxu3 %v10754_v19 }
 0x41a   : > { %8395 = vmatpush.bf16.msrb.mxu0 %v10554_v33 }
 0x41b   : > { %8408 = vmatpush.bf16.msrb.mxu1 %v10618_v36 }
 0x41c   : > { %8421 = vmatpush.bf16.msrb.mxu2 %v10682_v41 }
 0x41d   : > { %8434 = vmatpush.bf16.msrb.mxu3 %v10746_v40 }
 0x41e   : > { %8396 = vmatpush.bf16.msrb.mxu0 %v10546_v29  ;;  %v11382_v29 = vld [vmem:[%s12632_s28 + $0x68] sm:$0xff] }
 0x41f   : > { %8409 = vmatpush.bf16.msrb.mxu1 %v10610_v30 }
 0x420   : > { %8422 = vmatpush.bf16.msrb.mxu2 %v10674_v45 }
 0x421   : > { %8435 = vmatpush.bf16.msrb.mxu3 %v10738_v35  ;;  %v11379_v35 = vld [vmem:[%s12632_s28 + $0x50] sm:$0xff] }
 0x422   : > { %8397 = vmatpush.bf16.msrb.mxu0 %v10538_v62  ;;  %v8191_v21 = vpop.f32.mrf.mxu0  ;;  %v11377_v62 = vld [vmem:[%s12632_s28 + $0x40] sm:$0xff] }
 0x423   : > { %8410 = vmatpush.bf16.msrb.mxu1 %v10602_v63  ;;  %v8192_v13 = vadd.f32 %v8191_v21, %v8179_v11  ;;  %v8204_v10 = vpop.f32.mrf.mxu1 }
 0x424   : > { %8423 = vmatpush.bf16.msrb.mxu2 %v10666_v0 }
 0x425   : > { %8436 = vmatpush.bf16.msrb.mxu3 %v10730_v59  ;;  %8398 = vmatmul.bf16.vlgmr.msrb.gmra.mxu0 %v11438_v9  ;;  %v8205_v8 = vadd.f32 %v8204_v10, %v8192_v13 }
 0x426   : > { %8575 = vmatpush.bf16.msra.mxu0 %v11376_v5  ;;  %8411 = vmatmul.bf16.vlgmr.msrb.gmra.mxu1 %v11439_v12 }
 0x427   : > { %8424 = vmatmul.bf16.vlgmr.msrb.gmra.mxu2 %v11440_v20  ;;  %8588 = vmatpush.bf16.msra.mxu1 %v11384_v42 }
 0x428   : > { %8437 = vmatmul.bf16.vlgmr.msrb.gmra.mxu3 %v11441_v6 }
 0x42a   : > { %8576 = vmatpush.bf16.msra.mxu0 %v11375_v4  ;;  %v8217_v22 = vpop.f32.mrf.mxu2  ;;  %v8193_v47 = vpop.f32.mrf.mxu0 }
 0x42b   : > { %v8218_v24 = vadd.f32 %v8217_v22, %v8205_v8  ;;  %v8230_v25 = vpop.f32.mrf.mxu3  ;;  %v8206_v16 = vpop.f32.mrf.mxu1  ;;  %8589 = vmatpush.bf16.msra.mxu1 %v11383_v57 }
 0x42d   : > { %v8231_v15 = vadd.f32 %v8230_v25, %v8218_v24 }
 0x42e   : > { %8577 = vmatpush.bf16.msra.mxu0 %v11374_v7 }
 0x42f   : > { %8590 = vmatpush.bf16.msra.mxu1 %v11382_v29 }
 0x432   : > { %8578 = vmatpush.bf16.msra.mxu0 %v11373_v3  ;;  %v8219_v19 = vpop.f32.mrf.mxu2 }
 0x433   : > { %v8232_v26 = vpop.f32.mrf.mxu3  ;;  %8591 = vmatpush.bf16.msra.mxu1 %v11381_v46 }
 0x434   : > { %v8444_v26 = vld [vmem:[#allocation3] sm:$0x3] }
 0x436   : > { %8579 = vmatpush.bf16.msra.mxu0 %v11372_v1 }
 0x437   : > { %8592 = vmatpush.bf16.msra.mxu1 %v11380_v51 }
 0x43a   : > { %8580 = vmatpush.bf16.msra.mxu0 %v11371_v14 }
 0x43b   : > { %8593 = vmatpush.bf16.msra.mxu1 %v11379_v35 }
 0x43e   : > { %8581 = vmatpush.bf16.msra.mxu0 %v11370_v17 }
 0x43f   : > { %8594 = vmatpush.bf16.msra.mxu1 %v11378_v54 }
 0x442   : > { %8582 = vmatpush.bf16.msra.mxu0 %v11369_v27  ;;  %v8243_v31 = vpop.f32.mrf.mxu0 }
 0x443   : > { %v8244_v18 = vadd.f32 %v8243_v31, %v8231_v15  ;;  %v8256_v32 = vpop.f32.mrf.mxu1  ;;  %8595 = vmatpush.bf16.msra.mxu1 %v11377_v62 }
 0x445   : > { %8583 = vmatmul.bf16.vlgmr.msra.gmra.mxu0 %v8445_v49  ;;  %v8257_v50 = vadd.f32 %v8256_v32, %v8244_v18 }
 0x44a   : > { %v8269_v60 = vpop.f32.mrf.mxu2  ;;  %v8245_v11 = vpop.f32.mrf.mxu0 }
 0x44b   : > { %v8270_v33 = vadd.f32 %v8269_v60, %v8257_v50  ;;  %v8282_v34 = vpop.f32.mrf.mxu3  ;;  %v8258_v36 = vpop.f32.mrf.mxu1 }
 0x44d   : > { %v8283_v41 = vadd.f32 %v8282_v34, %v8270_v33 }
 0x452   : > { %v8271_v37 = vpop.f32.mrf.mxu2 }
 0x453   : > { %v8284_v38 = vpop.f32.mrf.mxu3 }
 0x462   : > { %v8295_v2 = vpop.f32.mrf.mxu0 }
 0x463   : > { %v8308_v39 = vpop.f32.mrf.mxu1  ;;  %v8296_v55 = vadd.f32 %v8295_v2, %v8283_v41 }
 0x465   : > { %v8309_v63 = vadd.f32 %v8308_v39, %v8296_v55 }
 0x46a   : > { %v8321_v40 = vpop.f32.mrf.mxu2  ;;  %v8297_v23 = vpop.f32.mrf.mxu0 }
 0x46b   : > { %v8334_v28 = vpop.f32.mrf.mxu3  ;;  %v8310_v43 = vpop.f32.mrf.mxu1  ;;  %v8322_v0 = vadd.f32 %v8321_v40, %v8309_v63 }
 0x46d   : > { %v8335_v4 = vadd.f32 %v8334_v28, %v8322_v0 }
 0x472   : > { %v8323_v30 = vpop.f32.mrf.mxu2 }
 0x473   : > { %v8336_v45 = vpop.f32.mrf.mxu3 }
 0x482   : > { %v8347_v52 = vpop.f32.mrf.mxu0 }
 0x483   : > { %v8360_v53 = vpop.f32.mrf.mxu1  ;;  %v8348_v9 = vadd.f32 %v8347_v52, %v8335_v4 }
 0x485   : > { %v8361_v12 = vadd.f32 %v8360_v53, %v8348_v9 }
 0x48a   : > { %v8373_v56 = vpop.f32.mrf.mxu2  ;;  %v8349_v58 = vpop.f32.mrf.mxu0 }
 0x48b   : > { %v8386_v44 = vpop.f32.mrf.mxu3  ;;  %v8362_v61 = vpop.f32.mrf.mxu1  ;;  %v8374_v20 = vadd.f32 %v8373_v56, %v8361_v12 }
 0x48d   : > { %v8387_v6 = vadd.f32 %v8386_v44, %v8374_v20 }
 0x492   : > { %v8375_v59 = vpop.f32.mrf.mxu2 }
 0x493   : > { %v8388_v5 = vpop.f32.mrf.mxu3 }
 0x4a2   : > { %v8399_v7 = vpop.f32.mrf.mxu0 }
 0x4a3   : > { %v8412_v21 = vpop.f32.mrf.mxu1  ;;  %v8400_v13 = vadd.f32 %v8399_v7, %v8387_v6 }
 0x4a5   : > { %v8413_v3 = vadd.f32 %v8412_v21, %v8400_v13 }
 0x4aa   : > { %v8425_v10 = vpop.f32.mrf.mxu2  ;;  %v8401_v22 = vpop.f32.mrf.mxu0 }
 0x4ab   : > { %v8426_v8 = vadd.f32 %v8425_v10, %v8413_v3  ;;  %v8438_v1 = vpop.f32.mrf.mxu3  ;;  %v8414_v24 = vpop.f32.mrf.mxu1 }
 0x4ad   : > { %v8439_v25 = vadd.f32 %v8438_v1, %v8426_v8 }
 0x4af   : > { %v8443_v47 = vmax.f32 %v8439_v25, 0.0 }
 0x4b1   : > { %v8446_v14 = vpack.c.bf16 %v8443_v47, %v8443_v47 }
 0x4b2   : > { %v8427_v16 = vpop.f32.mrf.mxu2 }
 0x4b3   : > { %v8440_v15 = vpop.f32.mrf.mxu3  ;;  %8596 = vmatmul.bf16.vlgmr.msra.gmra.mxu1 %v8446_v14 }
 0x4c2   : > { %v8584_v17 = vpop.f32.mrf.mxu0 }
 0x4ca   : > { %v8586_v19 = vpop.f32.mrf.mxu0 }
 0x530   : > { %v8597_v27 = vpop.f32.mrf.mxu1 }
 0x531   : > { %v8598_v48 = vadd.f32 %v8597_v27, %v8584_v17 }
 0x533   : > { %v8601_v49 = vadd.f32 %v8598_v48, %v8444_v26 }
 0x534   : > { %8606 = sbr.rel (%p10851_p12) target bundleno = 1344 (0x540), region = 100 }
 0x535   : > { %8602 = vst [vmem:[#allocation3] sm:$0x3] %v8601_v49 }
 0x538   : > { %v8599_v31 = vpop.f32.mrf.mxu1 }
 0x539   : > { %v11442_v32 = vld [vmem:[%s13842_s4] ss:$0 sm:$0xff] }
 0x53c   : > { %v8607_v18 = vld [vmem:[#allocation3] sm:$0x3] }
 0x53d   : > { %v8612_v50 = vadd.f32 %v11442_v32, %v8607_v18 }
 0x53f   : > { %8613 = vst [vmem:[#allocation3] sm:$0x3] %v8612_v50 }
 0x540 PF: > { %p11389_p13 = scmp.eq.s32.totalorder %s8726_s23, 1  ;;  %s8624_s16 = sshll.u32 %s13843_s5, 4  ;;  %s8625_s16 = int_to_ptr.hbm [resolvable:$true] %s8624_s16 }
 0x541   : > { %s11516_s17 = smov [#allocation3]  }
 0x542   : > { %s8622_s25 = sshll.u32 %s11516_s17, 4  ;;  %s8623_s25 = int_to_ptr.vmem [resolvable:$true] %s8622_s25 }
 0x543   : > { %11386 = dma.vmem_to_hbm [thread:$0]  (%p11389_p13), %s8623_s25, 32, %s8625_s16, [#allocation4]  }
 0x544   : > { %11492 = dma.done.wait (%p11389_p13), [#allocation4], 32  }
 0x545   : > { %11494 = vsyncadd (%p11389_p13), [#allocation4], 4294967264 }
 0x546 PF: > { %s16_s22 = sadd.s32 1, %s11513_s22   ;;  %s13844_s18 = smov %s11501_s19 }
 0x547   : > { %p13_p0 = scmp.ge.s32.totalorder %s16_s22, 4   ;;  %s13845_s19 = smov %s11583_s27 }
 0x548   : > { %s13846_s20 = smov %s11509_s21  ;;  %s13847_s21 = smov %s13849_s24 }
 0x549   :  { %15 = sbr.rel (!%p13_p0) target bundleno = 3 (0x3), region = 148 }
 0x54e   :  { %8638 = vsyncpa [#allocation4], 1 }
 0x54f   :  { %8640 = vsyncpa [#allocation4 + $0x1], 1 }

</bundles_post_ra>
